<compile_context>
chip_gen: v5e
topology: v5e:2x2
jax: 0.10.0
libtpu: 0.0.40
codegen_flags: <defaults>
</compile_context>

<pallas_src>
import functools

import numpy as np
import jax
import jax.numpy as jnp
from jax.experimental import pallas as pl
from jax.experimental.pallas import tpu as pltpu


# --------------------------------------------------------------------------
# Pallas kernels
# --------------------------------------------------------------------------
def _gemm_t_kernel(*refs, relu, has_bias):
    """o_T = act(W @ X_T + b) for one (N, block_m) lane-dense output tile."""
    if has_bias:
        w_ref, x_ref, b_ref, o_ref = refs
    else:
        w_ref, x_ref, o_ref = refs
    acc = jnp.dot(w_ref[...], x_ref[...], preferred_element_type=jnp.float32)
    if has_bias:
        acc = acc + b_ref[...]          # (N, block_m) + (N, 1) broadcast on lanes
    if relu:
        acc = jnp.maximum(acc, 0.0)
    o_ref[...] = acc.astype(o_ref.dtype)


def _pick_block_m(M, cap=1024):
    """Large lane tiles; keep >=2 parallel grid steps for big M (v7x megacore)."""
    if M <= 256:
        return M                        # single full-M block (last dim == full dim)
    half = -(-M // 2)
    half = -(-half // 128) * 128        # round up to lane multiple
    return min(cap, half)


def matmul_t(w, x_t, b=None, relu=False, block_m=None):
    """out_T (N, M) = act(w (N, K) @ x_t (K, M) + b).

    M (the big B*H*W dim) is on lanes -> dense stores; grid tiles only over M
    with a masked partial last block (no pre-pad, no out[:M] slice).
    """
    N, K = w.shape
    K2, M = x_t.shape
    assert K == K2
    if block_m is None:
        block_m = _pick_block_m(M)
    grid_m = (M + block_m - 1) // block_m
    has_bias = b is not None

    # Constant (0, 0) index maps: weight/bias blocks are revisited, not re-DMA'd,
    # across the M grid steps.
    in_specs = [
        pl.BlockSpec((N, K), lambda i: (0, 0)),
        pl.BlockSpec((K, block_m), lambda i: (0, i)),
    ]
    operands = [w, x_t]
    if has_bias:
        in_specs.append(pl.BlockSpec((N, 1), lambda i: (0, 0)))
        operands.append(b.reshape(N, 1))

    return pl.pallas_call(
        functools.partial(_gemm_t_kernel, relu=relu, has_bias=has_bias),
        out_shape=jax.ShapeDtypeStruct((N, M), jnp.float32),
        grid=(grid_m,),
        in_specs=in_specs,
        out_specs=pl.BlockSpec((N, block_m), lambda i: (0, i)),
        compiler_params=pltpu.CompilerParams(
            dimension_semantics=("parallel",)),
    )(*operands)


def _heads_decode_kernel(w_ref, enc_ref, b_ref, eps_ref, wz_ref, wp_ref,
                         db_ref, heads_ref, z_ref, d_ref, *, latent):
    """Fused: [mu|log_var|pose] GEMM + reparameterisation + decoder Linear."""
    heads = jnp.dot(w_ref[...], enc_ref[...],
                    preferred_element_type=jnp.float32) + b_ref[...]  # (17, B)
    mu = heads[0:latent]
    log_var = heads[latent:2 * latent]
    pose = heads[2 * latent:]                                   # (1, B)
    z = eps_ref[...] * jnp.exp(0.5 * log_var) + mu              # reparameterise
    # decoder Linear on z_pose = [pose, z]; pose part is a rank-1 broadcast-mul.
    d = (jnp.dot(wz_ref[...], z, preferred_element_type=jnp.float32)
         + wp_ref[...] * pose + db_ref[...])                    # (flat, B)
    heads_ref[...] = heads
    z_ref[...] = z
    d_ref[...] = d


def fused_heads_decode(params, enc_t, eps_t):
    """enc_t (flat, B), eps_t (latent, B) -> heads_T (17, B), z_T, d_T (flat, B)."""
    latent = params['mu_w'].shape[1]
    pose_d = params['pose_w'].shape[1]
    assert pose_d == 1      # broadcast trick in the kernel assumes one pose dim
    B = enc_t.shape[1]
    w_heads = jnp.concatenate(
        [params['mu_w'], params['lv_w'], params['pose_w']], axis=1).T   # (17, flat)
    b_heads = jnp.concatenate(
        [params['mu_b'], params['lv_b'], params['pose_b']]).reshape(-1, 1)
    d0_wt = params['d0_w'].T                                    # (flat, pose+latent)
    wp = d0_wt[:, :pose_d]
    wz = d0_wt[:, pose_d:]
    db = params['d0_b'].reshape(-1, 1)
    flat = d0_wt.shape[0]
    # TODO(synk): torch.randn_like is replaced by an externally supplied eps
    # (jax.random.normal); torch's RNG stream cannot be reproduced in-kernel.
    return pl.pallas_call(
        functools.partial(_heads_decode_kernel, latent=latent),
        out_shape=(
            jax.ShapeDtypeStruct((2 * latent + pose_d, B), jnp.float32),
            jax.ShapeDtypeStruct((latent, B), jnp.float32),
            jax.ShapeDtypeStruct((flat, B), jnp.float32),
        ),
    )(w_heads, enc_t, b_heads, eps_t, wz, wp, db)


# --------------------------------------------------------------------------
# Conv / ConvTranspose lowered onto the transposed Pallas GEMM
# Internal activation layout is (C, B, H, W) to avoid layout shuffles.
# --------------------------------------------------------------------------
def _im2col_t(x, kh, kw, stride, pad):
    """x (C, B, H, W) -> cols_T (C*kh*kw, B*Ho*Wo); K order matches w.reshape."""
    xp = jnp.pad(x, ((0, 0), (0, 0), (pad, pad), (pad, pad)))
    C, B, H, W = xp.shape
    Ho = (H - kh) // stride + 1
    Wo = (W - kw) // stride + 1
    patches = [xp[:, :, i:i + stride * Ho:stride, j:j + stride * Wo:stride]
               for i in range(kh) for j in range(kw)]
    cols = jnp.stack(patches, axis=1)              # (C, kh*kw, B, Ho, Wo)
    return cols.reshape(C * kh * kw, B * Ho * Wo), Ho, Wo


def conv2d(x, w, b, *, stride, pad, relu):
    """x (Cin, B, H, W); w (Cout, Cin, kh, kw) PyTorch layout -> (Cout, B, Ho, Wo)."""
    Cin, B, H, W = x.shape
    Cout, Cin2, kh, kw = w.shape
    assert Cin == Cin2
    cols_t, Ho, Wo = _im2col_t(x, kh, kw, stride, pad)
    out_t = matmul_t(w.reshape(Cout, Cin * kh * kw), cols_t, b, relu=relu)
    return out_t.reshape(Cout, B, Ho, Wo)


def conv_transpose2d(x, w, b, *, stride, pad, relu):
    """x (Cin, B, H, W); w (Cin, Cout, kh, kw) PyTorch ConvTranspose2d layout.

    Dense sub-pixel form: one GEMM (Cout*kh*kw, Cin) @ (Cin, B*H*W) -- no zero
    taps are fed to the MXU -- followed by overlap-add (col2im), crop, bias, ReLU.
    """
    Cin, B, H, W = x.shape
    Cin2, Cout, kh, kw = w.shape
    assert Cin == Cin2
    s = stride
    w_r = w.reshape(Cin, Cout * kh * kw).T                     # (Cout*kh*kw, Cin)
    pf = matmul_t(w_r, x.reshape(Cin, B * H * W))              # (Cout*kh*kw, B*H*W)
    pf = pf.reshape(Cout, kh, kw, B, H, W)
    Hf, Wf = (H - 1) * s + kh, (W - 1) * s + kw
    full = jnp.zeros((Cout, B, Hf, Wf), jnp.float32)
    for ki in range(kh):
        for kj in range(kw):
            full = full.at[:, :,
                           ki:ki + (H - 1) * s + 1:s,
                           kj:kj + (W - 1) * s + 1:s].add(pf[:, ki, kj])
    Ho = (H - 1) * s - 2 * pad + kh
    Wo = (W - 1) * s - 2 * pad + kw
    out = full[:, :, pad:pad + Ho, pad:pad + Wo] + b[:, None, None, None]
    # TODO(synk): bias+ReLU stay in XLA glue here because the col2im overlap-add
    # prevents folding them into the Pallas GEMM epilogue.
    return jnp.maximum(out, 0.0) if relu else out


# --------------------------------------------------------------------------
# Parameters (deterministic, PyTorch-default-style uniform init)
# --------------------------------------------------------------------------
def init_params(key, latent_dims=8, pose_dims=1):
    flat = 64 * 4 * 4
    keys = iter(jax.random.split(key, 24))

    def uniform(k, shape, fan_in):
        bound = 1.0 / float(np.sqrt(fan_in))
        return jax.random.uniform(k, shape, jnp.float32, -bound, bound)

    def conv_p(cout, cin, ksz):
        fan = cin * ksz * ksz
        return (uniform(next(keys), (cout, cin, ksz, ksz), fan),
                uniform(next(keys), (cout,), fan))

    def convT_p(cin, cout, ksz):
        fan = cout * ksz * ksz
        return (uniform(next(keys), (cin, cout, ksz, ksz), fan),
                uniform(next(keys), (cout,), fan))

    def lin_p(din, dout):
        return (uniform(next(keys), (din, dout), din),
                uniform(next(keys), (dout,), din))

    p = {}
    p['e1_w'], p['e1_b'] = conv_p(8, 1, 3)
    p['e2_w'], p['e2_b'] = conv_p(16, 8, 3)
    p['e3_w'], p['e3_b'] = conv_p(32, 16, 3)
    p['e4_w'], p['e4_b'] = conv_p(64, 32, 3)
    p['mu_w'], p['mu_b'] = lin_p(flat, latent_dims)
    p['lv_w'], p['lv_b'] = lin_p(flat, latent_dims)
    p['pose_w'], p['pose_b'] = lin_p(flat, pose_dims)
    p['d0_w'], p['d0_b'] = lin_p(latent_dims + pose_dims, flat)
    p['t1_w'], p['t1_b'] = convT_p(64, 32, 3)
    p['t2_w'], p['t2_b'] = convT_p(32, 16, 3)
    p['t3_w'], p['t3_b'] = convT_p(16, 8, 3)
    p['t4_w'], p['t4_b'] = convT_p(8, 1, 2)
    return p


# --------------------------------------------------------------------------
# ShapeVAE forward (spatial_dims=2, latent_dims=8, pose_dims=1)
# --------------------------------------------------------------------------
def shape_vae_forward(params, x, eps):
    B = x.shape[0]
    latent = params['mu_w'].shape[1]

    a = x.transpose(1, 0, 2, 3)                    # NCHW -> internal (C, B, H, W)
    a = conv2d(a, params['e1_w'], params['e1_b'], stride=2, pad=1, relu=True)
    a = conv2d(a, params['e2_w'], params['e2_b'], stride=2, pad=1, relu=True)
    a = conv2d(a, params['e3_w'], params['e3_b'], stride=2, pad=1, relu=True)
    a = conv2d(a, params['e4_w'], params['e4_b'], stride=2, pad=1, relu=True)  # (64,B,4,4)
    enc_t = a.transpose(0, 2, 3, 1).reshape(-1, B)   # (1024, B), PyTorch flatten order

    heads_t, z_t, d_t = fused_heads_decode(params, enc_t, eps.T)
    mu = heads_t[:latent].T
    log_var = heads_t[latent:2 * latent].T
    pose = heads_t[2 * latent:].T
    z = z_t.T
    z_pose = jnp.concatenate([pose, z], axis=-1)

    d = d_t.reshape(64, 4, 4, B).transpose(0, 3, 1, 2)   # Unflatten -> (64, B, 4, 4)
    d = conv_transpose2d(d, params['t1_w'], params['t1_b'], stride=2, pad=0, relu=True)
    d = conv_transpose2d(d, params['t2_w'], params['t2_b'], stride=2, pad=1, relu=True)
    d = conv_transpose2d(d, params['t3_w'], params['t3_b'], stride=2, pad=1, relu=True)
    d = conv_transpose2d(d, params['t4_w'], params['t4_b'], stride=2, pad=1, relu=False)
    x_rec = d.transpose(1, 0, 2, 3)                # back to NCHW
    return x_rec, z, z_pose, mu, log_var


# --------------------------------------------------------------------------
# Pure-JAX reference (XLA convs) for a numerical sanity check
# --------------------------------------------------------------------------
def _ref_forward(params, x, eps):
    dn = ('NCHW', 'OIHW', 'NCHW')

    def conv(h, w, b, s, p):
        y = jax.lax.conv_general_dilated(h, w, (s, s), [(p, p), (p, p)],
                                         dimension_numbers=dn)
        return y + b[None, :, None, None]

    def convT(h, w, b, s, p):
        k = w.shape[2]
        wc = jnp.flip(w, (2, 3)).transpose(1, 0, 2, 3)
        y = jax.lax.conv_general_dilated(h, wc, (1, 1),
                                         [(k - 1 - p, k - 1 - p)] * 2,
                                         lhs_dilation=(s, s),
                                         dimension_numbers=dn)
        return y + b[None, :, None, None]

    h = jax.nn.relu(conv(x, params['e1_w'], params['e1_b'], 2, 1))
    h = jax.nn.relu(conv(h, params['e2_w'], params['e2_b'], 2, 1))
    h = jax.nn.relu(conv(h, params['e3_w'], params['e3_b'], 2, 1))
    h = jax.nn.relu(conv(h, params['e4_w'], params['e4_b'], 2, 1))
    enc = h.reshape(h.shape[0], -1)
    mu = enc @ params['mu_w'] + params['mu_b']
    lv = enc @ params['lv_w'] + params['lv_b']
    pose = enc @ params['pose_w'] + params['pose_b']
    z = eps * jnp.exp(0.5 * lv) + mu
    zp = jnp.concatenate([pose, z], axis=-1)
    d = (zp @ params['d0_w'] + params['d0_b']).reshape(-1, 64, 4, 4)
    d = jax.nn.relu(convT(d, params['t1_w'], params['t1_b'], 2, 0))
    d = jax.nn.relu(convT(d, params['t2_w'], params['t2_b'], 2, 1))
    d = jax.nn.relu(convT(d, params['t3_w'], params['t3_b'], 2, 1))
    xr = convT(d, params['t4_w'], params['t4_b'], 2, 1)
    return xr, z, zp, mu, lv


if __name__ == "__main__":
    key = jax.random.PRNGKey(0)
    pkey, xkey, ekey = jax.random.split(key, 3)

    params = init_params(pkey)
    # 64x64 input is implied by the module (4 stride-2 convs -> 4x4x64 = 1024 flat).
    x = jax.random.normal(xkey, (2, 1, 64, 64), dtype=jnp.float32)
    eps = jax.random.normal(ekey, (2, 8), dtype=jnp.float32)

    fwd = jax.jit(shape_vae_forward)
    outs = fwd(params, x, eps)
    jax.block_until_ready(outs)
    x_rec, z, z_pose, mu, log_var = outs

    assert x_rec.shape == (2, 1, 64, 64)
    assert z.shape == (2, 8)
    assert z_pose.shape == (2, 9)
    assert mu.shape == (2, 8)
    assert log_var.shape == (2, 8)
    assert bool(jnp.all(jnp.isfinite(x_rec)))

    # Numerical sanity check against an XLA-conv reference (loose tol: MXU vs
    # XLA conv use different f32 accumulation paths).
    ref = jax.jit(_ref_forward)(params, x, eps)
    jax.block_until_ready(ref)
    for got, want in zip(outs, ref):
        assert got.shape == want.shape
        assert bool(jnp.allclose(got, want, rtol=5e-2, atol=5e-2))

    print("KERNEL_OK")
</pallas_src>

<mosaic_0001>
module attributes {stable_mosaic.version = 11 : i64} {
  func.func @_gemm_t_kernel(%arg0: i32, %arg1: memref<8x9xf32, #tpu.memory_space<vmem>>, %arg2: memref<9x1024xf32, #tpu.memory_space<vmem>>, %arg3: memref<8x1xf32, #tpu.memory_space<vmem>>, %arg4: memref<8x1024xf32, #tpu.memory_space<vmem>>) attributes {dimension_semantics = [#tpu.dimension_semantics<parallel>], iteration_bounds = array<i64: 2>, scalar_prefetch = 0 : i64, scratch_operands = 0 : i64, tpu.core_type = #tpu.core_type<tc>, window_params = [{pipeline_mode = #tpu.pipeline_mode<synchronous>, transform_indices = @transform_0, window_bounds = array<i64: 8, 9>}, {transform_indices = @transform_1, window_bounds = array<i64: 9, 1024>}, {pipeline_mode = #tpu.pipeline_mode<synchronous>, transform_indices = @transform_2, window_bounds = array<i64: 8, 1>}, {transform_indices = @transform_3, window_bounds = array<i64: 8, 1024>}]} {
    %c0 = arith.constant 0 : index
    %c0_0 = arith.constant 0 : index
    %0 = vector.load %arg1[%c0, %c0_0] : memref<8x9xf32, #tpu.memory_space<vmem>>, vector<8x9xf32>
    %c0_1 = arith.constant 0 : index
    %c0_2 = arith.constant 0 : index
    %1 = vector.load %arg2[%c0_1, %c0_2] : memref<9x1024xf32, #tpu.memory_space<vmem>>, vector<9x1024xf32>
    %cst = arith.constant dense<0.000000e+00> : vector<8x1024xf32>
    %2 = tpu.matmul %0, %1, %cst {dimension_numbers = #tpu.dot_dimension_numbers<[1], [0], [0], [1], [0, 0, 1, 1], [], []>} : vector<8x9xf32>, vector<9x1024xf32>, vector<8x1024xf32> -> vector<8x1024xf32>
    %c0_3 = arith.constant 0 : index
    %c0_4 = arith.constant 0 : index
    %3 = vector.load %arg3[%c0_3, %c0_4] : memref<8x1xf32, #tpu.memory_space<vmem>>, vector<8x1xf32>
    %4 = vector.broadcast %3 : vector<8x1xf32> to vector<8x1024xf32>
    %5 = arith.addf %2, %4 : vector<8x1024xf32>
    %cst_5 = arith.constant 0.000000e+00 : f32
    %6 = vector.broadcast %cst_5 : f32 to vector<8x1024xf32>
    %7 = arith.maximumf %5, %6 : vector<8x1024xf32>
    %c0_6 = arith.constant 0 : index
    %c0_7 = arith.constant 0 : index
    %8 = vector.load %arg4[%c0_6, %c0_7] : memref<8x1024xf32, #tpu.memory_space<vmem>>, vector<8x1024xf32>
    tpu.vector_store %arg4[%c0_6, %c0_7], %7 {strides = array<i32>} : memref<8x1024xf32, #tpu.memory_space<vmem>>, vector<8x1024xf32>,
    return
  }
  func.func @transform_0(%arg0: i32) -> (i32, i32) {
    %c0_i32 = arith.constant 0 : i32
    %c0_i32_0 = arith.constant 0 : i32
    %c0_i32_1 = arith.constant 0 : i32
    return %c0_i32, %c0_i32_0 : i32, i32
  }
  func.func @transform_1(%arg0: i32) -> (i32, i32) {
    %c0_i32 = arith.constant 0 : i32
    %c0_i32_0 = arith.constant 0 : i32
    return %c0_i32, %arg0 : i32, i32
  }
  func.func @transform_2(%arg0: i32) -> (i32, i32) {
    %c0_i32 = arith.constant 0 : i32
    %c0_i32_0 = arith.constant 0 : i32
    %c0_i32_1 = arith.constant 0 : i32
    return %c0_i32, %c0_i32_0 : i32, i32
  }
  func.func @transform_3(%arg0: i32) -> (i32, i32) {
    %c0_i32 = arith.constant 0 : i32
    %c0_i32_0 = arith.constant 0 : i32
    return %c0_i32, %arg0 : i32, i32
  }
}

module attributes {stable_mosaic.version = 11 : i64} {
  func.func @_gemm_t_kernel(%arg0: i32, %arg1: memref<16x72xf32, #tpu.memory_space<vmem>>, %arg2: memref<72x256xf32, #tpu.memory_space<vmem>>, %arg3: memref<16x1xf32, #tpu.memory_space<vmem>>, %arg4: memref<16x256xf32, #tpu.memory_space<vmem>>) attributes {dimension_semantics = [#tpu.dimension_semantics<parallel>], iteration_bounds = array<i64: 2>, scalar_prefetch = 0 : i64, scratch_operands = 0 : i64, tpu.core_type = #tpu.core_type<tc>, window_params = [{pipeline_mode = #tpu.pipeline_mode<synchronous>, transform_indices = @transform_0, window_bounds = array<i64: 16, 72>}, {transform_indices = @transform_1, window_bounds = array<i64: 72, 256>}, {pipeline_mode = #tpu.pipeline_mode<synchronous>, transform_indices = @transform_2, window_bounds = array<i64: 16, 1>}, {transform_indices = @transform_3, window_bounds = array<i64: 16, 256>}]} {
    %c0 = arith.constant 0 : index
    %c0_0 = arith.constant 0 : index
    %0 = vector.load %arg1[%c0, %c0_0] : memref<16x72xf32, #tpu.memory_space<vmem>>, vector<16x72xf32>
    %c0_1 = arith.constant 0 : index
    %c0_2 = arith.constant 0 : index
    %1 = vector.load %arg2[%c0_1, %c0_2] : memref<72x256xf32, #tpu.memory_space<vmem>>, vector<72x256xf32>
    %cst = arith.constant dense<0.000000e+00> : vector<16x256xf32>
    %2 = tpu.matmul %0, %1, %cst {dimension_numbers = #tpu.dot_dimension_numbers<[1], [0], [0], [1], [0, 0, 1, 1], [], []>} : vector<16x72xf32>, vector<72x256xf32>, vector<16x256xf32> -> vector<16x256xf32>
    %c0_3 = arith.constant 0 : index
    %c0_4 = arith.constant 0 : index
    %3 = vector.load %arg3[%c0_3, %c0_4] : memref<16x1xf32, #tpu.memory_space<vmem>>, vector<16x1xf32>
    %4 = vector.broadcast %3 : vector<16x1xf32> to vector<16x256xf32>
    %5 = arith.addf %2, %4 : vector<16x256xf32>
    %cst_5 = arith.constant 0.000000e+00 : f32
    %6 = vector.broadcast %cst_5 : f32 to vector<16x256xf32>
    %7 = arith.maximumf %5, %6 : vector<16x256xf32>
    %c0_6 = arith.constant 0 : index
    %c0_7 = arith.constant 0 : index
    %8 = vector.load %arg4[%c0_6, %c0_7] : memref<16x256xf32, #tpu.memory_space<vmem>>, vector<16x256xf32>
    tpu.vector_store %arg4[%c0_6, %c0_7], %7 {strides = array<i32>} : memref<16x256xf32, #tpu.memory_space<vmem>>, vector<16x256xf32>,
    return
  }
  func.func @transform_0(%arg0: i32) -> (i32, i32) {
    %c0_i32 = arith.constant 0 : i32
    %c0_i32_0 = arith.constant 0 : i32
    %c0_i32_1 = arith.constant 0 : i32
    return %c0_i32, %c0_i32_0 : i32, i32
  }
  func.func @transform_1(%arg0: i32) -> (i32, i32) {
    %c0_i32 = arith.constant 0 : i32
    %c0_i32_0 = arith.constant 0 : i32
    return %c0_i32, %arg0 : i32, i32
  }
  func.func @transform_2(%arg0: i32) -> (i32, i32) {
    %c0_i32 = arith.constant 0 : i32
    %c0_i32_0 = arith.constant 0 : i32
    %c0_i32_1 = arith.constant 0 : i32
    return %c0_i32, %c0_i32_0 : i32, i32
  }
  func.func @transform_3(%arg0: i32) -> (i32, i32) {
    %c0_i32 = arith.constant 0 : i32
    %c0_i32_0 = arith.constant 0 : i32
    return %c0_i32, %arg0 : i32, i32
  }
}

module attributes {stable_mosaic.version = 11 : i64} {
  func.func @_gemm_t_kernel(%arg0: i32, %arg1: memref<32x144xf32, #tpu.memory_space<vmem>>, %arg2: memref<144x128xf32, #tpu.memory_space<vmem>>, %arg3: memref<32x1xf32, #tpu.memory_space<vmem>>, %arg4: memref<32x128xf32, #tpu.memory_space<vmem>>) attributes {dimension_semantics = [#tpu.dimension_semantics<parallel>], iteration_bounds = array<i64: 1>, scalar_prefetch = 0 : i64, scratch_operands = 0 : i64, tpu.core_type = #tpu.core_type<tc>, window_params = [{pipeline_mode = #tpu.pipeline_mode<synchronous>, transform_indices = @transform_0, window_bounds = array<i64: 32, 144>}, {transform_indices = @transform_1, window_bounds = array<i64: 144, 128>}, {pipeline_mode = #tpu.pipeline_mode<synchronous>, transform_indices = @transform_2, window_bounds = array<i64: 32, 1>}, {transform_indices = @transform_3, window_bounds = array<i64: 32, 128>}]} {
    %c0 = arith.constant 0 : index
    %c0_0 = arith.constant 0 : index
    %0 = vector.load %arg1[%c0, %c0_0] : memref<32x144xf32, #tpu.memory_space<vmem>>, vector<32x144xf32>
    %c0_1 = arith.constant 0 : index
    %c0_2 = arith.constant 0 : index
    %1 = vector.load %arg2[%c0_1, %c0_2] : memref<144x128xf32, #tpu.memory_space<vmem>>, vector<144x128xf32>
    %cst = arith.constant dense<0.000000e+00> : vector<32x128xf32>
    %2 = tpu.matmul %0, %1, %cst {dimension_numbers = #tpu.dot_dimension_numbers<[1], [0], [0], [1], [0, 0, 1, 1], [], []>} : vector<32x144xf32>, vector<144x128xf32>, vector<32x128xf32> -> vector<32x128xf32>
    %c0_3 = arith.constant 0 : index
    %c0_4 = arith.constant 0 : index
    %3 = vector.load %arg3[%c0_3, %c0_4] : memref<32x1xf32, #tpu.memory_space<vmem>>, vector<32x1xf32>
    %4 = vector.broadcast %3 : vector<32x1xf32> to vector<32x128xf32>
    %5 = arith.addf %2, %4 : vector<32x128xf32>
    %cst_5 = arith.constant 0.000000e+00 : f32
    %6 = vector.broadcast %cst_5 : f32 to vector<32x128xf32>
    %7 = arith.maximumf %5, %6 : vector<32x128xf32>
    %c0_6 = arith.constant 0 : index
    %c0_7 = arith.constant 0 : index
    %8 = vector.load %arg4[%c0_6, %c0_7] : memref<32x128xf32, #tpu.memory_space<vmem>>, vector<32x128xf32>
    tpu.vector_store %arg4[%c0_6, %c0_7], %7 {strides = array<i32>} : memref<32x128xf32, #tpu.memory_space<vmem>>, vector<32x128xf32>,
    return
  }
  func.func @transform_0(%arg0: i32) -> (i32, i32) {
    %c0_i32 = arith.constant 0 : i32
    %c0_i32_0 = arith.constant 0 : i32
    %c0_i32_1 = arith.constant 0 : i32
    return %c0_i32, %c0_i32_0 : i32, i32
  }
  func.func @transform_1(%arg0: i32) -> (i32, i32) {
    %c0_i32 = arith.constant 0 : i32
    %c0_i32_0 = arith.constant 0 : i32
    return %c0_i32, %arg0 : i32, i32
  }
  func.func @transform_2(%arg0: i32) -> (i32, i32) {
    %c0_i32 = arith.constant 0 : i32
    %c0_i32_0 = arith.constant 0 : i32
    %c0_i32_1 = arith.constant 0 : i32
    return %c0_i32, %c0_i32_0 : i32, i32
  }
  func.func @transform_3(%arg0: i32) -> (i32, i32) {
    %c0_i32 = arith.constant 0 : i32
    %c0_i32_0 = arith.constant 0 : i32
    return %c0_i32, %arg0 : i32, i32
  }
}

module attributes {stable_mosaic.version = 11 : i64} {
  func.func @_gemm_t_kernel(%arg0: i32, %arg1: memref<64x288xf32, #tpu.memory_space<vmem>>, %arg2: memref<288x32xf32, #tpu.memory_space<vmem>>, %arg3: memref<64x1xf32, #tpu.memory_space<vmem>>, %arg4: memref<64x32xf32, #tpu.memory_space<vmem>>) attributes {dimension_semantics = [#tpu.dimension_semantics<parallel>], iteration_bounds = array<i64: 1>, scalar_prefetch = 0 : i64, scratch_operands = 0 : i64, tpu.core_type = #tpu.core_type<tc>, window_params = [{pipeline_mode = #tpu.pipeline_mode<synchronous>, transform_indices = @transform_0, window_bounds = array<i64: 64, 288>}, {transform_indices = @transform_1, window_bounds = array<i64: 288, 32>}, {pipeline_mode = #tpu.pipeline_mode<synchronous>, transform_indices = @transform_2, window_bounds = array<i64: 64, 1>}, {transform_indices = @transform_3, window_bounds = array<i64: 64, 32>}]} {
    %c0 = arith.constant 0 : index
    %c0_0 = arith.constant 0 : index
    %0 = vector.load %arg1[%c0, %c0_0] : memref<64x288xf32, #tpu.memory_space<vmem>>, vector<64x288xf32>
    %c0_1 = arith.constant 0 : index
    %c0_2 = arith.constant 0 : index
    %1 = vector.load %arg2[%c0_1, %c0_2] : memref<288x32xf32, #tpu.memory_space<vmem>>, vector<288x32xf32>
    %cst = arith.constant dense<0.000000e+00> : vector<64x32xf32>
    %2 = tpu.matmul %0, %1, %cst {dimension_numbers = #tpu.dot_dimension_numbers<[1], [0], [0], [1], [0, 0, 1, 1], [], []>} : vector<64x288xf32>, vector<288x32xf32>, vector<64x32xf32> -> vector<64x32xf32>
    %c0_3 = arith.constant 0 : index
    %c0_4 = arith.constant 0 : index
    %3 = vector.load %arg3[%c0_3, %c0_4] : memref<64x1xf32, #tpu.memory_space<vmem>>, vector<64x1xf32>
    %4 = vector.broadcast %3 : vector<64x1xf32> to vector<64x32xf32>
    %5 = arith.addf %2, %4 : vector<64x32xf32>
    %cst_5 = arith.constant 0.000000e+00 : f32
    %6 = vector.broadcast %cst_5 : f32 to vector<64x32xf32>
    %7 = arith.maximumf %5, %6 : vector<64x32xf32>
    %c0_6 = arith.constant 0 : index
    %c0_7 = arith.constant 0 : index
    %8 = vector.load %arg4[%c0_6, %c0_7] : memref<64x32xf32, #tpu.memory_space<vmem>>, vector<64x32xf32>
    tpu.vector_store %arg4[%c0_6, %c0_7], %7 {strides = array<i32>} : memref<64x32xf32, #tpu.memory_space<vmem>>, vector<64x32xf32>,
    return
  }
  func.func @transform_0(%arg0: i32) -> (i32, i32) {
    %c0_i32 = arith.constant 0 : i32
    %c0_i32_0 = arith.constant 0 : i32
    %c0_i32_1 = arith.constant 0 : i32
    return %c0_i32, %c0_i32_0 : i32, i32
  }
  func.func @transform_1(%arg0: i32) -> (i32, i32) {
    %c0_i32 = arith.constant 0 : i32
    %c0_i32_0 = arith.constant 0 : i32
    return %c0_i32, %arg0 : i32, i32
  }
  func.func @transform_2(%arg0: i32) -> (i32, i32) {
    %c0_i32 = arith.constant 0 : i32
    %c0_i32_0 = arith.constant 0 : i32
    %c0_i32_1 = arith.constant 0 : i32
    return %c0_i32, %c0_i32_0 : i32, i32
  }
  func.func @transform_3(%arg0: i32) -> (i32, i32) {
    %c0_i32 = arith.constant 0 : i32
    %c0_i32_0 = arith.constant 0 : i32
    return %c0_i32, %arg0 : i32, i32
  }
}

module attributes {stable_mosaic.version = 11 : i64} {
  func.func @_heads_decode_kernel(%arg0: memref<17x1024xf32, #tpu.memory_space<vmem>>, %arg1: memref<1024x2xf32, #tpu.memory_space<vmem>>, %arg2: memref<17x1xf32, #tpu.memory_space<vmem>>, %arg3: memref<8x2xf32, #tpu.memory_space<vmem>>, %arg4: memref<1024x8xf32, #tpu.memory_space<vmem>>, %arg5: memref<1024x1xf32, #tpu.memory_space<vmem>>, %arg6: memref<1024x1xf32, #tpu.memory_space<vmem>>, %arg7: memref<17x2xf32, #tpu.memory_space<vmem>>, %arg8: memref<8x2xf32, #tpu.memory_space<vmem>>, %arg9: memref<1024x2xf32, #tpu.memory_space<vmem>>) attributes {dimension_semantics = [], scalar_prefetch = 0 : i64, scratch_operands = 0 : i64, tpu.core_type = #tpu.core_type<tc>} {
    %c0 = arith.constant 0 : index
    %c0_0 = arith.constant 0 : index
    %0 = vector.load %arg0[%c0, %c0_0] : memref<17x1024xf32, #tpu.memory_space<vmem>>, vector<17x1024xf32>
    %c0_1 = arith.constant 0 : index
    %c0_2 = arith.constant 0 : index
    %1 = vector.load %arg1[%c0_1, %c0_2] : memref<1024x2xf32, #tpu.memory_space<vmem>>, vector<1024x2xf32>
    %cst = arith.constant dense<0.000000e+00> : vector<17x2xf32>
    %2 = tpu.matmul %0, %1, %cst {dimension_numbers = #tpu.dot_dimension_numbers<[1], [0], [0], [1], [0, 0, 1, 1], [], []>} : vector<17x1024xf32>, vector<1024x2xf32>, vector<17x2xf32> -> vector<17x2xf32>
    %c0_3 = arith.constant 0 : index
    %c0_4 = arith.constant 0 : index
    %3 = vector.load %arg2[%c0_3, %c0_4] : memref<17x1xf32, #tpu.memory_space<vmem>>, vector<17x1xf32>
    %4 = vector.broadcast %3 : vector<17x1xf32> to vector<17x2xf32>
    %5 = arith.addf %2, %4 : vector<17x2xf32>
    %6 = vector.extract_strided_slice %5 {offsets = [0, 0], sizes = [8, 2], strides = [1, 1]} : vector<17x2xf32> to vector<8x2xf32>
    %7 = vector.extract_strided_slice %5 {offsets = [8, 0], sizes = [8, 2], strides = [1, 1]} : vector<17x2xf32> to vector<8x2xf32>
    %8 = vector.extract_strided_slice %5 {offsets = [16, 0], sizes = [1, 2], strides = [1, 1]} : vector<17x2xf32> to vector<1x2xf32>
    %c0_5 = arith.constant 0 : index
    %c0_6 = arith.constant 0 : index
    %9 = vector.load %arg3[%c0_5, %c0_6] : memref<8x2xf32, #tpu.memory_space<vmem>>, vector<8x2xf32>
    %cst_7 = arith.constant 5.000000e-01 : f32
    %10 = vector.broadcast %cst_7 : f32 to vector<8x2xf32>
    %11 = arith.mulf %10, %7 : vector<8x2xf32>
    %12 = math.exp %11 : vector<8x2xf32>
    %13 = arith.mulf %9, %12 : vector<8x2xf32>
    %14 = arith.addf %13, %6 : vector<8x2xf32>
    %c0_8 = arith.constant 0 : index
    %c0_9 = arith.constant 0 : index
    %15 = vector.load %arg4[%c0_8, %c0_9] : memref<1024x8xf32, #tpu.memory_space<vmem>>, vector<1024x8xf32>
    %cst_10 = arith.constant dense<0.000000e+00> : vector<1024x2xf32>
    %16 = tpu.matmul %15, %14, %cst_10 {dimension_numbers = #tpu.dot_dimension_numbers<[1], [0], [0], [1], [0, 0, 1, 1], [], []>} : vector<1024x8xf32>, vector<8x2xf32>, vector<1024x2xf32> -> vector<1024x2xf32>
    %c0_11 = arith.constant 0 : index
    %c0_12 = arith.constant 0 : index
    %17 = vector.load %arg5[%c0_11, %c0_12] : memref<1024x1xf32, #tpu.memory_space<vmem>>, vector<1024x1xf32>
    %18 = vector.broadcast %17 : vector<1024x1xf32> to vector<1024x2xf32>
    %19 = vector.broadcast %8 : vector<1x2xf32> to vector<1024x2xf32>
    %20 = arith.mulf %18, %19 : vector<1024x2xf32>
    %21 = arith.addf %16, %20 : vector<1024x2xf32>
    %c0_13 = arith.constant 0 : index
    %c0_14 = arith.constant 0 : index
    %22 = vector.load %arg6[%c0_13, %c0_14] : memref<1024x1xf32, #tpu.memory_space<vmem>>, vector<1024x1xf32>
    %23 = vector.broadcast %22 : vector<1024x1xf32> to vector<1024x2xf32>
    %24 = arith.addf %21, %23 : vector<1024x2xf32>
    %c0_15 = arith.constant 0 : index
    %c0_16 = arith.constant 0 : index
    %25 = vector.load %arg7[%c0_15, %c0_16] : memref<17x2xf32, #tpu.memory_space<vmem>>, vector<17x2xf32>
    tpu.vector_store %arg7[%c0_15, %c0_16], %5 {strides = array<i32>} : memref<17x2xf32, #tpu.memory_space<vmem>>, vector<17x2xf32>,
    %c0_17 = arith.constant 0 : index
    %c0_18 = arith.constant 0 : index
    %26 = vector.load %arg8[%c0_17, %c0_18] : memref<8x2xf32, #tpu.memory_space<vmem>>, vector<8x2xf32>
    tpu.vector_store %arg8[%c0_17, %c0_18], %14 {strides = array<i32>} : memref<8x2xf32, #tpu.memory_space<vmem>>, vector<8x2xf32>,
    %c0_19 = arith.constant 0 : index
    %c0_20 = arith.constant 0 : index
    %27 = vector.load %arg9[%c0_19, %c0_20] : memref<1024x2xf32, #tpu.memory_space<vmem>>, vector<1024x2xf32>
    tpu.vector_store %arg9[%c0_19, %c0_20], %24 {strides = array<i32>} : memref<1024x2xf32, #tpu.memory_space<vmem>>, vector<1024x2xf32>,
    return
  }
}

module attributes {stable_mosaic.version = 11 : i64} {
  func.func @_gemm_t_kernel(%arg0: i32, %arg1: memref<288x64xf32, #tpu.memory_space<vmem>>, %arg2: memref<64x32xf32, #tpu.memory_space<vmem>>, %arg3: memref<288x32xf32, #tpu.memory_space<vmem>>) attributes {dimension_semantics = [#tpu.dimension_semantics<parallel>], iteration_bounds = array<i64: 1>, scalar_prefetch = 0 : i64, scratch_operands = 0 : i64, tpu.core_type = #tpu.core_type<tc>, window_params = [{pipeline_mode = #tpu.pipeline_mode<synchronous>, transform_indices = @transform_0, window_bounds = array<i64: 288, 64>}, {transform_indices = @transform_1, window_bounds = array<i64: 64, 32>}, {transform_indices = @transform_2, window_bounds = array<i64: 288, 32>}]} {
    %c0 = arith.constant 0 : index
    %c0_0 = arith.constant 0 : index
    %0 = vector.load %arg1[%c0, %c0_0] : memref<288x64xf32, #tpu.memory_space<vmem>>, vector<288x64xf32>
    %c0_1 = arith.constant 0 : index
    %c0_2 = arith.constant 0 : index
    %1 = vector.load %arg2[%c0_1, %c0_2] : memref<64x32xf32, #tpu.memory_space<vmem>>, vector<64x32xf32>
    %cst = arith.constant dense<0.000000e+00> : vector<288x32xf32>
    %2 = tpu.matmul %0, %1, %cst {dimension_numbers = #tpu.dot_dimension_numbers<[1], [0], [0], [1], [0, 0, 1, 1], [], []>} : vector<288x64xf32>, vector<64x32xf32>, vector<288x32xf32> -> vector<288x32xf32>
    %c0_3 = arith.constant 0 : index
    %c0_4 = arith.constant 0 : index
    %3 = vector.load %arg3[%c0_3, %c0_4] : memref<288x32xf32, #tpu.memory_space<vmem>>, vector<288x32xf32>
    tpu.vector_store %arg3[%c0_3, %c0_4], %2 {strides = array<i32>} : memref<288x32xf32, #tpu.memory_space<vmem>>, vector<288x32xf32>,
    return
  }
  func.func @transform_0(%arg0: i32) -> (i32, i32) {
    %c0_i32 = arith.constant 0 : i32
    %c0_i32_0 = arith.constant 0 : i32
    %c0_i32_1 = arith.constant 0 : i32
    return %c0_i32, %c0_i32_0 : i32, i32
  }
  func.func @transform_1(%arg0: i32) -> (i32, i32) {
    %c0_i32 = arith.constant 0 : i32
    %c0_i32_0 = arith.constant 0 : i32
    return %c0_i32, %arg0 : i32, i32
  }
  func.func @transform_2(%arg0: i32) -> (i32, i32) {
    %c0_i32 = arith.constant 0 : i32
    %c0_i32_0 = arith.constant 0 : i32
    return %c0_i32, %arg0 : i32, i32
  }
}

module attributes {stable_mosaic.version = 11 : i64} {
  func.func @_gemm_t_kernel(%arg0: i32, %arg1: memref<144x32xf32, #tpu.memory_space<vmem>>, %arg2: memref<32x162xf32, #tpu.memory_space<vmem>>, %arg3: memref<144x162xf32, #tpu.memory_space<vmem>>) attributes {dimension_semantics = [#tpu.dimension_semantics<parallel>], iteration_bounds = array<i64: 1>, scalar_prefetch = 0 : i64, scratch_operands = 0 : i64, tpu.core_type = #tpu.core_type<tc>, window_params = [{pipeline_mode = #tpu.pipeline_mode<synchronous>, transform_indices = @transform_0, window_bounds = array<i64: 144, 32>}, {transform_indices = @transform_1, window_bounds = array<i64: 32, 162>}, {transform_indices = @transform_2, window_bounds = array<i64: 144, 162>}]} {
    %c0 = arith.constant 0 : index
    %c0_0 = arith.constant 0 : index
    %0 = vector.load %arg1[%c0, %c0_0] : memref<144x32xf32, #tpu.memory_space<vmem>>, vector<144x32xf32>
    %c0_1 = arith.constant 0 : index
    %c0_2 = arith.constant 0 : index
    %1 = vector.load %arg2[%c0_1, %c0_2] : memref<32x162xf32, #tpu.memory_space<vmem>>, vector<32x162xf32>
    %cst = arith.constant dense<0.000000e+00> : vector<144x162xf32>
    %2 = tpu.matmul %0, %1, %cst {dimension_numbers = #tpu.dot_dimension_numbers<[1], [0], [0], [1], [0, 0, 1, 1], [], []>} : vector<144x32xf32>, vector<32x162xf32>, vector<144x162xf32> -> vector<144x162xf32>
    %c0_3 = arith.constant 0 : index
    %c0_4 = arith.constant 0 : index
    %3 = vector.load %arg3[%c0_3, %c0_4] : memref<144x162xf32, #tpu.memory_space<vmem>>, vector<144x162xf32>
    tpu.vector_store %arg3[%c0_3, %c0_4], %2 {strides = array<i32>} : memref<144x162xf32, #tpu.memory_space<vmem>>, vector<144x162xf32>,
    return
  }
  func.func @transform_0(%arg0: i32) -> (i32, i32) {
    %c0_i32 = arith.constant 0 : i32
    %c0_i32_0 = arith.constant 0 : i32
    %c0_i32_1 = arith.constant 0 : i32
    return %c0_i32, %c0_i32_0 : i32, i32
  }
  func.func @transform_1(%arg0: i32) -> (i32, i32) {
    %c0_i32 = arith.constant 0 : i32
    %c0_i32_0 = arith.constant 0 : i32
    return %c0_i32, %arg0 : i32, i32
  }
  func.func @transform_2(%arg0: i32) -> (i32, i32) {
    %c0_i32 = arith.constant 0 : i32
    %c0_i32_0 = arith.constant 0 : i32
    return %c0_i32, %arg0 : i32, i32
  }
}

module attributes {stable_mosaic.version = 11 : i64} {
  func.func @_gemm_t_kernel(%arg0: i32, %arg1: memref<72x16xf32, #tpu.memory_space<vmem>>, %arg2: memref<16x384xf32, #tpu.memory_space<vmem>>, %arg3: memref<72x384xf32, #tpu.memory_space<vmem>>) attributes {dimension_semantics = [#tpu.dimension_semantics<parallel>], iteration_bounds = array<i64: 2>, scalar_prefetch = 0 : i64, scratch_operands = 0 : i64, tpu.core_type = #tpu.core_type<tc>, window_params = [{pipeline_mode = #tpu.pipeline_mode<synchronous>, transform_indices = @transform_0, window_bounds = array<i64: 72, 16>}, {transform_indices = @transform_1, window_bounds = array<i64: 16, 384>}, {transform_indices = @transform_2, window_bounds = array<i64: 72, 384>}]} {
    %c0 = arith.constant 0 : index
    %c0_0 = arith.constant 0 : index
    %0 = vector.load %arg1[%c0, %c0_0] : memref<72x16xf32, #tpu.memory_space<vmem>>, vector<72x16xf32>
    %c0_1 = arith.constant 0 : index
    %c0_2 = arith.constant 0 : index
    %1 = vector.load %arg2[%c0_1, %c0_2] : memref<16x384xf32, #tpu.memory_space<vmem>>, vector<16x384xf32>
    %cst = arith.constant dense<0.000000e+00> : vector<72x384xf32>
    %2 = tpu.matmul %0, %1, %cst {dimension_numbers = #tpu.dot_dimension_numbers<[1], [0], [0], [1], [0, 0, 1, 1], [], []>} : vector<72x16xf32>, vector<16x384xf32>, vector<72x384xf32> -> vector<72x384xf32>
    %c0_3 = arith.constant 0 : index
    %c0_4 = arith.constant 0 : index
    %3 = vector.load %arg3[%c0_3, %c0_4] : memref<72x384xf32, #tpu.memory_space<vmem>>, vector<72x384xf32>
    tpu.vector_store %arg3[%c0_3, %c0_4], %2 {strides = array<i32>} : memref<72x384xf32, #tpu.memory_space<vmem>>, vector<72x384xf32>,
    return
  }
  func.func @transform_0(%arg0: i32) -> (i32, i32) {
    %c0_i32 = arith.constant 0 : i32
    %c0_i32_0 = arith.constant 0 : i32
    %c0_i32_1 = arith.constant 0 : i32
    return %c0_i32, %c0_i32_0 : i32, i32
  }
  func.func @transform_1(%arg0: i32) -> (i32, i32) {
    %c0_i32 = arith.constant 0 : i32
    %c0_i32_0 = arith.constant 0 : i32
    return %c0_i32, %arg0 : i32, i32
  }
  func.func @transform_2(%arg0: i32) -> (i32, i32) {
    %c0_i32 = arith.constant 0 : i32
    %c0_i32_0 = arith.constant 0 : i32
    return %c0_i32, %arg0 : i32, i32
  }
}

module attributes {stable_mosaic.version = 11 : i64} {
  func.func @_gemm_t_kernel(%arg0: i32, %arg1: memref<4x8xf32, #tpu.memory_space<vmem>>, %arg2: memref<8x1024xf32, #tpu.memory_space<vmem>>, %arg3: memref<4x1024xf32, #tpu.memory_space<vmem>>) attributes {dimension_semantics = [#tpu.dimension_semantics<parallel>], iteration_bounds = array<i64: 3>, scalar_prefetch = 0 : i64, scratch_operands = 0 : i64, tpu.core_type = #tpu.core_type<tc>, window_params = [{pipeline_mode = #tpu.pipeline_mode<synchronous>, transform_indices = @transform_0, window_bounds = array<i64: 4, 8>}, {transform_indices = @transform_1, window_bounds = array<i64: 8, 1024>}, {transform_indices = @transform_2, window_bounds = array<i64: 4, 1024>}]} {
    %c0 = arith.constant 0 : index
    %c0_0 = arith.constant 0 : index
    %0 = vector.load %arg1[%c0, %c0_0] : memref<4x8xf32, #tpu.memory_space<vmem>>, vector<4x8xf32>
    %c0_1 = arith.constant 0 : index
    %c0_2 = arith.constant 0 : index
    %1 = vector.load %arg2[%c0_1, %c0_2] : memref<8x1024xf32, #tpu.memory_space<vmem>>, vector<8x1024xf32>
    %cst = arith.constant dense<0.000000e+00> : vector<4x1024xf32>
    %2 = tpu.matmul %0, %1, %cst {dimension_numbers = #tpu.dot_dimension_numbers<[1], [0], [0], [1], [0, 0, 1, 1], [], []>} : vector<4x8xf32>, vector<8x1024xf32>, vector<4x1024xf32> -> vector<4x1024xf32>
    %c0_3 = arith.constant 0 : index
    %c0_4 = arith.constant 0 : index
    %3 = vector.load %arg3[%c0_3, %c0_4] : memref<4x1024xf32, #tpu.memory_space<vmem>>, vector<4x1024xf32>
    tpu.vector_store %arg3[%c0_3, %c0_4], %2 {strides = array<i32>} : memref<4x1024xf32, #tpu.memory_space<vmem>>, vector<4x1024xf32>,
    return
  }
  func.func @transform_0(%arg0: i32) -> (i32, i32) {
    %c0_i32 = arith.constant 0 : i32
    %c0_i32_0 = arith.constant 0 : i32
    %c0_i32_1 = arith.constant 0 : i32
    return %c0_i32, %c0_i32_0 : i32, i32
  }
  func.func @transform_1(%arg0: i32) -> (i32, i32) {
    %c0_i32 = arith.constant 0 : i32
    %c0_i32_0 = arith.constant 0 : i32
    return %c0_i32, %arg0 : i32, i32
  }
  func.func @transform_2(%arg0: i32) -> (i32, i32) {
    %c0_i32 = arith.constant 0 : i32
    %c0_i32_0 = arith.constant 0 : i32
    return %c0_i32, %arg0 : i32, i32
  }
}

</mosaic_0001>

<bundles_post_ra>
// kernel: shape_vae_forward.9
= control target key start
LH: loop header
LB: loop body
LE: loop exit
PB: predicated region body
PF: predicated region fallthrough
CT: control target
= control target key end

     0   :  { %s614_s12 = smov 0   ;;  %s616_s13 = smov 0   ;;  %s724_s0 = inlined_call_operand.vmem [shape: f32[8,9], index: 0, kind: input, shape index: {}]   ;;  %s725_s1 = inlined_call_operand.vmem [shape: f32[9,2048], index: 1, kind: input, shape index: {}]   ;;  %s726_s2 = inlined_call_operand.vmem [shape: f32[8,1], index: 2, kind: input, shape index: {}]   ;;  %s727_s3 = inlined_call_operand.vmem [shape: f32[8,2048], index: 3, kind: output, shape index: {}]  }
   0x1   :  { %s618_s14 = smov 0  }
   0x2 LB: > { %s513_s15 = sadd.s32 4294967295, %s591_s14   ;;  %s631_s16 = sadd.s32 1, %s591_s14   ;;  %s591_s14 = sphi %s618_s14, %s730_s14   ;;  %s587_s13 = sphi %s616_s13, %s729_s13   ;;  %s583_s12 = sphi %s614_s12, %s728_s12  }
   0x3   : > { %s38_s17 = ssub.s32 %s591_s14, %s631_s16  ;;  %s41_s18 = sadd.s32 1, %s587_s13 }
   0x4   : > { %p39_p0 = scmp.eq.s32.totalorder %s38_s17, 0  ;;  %p48_p1 = scmp.ne.s32.totalorder %s587_s13, %s583_s12 }
   0x5   : > { %p49_p2 = scmp.eq.s32.totalorder %s591_s14, 0  ;;  %p516_p4 = scmp.ge.s32.totalorder %s591_s14, 2 }
   0x6   : > { %s640_s19 = scalar_select %p39_p0, %s587_s13, %s41_s18  }
   0x7   : > { %p50_p3 = por %p49_p2, %p48_p1  ;;  %127 = sbr.rel (%p516_p4) target bundleno = 32 (0x20), region = 24 }
   0xc   : > { %130 = sbr.rel (!%p50_p3) target bundleno = 32 (0x20), region = 28  ;;  %s132_s20 = sand.u32 (%p50_p3), 1, %s587_s13  }
   0xd   : > { %s542_s21 = sshll.u32 (%p50_p3), %s591_s14, 6  ;;  %s517_s22 = sshll.u32 (%p50_p3), %s132_s20, 7 }
   0xe   : > { %s648_s25 = scalar_lea.vmem (%p50_p3), %s725_s1, %s542_s21  ;;  %s134_s26 = scalar_lea.vmem (%p50_p3), [#allocation2], %s517_s22 }
   0xf   : > { %v150_v0 = vld [vmem:[%s648_s25] sm:$0xff] (%p50_p3)  ;;  %v152_v1 = vld [vmem:[%s648_s25 + $0x8] sm:$0xff] (%p50_p3)  ;;  %v154_v2 = vld [vmem:[%s648_s25 + $0x10] sm:$0xff] (%p50_p3) }
  0x10   : > { %151 = vst [vmem:[%s134_s26] sm:$0xff] (%p50_p3), %v150_v0  ;;  %v156_v3 = vld [vmem:[%s648_s25 + $0x18] sm:$0xff] (%p50_p3)  ;;  %v158_v4 = vld [vmem:[%s648_s25 + $0x20] sm:$0xff] (%p50_p3)  ;;  %v160_v5 = vld [vmem:[%s648_s25 + $0x28] sm:$0xff] (%p50_p3) }
  0x11   : > { %153 = vst [vmem:[%s134_s26 + $0x8] sm:$0xff] %v152_v1  ;;  %v162_v6 = vld [vmem:[%s648_s25 + $0x30] sm:$0xff]  ;;  %v164_v7 = vld [vmem:[%s648_s25 + $0x38] sm:$0xff]  ;;  %v166_v8 = vld [vmem:[%s648_s25 + $0x80] sm:$0xff] }
  0x12   : > { %155 = vst [vmem:[%s134_s26 + $0x10] sm:$0xff] %v154_v2  ;;  %v168_v9 = vld [vmem:[%s648_s25 + $0x88] sm:$0xff]  ;;  %v170_v10 = vld [vmem:[%s648_s25 + $0x90] sm:$0xff]  ;;  %v172_v11 = vld [vmem:[%s648_s25 + $0x98] sm:$0xff] }
  0x13   : > { %157 = vst [vmem:[%s134_s26 + $0x18] sm:$0xff] %v156_v3  ;;  %v174_v12 = vld [vmem:[%s648_s25 + $0xa0] sm:$0xff]  ;;  %v176_v13 = vld [vmem:[%s648_s25 + $0xa8] sm:$0xff]  ;;  %v178_v14 = vld [vmem:[%s648_s25 + $0xb0] sm:$0xff] }
  0x14   : > { %159 = vst [vmem:[%s134_s26 + $0x20] sm:$0xff] %v158_v4  ;;  %v180_v15 = vld [vmem:[%s648_s25 + $0xb8] sm:$0xff] }
  0x15   : > { %161 = vst [vmem:[%s134_s26 + $0x28] sm:$0xff] %v160_v5 }
  0x16   : > { %163 = vst [vmem:[%s134_s26 + $0x30] sm:$0xff] %v162_v6 }
  0x17   : > { %165 = vst [vmem:[%s134_s26 + $0x38] sm:$0xff] %v164_v7 }
  0x18   : > { %167 = vst [vmem:[%s134_s26 + $0x40] sm:$0xff] %v166_v8 }
  0x19   : > { %169 = vst [vmem:[%s134_s26 + $0x48] sm:$0xff] %v168_v9 }
  0x1a   : > { %171 = vst [vmem:[%s134_s26 + $0x50] sm:$0xff] %v170_v10 }
  0x1b   : > { %173 = vst [vmem:[%s134_s26 + $0x58] sm:$0xff] %v172_v11 }
  0x1c   : > { %175 = vst [vmem:[%s134_s26 + $0x60] sm:$0xff] %v174_v12 }
  0x1d   : > { %177 = vst [vmem:[%s134_s26 + $0x68] sm:$0xff] %v176_v13 }
  0x1e   : > { %179 = vst [vmem:[%s134_s26 + $0x70] sm:$0xff] %v178_v14 }
  0x1f   : > { %181 = vst [vmem:[%s134_s26 + $0x78] sm:$0xff] %v180_v15 }
  0x20 PF: > { %p520_p5 = scmp.ge.s32.totalorder %s591_s14, 1  ;;  %p186_p6 = scmp.lt.s32.totalorder %s591_s14, 3 }
  0x22   : > { %p187_p7 = pnand %p520_p5, %p186_p6 }
  0x23   : > { %s193_s27 = sand.u32 (!%p187_p7), 1, %s583_s12   ;;  %s522_s7 = sshll.u32 (!%p187_p7), %s513_s15, 3 }
  0x24   : > { %190 = sbr.rel (%p187_p7) target bundleno = 192 (0xc0), region = 51  ;;  %s521_s30 = sshll.u32 (!%p187_p7), %s193_s27, 7 }
  0x25   : > { %s672_s4 = scalar_lea.vmem (!%p187_p7), [#allocation2], %s521_s30  ;;  %p218_p8 = scmp.lt.s32.totalorder (!%p187_p7), %s522_s7, 15 }
  0x29   : > { %v240_v16 = vld [vmem:[%s726_s2] sm:$0xff]  ;;  %vm250_vm0 = vcmask 1040384   ;;  %v593_v17 = vmov 0   ;;  %v234_v18 = vld [vmem:[%s672_s4 + $0x50] sm:$0x1]  ;;  %v227_v21 = vld [vmem:[%s672_s4 + $0x18] sm:$0xff] }
  0x2a   : > { %568 = vset.pattern.permute.xlu0 %v593_v17  ;;  %v235_v19 = vld [vmem:[%s672_s4 + $0x58] sm:$0x1]  ;;  %v226_v20 = vld [vmem:[%s672_s4 + $0x10] sm:$0xff]  ;;  %528 = vmatpush.msk.msra.mxu2 %vm250_vm0, %v234_v18  ;;  %v223_v22 = vld [vmem:[%s724_s0] sm:$0xff]  ;;  %vm246_vm1 = vcmask 72704   ;;  %s732_s7 = smov (!%p218_p8, %s522_s7), 15 }
  0x2b   : > { %243 = vperm.xlu0 %568, %v240_v16   ;;  %530 = vmatpush.msk.msra.mxu3 %vm250_vm0, %v235_v19  ;;  %v238_v23 = vld [vmem:[%s672_s4 + $0x70] sm:$0x1]  ;;  %v239_v24 = vld [vmem:[%s672_s4 + $0x78] sm:$0x1]  ;;  %v232_v25 = vld [vmem:[%s672_s4 + $0x40] sm:$0x1] }
  0x2c   : > { %330 = vmatpush.msra.mxu2 %v226_v20  ;;  %v233_v26 = vld [vmem:[%s672_s4 + $0x48] sm:$0x1]  ;;  %v230_v27 = vld [vmem:[%s672_s4 + $0x30] sm:$0xff]  ;;  %v231_v28 = vld [vmem:[%s672_s4 + $0x38] sm:$0xff]  ;;  %524 = vmatpush.msk.msra.mxu0 %vm250_vm0, %v232_v25  ;;  %s523_s8 = sshll.u32 %s732_s7, 3 }
  0x2d   : > { %350 = vmatpush.msra.mxu3 %v227_v21  ;;  %529 = vmatmul.msk.f32.vlgmr.msra.gmra.mxu2 %vm246_vm1, %v223_v22  ;;  %v224_v29 = vld [vmem:[%s672_s4] sm:$0xff]  ;;  %v225_v30 = vld [vmem:[%s672_s4 + $0x8] sm:$0xff]  ;;  %s221_s11 = scalar_lea.vmem %s727_s3, %s523_s8 }
  0x2e   : > { %531 = vmatmul.msk.f32.vlgmr.msra.gmra.mxu3 %vm246_vm1, %v223_v22  ;;  %536 = vmatpush.msk.msrb.mxu2 %vm250_vm0, %v238_v23  ;;  %v236_v31 = vld [vmem:[%s672_s4 + $0x60] sm:$0x1]  ;;  %v237_v32 = vld [vmem:[%s672_s4 + $0x68] sm:$0x1] }
  0x2f   : > { %538 = vmatpush.msk.msrb.mxu3 %vm250_vm0, %v239_v24  ;;  %526 = vmatpush.msk.msra.mxu1 %vm250_vm0, %v233_v26  ;;  %v228_v33 = vld [vmem:[%s672_s4 + $0x20] sm:$0xff]  ;;  %v229_v34 = vld [vmem:[%s672_s4 + $0x28] sm:$0xff] }
  0x30   : > { %410 = vmatpush.msrb.mxu2 %v230_v27  ;;  %290 = vmatpush.msra.mxu0 %v224_v29 }
  0x31   : > { %430 = vmatpush.msrb.mxu3 %v231_v28  ;;  %310 = vmatpush.msra.mxu1 %v225_v30 }
  0x32   : > { %525 = vmatmul.msk.f32.vlgmr.msra.gmra.mxu0 %vm246_vm1, %v223_v22  ;;  %527 = vmatmul.msk.f32.vlgmr.msra.gmra.mxu1 %vm246_vm1, %v223_v22 }
  0x33   : > { %532 = vmatpush.msk.msrb.mxu0 %vm250_vm0, %v236_v31  ;;  %534 = vmatpush.msk.msrb.mxu1 %vm250_vm0, %v237_v32 }
  0x35   : > { %537 = vmatmul.msk.f32.vlgmr.msrb.gmra.mxu2 %vm246_vm1, %v223_v22  ;;  %370 = vmatpush.msrb.mxu0 %v228_v33 }
  0x36   : > { %539 = vmatmul.msk.f32.vlgmr.msrb.gmra.mxu3 %vm246_vm1, %v223_v22  ;;  %390 = vmatpush.msrb.mxu1 %v229_v34 }
  0x3a   : > { %533 = vmatmul.msk.f32.vlgmr.msrb.gmra.mxu0 %vm246_vm1, %v223_v22  ;;  %535 = vmatmul.msk.f32.vlgmr.msrb.gmra.mxu1 %vm246_vm1, %v223_v22 }
  0x9d   : > { %v244_v35 = vpop.permute.xlu0 %243 }
  0xaf   : > { %v292_v36 = vpop.f32.mrf.mxu0  ;;  %v312_v37 = vpop.f32.mrf.mxu1 }
  0xb0   : > { %v293_v38 = vadd.f32 %v292_v36, %v244_v35  ;;  %v313_v39 = vadd.f32 %v312_v37, %v244_v35  ;;  %v332_v40 = vpop.f32.mrf.mxu2 }
  0xb1   : > { %v352_v41 = vpop.f32.mrf.mxu3  ;;  %v333_v42 = vadd.f32 %v332_v40, %v244_v35 }
  0xb2   : > { %v353_v43 = vadd.f32 %v352_v41, %v244_v35  ;;  %v435_v44 = vmax.f32 %v293_v38, 0.0  ;;  %v436_v45 = vmax.f32 %v313_v39, 0.0 }
  0xb3   : > { %v437_v46 = vmax.f32 %v333_v42, 0.0 }
  0xb4   : > { %v438_v47 = vmax.f32 %v353_v43, 0.0  ;;  %443 = vst [vmem:[%s221_s11] sm:$0xff] %v435_v44 }
  0xb5   : > { %444 = vst [vmem:[%s221_s11 + $0x8] sm:$0xff] %v436_v45 }
  0xb6   : > { %445 = vst [vmem:[%s221_s11 + $0x10] sm:$0xff] %v437_v46 }
  0xb7   : > { %446 = vst [vmem:[%s221_s11 + $0x18] sm:$0xff] %v438_v47  ;;  %v372_v48 = vpop.f32.mrf.mxu0  ;;  %v392_v49 = vpop.f32.mrf.mxu1 }
  0xb8   : > { %v373_v50 = vadd.f32 %v372_v48, %v244_v35  ;;  %v393_v51 = vadd.f32 %v392_v49, %v244_v35  ;;  %v412_v52 = vpop.f32.mrf.mxu2 }
  0xb9   : > { %v432_v53 = vpop.f32.mrf.mxu3  ;;  %v413_v54 = vadd.f32 %v412_v52, %v244_v35 }
  0xba   : > { %v433_v55 = vadd.f32 %v432_v53, %v244_v35  ;;  %v439_v56 = vmax.f32 %v373_v50, 0.0  ;;  %v440_v57 = vmax.f32 %v393_v51, 0.0 }
  0xbb   : > { %v441_v58 = vmax.f32 %v413_v54, 0.0 }
  0xbc   : > { %v442_v59 = vmax.f32 %v433_v55, 0.0  ;;  %447 = vst [vmem:[%s221_s11 + $0x20] sm:$0xff] %v439_v56 }
  0xbd   : > { %448 = vst [vmem:[%s221_s11 + $0x28] sm:$0xff] %v440_v57 }
  0xbe   : > { %449 = vst [vmem:[%s221_s11 + $0x30] sm:$0xff] %v441_v58 }
  0xbf   : > { %450 = vst [vmem:[%s221_s11 + $0x38] sm:$0xff] %v442_v59 }
  0xc0 PF: > { %p10_p9 = scmp.ge.s32.totalorder %s631_s16, 4   ;;  %s728_s12 = smov %s587_s13 }
  0xc1   : > { %s729_s13 = smov %s640_s19  ;;  %s730_s14 = smov %s631_s16 }
  0xc2   :  { %12 = sbr.rel (!%p10_p9) target bundleno = 2 (0x2), region = 90 }

// kernel: shape_vae_forward.10
= control target key start
LH: loop header
LB: loop body
LE: loop exit
PB: predicated region body
PF: predicated region fallthrough
CT: control target
= control target key end

     0   :  { %s513_s12 = smov 0   ;;  %s515_s13 = smov 0   ;;  %s649_s0 = inlined_call_operand.vmem [shape: f32[16,72], index: 0, kind: input, shape index: {}]   ;;  %s650_s1 = inlined_call_operand.vmem [shape: f32[72,512], index: 1, kind: input, shape index: {}]   ;;  %s651_s2 = inlined_call_operand.vmem [shape: f32[16,1], index: 2, kind: input, shape index: {}]   ;;  %s652_s3 = inlined_call_operand.vmem [shape: f32[16,512], index: 3, kind: output, shape index: {}]  }
   0x1   :  { %s517_s14 = smov 0  }
   0x2 LB: > { %s403_s15 = sadd.s32 4294967295, %s490_s14   ;;  %s530_s16 = sadd.s32 1, %s490_s14   ;;  %s490_s14 = sphi %s517_s14, %s656_s14   ;;  %s486_s13 = sphi %s515_s13, %s655_s13   ;;  %s482_s12 = sphi %s513_s12, %s654_s12  }
   0x3   : > { %s38_s17 = ssub.s32 %s490_s14, %s530_s16  ;;  %s41_s18 = sadd.s32 1, %s486_s13 }
   0x4   : > { %p39_p0 = scmp.eq.s32.totalorder %s38_s17, 0  ;;  %p48_p1 = scmp.ne.s32.totalorder %s486_s13, %s482_s12 }
   0x5   : > { %p49_p2 = scmp.eq.s32.totalorder %s490_s14, 0  ;;  %p99_p3 = scmp.eq.s32.totalorder %s403_s15, 1 }
   0x6   : > { %s541_s19 = scalar_select %p39_p0, %s486_s13, %s41_s18  }
   0x7   : > { %p50_p4 = por %p49_p2, %p48_p1  ;;  %p543_p5 = por %p99_p3, %p48_p1 }
   0x8   : > { %p406_p6 = scmp.ge.s32.totalorder %s490_s14, 2 }
   0xa   : > { %127 = sbr.rel (%p406_p6) target bundleno = 37 (0x25), region = 24 }
   0xf   : > { %130 = sbr.rel (!%p50_p4) target bundleno = 37 (0x25), region = 28  ;;  %s132_s21 = sand.u32 (%p50_p4), 1, %s486_s13  }
  0x10   : > { %s420_s22 = sshll.u32 (%p50_p4), %s490_s14, 4  ;;  %s440_s23 = smul.u32 (%p50_p4), 144, %s132_s21 }
  0x11   : > { %s553_s26 = scalar_lea.vmem (%p50_p4), %s650_s1, %s420_s22 }
  0x12   : > { %v150_v0 = vld [vmem:[%s553_s26] sm:$0xff] (%p50_p4)  ;;  %v152_v1 = vld [vmem:[%s553_s26 + $0x8] sm:$0xff] (%p50_p4)  ;;  %s558_s27 = scalar_lea.vmem (%p50_p4), [#allocation2], %s440_s23 }
  0x13   : > { %v154_v2 = vld [vmem:[%s553_s26 + $0x20] sm:$0xff] (%p50_p4)  ;;  %151 = vst [vmem:[%s558_s27] sm:$0xff] (%p50_p4), %v150_v0  ;;  %v156_v3 = vld [vmem:[%s553_s26 + $0x28] sm:$0xff] (%p50_p4) }
  0x14   : > { %153 = vst [vmem:[%s558_s27 + $0x8] sm:$0xff] %v152_v1  ;;  %v158_v4 = vld [vmem:[%s553_s26 + $0x40] sm:$0xff]  ;;  %v160_v5 = vld [vmem:[%s553_s26 + $0x48] sm:$0xff] }
  0x15   : > { %155 = vst [vmem:[%s558_s27 + $0x10] sm:$0xff] %v154_v2  ;;  %v162_v6 = vld [vmem:[%s553_s26 + $0x60] sm:$0xff]  ;;  %v164_v7 = vld [vmem:[%s553_s26 + $0x68] sm:$0xff] }
  0x16   : > { %157 = vst [vmem:[%s558_s27 + $0x18] sm:$0xff] %v156_v3  ;;  %v166_v8 = vld [vmem:[%s553_s26 + $0x80] sm:$0xff]  ;;  %v168_v9 = vld [vmem:[%s553_s26 + $0x88] sm:$0xff] }
  0x17   : > { %159 = vst [vmem:[%s558_s27 + $0x20] sm:$0xff] %v158_v4  ;;  %v170_v10 = vld [vmem:[%s553_s26 + $0xa0] sm:$0xff]  ;;  %v172_v11 = vld [vmem:[%s553_s26 + $0xa8] sm:$0xff] }
  0x18   : > { %161 = vst [vmem:[%s558_s27 + $0x28] sm:$0xff] %v160_v5  ;;  %v174_v12 = vld [vmem:[%s553_s26 + $0xc0] sm:$0xff]  ;;  %v176_v13 = vld [vmem:[%s553_s26 + $0xc8] sm:$0xff] }
  0x19   : > { %163 = vst [vmem:[%s558_s27 + $0x30] sm:$0xff] %v162_v6  ;;  %v178_v14 = vld [vmem:[%s553_s26 + $0xe0] sm:$0xff]  ;;  %v180_v15 = vld [vmem:[%s553_s26 + $0xe8] sm:$0xff] }
  0x1a   : > { %165 = vst [vmem:[%s558_s27 + $0x38] sm:$0xff] %v164_v7  ;;  %v182_v16 = vld [vmem:[%s553_s26 + $0x100] sm:$0xff]  ;;  %v184_v17 = vld [vmem:[%s553_s26 + $0x108] sm:$0xff] }
  0x1b   : > { %167 = vst [vmem:[%s558_s27 + $0x40] sm:$0xff] %v166_v8 }
  0x1c   : > { %169 = vst [vmem:[%s558_s27 + $0x48] sm:$0xff] %v168_v9 }
  0x1d   : > { %171 = vst [vmem:[%s558_s27 + $0x50] sm:$0xff] %v170_v10 }
  0x1e   : > { %173 = vst [vmem:[%s558_s27 + $0x58] sm:$0xff] %v172_v11 }
  0x1f   : > { %175 = vst [vmem:[%s558_s27 + $0x60] sm:$0xff] %v174_v12 }
  0x20   : > { %177 = vst [vmem:[%s558_s27 + $0x68] sm:$0xff] %v176_v13 }
  0x21   : > { %179 = vst [vmem:[%s558_s27 + $0x70] sm:$0xff] %v178_v14 }
  0x22   : > { %181 = vst [vmem:[%s558_s27 + $0x78] sm:$0xff] %v180_v15 }
  0x23   : > { %183 = vst [vmem:[%s558_s27 + $0x80] sm:$0xff] %v182_v16 }
  0x24   : > { %185 = vst [vmem:[%s558_s27 + $0x88] sm:$0xff] %v184_v17 }
  0x25 PF: > { %p409_p7 = scmp.ge.s32.totalorder %s490_s14, 1  ;;  %p190_p8 = scmp.lt.s32.totalorder %s490_s14, 3 }
  0x27   : > { %p191_p9 = pnand %p409_p7, %p190_p8 }
  0x28   : > { %s197_s28 = sand.u32 (!%p191_p9), 1, %s482_s12  }
  0x29   : > { %194 = sbr.rel (%p191_p9) target bundleno = 212 (0xd4), region = 51  ;;  %s410_s17 = sshll.u32 (!%p191_p9), %s197_s28, 5 }
  0x2a   : > { %s441_s4 = smul.u32 (!%p191_p9), 144, %s197_s28  ;;  %s218_s18 = scalar_lea.vmem (!%p191_p9), [#allocation3], %s410_s17 }
  0x2c   : > { %s601_s5 = scalar_lea.vmem (!%p191_p9), [#allocation2], %s441_s4 }
  0x2e   : > { %v241_v18 = vld [vmem:[%s651_s2] sm:$0xff]  ;;  %v492_v19 = vmov 0   ;;  %v240_v21 = vld [vmem:[%s601_s5 + $0x88] sm:$0xff]  ;;  %v238_v23 = vld [vmem:[%s601_s5 + $0x78] sm:$0xff]  ;;  %vm253_vm0 = vcmask 588800   ;;  %s421_s12 = sshll.u32 (%p543_p5), %s403_s15, 4 }
  0x2f   : > { %467 = vset.pattern.permute.xlu0 %v492_v19  ;;  %v239_v20 = vld [vmem:[%s601_s5 + $0x80] sm:$0xff]  ;;  %v237_v22 = vld [vmem:[%s601_s5 + $0x70] sm:$0xff]  ;;  %290 = vmatpush.msra.mxu1 %v240_v21  ;;  %v236_v25 = vld [vmem:[%s601_s5 + $0x68] sm:$0xff]  ;;  %s323_s23 = scalar_lea.vmem (%p543_p5), %s652_s3, %s421_s12 }
  0x30   : > { %245 = vperm.xlu0 %467, %v241_v18   ;;  %267 = vmatpush.msra.mxu0 %v239_v20  ;;  %v235_v24 = vld [vmem:[%s601_s5 + $0x60] sm:$0xff]  ;;  %v233_v26 = vld [vmem:[%s601_s5 + $0x50] sm:$0xff]  ;;  %v234_v27 = vld [vmem:[%s601_s5 + $0x58] sm:$0xff] }
  0x31   : > { %422 = vmatpush.msra.mxu2 %v239_v20  ;;  %431 = vmatpush.msra.mxu3 %v240_v21  ;;  %v231_v28 = vld [vmem:[%s601_s5 + $0x40] sm:$0xff]  ;;  %v232_v29 = vld [vmem:[%s601_s5 + $0x48] sm:$0xff]  ;;  %v229_v30 = vld [vmem:[%s601_s5 + $0x30] sm:$0xff] }
  0x32   : > { %268 = vmatpush.msra.mxu0 %v237_v22  ;;  %291 = vmatpush.msra.mxu1 %v238_v23  ;;  %v230_v31 = vld [vmem:[%s601_s5 + $0x38] sm:$0xff]  ;;  %v227_v32 = vld [vmem:[%s601_s5 + $0x20] sm:$0xff]  ;;  %v228_v33 = vld [vmem:[%s601_s5 + $0x28] sm:$0xff] }
  0x33   : > { %423 = vmatpush.msra.mxu2 %v237_v22  ;;  %432 = vmatpush.msra.mxu3 %v238_v23  ;;  %v225_v34 = vld [vmem:[%s601_s5 + $0x10] sm:$0xff]  ;;  %v226_v35 = vld [vmem:[%s601_s5 + $0x18] sm:$0xff]  ;;  %v223_v36 = vld [vmem:[%s601_s5] sm:$0xff] }
  0x34   : > { %269 = vmatpush.msra.mxu0 %v235_v24  ;;  %292 = vmatpush.msra.mxu1 %v236_v25  ;;  %v224_v37 = vld [vmem:[%s601_s5 + $0x8] sm:$0xff]  ;;  %v221_v38 = vld [vmem:[%s649_s0] sm:$0xff] }
  0x35   : > { %424 = vmatpush.msra.mxu2 %v235_v24  ;;  %433 = vmatpush.msra.mxu3 %v236_v25  ;;  %v222_v39 = vld [vmem:[%s649_s0 + $0x8] sm:$0xff] }
  0x36   : > { %270 = vmatpush.msra.mxu0 %v233_v26  ;;  %293 = vmatpush.msra.mxu1 %v234_v27  ;;  %v242_v40 = vld [vmem:[%s651_s2 + $0x8] sm:$0xff] }
  0x37   : > { %425 = vmatpush.msra.mxu2 %v233_v26  ;;  %434 = vmatpush.msra.mxu3 %v234_v27 }
  0x38   : > { %271 = vmatpush.msra.mxu0 %v231_v28  ;;  %294 = vmatpush.msra.mxu1 %v232_v29 }
  0x39   : > { %426 = vmatpush.msra.mxu2 %v231_v28  ;;  %435 = vmatpush.msra.mxu3 %v232_v29 }
  0x3a   : > { %272 = vmatpush.msra.mxu0 %v229_v30  ;;  %295 = vmatpush.msra.mxu1 %v230_v31 }
  0x3b   : > { %427 = vmatpush.msra.mxu2 %v229_v30  ;;  %436 = vmatpush.msra.mxu3 %v230_v31 }
  0x3c   : > { %273 = vmatpush.msra.mxu0 %v227_v32  ;;  %296 = vmatpush.msra.mxu1 %v228_v33 }
  0x3d   : > { %428 = vmatpush.msra.mxu2 %v227_v32  ;;  %437 = vmatpush.msra.mxu3 %v228_v33 }
  0x3e   : > { %274 = vmatpush.msra.mxu0 %v225_v34  ;;  %297 = vmatpush.msra.mxu1 %v226_v35 }
  0x3f   : > { %429 = vmatpush.msra.mxu2 %v225_v34  ;;  %438 = vmatpush.msra.mxu3 %v226_v35 }
  0x40   : > { %275 = vmatpush.msra.mxu0 %v223_v36  ;;  %298 = vmatpush.msra.mxu1 %v224_v37 }
  0x41   : > { %430 = vmatpush.msra.mxu2 %v223_v36  ;;  %439 = vmatpush.msra.mxu3 %v224_v37 }
  0x42   : > { %411 = vmatmul.msk.f32.vlgmr.msra.gmra.mxu0 %vm253_vm0, %v221_v38  ;;  %412 = vmatmul.msk.f32.vlgmr.msra.gmra.mxu2 %vm253_vm0, %v222_v39 }
  0x43   : > { %413 = vmatmul.msk.f32.vlgmr.msra.gmra.mxu1 %vm253_vm0, %v221_v38  ;;  %414 = vmatmul.msk.f32.vlgmr.msra.gmra.mxu3 %vm253_vm0, %v222_v39 }
  0x44   : > { %250 = vperm.xlu0 %467, %v242_v40  }
  0xa2   : > { %v246_v41 = vpop.permute.xlu0 %245 }
  0xb6   : > { %v251_v48 = vpop.permute.xlu0 %250 }
  0xbf   : > { %v277_v42 = vpop.f32.mrf.mxu0 }
  0xc0   : > { %v278_v43 = vadd.f32 %v277_v42, %v246_v41  ;;  %v300_v44 = vpop.f32.mrf.mxu1 }
  0xc1   : > { %v301_v45 = vadd.f32 %v300_v44, %v246_v41 }
  0xc2   : > { %v306_v46 = vmax.f32 %v278_v43, 0.0 }
  0xc3   : > { %v307_v47 = vmax.f32 %v301_v45, 0.0 }
  0xc4   : > { %310 = vst [vmem:[%s218_s18] sm:$0xff] %v306_v46 }
  0xc5   : > { %311 = vst [vmem:[%s218_s18 + $0x8] sm:$0xff] %v307_v47  ;;  %v280_v49 = vpop.f32.mrf.mxu2 }
  0xc6   : > { %v281_v50 = vadd.f32 %v280_v49, %v251_v48  ;;  %v303_v51 = vpop.f32.mrf.mxu3 }
  0xc7   : > { %v304_v52 = vadd.f32 %v303_v51, %v251_v48  ;;  %320 = sbr.rel (!%p543_p5) target bundleno = 212 (0xd4), region = 59 }
  0xc8   : > { %v308_v53 = vmax.f32 %v281_v50, 0.0 }
  0xc9   : > { %v309_v54 = vmax.f32 %v304_v52, 0.0 }
  0xca   : > { %312 = vst [vmem:[%s218_s18 + $0x10] sm:$0xff] %v308_v53 }
  0xcb   : > { %313 = vst [vmem:[%s218_s18 + $0x18] sm:$0xff] %v309_v54  ;;  %v336_v55 = vld [vmem:[%s218_s18] sm:$0xff] (%p543_p5) }
  0xcc   : > { %v338_v56 = vld [vmem:[%s218_s18 + $0x8] sm:$0xff]  ;;  %337 = vst [vmem:[%s323_s23] sm:$0xff] %v336_v55 }
  0xcd   : > { %339 = vst [vmem:[%s323_s23 + $0x8] sm:$0xff] %v338_v56 }
  0xd1   : > { %v340_v57 = vld [vmem:[%s218_s18 + $0x10] sm:$0xff] }
  0xd2   : > { %v342_v58 = vld [vmem:[%s218_s18 + $0x18] sm:$0xff]  ;;  %341 = vst [vmem:[%s323_s23 + $0x20] sm:$0xff] %v340_v57 }
  0xd3   : > { %343 = vst [vmem:[%s323_s23 + $0x28] sm:$0xff] %v342_v58 }
  0xd4 PF: > { %p10_p10 = scmp.ge.s32.totalorder %s530_s16, 4   ;;  %s654_s12 = smov %s486_s13 }
  0xd5   : > { %s655_s13 = smov %s541_s19  ;;  %s656_s14 = smov %s530_s16 }
  0xd6   :  { %12 = sbr.rel (!%p10_p10) target bundleno = 2 (0x2), region = 113 }

// kernel: shape_vae_forward.11
= control target key start
LH: loop header
LB: loop body
LE: loop exit
PB: predicated region body
PF: predicated region fallthrough
CT: control target
= control target key end

     0   :  { %v186_v3 = vmov 0   ;;  %vm64_vm0 = vcmask 130048   ;;  %s313_s1 = inlined_call_operand.vmem [shape: f32[144,128], index: 1, kind: input, shape index: {}]   ;;  %s314_s0 = inlined_call_operand.vmem [shape: f32[32,144], index: 0, kind: input, shape index: {}]   ;;  %s315_s2 = inlined_call_operand.vmem [shape: f32[32,1], index: 2, kind: input, shape index: {}]   ;;  %s316_s3 = inlined_call_operand.vmem [shape: f32[32,128], index: 3, kind: output, shape index: {}]  }
   0x1   :  { %v37_v0 = vld [vmem:[%s313_s1 + $0x78] sm:$0xff]  ;;  %v36_v1 = vld [vmem:[%s313_s1 + $0x70] sm:$0xff]  ;;  %v35_v2 = vld [vmem:[%s313_s1 + $0x68] sm:$0xff]  ;;  %185 = vset.pattern.permute.xlu1 %v186_v3  ;;  %184 = vset.pattern.permute.xlu0 %v186_v3 }
   0x2   :  { %77 = vmatpush.msra.mxu0 %v37_v0  ;;  %151 = vmatpush.msra.mxu2 %v37_v0  ;;  %v39_v4 = vld [vmem:[%s313_s1 + $0x88] sm:$0xff]  ;;  %v34_v5 = vld [vmem:[%s313_s1 + $0x60] sm:$0xff]  ;;  %v33_v8 = vld [vmem:[%s313_s1 + $0x58] sm:$0xff] }
   0x3   :  { %152 = vmatpush.msra.mxu3 %v37_v0  ;;  %120 = vmatpush.msra.mxu1 %v39_v4  ;;  %v38_v6 = vld [vmem:[%s313_s1 + $0x80] sm:$0xff]  ;;  %v15_v7 = vld [vmem:[%s314_s0 + $0x8] sm:$0xff]  ;;  %v32_v9 = vld [vmem:[%s313_s1 + $0x50] sm:$0xff] }
   0x4   :  { %78 = vmatpush.msra.mxu0 %v36_v1  ;;  %153 = vmatpush.msra.mxu2 %v36_v1  ;;  %v42_v10 = vld [vmem:[%s315_s2 + $0x10] sm:$0xff]  ;;  %v31_v11 = vld [vmem:[%s313_s1 + $0x48] sm:$0xff]  ;;  %v40_v12 = vld [vmem:[%s315_s2] sm:$0xff] }
   0x5   :  { %154 = vmatpush.msra.mxu3 %v36_v1  ;;  %121 = vmatpush.msra.mxu1 %v38_v6  ;;  %v30_v13 = vld [vmem:[%s313_s1 + $0x40] sm:$0xff]  ;;  %v17_v14 = vld [vmem:[%s314_s0 + $0x18] sm:$0xff]  ;;  %v28_v16 = vld [vmem:[%s313_s1 + $0x30] sm:$0xff] }
   0x6   :  { %79 = vmatpush.msra.mxu0 %v35_v2  ;;  %155 = vmatpush.msra.mxu2 %v35_v2  ;;  %v29_v15 = vld [vmem:[%s313_s1 + $0x38] sm:$0xff]  ;;  %v27_v18 = vld [vmem:[%s313_s1 + $0x28] sm:$0xff]  ;;  %v26_v20 = vld [vmem:[%s313_s1 + $0x20] sm:$0xff] }
   0x7   :  { %156 = vmatpush.msra.mxu3 %v35_v2  ;;  %147 = vmatmul.msk.f32.vlgmr.msra.gmra.mxu1 %vm64_vm0, %v15_v7  ;;  %v43_v17 = vld [vmem:[%s315_s2 + $0x18] sm:$0xff]  ;;  %v41_v19 = vld [vmem:[%s315_s2 + $0x8] sm:$0xff]  ;;  %v24_v23 = vld [vmem:[%s313_s1 + $0x10] sm:$0xff] }
   0x8   :  { %80 = vmatpush.msra.mxu0 %v34_v5  ;;  %157 = vmatpush.msra.mxu2 %v34_v5  ;;  %v19_v21 = vld [vmem:[%s314_s0 + $0x28] sm:$0xff]  ;;  %v25_v22 = vld [vmem:[%s313_s1 + $0x18] sm:$0xff]  ;;  %v22_v25 = vld [vmem:[%s313_s1] sm:$0xff] }
   0x9   :  { %158 = vmatpush.msra.mxu3 %v34_v5  ;;  %56 = vperm.xlu1 %185, %v42_v10   ;;  %v23_v24 = vld [vmem:[%s313_s1 + $0x8] sm:$0xff]  ;;  %v14_v26 = vld [vmem:[%s314_s0] sm:$0xff]  ;;  %v16_v27 = vld [vmem:[%s314_s0 + $0x10] sm:$0xff] }
   0xa   :  { %81 = vmatpush.msra.mxu0 %v33_v8  ;;  %159 = vmatpush.msra.mxu2 %v33_v8  ;;  %v18_v28 = vld [vmem:[%s314_s0 + $0x20] sm:$0xff]  ;;  %v21_v29 = vld [vmem:[%s314_s0 + $0x38] sm:$0xff]  ;;  %v20_v30 = vld [vmem:[%s314_s0 + $0x30] sm:$0xff] }
   0xb   :  { %160 = vmatpush.msra.mxu3 %v33_v8  ;;  %46 = vperm.xlu0 %184, %v40_v12  }
   0xc   :  { %82 = vmatpush.msra.mxu0 %v32_v9  ;;  %161 = vmatpush.msra.mxu2 %v32_v9 }
   0xd   :  { %162 = vmatpush.msra.mxu3 %v32_v9 }
   0xe   :  { %83 = vmatpush.msra.mxu0 %v31_v11  ;;  %163 = vmatpush.msra.mxu2 %v31_v11 }
   0xf   :  { %164 = vmatpush.msra.mxu3 %v31_v11  ;;  %148 = vmatmul.msk.f32.gmra.mxu1 %vm64_vm0, %v17_v14 }
  0x10   :  { %84 = vmatpush.msra.mxu0 %v30_v13  ;;  %165 = vmatpush.msra.mxu2 %v30_v13 }
  0x11   :  { %166 = vmatpush.msra.mxu3 %v30_v13  ;;  %61 = vperm.xlu1 %185, %v43_v17  }
  0x12   :  { %85 = vmatpush.msra.mxu0 %v29_v15  ;;  %167 = vmatpush.msra.mxu2 %v29_v15 }
  0x13   :  { %168 = vmatpush.msra.mxu3 %v29_v15  ;;  %51 = vperm.xlu0 %184, %v41_v19  }
  0x14   :  { %86 = vmatpush.msra.mxu0 %v28_v16  ;;  %169 = vmatpush.msra.mxu2 %v28_v16 }
  0x15   :  { %170 = vmatpush.msra.mxu3 %v28_v16 }
  0x16   :  { %87 = vmatpush.msra.mxu0 %v27_v18  ;;  %171 = vmatpush.msra.mxu2 %v27_v18 }
  0x17   :  { %172 = vmatpush.msra.mxu3 %v27_v18  ;;  %149 = vmatmul.msk.f32.gmra.mxu1 %vm64_vm0, %v19_v21 }
  0x18   :  { %88 = vmatpush.msra.mxu0 %v26_v20  ;;  %173 = vmatpush.msra.mxu2 %v26_v20 }
  0x19   :  { %174 = vmatpush.msra.mxu3 %v26_v20 }
  0x1a   :  { %89 = vmatpush.msra.mxu0 %v25_v22  ;;  %175 = vmatpush.msra.mxu2 %v25_v22 }
  0x1b   :  { %176 = vmatpush.msra.mxu3 %v25_v22 }
  0x1c   :  { %90 = vmatpush.msra.mxu0 %v24_v23  ;;  %177 = vmatpush.msra.mxu2 %v24_v23 }
  0x1d   :  { %178 = vmatpush.msra.mxu3 %v24_v23 }
  0x1e   :  { %91 = vmatpush.msra.mxu0 %v23_v24  ;;  %179 = vmatpush.msra.mxu2 %v23_v24 }
  0x1f   :  { %180 = vmatpush.msra.mxu3 %v23_v24  ;;  %150 = vmatmul.msk.f32.gmra.mxu1 %vm64_vm0, %v21_v29 }
  0x20   :  { %92 = vmatpush.msra.mxu0 %v22_v25  ;;  %181 = vmatpush.msra.mxu2 %v22_v25 }
  0x21   :  { %182 = vmatpush.msra.mxu3 %v22_v25  ;;  %93 = vmatmul.f32.vlgmr.msra.gmra.mxu0 %v14_v26 }
  0x22   :  { %96 = vmatmul.f32.vlgmr.msra.gmra.mxu2 %v16_v27  ;;  %99 = vmatmul.f32.vlgmr.msra.gmra.mxu3 %v18_v28 }
  0x2a   :  { %102 = vmatmul.f32.gmra.mxu3 %v20_v30 }
  0x7b   :  { %v57_v37 = vpop.permute.xlu1 %56 }
  0x7d   :  { %v47_v32 = vpop.permute.xlu0 %46 }
  0x83   :  { %v62_v49 = vpop.permute.xlu1 %61 }
  0x84   :  { %v123_v31 = vpop.f32.mrf.mxu1 }
  0x85   :  { %v52_v39 = vpop.permute.xlu0 %51 }
  0x8c   :  { %v126_v33 = vpop.f32.mrf.mxu1 }
  0x94   :  { %v129_v40 = vpop.f32.mrf.mxu1 }
  0x9c   :  { %v132_v51 = vpop.f32.mrf.mxu1 }
  0x9e   :  { %v94_v34 = vpop.f32.mrf.mxu0 }
  0x9f   :  { %v95_v35 = vadd.f32 %v94_v34, %v47_v32 }
  0xa1   :  { %v124_v36 = vadd.f32 %v123_v31, %v95_v35 }
  0xa3   :  { %v135_v38 = vmax.f32 %v124_v36, 0.0 }
  0xa5   :  { %139 = vst [vmem:[%s316_s3] sm:$0xff] %v135_v38  ;;  %v97_v41 = vpop.f32.mrf.mxu2  ;;  %v100_v42 = vpop.f32.mrf.mxu3 }
  0xa6   :  { %v98_v43 = vadd.f32 %v97_v41, %v52_v39  ;;  %v101_v44 = vadd.f32 %v100_v42, %v57_v37 }
  0xa8   :  { %v127_v45 = vadd.f32 %v126_v33, %v98_v43  ;;  %v130_v46 = vadd.f32 %v129_v40, %v101_v44 }
  0xaa   :  { %v136_v47 = vmax.f32 %v127_v45, 0.0  ;;  %v137_v48 = vmax.f32 %v130_v46, 0.0 }
  0xac   :  { %140 = vst [vmem:[%s316_s3 + $0x8] sm:$0xff] %v136_v47 }
  0xad   :  { %141 = vst [vmem:[%s316_s3 + $0x10] sm:$0xff] %v137_v48  ;;  %v103_v50 = vpop.f32.mrf.mxu3 }
  0xae   :  { %v104_v52 = vadd.f32 %v103_v50, %v62_v49 }
  0xb0   :  { %v133_v53 = vadd.f32 %v132_v51, %v104_v52 }
  0xb2   :  { %v138_v54 = vmax.f32 %v133_v53, 0.0 }
  0xb4   :  { %142 = vst [vmem:[%s316_s3 + $0x18] sm:$0xff] %v138_v54 }

// kernel: shape_vae_forward.12
= control target key start
LH: loop header
LB: loop body
LE: loop exit
PB: predicated region body
PF: predicated region fallthrough
CT: control target
= control target key end

     0   :  { %vm122_vm0 = vcmask 261120   ;;  %v334_v22 = vmov 0   ;;  %s655_s1 = inlined_call_operand.vmem [shape: f32[288,32], index: 1, kind: input, shape index: {}]   ;;  %s656_s0 = inlined_call_operand.vmem [shape: f32[64,288], index: 0, kind: input, shape index: {}]   ;;  %s657_s2 = inlined_call_operand.vmem [shape: f32[64,1], index: 2, kind: input, shape index: {}]   ;;  %s658_s3 = inlined_call_operand.vmem [shape: f32[64,32], index: 3, kind: output, shape index: {}]  }
   0x1   :  { %v53_v0 = vld [vmem:[%s655_s1 + $0x78] sm:$0xff]  ;;  %v52_v1 = vld [vmem:[%s655_s1 + $0x70] sm:$0xff]  ;;  %v51_v4 = vld [vmem:[%s655_s1 + $0x68] sm:$0xff]  ;;  %331 = vset.pattern.permute.xlu0 %v334_v22  ;;  %332 = vset.pattern.permute.xlu1 %v334_v22 }
   0x2   :  { %v364_v2 = vld [vmem:[%s655_s1 + $0xf8] sm:$0xff]  ;;  %147 = vmatpush.msra.mxu0 %v53_v0  ;;  %298 = vmatpush.msra.mxu3 %v53_v0  ;;  %v369_v3 = vld [vmem:[%s655_s1 + $0xf0] sm:$0xff]  ;;  %v378_v5 = vld [vmem:[%s655_s1 + $0xe8] sm:$0xff] }
   0x3   :  { %188 = vmatpush.msra.mxu1 %v364_v2  ;;  %v73_v6 = vld [vmem:[%s655_s1 + $0x118] sm:$0xff]  ;;  %v50_v7 = vld [vmem:[%s655_s1 + $0x60] sm:$0xff]  ;;  %v72_v8 = vld [vmem:[%s655_s1 + $0x110] sm:$0xff]  ;;  %333 = vset.pattern.permute.xlu2 %v334_v22 }
   0x4   :  { %148 = vmatpush.msra.mxu0 %v52_v1  ;;  %299 = vmatpush.msra.mxu3 %v52_v1  ;;  %v393_v9 = vld [vmem:[%s655_s1 + $0xe0] sm:$0xff]  ;;  %v71_v10 = vld [vmem:[%s655_s1 + $0x108] sm:$0xff]  ;;  %v49_v11 = vld [vmem:[%s655_s1 + $0x58] sm:$0xff] }
   0x5   :  { %189 = vmatpush.msra.mxu1 %v369_v3  ;;  %241 = vmatpush.msra.mxu2 %v73_v6  ;;  %v405_v12 = vld [vmem:[%s655_s1 + $0xd8] sm:$0xff]  ;;  %v70_v13 = vld [vmem:[%s655_s1 + $0x100] sm:$0xff]  ;;  %v48_v14 = vld [vmem:[%s655_s1 + $0x50] sm:$0xff] }
   0x6   :  { %149 = vmatpush.msra.mxu0 %v51_v4  ;;  %300 = vmatpush.msra.mxu3 %v51_v4  ;;  %v417_v15 = vld [vmem:[%s655_s1 + $0xd0] sm:$0xff]  ;;  %v47_v17 = vld [vmem:[%s655_s1 + $0x48] sm:$0xff]  ;;  %v46_v19 = vld [vmem:[%s655_s1 + $0x40] sm:$0xff] }
   0x7   :  { %190 = vmatpush.msra.mxu1 %v378_v5  ;;  %242 = vmatpush.msra.mxu2 %v72_v8  ;;  %v16_v16 = vld [vmem:[%s656_s0 + $0x10] sm:$0xff]  ;;  %v429_v18 = vld [vmem:[%s655_s1 + $0xc8] sm:$0xff]  ;;  %v439_v20 = vld [vmem:[%s655_s1 + $0xc0] sm:$0xff] }
   0x8   :  { %150 = vmatpush.msra.mxu0 %v50_v7  ;;  %301 = vmatpush.msra.mxu3 %v50_v7  ;;  %v45_v21 = vld [vmem:[%s655_s1 + $0x38] sm:$0xff]  ;;  %v74_v23 = vld [vmem:[%s657_s2] sm:$0xff]  ;;  %v44_v25 = vld [vmem:[%s655_s1 + $0x30] sm:$0xff] }
   0x9   :  { %191 = vmatpush.msra.mxu1 %v393_v9  ;;  %243 = vmatpush.msra.mxu2 %v71_v10  ;;  %v451_v24 = vld [vmem:[%s655_s1 + $0xb8] sm:$0xff]  ;;  %v460_v26 = vld [vmem:[%s655_s1 + $0xb0] sm:$0xff]  ;;  %v19_v27 = vld [vmem:[%s656_s0 + $0x28] sm:$0xff] }
   0xa   :  { %151 = vmatpush.msra.mxu0 %v49_v11  ;;  %302 = vmatpush.msra.mxu3 %v49_v11  ;;  %v43_v28 = vld [vmem:[%s655_s1 + $0x28] sm:$0xff]  ;;  %v42_v30 = vld [vmem:[%s655_s1 + $0x20] sm:$0xff]  ;;  %v76_v31 = vld [vmem:[%s657_s2 + $0x10] sm:$0xff] }
   0xb   :  { %192 = vmatpush.msra.mxu1 %v405_v12  ;;  %244 = vmatpush.msra.mxu2 %v70_v13  ;;  %v472_v29 = vld [vmem:[%s655_s1 + $0xa8] sm:$0xff]  ;;  %v485_v32 = vld [vmem:[%s655_s1 + $0xa0] sm:$0xff]  ;;  %v41_v34 = vld [vmem:[%s655_s1 + $0x18] sm:$0xff] }
   0xc   :  { %152 = vmatpush.msra.mxu0 %v48_v14  ;;  %303 = vmatpush.msra.mxu3 %v48_v14  ;;  %v75_v33 = vld [vmem:[%s657_s2 + $0x8] sm:$0xff]  ;;  %v497_v35 = vld [vmem:[%s655_s1 + $0x98] sm:$0xff]  ;;  %v40_v36 = vld [vmem:[%s655_s1 + $0x10] sm:$0xff] }
   0xd   :  { %193 = vmatpush.msra.mxu1 %v417_v15  ;;  %290 = vmatmul.msk.f32.vlgmr.msra.gmra.mxu2 %vm122_vm0, %v16_v16  ;;  %v506_v37 = vld [vmem:[%s655_s1 + $0x90] sm:$0xff]  ;;  %v22_v38 = vld [vmem:[%s656_s0 + $0x40] sm:$0xff]  ;;  %v39_v39 = vld [vmem:[%s655_s1 + $0x8] sm:$0xff] }
   0xe   :  { %153 = vmatpush.msra.mxu0 %v47_v17  ;;  %304 = vmatpush.msra.mxu3 %v47_v17  ;;  %v55_v40 = vld [vmem:[%s655_s1 + $0x88] sm:$0xff]  ;;  %v38_v41 = vld [vmem:[%s655_s1] sm:$0xff]  ;;  %v77_v42 = vld [vmem:[%s657_s2 + $0x18] sm:$0xff] }
   0xf   :  { %194 = vmatpush.msra.mxu1 %v429_v18  ;;  %84 = vperm.xlu0 %331, %v74_v23   ;;  %v14_v43 = vld [vmem:[%s656_s0] sm:$0xff]  ;;  %v32_v45 = vld [vmem:[%s656_s0 + $0x90] sm:$0xff]  ;;  %v15_v46 = vld [vmem:[%s656_s0 + $0x8] sm:$0xff] }
  0x10   :  { %154 = vmatpush.msra.mxu0 %v46_v19  ;;  %305 = vmatpush.msra.mxu3 %v46_v19  ;;  %v54_v44 = vld [vmem:[%s655_s1 + $0x80] sm:$0xff]  ;;  %v80_v47 = vld [vmem:[%s657_s2 + $0x30] sm:$0xff]  ;;  %v25_v48 = vld [vmem:[%s656_s0 + $0x58] sm:$0xff] }
  0x11   :  { %195 = vmatpush.msra.mxu1 %v439_v20  ;;  %94 = vperm.xlu1 %332, %v76_v31   ;;  %v81_v49 = vld [vmem:[%s657_s2 + $0x38] sm:$0xff]  ;;  %v35_v51 = vld [vmem:[%s656_s0 + $0xa8] sm:$0xff]  ;;  %v18_v52 = vld [vmem:[%s656_s0 + $0x20] sm:$0xff] }
  0x12   :  { %155 = vmatpush.msra.mxu0 %v45_v21  ;;  %306 = vmatpush.msra.mxu3 %v45_v21  ;;  %v17_v50 = vld [vmem:[%s656_s0 + $0x18] sm:$0xff]  ;;  %v28_v53 = vld [vmem:[%s656_s0 + $0x70] sm:$0xff]  ;;  %v78_v54 = vld [vmem:[%s657_s2 + $0x20] sm:$0xff] }
  0x13   :  { %196 = vmatpush.msra.mxu1 %v451_v24  ;;  %104 = vperm.xlu2 %333, %v78_v54   ;;  %v20_v55 = vld [vmem:[%s656_s0 + $0x30] sm:$0xff]  ;;  %v21_v56 = vld [vmem:[%s656_s0 + $0x38] sm:$0xff]  ;;  %v79_v57 = vld [vmem:[%s657_s2 + $0x28] sm:$0xff] }
  0x14   :  { %156 = vmatpush.msra.mxu0 %v44_v25  ;;  %307 = vmatpush.msra.mxu3 %v44_v25  ;;  %v31_v58 = vld [vmem:[%s656_s0 + $0x88] sm:$0xff]  ;;  %v24_v60 = vld [vmem:[%s656_s0 + $0x50] sm:$0xff]  ;;  %v34_v61 = vld [vmem:[%s656_s0 + $0xa0] sm:$0xff] }
  0x15   :  { %197 = vmatpush.msra.mxu1 %v460_v26  ;;  %291 = vmatmul.msk.f32.gmra.mxu2 %vm122_vm0, %v19_v27  ;;  %v23_v59 = vld [vmem:[%s656_s0 + $0x48] sm:$0xff]  ;;  %v33_v62 = vld [vmem:[%s656_s0 + $0x98] sm:$0xff]  ;;  %v26_v63 = vld [vmem:[%s656_s0 + $0x60] sm:$0xff] }
  0x16   :  { %157 = vmatpush.msra.mxu0 %v43_v28  ;;  %308 = vmatpush.msra.mxu3 %v43_v28  ;;  %v27_v0 = vld [vmem:[%s656_s0 + $0x68] sm:$0xff]  ;;  %v37_v1 = vld [vmem:[%s656_s0 + $0xb8] sm:$0xff]  ;;  %v30_v4 = vld [vmem:[%s656_s0 + $0x80] sm:$0xff] }
  0x17   :  { %198 = vmatpush.msra.mxu1 %v472_v29  ;;  %89 = vperm.xlu0 %331, %v75_v33  }
  0x18   :  { %158 = vmatpush.msra.mxu0 %v42_v30  ;;  %309 = vmatpush.msra.mxu3 %v42_v30 }
  0x19   :  { %199 = vmatpush.msra.mxu1 %v485_v32  ;;  %99 = vperm.xlu1 %332, %v77_v42  }
  0x1a   :  { %159 = vmatpush.msra.mxu0 %v41_v34  ;;  %310 = vmatpush.msra.mxu3 %v41_v34 }
  0x1b   :  { %200 = vmatpush.msra.mxu1 %v497_v35  ;;  %109 = vperm.xlu2 %333, %v79_v57  }
  0x1c   :  { %160 = vmatpush.msra.mxu0 %v40_v36  ;;  %311 = vmatpush.msra.mxu3 %v40_v36 }
  0x1d   :  { %201 = vmatpush.msra.mxu1 %v506_v37  ;;  %292 = vmatmul.msk.f32.gmra.mxu2 %vm122_vm0, %v22_v38 }
  0x1e   :  { %161 = vmatpush.msra.mxu0 %v39_v39  ;;  %312 = vmatpush.msra.mxu3 %v39_v39 }
  0x1f   :  { %202 = vmatpush.msra.mxu1 %v55_v40  ;;  %114 = vperm.xlu0 %331, %v80_v47  }
  0x20   :  { %162 = vmatpush.msra.mxu0 %v38_v41  ;;  %313 = vmatpush.msra.mxu3 %v38_v41 }
  0x21   :  { %163 = vmatmul.f32.vlgmr.msra.gmra.mxu0 %v14_v43  ;;  %203 = vmatpush.msra.mxu1 %v54_v44 }
  0x22   :  { %314 = vmatpush.msrb.mxu3 %v364_v2  ;;  %204 = vmatmul.f32.vlgmr.msra.gmra.mxu1 %v15_v46  ;;  %v36_v2 = vld [vmem:[%s656_s0 + $0xb0] sm:$0xff] }
  0x23   :  { %181 = vmatmul.f32.vlgmr.msra.gmra.mxu3 %v32_v45  ;;  %119 = vperm.xlu1 %332, %v81_v49  }
  0x24   :  { %315 = vmatpush.msrb.mxu3 %v369_v3  ;;  %v29_v3 = vld [vmem:[%s656_s0 + $0x78] sm:$0xff] }
  0x25   :  { %293 = vmatmul.msk.f32.gmra.mxu2 %vm122_vm0, %v25_v48 }
  0x26   :  { %316 = vmatpush.msrb.mxu3 %v378_v5 }
  0x28   :  { %317 = vmatpush.msrb.mxu3 %v393_v9 }
  0x29   :  { %166 = vmatmul.f32.gmra.mxu0 %v17_v50 }
  0x2a   :  { %318 = vmatpush.msrb.mxu3 %v405_v12  ;;  %207 = vmatmul.f32.gmra.mxu1 %v18_v52 }
  0x2b   :  { %184 = vmatmul.f32.gmra.mxu3 %v35_v51 }
  0x2c   :  { %319 = vmatpush.msrb.mxu3 %v417_v15 }
  0x2d   :  { %294 = vmatmul.msk.f32.gmra.mxu2 %vm122_vm0, %v28_v53 }
  0x2e   :  { %320 = vmatpush.msrb.mxu3 %v429_v18 }
  0x30   :  { %321 = vmatpush.msrb.mxu3 %v439_v20 }
  0x31   :  { %169 = vmatmul.f32.gmra.mxu0 %v20_v55 }
  0x32   :  { %322 = vmatpush.msrb.mxu3 %v451_v24  ;;  %210 = vmatmul.f32.gmra.mxu1 %v21_v56 }
  0x34   :  { %323 = vmatpush.msrb.mxu3 %v460_v26 }
  0x35   :  { %295 = vmatmul.msk.f32.gmra.mxu2 %vm122_vm0, %v31_v58 }
  0x36   :  { %324 = vmatpush.msrb.mxu3 %v472_v29 }
  0x38   :  { %325 = vmatpush.msrb.mxu3 %v485_v32 }
  0x39   :  { %172 = vmatmul.f32.gmra.mxu0 %v23_v59 }
  0x3a   :  { %326 = vmatpush.msrb.mxu3 %v497_v35  ;;  %213 = vmatmul.f32.gmra.mxu1 %v24_v60 }
  0x3c   :  { %327 = vmatpush.msrb.mxu3 %v506_v37 }
  0x3d   :  { %296 = vmatmul.msk.f32.gmra.mxu2 %vm122_vm0, %v34_v61 }
  0x3e   :  { %328 = vmatpush.msrb.mxu3 %v55_v40 }
  0x40   :  { %329 = vmatpush.msrb.mxu3 %v54_v44 }
  0x41   :  { %222 = vmatmul.f32.vlgmr.msrb.gmra.mxu3 %v33_v62  ;;  %175 = vmatmul.f32.gmra.mxu0 %v26_v63 }
  0x42   :  { %216 = vmatmul.f32.gmra.mxu1 %v27_v0 }
  0x45   :  { %297 = vmatmul.msk.f32.gmra.mxu2 %vm122_vm0, %v37_v1 }
  0x49   :  { %225 = vmatmul.f32.gmra.mxu3 %v36_v2  ;;  %178 = vmatmul.f32.gmra.mxu0 %v29_v3 }
  0x4a   :  { %219 = vmatmul.f32.gmra.mxu1 %v30_v4 }
  0x6d   :  { %v105_v40 = vpop.permute.xlu2 %104 }
  0x75   :  { %v110_v53 = vpop.permute.xlu2 %109 }
  0x81   :  { %v85_v7 = vpop.permute.xlu0 %84 }
  0x83   :  { %v95_v22 = vpop.permute.xlu1 %94 }
  0x89   :  { %v90_v14 = vpop.permute.xlu0 %89 }
  0x8b   :  { %v100_v32 = vpop.permute.xlu1 %99 }
  0x90   :  { %v246_v5 = vpop.f32.mrf.mxu2 }
  0x91   :  { %v115_v43 = vpop.permute.xlu0 %114 }
  0x95   :  { %v120_v56 = vpop.permute.xlu1 %119 }
  0x98   :  { %v249_v6 = vpop.f32.mrf.mxu2 }
  0x9e   :  { %v164_v8 = vpop.f32.mrf.mxu0 }
  0x9f   :  { %v165_v9 = vadd.f32 %v164_v8, %v85_v7  ;;  %v205_v10 = vpop.f32.mrf.mxu1 }
  0xa0   :  { %v252_v11 = vpop.f32.mrf.mxu2 }
  0xa1   :  { %v206_v12 = vadd.f32 %v205_v10, %v165_v9 }
  0xa3   :  { %v247_v13 = vadd.f32 %v246_v5, %v206_v12 }
  0xa5   :  { %v270_v15 = vmax.f32 %v247_v13, 0.0 }
  0xa6   :  { %v167_v16 = vpop.f32.mrf.mxu0  ;;  %v182_v29 = vpop.f32.mrf.mxu3 }
  0xa7   :  { %278 = vst.msk [vmem:[%s658_s3] sm:$0xff] %vm122_vm0, %v270_v15  ;;  %v168_v17 = vadd.f32 %v167_v16, %v90_v14  ;;  %v208_v18 = vpop.f32.mrf.mxu1  ;;  %v183_v48 = vadd.f32 %v182_v29, %v115_v43 }
  0xa8   :  { %v255_v19 = vpop.f32.mrf.mxu2 }
  0xa9   :  { %v209_v20 = vadd.f32 %v208_v18, %v168_v17 }
  0xab   :  { %v250_v21 = vadd.f32 %v249_v6, %v209_v20 }
  0xad   :  { %v271_v23 = vmax.f32 %v250_v21, 0.0 }
  0xae   :  { %v170_v24 = vpop.f32.mrf.mxu0  ;;  %v185_v39 = vpop.f32.mrf.mxu3 }
  0xaf   :  { %279 = vst.msk [vmem:[%s658_s3 + $0x8] sm:$0xff] %vm122_vm0, %v271_v23  ;;  %v171_v25 = vadd.f32 %v170_v24, %v95_v22  ;;  %v211_v26 = vpop.f32.mrf.mxu1  ;;  %v186_v61 = vadd.f32 %v185_v39, %v120_v56 }
  0xb0   :  { %v258_v27 = vpop.f32.mrf.mxu2 }
  0xb1   :  { %v212_v28 = vadd.f32 %v211_v26, %v171_v25 }
  0xb3   :  { %v253_v30 = vadd.f32 %v252_v11, %v212_v28 }
  0xb5   :  { %v272_v31 = vmax.f32 %v253_v30, 0.0 }
  0xb6   :  { %v173_v33 = vpop.f32.mrf.mxu0 }
  0xb7   :  { %280 = vst.msk [vmem:[%s658_s3 + $0x10] sm:$0xff] %vm122_vm0, %v272_v31  ;;  %v174_v34 = vadd.f32 %v173_v33, %v100_v32  ;;  %v214_v35 = vpop.f32.mrf.mxu1 }
  0xb8   :  { %v261_v36 = vpop.f32.mrf.mxu2 }
  0xb9   :  { %v215_v37 = vadd.f32 %v214_v35, %v174_v34 }
  0xbb   :  { %v256_v38 = vadd.f32 %v255_v19, %v215_v37 }
  0xbd   :  { %v273_v41 = vmax.f32 %v256_v38, 0.0 }
  0xbe   :  { %v176_v42 = vpop.f32.mrf.mxu0 }
  0xbf   :  { %281 = vst.msk [vmem:[%s658_s3 + $0x18] sm:$0xff] %vm122_vm0, %v273_v41  ;;  %v177_v44 = vadd.f32 %v176_v42, %v105_v40  ;;  %v217_v45 = vpop.f32.mrf.mxu1 }
  0xc0   :  { %v264_v47 = vpop.f32.mrf.mxu2 }
  0xc1   :  { %v218_v46 = vadd.f32 %v217_v45, %v177_v44 }
  0xc3   :  { %v259_v49 = vadd.f32 %v258_v27, %v218_v46 }
  0xc4   :  { %v223_v50 = vpop.f32.mrf.mxu3 }
  0xc5   :  { %v224_v51 = vadd.f32 %v223_v50, %v183_v48  ;;  %v274_v52 = vmax.f32 %v259_v49, 0.0 }
  0xc6   :  { %v179_v55 = vpop.f32.mrf.mxu0 }
  0xc7   :  { %v265_v54 = vadd.f32 %v264_v47, %v224_v51  ;;  %282 = vst.msk [vmem:[%s658_s3 + $0x20] sm:$0xff] %vm122_vm0, %v274_v52  ;;  %v180_v57 = vadd.f32 %v179_v55, %v110_v53  ;;  %v220_v59 = vpop.f32.mrf.mxu1 }
  0xc8   :  { %v267_v0 = vpop.f32.mrf.mxu2 }
  0xc9   :  { %v276_v58 = vmax.f32 %v265_v54, 0.0  ;;  %v221_v60 = vadd.f32 %v220_v59, %v180_v57 }
  0xcb   :  { %284 = vst.msk [vmem:[%s658_s3 + $0x30] sm:$0xff] %vm122_vm0, %v276_v58  ;;  %v262_v62 = vadd.f32 %v261_v36, %v221_v60 }
  0xcc   :  { %v226_v63 = vpop.f32.mrf.mxu3 }
  0xcd   :  { %v227_v1 = vadd.f32 %v226_v63, %v186_v61  ;;  %v275_v2 = vmax.f32 %v262_v62, 0.0 }
  0xcf   :  { %v268_v3 = vadd.f32 %v267_v0, %v227_v1  ;;  %283 = vst.msk [vmem:[%s658_s3 + $0x28] sm:$0xff] %vm122_vm0, %v275_v2 }
  0xd1   :  { %v277_v4 = vmax.f32 %v268_v3, 0.0 }
  0xd3   :  { %285 = vst.msk [vmem:[%s658_s3 + $0x38] sm:$0xff] %vm122_vm0, %v277_v4 }

// kernel: shape_vae_forward.14
= control target key start
LH: loop header
LB: loop body
LE: loop exit
PB: predicated region body
PF: predicated region fallthrough
CT: control target
= control target key end

     0   :  { %vm55_vm0 = vcmask 523264   ;;  %vm289_vm1 = vcmask 261120   ;;  %s717_s1 = inlined_call_operand.vmem [shape: f32[64,32], index: 1, kind: input, shape index: {}]   ;;  %s718_s0 = inlined_call_operand.vmem [shape: f32[288,64], index: 0, kind: input, shape index: {}]   ;;  %s719_s2 = inlined_call_operand.vmem [shape: f32[288,32], index: 2, kind: output, shape index: {}]  }
   0x1   :  { %v54_v0 = vld [vmem:[%s717_s1 + $0x38] sm:$0xff]  ;;  %v53_v1 = vld [vmem:[%s717_s1 + $0x30] sm:$0xff]  ;;  %v52_v2 = vld [vmem:[%s717_s1 + $0x28] sm:$0xff] }
   0x2   :  { %367 = vmatpush.msra.mxu2 %v54_v0  ;;  %368 = vmatpush.msra.mxu3 %v54_v0  ;;  %v51_v3 = vld [vmem:[%s717_s1 + $0x20] sm:$0xff]  ;;  %v50_v4 = vld [vmem:[%s717_s1 + $0x18] sm:$0xff]  ;;  %v49_v5 = vld [vmem:[%s717_s1 + $0x10] sm:$0xff] }
   0x3   :  { %172 = vmatpush.msra.mxu0 %v54_v0  ;;  %366 = vmatpush.msra.mxu1 %v54_v0  ;;  %v48_v6 = vld [vmem:[%s717_s1 + $0x8] sm:$0xff]  ;;  %v47_v7 = vld [vmem:[%s717_s1] sm:$0xff]  ;;  %v29_v8 = vld [vmem:[%s718_s0 + $0x90] sm:$0xff] }
   0x4   :  { %370 = vmatpush.msra.mxu2 %v53_v1  ;;  %371 = vmatpush.msra.mxu3 %v53_v1  ;;  %v38_v9 = vld [vmem:[%s718_s0 + $0xd8] sm:$0xff]  ;;  %v11_v10 = vld [vmem:[%s718_s0] sm:$0xff]  ;;  %v20_v11 = vld [vmem:[%s718_s0 + $0x48] sm:$0xff] }
   0x5   :  { %173 = vmatpush.msra.mxu0 %v53_v1  ;;  %369 = vmatpush.msra.mxu1 %v53_v1  ;;  %v30_v12 = vld [vmem:[%s718_s0 + $0x98] sm:$0xff]  ;;  %v39_v13 = vld [vmem:[%s718_s0 + $0xe0] sm:$0xff]  ;;  %v12_v14 = vld [vmem:[%s718_s0 + $0x8] sm:$0xff] }
   0x6   :  { %373 = vmatpush.msra.mxu2 %v52_v2  ;;  %374 = vmatpush.msra.mxu3 %v52_v2  ;;  %v21_v15 = vld [vmem:[%s718_s0 + $0x50] sm:$0xff]  ;;  %v31_v16 = vld [vmem:[%s718_s0 + $0xa0] sm:$0xff]  ;;  %v40_v17 = vld [vmem:[%s718_s0 + $0xe8] sm:$0xff] }
   0x7   :  { %174 = vmatpush.msra.mxu0 %v52_v2  ;;  %372 = vmatpush.msra.mxu1 %v52_v2  ;;  %v13_v18 = vld [vmem:[%s718_s0 + $0x10] sm:$0xff]  ;;  %v22_v19 = vld [vmem:[%s718_s0 + $0x58] sm:$0xff]  ;;  %v32_v20 = vld [vmem:[%s718_s0 + $0xa8] sm:$0xff] }
   0x8   :  { %376 = vmatpush.msra.mxu2 %v51_v3  ;;  %377 = vmatpush.msra.mxu3 %v51_v3  ;;  %v41_v21 = vld [vmem:[%s718_s0 + $0xf0] sm:$0xff]  ;;  %v14_v22 = vld [vmem:[%s718_s0 + $0x18] sm:$0xff]  ;;  %v23_v23 = vld [vmem:[%s718_s0 + $0x60] sm:$0xff] }
   0x9   :  { %175 = vmatpush.msra.mxu0 %v51_v3  ;;  %375 = vmatpush.msra.mxu1 %v51_v3  ;;  %v33_v24 = vld [vmem:[%s718_s0 + $0xb0] sm:$0xff]  ;;  %v42_v25 = vld [vmem:[%s718_s0 + $0xf8] sm:$0xff]  ;;  %v15_v26 = vld [vmem:[%s718_s0 + $0x20] sm:$0xff] }
   0xa   :  { %379 = vmatpush.msra.mxu2 %v50_v4  ;;  %380 = vmatpush.msra.mxu3 %v50_v4  ;;  %v24_v27 = vld [vmem:[%s718_s0 + $0x68] sm:$0xff]  ;;  %v34_v28 = vld [vmem:[%s718_s0 + $0xb8] sm:$0xff]  ;;  %v43_v29 = vld [vmem:[%s718_s0 + $0x100] sm:$0xff] }
   0xb   :  { %176 = vmatpush.msra.mxu0 %v50_v4  ;;  %378 = vmatpush.msra.mxu1 %v50_v4  ;;  %v16_v30 = vld [vmem:[%s718_s0 + $0x28] sm:$0xff]  ;;  %v25_v31 = vld [vmem:[%s718_s0 + $0x70] sm:$0xff]  ;;  %v35_v32 = vld [vmem:[%s718_s0 + $0xc0] sm:$0xff] }
   0xc   :  { %382 = vmatpush.msra.mxu2 %v49_v5  ;;  %383 = vmatpush.msra.mxu3 %v49_v5  ;;  %v44_v33 = vld [vmem:[%s718_s0 + $0x108] sm:$0xff]  ;;  %v17_v34 = vld [vmem:[%s718_s0 + $0x30] sm:$0xff]  ;;  %v26_v35 = vld [vmem:[%s718_s0 + $0x78] sm:$0xff] }
   0xd   :  { %177 = vmatpush.msra.mxu0 %v49_v5  ;;  %381 = vmatpush.msra.mxu1 %v49_v5  ;;  %v36_v36 = vld [vmem:[%s718_s0 + $0xc8] sm:$0xff]  ;;  %v45_v37 = vld [vmem:[%s718_s0 + $0x110] sm:$0xff]  ;;  %v18_v38 = vld [vmem:[%s718_s0 + $0x38] sm:$0xff] }
   0xe   :  { %385 = vmatpush.msra.mxu2 %v48_v6  ;;  %386 = vmatpush.msra.mxu3 %v48_v6  ;;  %v27_v39 = vld [vmem:[%s718_s0 + $0x80] sm:$0xff]  ;;  %v37_v40 = vld [vmem:[%s718_s0 + $0xd0] sm:$0xff]  ;;  %v46_v41 = vld [vmem:[%s718_s0 + $0x118] sm:$0xff] }
   0xf   :  { %178 = vmatpush.msra.mxu0 %v48_v6  ;;  %384 = vmatpush.msra.mxu1 %v48_v6  ;;  %v19_v42 = vld [vmem:[%s718_s0 + $0x40] sm:$0xff]  ;;  %v28_v43 = vld [vmem:[%s718_s0 + $0x88] sm:$0xff] }
  0x10   :  { %388 = vmatpush.msra.mxu2 %v47_v7  ;;  %389 = vmatpush.msra.mxu3 %v47_v7 }
  0x11   :  { %348 = vmatmul.msk.f32.vlgmr.msra.gmra.mxu2 %vm55_vm0, %v29_v8  ;;  %357 = vmatmul.msk.f32.vlgmr.msra.gmra.mxu3 %vm55_vm0, %v38_v9 }
  0x12   :  { %179 = vmatpush.msra.mxu0 %v47_v7  ;;  %387 = vmatpush.msra.mxu1 %v47_v7 }
  0x13   :  { %330 = vmatmul.msk.f32.vlgmr.msra.gmra.mxu0 %vm55_vm0, %v11_v10  ;;  %339 = vmatmul.msk.f32.vlgmr.msra.gmra.mxu1 %vm55_vm0, %v20_v11 }
  0x19   :  { %349 = vmatmul.msk.f32.gmra.mxu2 %vm55_vm0, %v30_v12  ;;  %358 = vmatmul.msk.f32.gmra.mxu3 %vm55_vm0, %v39_v13 }
  0x1b   :  { %331 = vmatmul.msk.f32.gmra.mxu0 %vm55_vm0, %v12_v14  ;;  %340 = vmatmul.msk.f32.gmra.mxu1 %vm55_vm0, %v21_v15 }
  0x21   :  { %350 = vmatmul.msk.f32.gmra.mxu2 %vm55_vm0, %v31_v16  ;;  %359 = vmatmul.msk.f32.gmra.mxu3 %vm55_vm0, %v40_v17 }
  0x23   :  { %332 = vmatmul.msk.f32.gmra.mxu0 %vm55_vm0, %v13_v18  ;;  %341 = vmatmul.msk.f32.gmra.mxu1 %vm55_vm0, %v22_v19 }
  0x29   :  { %351 = vmatmul.msk.f32.gmra.mxu2 %vm55_vm0, %v32_v20  ;;  %360 = vmatmul.msk.f32.gmra.mxu3 %vm55_vm0, %v41_v21 }
  0x2b   :  { %333 = vmatmul.msk.f32.gmra.mxu0 %vm55_vm0, %v14_v22  ;;  %342 = vmatmul.msk.f32.gmra.mxu1 %vm55_vm0, %v23_v23 }
  0x31   :  { %352 = vmatmul.msk.f32.gmra.mxu2 %vm55_vm0, %v33_v24  ;;  %361 = vmatmul.msk.f32.gmra.mxu3 %vm55_vm0, %v42_v25 }
  0x33   :  { %334 = vmatmul.msk.f32.gmra.mxu0 %vm55_vm0, %v15_v26  ;;  %343 = vmatmul.msk.f32.gmra.mxu1 %vm55_vm0, %v24_v27 }
  0x39   :  { %353 = vmatmul.msk.f32.gmra.mxu2 %vm55_vm0, %v34_v28  ;;  %362 = vmatmul.msk.f32.gmra.mxu3 %vm55_vm0, %v43_v29 }
  0x3b   :  { %335 = vmatmul.msk.f32.gmra.mxu0 %vm55_vm0, %v16_v30  ;;  %344 = vmatmul.msk.f32.gmra.mxu1 %vm55_vm0, %v25_v31 }
  0x41   :  { %354 = vmatmul.msk.f32.gmra.mxu2 %vm55_vm0, %v35_v32  ;;  %363 = vmatmul.msk.f32.gmra.mxu3 %vm55_vm0, %v44_v33 }
  0x43   :  { %336 = vmatmul.msk.f32.gmra.mxu0 %vm55_vm0, %v17_v34  ;;  %345 = vmatmul.msk.f32.gmra.mxu1 %vm55_vm0, %v26_v35 }
  0x49   :  { %355 = vmatmul.msk.f32.gmra.mxu2 %vm55_vm0, %v36_v36  ;;  %364 = vmatmul.msk.f32.gmra.mxu3 %vm55_vm0, %v45_v37 }
  0x4b   :  { %337 = vmatmul.msk.f32.gmra.mxu0 %vm55_vm0, %v18_v38  ;;  %346 = vmatmul.msk.f32.gmra.mxu1 %vm55_vm0, %v27_v39 }
  0x51   :  { %356 = vmatmul.msk.f32.gmra.mxu2 %vm55_vm0, %v37_v40  ;;  %365 = vmatmul.msk.f32.gmra.mxu3 %vm55_vm0, %v46_v41 }
  0x53   :  { %338 = vmatmul.msk.f32.gmra.mxu0 %vm55_vm0, %v19_v42  ;;  %347 = vmatmul.msk.f32.gmra.mxu1 %vm55_vm0, %v28_v43 }
  0x90   :  { %v181_v44 = vpop.f32.mrf.mxu0  ;;  %v208_v45 = vpop.f32.mrf.mxu1 }
  0x91   :  { %290 = vst.msk [vmem:[%s719_s2] sm:$0xff] %vm289_vm1, %v181_v44 }
  0x92   :  { %299 = vst.msk [vmem:[%s719_s2 + $0x48] sm:$0xff] %vm289_vm1, %v208_v45 }
  0x94   :  { %v235_v46 = vpop.f32.mrf.mxu2  ;;  %v262_v47 = vpop.f32.mrf.mxu3 }
  0x95   :  { %308 = vst.msk [vmem:[%s719_s2 + $0x90] sm:$0xff] %vm289_vm1, %v235_v46 }
  0x96   :  { %317 = vst.msk [vmem:[%s719_s2 + $0xd8] sm:$0xff] %vm289_vm1, %v262_v47 }
  0x98   :  { %v184_v48 = vpop.f32.mrf.mxu0  ;;  %v211_v49 = vpop.f32.mrf.mxu1 }
  0x99   :  { %291 = vst.msk [vmem:[%s719_s2 + $0x8] sm:$0xff] %vm289_vm1, %v184_v48 }
  0x9a   :  { %300 = vst.msk [vmem:[%s719_s2 + $0x50] sm:$0xff] %vm289_vm1, %v211_v49 }
  0x9c   :  { %v238_v50 = vpop.f32.mrf.mxu2  ;;  %v265_v51 = vpop.f32.mrf.mxu3 }
  0x9d   :  { %309 = vst.msk [vmem:[%s719_s2 + $0x98] sm:$0xff] %vm289_vm1, %v238_v50 }
  0x9e   :  { %318 = vst.msk [vmem:[%s719_s2 + $0xe0] sm:$0xff] %vm289_vm1, %v265_v51 }
  0xa0   :  { %v187_v52 = vpop.f32.mrf.mxu0  ;;  %v214_v53 = vpop.f32.mrf.mxu1 }
  0xa1   :  { %292 = vst.msk [vmem:[%s719_s2 + $0x10] sm:$0xff] %vm289_vm1, %v187_v52 }
  0xa2   :  { %301 = vst.msk [vmem:[%s719_s2 + $0x58] sm:$0xff] %vm289_vm1, %v214_v53 }
  0xa4   :  { %v241_v54 = vpop.f32.mrf.mxu2  ;;  %v268_v55 = vpop.f32.mrf.mxu3 }
  0xa5   :  { %310 = vst.msk [vmem:[%s719_s2 + $0xa0] sm:$0xff] %vm289_vm1, %v241_v54 }
  0xa6   :  { %319 = vst.msk [vmem:[%s719_s2 + $0xe8] sm:$0xff] %vm289_vm1, %v268_v55 }
  0xa8   :  { %v190_v56 = vpop.f32.mrf.mxu0  ;;  %v217_v57 = vpop.f32.mrf.mxu1 }
  0xa9   :  { %293 = vst.msk [vmem:[%s719_s2 + $0x18] sm:$0xff] %vm289_vm1, %v190_v56 }
  0xaa   :  { %302 = vst.msk [vmem:[%s719_s2 + $0x60] sm:$0xff] %vm289_vm1, %v217_v57 }
  0xac   :  { %v244_v58 = vpop.f32.mrf.mxu2  ;;  %v271_v59 = vpop.f32.mrf.mxu3 }
  0xad   :  { %311 = vst.msk [vmem:[%s719_s2 + $0xa8] sm:$0xff] %vm289_vm1, %v244_v58 }
  0xae   :  { %320 = vst.msk [vmem:[%s719_s2 + $0xf0] sm:$0xff] %vm289_vm1, %v271_v59 }
  0xb0   :  { %v193_v60 = vpop.f32.mrf.mxu0  ;;  %v220_v61 = vpop.f32.mrf.mxu1 }
  0xb1   :  { %294 = vst.msk [vmem:[%s719_s2 + $0x20] sm:$0xff] %vm289_vm1, %v193_v60 }
  0xb2   :  { %303 = vst.msk [vmem:[%s719_s2 + $0x68] sm:$0xff] %vm289_vm1, %v220_v61 }
  0xb4   :  { %v247_v62 = vpop.f32.mrf.mxu2  ;;  %v274_v63 = vpop.f32.mrf.mxu3 }
  0xb5   :  { %312 = vst.msk [vmem:[%s719_s2 + $0xb0] sm:$0xff] %vm289_vm1, %v247_v62 }
  0xb6   :  { %321 = vst.msk [vmem:[%s719_s2 + $0xf8] sm:$0xff] %vm289_vm1, %v274_v63 }
  0xb8   :  { %v196_v0 = vpop.f32.mrf.mxu0  ;;  %v223_v1 = vpop.f32.mrf.mxu1 }
  0xb9   :  { %295 = vst.msk [vmem:[%s719_s2 + $0x28] sm:$0xff] %vm289_vm1, %v196_v0 }
  0xba   :  { %304 = vst.msk [vmem:[%s719_s2 + $0x70] sm:$0xff] %vm289_vm1, %v223_v1 }
  0xbc   :  { %v250_v2 = vpop.f32.mrf.mxu2  ;;  %v277_v3 = vpop.f32.mrf.mxu3 }
  0xbd   :  { %313 = vst.msk [vmem:[%s719_s2 + $0xb8] sm:$0xff] %vm289_vm1, %v250_v2 }
  0xbe   :  { %322 = vst.msk [vmem:[%s719_s2 + $0x100] sm:$0xff] %vm289_vm1, %v277_v3 }
  0xc0   :  { %v199_v4 = vpop.f32.mrf.mxu0  ;;  %v226_v5 = vpop.f32.mrf.mxu1 }
  0xc1   :  { %296 = vst.msk [vmem:[%s719_s2 + $0x30] sm:$0xff] %vm289_vm1, %v199_v4 }
  0xc2   :  { %305 = vst.msk [vmem:[%s719_s2 + $0x78] sm:$0xff] %vm289_vm1, %v226_v5 }
  0xc4   :  { %v253_v6 = vpop.f32.mrf.mxu2  ;;  %v280_v7 = vpop.f32.mrf.mxu3 }
  0xc5   :  { %314 = vst.msk [vmem:[%s719_s2 + $0xc0] sm:$0xff] %vm289_vm1, %v253_v6 }
  0xc6   :  { %323 = vst.msk [vmem:[%s719_s2 + $0x108] sm:$0xff] %vm289_vm1, %v280_v7 }
  0xc8   :  { %v202_v8 = vpop.f32.mrf.mxu0  ;;  %v229_v9 = vpop.f32.mrf.mxu1 }
  0xc9   :  { %297 = vst.msk [vmem:[%s719_s2 + $0x38] sm:$0xff] %vm289_vm1, %v202_v8 }
  0xca   :  { %306 = vst.msk [vmem:[%s719_s2 + $0x80] sm:$0xff] %vm289_vm1, %v229_v9 }
  0xcc   :  { %v256_v10 = vpop.f32.mrf.mxu2  ;;  %v283_v11 = vpop.f32.mrf.mxu3 }
  0xcd   :  { %315 = vst.msk [vmem:[%s719_s2 + $0xc8] sm:$0xff] %vm289_vm1, %v256_v10 }
  0xce   :  { %324 = vst.msk [vmem:[%s719_s2 + $0x110] sm:$0xff] %vm289_vm1, %v283_v11 }
  0xd0   :  { %v205_v12 = vpop.f32.mrf.mxu0  ;;  %v232_v13 = vpop.f32.mrf.mxu1 }
  0xd1   :  { %298 = vst.msk [vmem:[%s719_s2 + $0x40] sm:$0xff] %vm289_vm1, %v205_v12 }
  0xd2   :  { %307 = vst.msk [vmem:[%s719_s2 + $0x88] sm:$0xff] %vm289_vm1, %v232_v13 }
  0xd4   :  { %v259_v14 = vpop.f32.mrf.mxu2  ;;  %v286_v15 = vpop.f32.mrf.mxu3 }
  0xd5   :  { %316 = vst.msk [vmem:[%s719_s2 + $0xd0] sm:$0xff] %vm289_vm1, %v259_v14 }
  0xd6   :  { %325 = vst.msk [vmem:[%s719_s2 + $0x118] sm:$0xff] %vm289_vm1, %v286_v15 }

// kernel: shape_vae_forward.13
= control target key start
LH: loop header
LB: loop body
LE: loop exit
PB: predicated region body
PF: predicated region fallthrough
CT: control target
= control target key end

     0   :  { %v3403_v0 = vmov 0   ;;  %vm3120_vm0 = vcmask 15360   ;;  %vm3123_vm1 = vcmask 8192   ;;  %vm1438_vm2 = vcmask 64512   ;;  %s6595_s5 = inlined_call_operand.vmem [shape: f32[1024,1], index: 5, kind: input, shape index: {}]   ;;  %s6596_s2 = inlined_call_operand.vmem [shape: f32[17,1], index: 2, kind: input, shape index: {}]   ;;  %s6597_s1 = inlined_call_operand.vmem [shape: f32[1024,2], index: 1, kind: input, shape index: {}]   ;;  %s6598_s0 = inlined_call_operand.vmem [shape: f32[17,1024], index: 0, kind: input, shape index: {}]   ;;  %s6599_s7 = inlined_call_operand.vmem [shape: f32[17,2], index: 7, kind: output, shape index: {0}]   ;;  %s6600_s3 = inlined_call_operand.vmem [shape: f32[8,2], index: 3, kind: input, shape index: {}]   ;;  %s6601_s4 = inlined_call_operand.vmem [shape: f32[1024,8], index: 4, kind: input, shape index: {}]   ;;  %s6602_s8 = inlined_call_operand.vmem [shape: f32[8,2], index: 8, kind: output, shape index: {1}]   ;;  %s6603_s6 = inlined_call_operand.vmem [shape: f32[1024,1], index: 6, kind: input, shape index: {}]   ;;  %s6604_s9 = inlined_call_operand.vmem [shape: f32[1024,2], index: 9, kind: output, shape index: {2}]  }
   0x1   :  { %3400 = vset.pattern.permute.xlu2 %v3403_v0  ;;  %3399 = vset.pattern.permute.xlu1 %v3403_v0  ;;  %v542_v1 = vld [vmem:[%s6595_s5 + $0x8] sm:$0xff]  ;;  %v183_v2 = vld [vmem:[%s6596_s2 + $0x10] sm:$0x1]  ;;  %v181_v3 = vld [vmem:[%s6596_s2] sm:$0xff] }
   0x2   :  { %3398 = vset.pattern.permute.xlu0 %v3403_v0  ;;  %676 = vperm.xlu2 %3400, %v542_v1   ;;  %v68_v4 = vld [vmem:[%s6597_s1 + $0x78] sm:$0xff]  ;;  %v67_v6 = vld [vmem:[%s6597_s1 + $0x70] sm:$0xff]  ;;  %v66_v11 = vld [vmem:[%s6597_s1 + $0x68] sm:$0xff] }
   0x3   :  { %v100_v5 = vld [vmem:[%s6597_s1 + $0x178] sm:$0xff]  ;;  %196 = vperm.xlu1 %3399, %v183_v2   ;;  %186 = vperm.xlu0 %3398, %v181_v3   ;;  %v99_v8 = vld [vmem:[%s6597_s1 + $0x170] sm:$0xff]  ;;  %v98_v12 = vld [vmem:[%s6597_s1 + $0x168] sm:$0xff] }
   0x4   :  { %v84_v7 = vld [vmem:[%s6597_s1 + $0xf8] sm:$0xff]  ;;  %199 = vmatpush.msra.mxu0 %v68_v4  ;;  %251 = vmatpush.msra.mxu2 %v100_v5  ;;  %v83_v10 = vld [vmem:[%s6597_s1 + $0xf0] sm:$0xff]  ;;  %v82_v14 = vld [vmem:[%s6597_s1 + $0xe8] sm:$0xff] }
   0x5   :  { %v116_v9 = vld [vmem:[%s6597_s1 + $0x1f8] sm:$0xff]  ;;  %225 = vmatpush.msra.mxu1 %v84_v7  ;;  %v115_v13 = vld [vmem:[%s6597_s1 + $0x1f0] sm:$0xff]  ;;  %v114_v15 = vld [vmem:[%s6597_s1 + $0x1e8] sm:$0xff] }
   0x6   :  { %277 = vmatpush.msra.mxu3 %v116_v9  ;;  %200 = vmatpush.msra.mxu0 %v67_v6  ;;  %v65_v16 = vld [vmem:[%s6597_s1 + $0x60] sm:$0xff]  ;;  %v543_v18 = vld [vmem:[%s6595_s5 + $0x10] sm:$0xff]  ;;  %v182_v20 = vld [vmem:[%s6596_s2 + $0x8] sm:$0xff] }
   0x7   :  { %252 = vmatpush.msra.mxu2 %v99_v8  ;;  %226 = vmatpush.msra.mxu1 %v83_v10  ;;  %v97_v17 = vld [vmem:[%s6597_s1 + $0x160] sm:$0xff]  ;;  %v64_v21 = vld [vmem:[%s6597_s1 + $0x58] sm:$0xff]  ;;  %v63_v25 = vld [vmem:[%s6597_s1 + $0x50] sm:$0xff] }
   0x8   :  { %278 = vmatpush.msra.mxu3 %v115_v13  ;;  %201 = vmatpush.msra.mxu0 %v66_v11  ;;  %v541_v19 = vld [vmem:[%s6595_s5] sm:$0xff]  ;;  %v96_v23 = vld [vmem:[%s6597_s1 + $0x158] sm:$0xff]  ;;  %v95_v27 = vld [vmem:[%s6597_s1 + $0x150] sm:$0xff] }
   0x9   :  { %253 = vmatpush.msra.mxu2 %v98_v12  ;;  %227 = vmatpush.msra.mxu1 %v82_v14  ;;  %v81_v22 = vld [vmem:[%s6597_s1 + $0xe0] sm:$0xff]  ;;  %v80_v26 = vld [vmem:[%s6597_s1 + $0xd8] sm:$0xff]  ;;  %v62_v29 = vld [vmem:[%s6597_s1 + $0x48] sm:$0xff] }
   0xa   :  { %279 = vmatpush.msra.mxu3 %v114_v15  ;;  %202 = vmatpush.msra.mxu0 %v65_v16  ;;  %v113_v24 = vld [vmem:[%s6597_s1 + $0x1e0] sm:$0xff]  ;;  %v112_v28 = vld [vmem:[%s6597_s1 + $0x1d8] sm:$0xff]  ;;  %v79_v30 = vld [vmem:[%s6597_s1 + $0xd0] sm:$0xff] }
   0xb   :  { %254 = vmatpush.msra.mxu2 %v97_v17  ;;  %681 = vperm.xlu2 %3400, %v543_v18   ;;  %v94_v31 = vld [vmem:[%s6597_s1 + $0x148] sm:$0xff]  ;;  %v111_v32 = vld [vmem:[%s6597_s1 + $0x1d0] sm:$0xff]  ;;  %v61_v33 = vld [vmem:[%s6597_s1 + $0x40] sm:$0xff] }
   0xc   :  { %671 = vperm.xlu1 %3399, %v541_v19   ;;  %191 = vperm.xlu0 %3398, %v182_v20   ;;  %v78_v34 = vld [vmem:[%s6597_s1 + $0xc8] sm:$0xff]  ;;  %v93_v35 = vld [vmem:[%s6597_s1 + $0x140] sm:$0xff]  ;;  %v544_v39 = vld [vmem:[%s6595_s5 + $0x18] sm:$0xff] }
   0xd   :  { %203 = vmatpush.msra.mxu0 %v64_v21  ;;  %228 = vmatpush.msra.mxu1 %v81_v22  ;;  %v110_v36 = vld [vmem:[%s6597_s1 + $0x1c8] sm:$0xff]  ;;  %v545_v38 = vld [vmem:[%s6595_s5 + $0x20] sm:$0xff]  ;;  %v60_v40 = vld [vmem:[%s6597_s1 + $0x38] sm:$0xff] }
   0xe   :  { %255 = vmatpush.msra.mxu2 %v96_v23  ;;  %280 = vmatpush.msra.mxu3 %v113_v24  ;;  %v546_v37 = vld [vmem:[%s6595_s5 + $0x28] sm:$0xff]  ;;  %v77_v41 = vld [vmem:[%s6597_s1 + $0xc0] sm:$0xff]  ;;  %v92_v42 = vld [vmem:[%s6597_s1 + $0x138] sm:$0xff] }
   0xf   :  { %204 = vmatpush.msra.mxu0 %v63_v25  ;;  %229 = vmatpush.msra.mxu1 %v80_v26  ;;  %v109_v43 = vld [vmem:[%s6597_s1 + $0x1c0] sm:$0xff]  ;;  %v59_v44 = vld [vmem:[%s6597_s1 + $0x30] sm:$0xff]  ;;  %v76_v45 = vld [vmem:[%s6597_s1 + $0xb8] sm:$0xff] }
  0x10   :  { %256 = vmatpush.msra.mxu2 %v95_v27  ;;  %281 = vmatpush.msra.mxu3 %v112_v28  ;;  %v91_v46 = vld [vmem:[%s6597_s1 + $0x130] sm:$0xff]  ;;  %v108_v47 = vld [vmem:[%s6597_s1 + $0x1b8] sm:$0xff]  ;;  %v58_v48 = vld [vmem:[%s6597_s1 + $0x28] sm:$0xff] }
  0x11   :  { %205 = vmatpush.msra.mxu0 %v62_v29  ;;  %230 = vmatpush.msra.mxu1 %v79_v30  ;;  %v75_v49 = vld [vmem:[%s6597_s1 + $0xb0] sm:$0xff]  ;;  %v90_v50 = vld [vmem:[%s6597_s1 + $0x128] sm:$0xff]  ;;  %v57_v52 = vld [vmem:[%s6597_s1 + $0x20] sm:$0xff] }
  0x12   :  { %257 = vmatpush.msra.mxu2 %v94_v31  ;;  %282 = vmatpush.msra.mxu3 %v111_v32  ;;  %v107_v51 = vld [vmem:[%s6597_s1 + $0x1b0] sm:$0xff]  ;;  %v74_v53 = vld [vmem:[%s6597_s1 + $0xa8] sm:$0xff]  ;;  %v89_v54 = vld [vmem:[%s6597_s1 + $0x120] sm:$0xff] }
  0x13   :  { %206 = vmatpush.msra.mxu0 %v61_v33  ;;  %231 = vmatpush.msra.mxu1 %v78_v34  ;;  %v106_v55 = vld [vmem:[%s6597_s1 + $0x1a8] sm:$0xff]  ;;  %v549_v56 = vld [vmem:[%s6595_s5 + $0x40] sm:$0xff]  ;;  %v548_v57 = vld [vmem:[%s6595_s5 + $0x38] sm:$0xff] }
  0x14   :  { %258 = vmatpush.msra.mxu2 %v93_v35  ;;  %283 = vmatpush.msra.mxu3 %v110_v36  ;;  %v547_v58 = vld [vmem:[%s6595_s5 + $0x30] sm:$0xff]  ;;  %v56_v59 = vld [vmem:[%s6597_s1 + $0x18] sm:$0xff]  ;;  %v73_v60 = vld [vmem:[%s6597_s1 + $0xa0] sm:$0xff] }
  0x15   :  { %696 = vperm.xlu2 %3400, %v546_v37   ;;  %691 = vperm.xlu1 %3399, %v545_v38   ;;  %v88_v61 = vld [vmem:[%s6597_s1 + $0x118] sm:$0xff]  ;;  %v105_v62 = vld [vmem:[%s6597_s1 + $0x1a0] sm:$0xff]  ;;  %v55_v63 = vld [vmem:[%s6597_s1 + $0x10] sm:$0xff] }
  0x16   :  { %686 = vperm.xlu0 %3398, %v544_v39   ;;  %207 = vmatpush.msra.mxu0 %v60_v40  ;;  %v72_v0 = vld [vmem:[%s6597_s1 + $0x98] sm:$0xff]  ;;  %v87_v1 = vld [vmem:[%s6597_s1 + $0x110] sm:$0xff]  ;;  %v54_v3 = vld [vmem:[%s6597_s1 + $0x8] sm:$0xff] }
  0x17   :  { %232 = vmatpush.msra.mxu1 %v77_v41  ;;  %259 = vmatpush.msra.mxu2 %v92_v42  ;;  %v104_v2 = vld [vmem:[%s6597_s1 + $0x198] sm:$0xff]  ;;  %v71_v4 = vld [vmem:[%s6597_s1 + $0x90] sm:$0xff]  ;;  %v86_v5 = vld [vmem:[%s6597_s1 + $0x108] sm:$0xff] }
  0x18   :  { %284 = vmatpush.msra.mxu3 %v109_v43  ;;  %208 = vmatpush.msra.mxu0 %v59_v44  ;;  %v103_v6 = vld [vmem:[%s6597_s1 + $0x190] sm:$0xff]  ;;  %v53_v7 = vld [vmem:[%s6597_s1] sm:$0xff]  ;;  %v70_v8 = vld [vmem:[%s6597_s1 + $0x88] sm:$0xff] }
  0x19   :  { %233 = vmatpush.msra.mxu1 %v76_v45  ;;  %260 = vmatpush.msra.mxu2 %v91_v46  ;;  %v85_v9 = vld [vmem:[%s6597_s1 + $0x100] sm:$0xff]  ;;  %v102_v10 = vld [vmem:[%s6597_s1 + $0x188] sm:$0xff]  ;;  %v31_v12 = vld [vmem:[%s6598_s0 + $0x10] sm:$0xff] }
  0x1a   :  { %285 = vmatpush.msra.mxu3 %v108_v47  ;;  %209 = vmatpush.msra.mxu0 %v58_v48  ;;  %v29_v11 = vld [vmem:[%s6598_s0] sm:$0xff]  ;;  %v132_v13 = vld [vmem:[%s6597_s1 + $0x278] sm:$0xff]  ;;  %v551_v16 = vld [vmem:[%s6595_s5 + $0x50] sm:$0xff] }
  0x1b   :  { %234 = vmatpush.msra.mxu1 %v75_v49  ;;  %261 = vmatpush.msra.mxu2 %v90_v50  ;;  %v164_v14 = vld [vmem:[%s6597_s1 + $0x378] sm:$0xff]  ;;  %v550_v17 = vld [vmem:[%s6595_s5 + $0x48] sm:$0xff]  ;;  %v69_v18 = vld [vmem:[%s6597_s1 + $0x80] sm:$0xff] }
  0x1c   :  { %286 = vmatpush.msra.mxu3 %v107_v51  ;;  %210 = vmatpush.msra.mxu0 %v57_v52  ;;  %v552_v15 = vld [vmem:[%s6595_s5 + $0x58] sm:$0xff]  ;;  %v101_v19 = vld [vmem:[%s6597_s1 + $0x180] sm:$0xff]  ;;  %v30_v20 = vld [vmem:[%s6598_s0 + $0x8] sm:$0xff] }
  0x1d   :  { %235 = vmatpush.msra.mxu1 %v74_v53  ;;  %262 = vmatpush.msra.mxu2 %v89_v54  ;;  %v32_v21 = vld [vmem:[%s6598_s0 + $0x18] sm:$0xff]  ;;  %v131_v22 = vld [vmem:[%s6597_s1 + $0x270] sm:$0xff]  ;;  %v130_v26 = vld [vmem:[%s6597_s1 + $0x268] sm:$0xff] }
  0x1e   :  { %287 = vmatpush.msra.mxu3 %v106_v55  ;;  %711 = vperm.xlu2 %3400, %v549_v56   ;;  %v148_v23 = vld [vmem:[%s6597_s1 + $0x2f8] sm:$0xff]  ;;  %v163_v24 = vld [vmem:[%s6597_s1 + $0x370] sm:$0xff]  ;;  %v162_v28 = vld [vmem:[%s6597_s1 + $0x368] sm:$0xff] }
  0x1f   :  { %706 = vperm.xlu1 %3399, %v548_v57   ;;  %701 = vperm.xlu0 %3398, %v547_v58   ;;  %v180_v25 = vld [vmem:[%s6597_s1 + $0x3f8] sm:$0xff]  ;;  %v147_v27 = vld [vmem:[%s6597_s1 + $0x2f0] sm:$0xff]  ;;  %v129_v30 = vld [vmem:[%s6597_s1 + $0x260] sm:$0xff] }
  0x20   :  { %211 = vmatpush.msra.mxu0 %v56_v59  ;;  %236 = vmatpush.msra.mxu1 %v73_v60  ;;  %v179_v29 = vld [vmem:[%s6597_s1 + $0x3f0] sm:$0xff]  ;;  %v146_v31 = vld [vmem:[%s6597_s1 + $0x2e8] sm:$0xff]  ;;  %v161_v32 = vld [vmem:[%s6597_s1 + $0x360] sm:$0xff] }
  0x21   :  { %263 = vmatpush.msra.mxu2 %v88_v61  ;;  %288 = vmatpush.msra.mxu3 %v105_v62  ;;  %v178_v33 = vld [vmem:[%s6597_s1 + $0x3e8] sm:$0xff]  ;;  %v37_v34 = vld [vmem:[%s6598_s0 + $0x40] sm:$0xff]  ;;  %v39_v35 = vld [vmem:[%s6598_s0 + $0x50] sm:$0xff] }
  0x22   :  { %212 = vmatpush.msra.mxu0 %v55_v63  ;;  %237 = vmatpush.msra.mxu1 %v72_v0  ;;  %v128_v36 = vld [vmem:[%s6597_s1 + $0x258] sm:$0xff]  ;;  %v145_v37 = vld [vmem:[%s6597_s1 + $0x2e0] sm:$0xff]  ;;  %v555_v40 = vld [vmem:[%s6595_s5 + $0x70] sm:$0xff] }
  0x23   :  { %264 = vmatpush.msra.mxu2 %v87_v1  ;;  %289 = vmatpush.msra.mxu3 %v104_v2  ;;  %v160_v38 = vld [vmem:[%s6597_s1 + $0x358] sm:$0xff]  ;;  %v177_v39 = vld [vmem:[%s6597_s1 + $0x3e0] sm:$0xff]  ;;  %v554_v41 = vld [vmem:[%s6595_s5 + $0x68] sm:$0xff] }
  0x24   :  { %213 = vmatpush.msra.mxu0 %v54_v3  ;;  %238 = vmatpush.msra.mxu1 %v71_v4  ;;  %v553_v42 = vld [vmem:[%s6595_s5 + $0x60] sm:$0xff]  ;;  %v38_v43 = vld [vmem:[%s6598_s0 + $0x48] sm:$0xff]  ;;  %v40_v44 = vld [vmem:[%s6598_s0 + $0x58] sm:$0xff] }
  0x25   :  { %265 = vmatpush.msra.mxu2 %v86_v5  ;;  %290 = vmatpush.msra.mxu3 %v103_v6  ;;  %v127_v45 = vld [vmem:[%s6597_s1 + $0x250] sm:$0xff]  ;;  %v144_v46 = vld [vmem:[%s6597_s1 + $0x2d8] sm:$0xff]  ;;  %v126_v49 = vld [vmem:[%s6597_s1 + $0x248] sm:$0xff] }
  0x26   :  { %214 = vmatpush.msra.mxu0 %v53_v7  ;;  %239 = vmatpush.msra.mxu1 %v70_v8  ;;  %v159_v47 = vld [vmem:[%s6597_s1 + $0x350] sm:$0xff]  ;;  %v176_v48 = vld [vmem:[%s6597_s1 + $0x3d8] sm:$0xff]  ;;  %v158_v51 = vld [vmem:[%s6597_s1 + $0x348] sm:$0xff] }
  0x27   :  { %266 = vmatpush.msra.mxu2 %v85_v9  ;;  %291 = vmatpush.msra.mxu3 %v102_v10  ;;  %v143_v50 = vld [vmem:[%s6597_s1 + $0x2d0] sm:$0xff]  ;;  %v125_v53 = vld [vmem:[%s6597_s1 + $0x240] sm:$0xff]  ;;  %v142_v54 = vld [vmem:[%s6597_s1 + $0x2c8] sm:$0xff] }
  0x28   :  { %215 = vmatmul.f32.vlgmr.msra.gmra.mxu0 %v29_v11  ;;  %267 = vmatmul.f32.vlgmr.msra.gmra.mxu2 %v31_v12  ;;  %v175_v52 = vld [vmem:[%s6597_s1 + $0x3d0] sm:$0xff]  ;;  %v157_v55 = vld [vmem:[%s6597_s1 + $0x340] sm:$0xff]  ;;  %v174_v56 = vld [vmem:[%s6597_s1 + $0x3c8] sm:$0xff] }
  0x29   :  { %303 = vmatpush.msrb.mxu0 %v132_v13  ;;  %355 = vmatpush.msrb.mxu2 %v164_v14  ;;  %v45_v57 = vld [vmem:[%s6598_s0 + $0x80] sm:$0x1]  ;;  %v47_v58 = vld [vmem:[%s6598_s0 + $0x90] sm:$0x1]  ;;  %v124_v59 = vld [vmem:[%s6597_s1 + $0x238] sm:$0xff] }
  0x2a   :  { %726 = vperm.xlu2 %3400, %v552_v15   ;;  %721 = vperm.xlu1 %3399, %v551_v16   ;;  %v141_v60 = vld [vmem:[%s6597_s1 + $0x2c0] sm:$0xff]  ;;  %v156_v61 = vld [vmem:[%s6597_s1 + $0x338] sm:$0xff]  ;;  %v558_v63 = vld [vmem:[%s6595_s5 + $0x88] sm:$0xff] }
  0x2b   :  { %716 = vperm.xlu0 %3398, %v550_v17   ;;  %240 = vmatpush.msra.mxu1 %v69_v18  ;;  %v173_v62 = vld [vmem:[%s6597_s1 + $0x3c0] sm:$0xff]  ;;  %v556_v1 = vld [vmem:[%s6595_s5 + $0x78] sm:$0xff]  ;;  %v46_v2 = vld [vmem:[%s6598_s0 + $0x88] sm:$0x1] }
  0x2c   :  { %292 = vmatpush.msra.mxu3 %v101_v19  ;;  %241 = vmatmul.f32.vlgmr.msra.gmra.mxu1 %v30_v20  ;;  %v557_v0 = vld [vmem:[%s6595_s5 + $0x80] sm:$0xff]  ;;  %v48_v3 = vld [vmem:[%s6598_s0 + $0x98] sm:$0x1]  ;;  %v123_v4 = vld [vmem:[%s6597_s1 + $0x230] sm:$0xff] }
  0x2d   :  { %293 = vmatmul.f32.vlgmr.msra.gmra.mxu3 %v32_v21  ;;  %304 = vmatpush.msrb.mxu0 %v131_v22  ;;  %v140_v5 = vld [vmem:[%s6597_s1 + $0x2b8] sm:$0xff]  ;;  %v155_v6 = vld [vmem:[%s6597_s1 + $0x330] sm:$0xff]  ;;  %v122_v8 = vld [vmem:[%s6597_s1 + $0x228] sm:$0xff] }
  0x2e   :  { %329 = vmatpush.msrb.mxu1 %v148_v23  ;;  %356 = vmatpush.msrb.mxu2 %v163_v24  ;;  %v172_v7 = vld [vmem:[%s6597_s1 + $0x3b8] sm:$0xff]  ;;  %v139_v9 = vld [vmem:[%s6597_s1 + $0x2b0] sm:$0xff]  ;;  %v154_v10 = vld [vmem:[%s6597_s1 + $0x328] sm:$0xff] }
  0x2f   :  { %381 = vmatpush.msrb.mxu3 %v180_v25  ;;  %305 = vmatpush.msrb.mxu0 %v130_v26  ;;  %v171_v11 = vld [vmem:[%s6597_s1 + $0x3b0] sm:$0xff]  ;;  %v121_v12 = vld [vmem:[%s6597_s1 + $0x220] sm:$0xff]  ;;  %v138_v13 = vld [vmem:[%s6597_s1 + $0x2a8] sm:$0xff] }
  0x30   :  { %330 = vmatpush.msrb.mxu1 %v147_v27  ;;  %357 = vmatpush.msrb.mxu2 %v162_v28  ;;  %v153_v14 = vld [vmem:[%s6597_s1 + $0x320] sm:$0xff]  ;;  %v170_v15 = vld [vmem:[%s6597_s1 + $0x3a8] sm:$0xff]  ;;  %v120_v16 = vld [vmem:[%s6597_s1 + $0x218] sm:$0xff] }
  0x31   :  { %382 = vmatpush.msrb.mxu3 %v179_v29  ;;  %306 = vmatpush.msrb.mxu0 %v129_v30  ;;  %v137_v17 = vld [vmem:[%s6597_s1 + $0x2a0] sm:$0xff]  ;;  %v152_v18 = vld [vmem:[%s6597_s1 + $0x318] sm:$0xff]  ;;  %v559_v22 = vld [vmem:[%s6595_s5 + $0x90] sm:$0xff] }
  0x32   :  { %331 = vmatpush.msrb.mxu1 %v146_v31  ;;  %358 = vmatpush.msrb.mxu2 %v161_v32  ;;  %v169_v19 = vld [vmem:[%s6597_s1 + $0x3a0] sm:$0xff]  ;;  %v560_v21 = vld [vmem:[%s6595_s5 + $0x98] sm:$0xff]  ;;  %v119_v23 = vld [vmem:[%s6597_s1 + $0x210] sm:$0xff] }
  0x33   :  { %383 = vmatpush.msrb.mxu3 %v178_v33  ;;  %218 = vmatmul.f32.gmra.mxu0 %v37_v34  ;;  %v561_v20 = vld [vmem:[%s6595_s5 + $0xa0] sm:$0xff]  ;;  %v136_v24 = vld [vmem:[%s6597_s1 + $0x298] sm:$0xff]  ;;  %v151_v25 = vld [vmem:[%s6597_s1 + $0x310] sm:$0xff] }
  0x34   :  { %270 = vmatmul.f32.gmra.mxu2 %v39_v35  ;;  %307 = vmatpush.msrb.mxu0 %v128_v36  ;;  %v168_v26 = vld [vmem:[%s6597_s1 + $0x398] sm:$0xff]  ;;  %v118_v27 = vld [vmem:[%s6597_s1 + $0x208] sm:$0xff]  ;;  %v135_v28 = vld [vmem:[%s6597_s1 + $0x290] sm:$0xff] }
  0x35   :  { %332 = vmatpush.msrb.mxu1 %v145_v37  ;;  %359 = vmatpush.msrb.mxu2 %v160_v38  ;;  %v150_v29 = vld [vmem:[%s6597_s1 + $0x308] sm:$0xff]  ;;  %v167_v30 = vld [vmem:[%s6597_s1 + $0x390] sm:$0xff]  ;;  %v117_v31 = vld [vmem:[%s6597_s1 + $0x200] sm:$0xff] }
  0x36   :  { %384 = vmatpush.msrb.mxu3 %v177_v39  ;;  %741 = vperm.xlu2 %3400, %v555_v40   ;;  %v134_v32 = vld [vmem:[%s6597_s1 + $0x288] sm:$0xff]  ;;  %v149_v33 = vld [vmem:[%s6597_s1 + $0x300] sm:$0xff]  ;;  %v35_v36 = vld [vmem:[%s6598_s0 + $0x30] sm:$0xff] }
  0x37   :  { %736 = vperm.xlu1 %3399, %v554_v41   ;;  %731 = vperm.xlu0 %3398, %v553_v42   ;;  %v166_v34 = vld [vmem:[%s6597_s1 + $0x388] sm:$0xff]  ;;  %v33_v35 = vld [vmem:[%s6598_s0 + $0x20] sm:$0xff]  ;;  %v564_v39 = vld [vmem:[%s6595_s5 + $0xb8] sm:$0xff] }
  0x38   :  { %244 = vmatmul.f32.gmra.mxu1 %v38_v43  ;;  %296 = vmatmul.f32.gmra.mxu3 %v40_v44  ;;  %v133_v37 = vld [vmem:[%s6597_s1 + $0x280] sm:$0xff]  ;;  %v563_v40 = vld [vmem:[%s6595_s5 + $0xb0] sm:$0xff]  ;;  %v562_v41 = vld [vmem:[%s6595_s5 + $0xa8] sm:$0xff] }
  0x39   :  { %308 = vmatpush.msrb.mxu0 %v127_v45  ;;  %333 = vmatpush.msrb.mxu1 %v144_v46  ;;  %v165_v38 = vld [vmem:[%s6597_s1 + $0x380] sm:$0xff]  ;;  %v34_v42 = vld [vmem:[%s6598_s0 + $0x28] sm:$0xff]  ;;  %v36_v43 = vld [vmem:[%s6598_s0 + $0x38] sm:$0xff] }
  0x3a   :  { %360 = vmatpush.msrb.mxu2 %v159_v47  ;;  %385 = vmatpush.msrb.mxu3 %v176_v48  ;;  %v41_v44 = vld [vmem:[%s6598_s0 + $0x60] sm:$0xff]  ;;  %v43_v45 = vld [vmem:[%s6598_s0 + $0x70] sm:$0xff]  ;;  %v566_v47 = vld [vmem:[%s6595_s5 + $0xc8] sm:$0xff] }
  0x3b   :  { %309 = vmatpush.msrb.mxu0 %v126_v49  ;;  %334 = vmatpush.msrb.mxu1 %v143_v50  ;;  %v567_v46 = vld [vmem:[%s6595_s5 + $0xd0] sm:$0xff]  ;;  %v565_v48 = vld [vmem:[%s6595_s5 + $0xc0] sm:$0xff]  ;;  %v42_v49 = vld [vmem:[%s6598_s0 + $0x68] sm:$0xff] }
  0x3c   :  { %361 = vmatpush.msrb.mxu2 %v158_v51  ;;  %386 = vmatpush.msrb.mxu3 %v175_v52  ;;  %v44_v50 = vld [vmem:[%s6598_s0 + $0x78] sm:$0xff]  ;;  %v49_v51 = vld [vmem:[%s6598_s0 + $0xa0] sm:$0x1] }
  0x3d   :  { %310 = vmatpush.msrb.mxu0 %v125_v53  ;;  %335 = vmatpush.msrb.mxu1 %v142_v54  ;;  %v51_v53 = vld [vmem:[%s6598_s0 + $0xb0] sm:$0x1]  ;;  %v570_v54 = vld [vmem:[%s6595_s5 + $0xe8] sm:$0xff] }
  0x3e   :  { %362 = vmatpush.msrb.mxu2 %v157_v55  ;;  %387 = vmatpush.msrb.mxu3 %v174_v56  ;;  %v569_v55 = vld [vmem:[%s6595_s5 + $0xe0] sm:$0xff]  ;;  %v568_v56 = vld [vmem:[%s6595_s5 + $0xd8] sm:$0xff] }
  0x3f   :  { %221 = vmatmul.f32.gmra.mxu0 %v45_v57  ;;  %273 = vmatmul.f32.gmra.mxu2 %v47_v58  ;;  %v50_v57 = vld [vmem:[%s6598_s0 + $0xa8] sm:$0x1]  ;;  %v52_v58 = vld [vmem:[%s6598_s0 + $0xb8] sm:$0x1] }
  0x40   :  { %311 = vmatpush.msrb.mxu0 %v124_v59  ;;  %336 = vmatpush.msrb.mxu1 %v141_v60  ;;  %v573_v59 = vld [vmem:[%s6595_s5 + $0x100] sm:$0xff] }
  0x41   :  { %363 = vmatpush.msrb.mxu2 %v156_v61  ;;  %388 = vmatpush.msrb.mxu3 %v173_v62  ;;  %v572_v61 = vld [vmem:[%s6595_s5 + $0xf8] sm:$0xff]  ;;  %v571_v62 = vld [vmem:[%s6595_s5 + $0xf0] sm:$0xff] }
  0x42   :  { %756 = vperm.xlu2 %3400, %v558_v63   ;;  %751 = vperm.xlu1 %3399, %v557_v0   ;;  %v576_v63 = vld [vmem:[%s6595_s5 + $0x118] sm:$0xff]  ;;  %v575_v0 = vld [vmem:[%s6595_s5 + $0x110] sm:$0xff] }
  0x43   :  { %746 = vperm.xlu0 %3398, %v556_v1   ;;  %247 = vmatmul.f32.gmra.mxu1 %v46_v2  ;;  %v574_v1 = vld [vmem:[%s6595_s5 + $0x108] sm:$0xff] }
  0x44   :  { %299 = vmatmul.f32.gmra.mxu3 %v48_v3  ;;  %312 = vmatpush.msrb.mxu0 %v123_v4 }
  0x45   :  { %337 = vmatpush.msrb.mxu1 %v140_v5  ;;  %364 = vmatpush.msrb.mxu2 %v155_v6  ;;  %v579_v5 = vld [vmem:[%s6595_s5 + $0x130] sm:$0xff]  ;;  %v578_v6 = vld [vmem:[%s6595_s5 + $0x128] sm:$0xff] }
  0x46   :  { %389 = vmatpush.msrb.mxu3 %v172_v7  ;;  %313 = vmatpush.msrb.mxu0 %v122_v8  ;;  %v577_v7 = vld [vmem:[%s6595_s5 + $0x120] sm:$0xff] }
  0x47   :  { %338 = vmatpush.msrb.mxu1 %v139_v9  ;;  %365 = vmatpush.msrb.mxu2 %v154_v10  ;;  %v582_v9 = vld [vmem:[%s6595_s5 + $0x148] sm:$0xff] }
  0x48   :  { %390 = vmatpush.msrb.mxu3 %v171_v11  ;;  %314 = vmatpush.msrb.mxu0 %v121_v12  ;;  %v581_v11 = vld [vmem:[%s6595_s5 + $0x140] sm:$0xff]  ;;  %v580_v12 = vld [vmem:[%s6595_s5 + $0x138] sm:$0xff] }
  0x49   :  { %339 = vmatpush.msrb.mxu1 %v138_v13  ;;  %366 = vmatpush.msrb.mxu2 %v153_v14 }
  0x4a   :  { %391 = vmatpush.msrb.mxu3 %v170_v15  ;;  %315 = vmatpush.msrb.mxu0 %v120_v16  ;;  %v585_v15 = vld [vmem:[%s6595_s5 + $0x160] sm:$0xff]  ;;  %v584_v16 = vld [vmem:[%s6595_s5 + $0x158] sm:$0xff] }
  0x4b   :  { %340 = vmatpush.msrb.mxu1 %v137_v17  ;;  %367 = vmatpush.msrb.mxu2 %v152_v18  ;;  %v583_v17 = vld [vmem:[%s6595_s5 + $0x150] sm:$0xff] }
  0x4c   :  { %392 = vmatpush.msrb.mxu3 %v169_v19  ;;  %771 = vperm.xlu2 %3400, %v561_v20   ;;  %v588_v20 = vld [vmem:[%s6595_s5 + $0x178] sm:$0xff] }
  0x4d   :  { %766 = vperm.xlu1 %3399, %v560_v21   ;;  %761 = vperm.xlu0 %3398, %v559_v22   ;;  %v587_v22 = vld [vmem:[%s6595_s5 + $0x170] sm:$0xff] }
  0x4e   :  { %316 = vmatpush.msrb.mxu0 %v119_v23  ;;  %341 = vmatpush.msrb.mxu1 %v136_v24  ;;  %v586_v23 = vld [vmem:[%s6595_s5 + $0x168] sm:$0xff] }
  0x4f   :  { %368 = vmatpush.msrb.mxu2 %v151_v25  ;;  %393 = vmatpush.msrb.mxu3 %v168_v26  ;;  %v591_v26 = vld [vmem:[%s6595_s5 + $0x190] sm:$0xff] }
  0x50   :  { %317 = vmatpush.msrb.mxu0 %v118_v27  ;;  %342 = vmatpush.msrb.mxu1 %v135_v28  ;;  %v590_v27 = vld [vmem:[%s6595_s5 + $0x188] sm:$0xff]  ;;  %v589_v28 = vld [vmem:[%s6595_s5 + $0x180] sm:$0xff] }
  0x51   :  { %369 = vmatpush.msrb.mxu2 %v150_v29  ;;  %394 = vmatpush.msrb.mxu3 %v167_v30 }
  0x52   :  { %318 = vmatpush.msrb.mxu0 %v117_v31  ;;  %343 = vmatpush.msrb.mxu1 %v134_v32  ;;  %v594_v32 = vld [vmem:[%s6595_s5 + $0x1a8] sm:$0xff] }
  0x53   :  { %370 = vmatpush.msrb.mxu2 %v149_v33  ;;  %395 = vmatpush.msrb.mxu3 %v166_v34  ;;  %v593_v33 = vld [vmem:[%s6595_s5 + $0x1a0] sm:$0xff]  ;;  %v592_v34 = vld [vmem:[%s6595_s5 + $0x198] sm:$0xff] }
  0x54   :  { %319 = vmatmul.f32.vlgmr.msrb.gmra.mxu0 %v33_v35  ;;  %371 = vmatmul.f32.vlgmr.msrb.gmra.mxu2 %v35_v36  ;;  %v597_v36 = vld [vmem:[%s6595_s5 + $0x1c0] sm:$0xff] }
  0x55   :  { %344 = vmatpush.msrb.mxu1 %v133_v37  ;;  %396 = vmatpush.msrb.mxu3 %v165_v38  ;;  %v596_v38 = vld [vmem:[%s6595_s5 + $0x1b8] sm:$0xff] }
  0x56   :  { %786 = vperm.xlu2 %3400, %v564_v39   ;;  %781 = vperm.xlu1 %3399, %v563_v40   ;;  %v595_v39 = vld [vmem:[%s6595_s5 + $0x1b0] sm:$0xff] }
  0x57   :  { %776 = vperm.xlu0 %3398, %v562_v41   ;;  %345 = vmatmul.f32.vlgmr.msrb.gmra.mxu1 %v34_v42  ;;  %v600_v42 = vld [vmem:[%s6595_s5 + $0x1d8] sm:$0xff] }
  0x58   :  { %397 = vmatmul.f32.vlgmr.msrb.gmra.mxu3 %v36_v43  ;;  %v599_v43 = vld [vmem:[%s6595_s5 + $0x1d0] sm:$0xff] }
  0x5c   :  { %322 = vmatmul.f32.gmra.mxu0 %v41_v44  ;;  %374 = vmatmul.f32.gmra.mxu2 %v43_v45  ;;  %v3991_v52 = vpop.permute.xlu2 %676  ;;  %v598_v44 = vld [vmem:[%s6595_s5 + $0x1c8] sm:$0xff] }
  0x5e   :  { %801 = vperm.xlu2 %3400, %v567_v46   ;;  %796 = vperm.xlu1 %3399, %v566_v47  }
  0x5f   :  { %791 = vperm.xlu0 %3398, %v565_v48   ;;  %348 = vmatmul.f32.gmra.mxu1 %v42_v49 }
  0x60   :  { %400 = vmatmul.f32.gmra.mxu3 %v44_v50  ;;  %v603_v50 = vld [vmem:[%s6595_s5 + $0x1f0] sm:$0xff] }
  0x64   :  { %325 = vmatmul.f32.gmra.mxu0 %v49_v51  ;;  %377 = vmatmul.f32.gmra.mxu2 %v51_v53  ;;  %v602_v53 = vld [vmem:[%s6595_s5 + $0x1e8] sm:$0xff] }
  0x65   :  { %v4014_v60 = vpop.permute.xlu2 %681 }
  0x66   :  { %816 = vperm.xlu2 %3400, %v570_v54   ;;  %811 = vperm.xlu1 %3399, %v569_v55   ;;  %v601_v54 = vld [vmem:[%s6595_s5 + $0x1e0] sm:$0xff] }
  0x67   :  { %806 = vperm.xlu0 %3398, %v568_v56   ;;  %351 = vmatmul.f32.gmra.mxu1 %v50_v57 }
  0x68   :  { %403 = vmatmul.f32.gmra.mxu3 %v52_v58 }
  0x6e   :  { %831 = vperm.xlu2 %3400, %v573_v59   ;;  %826 = vperm.xlu1 %3399, %v572_v61  }
  0x6f   :  { %821 = vperm.xlu0 %3398, %v571_v62   ;;  %v4031_v2 = vpop.permute.xlu2 %696  ;;  %v606_v62 = vld [vmem:[%s6595_s5 + $0x208] sm:$0xff] }
  0x75   :  { %v4033_v3 = vpop.permute.xlu1 %196  ;;  %v4035_v4 = vpop.permute.xlu0 %186 }
  0x76   :  { %846 = vperm.xlu2 %3400, %v576_v63   ;;  %841 = vperm.xlu1 %3399, %v575_v0   ;;  %v605_v63 = vld [vmem:[%s6595_s5 + $0x200] sm:$0xff]  ;;  %v604_v0 = vld [vmem:[%s6595_s5 + $0x1f8] sm:$0xff] }
  0x77   :  { %836 = vperm.xlu0 %3398, %v574_v1  }
  0x78   :  { %v4046_v8 = vpop.permute.xlu2 %711 }
  0x7e   :  { %861 = vperm.xlu2 %3400, %v579_v5   ;;  %856 = vperm.xlu1 %3399, %v578_v6   ;;  %v4051_v10 = vpop.permute.xlu1 %671  ;;  %v4059_v13 = vpop.permute.xlu0 %191 }
  0x7f   :  { %851 = vperm.xlu0 %3398, %v577_v7  }
  0x84   :  { %v4061_v14 = vpop.permute.xlu2 %726 }
  0x86   :  { %876 = vperm.xlu2 %3400, %v582_v9   ;;  %871 = vperm.xlu1 %3399, %v581_v11  }
  0x87   :  { %866 = vperm.xlu0 %3398, %v580_v12   ;;  %v4072_v18 = vpop.permute.xlu1 %691 }
  0x88   :  { %v4074_v19 = vpop.permute.xlu0 %686 }
  0x8e   :  { %891 = vperm.xlu2 %3400, %v585_v15   ;;  %886 = vperm.xlu1 %3399, %v584_v16   ;;  %v609_v16 = vld [vmem:[%s6595_s5 + $0x220] sm:$0xff] }
  0x8f   :  { %881 = vperm.xlu0 %3398, %v583_v17   ;;  %v608_v17 = vld [vmem:[%s6595_s5 + $0x218] sm:$0xff] }
  0x90   :  { %v4079_v21 = vpop.permute.xlu2 %741 }
  0x91   :  { %v4087_v24 = vpop.permute.xlu1 %706  ;;  %v4089_v25 = vpop.permute.xlu0 %701 }
  0x96   :  { %906 = vperm.xlu2 %3400, %v588_v20   ;;  %901 = vperm.xlu1 %3399, %v587_v22  }
  0x97   :  { %896 = vperm.xlu0 %3398, %v586_v23  }
  0x9c   :  { %v4100_v29 = vpop.permute.xlu2 %756  ;;  %v4102_v30 = vpop.permute.xlu1 %721 }
  0x9d   :  { %v4104_v31 = vpop.permute.xlu0 %716 }
  0x9e   :  { %921 = vperm.xlu2 %3400, %v591_v26   ;;  %916 = vperm.xlu1 %3399, %v590_v27  }
  0x9f   :  { %911 = vperm.xlu0 %3398, %v589_v28  }
  0xa5   :  { %v216_v45 = vpop.f32.mrf.mxu0 }
  0xa6   :  { %936 = vperm.xlu2 %3400, %v594_v32   ;;  %931 = vperm.xlu1 %3399, %v593_v33   ;;  %v4115_v35 = vpop.permute.xlu2 %771  ;;  %v217_v5 = vadd.f32 %v216_v45, %v4035_v4  ;;  %v607_v4 = vld [vmem:[%s6595_s5 + $0x210] sm:$0xff] }
  0xa7   :  { %926 = vperm.xlu0 %3398, %v592_v34  }
  0xa9   :  { %v4120_v37 = vpop.permute.xlu1 %736  ;;  %v4128_v40 = vpop.permute.xlu0 %731 }
  0xaa   :  { %v242_v49 = vpop.f32.mrf.mxu1 }
  0xab   :  { %v268_v51 = vpop.f32.mrf.mxu2  ;;  %v243_v15 = vadd.f32 %v242_v49, %v217_v5 }
  0xad   :  { %v269_v20 = vadd.f32 %v268_v51, %v243_v15 }
  0xae   :  { %951 = vperm.xlu2 %3400, %v597_v36   ;;  %946 = vperm.xlu1 %3399, %v596_v38  }
  0xaf   :  { %941 = vperm.xlu0 %3398, %v595_v39  }
  0xb0   :  { %v4130_v41 = vpop.permute.xlu2 %786  ;;  %v294_v55 = vpop.f32.mrf.mxu3 }
  0xb1   :  { %v219_v56 = vpop.f32.mrf.mxu0  ;;  %v295_v28 = vadd.f32 %v294_v55, %v269_v20 }
  0xb2   :  { %v220_v23 = vadd.f32 %v219_v56, %v4059_v13  ;;  %v611_v13 = vld [vmem:[%s6595_s5 + $0x230] sm:$0xff] }
  0xb4   :  { %v4141_v46 = vpop.permute.xlu1 %751 }
  0xb5   :  { %v4143_v47 = vpop.permute.xlu0 %746  ;;  %v245_v61 = vpop.f32.mrf.mxu1 }
  0xb6   :  { %966 = vperm.xlu2 %3400, %v600_v42   ;;  %961 = vperm.xlu1 %3399, %v599_v43   ;;  %v246_v36 = vadd.f32 %v245_v61, %v220_v23  ;;  %v612_v42 = vld [vmem:[%s6595_s5 + $0x238] sm:$0xff]  ;;  %v610_v43 = vld [vmem:[%s6595_s5 + $0x228] sm:$0xff] }
  0xb7   :  { %956 = vperm.xlu0 %3398, %v598_v44   ;;  %v271_v1 = vpop.f32.mrf.mxu2 }
  0xb8   :  { %v4145_v48 = vpop.permute.xlu2 %801  ;;  %v272_v44 = vadd.f32 %v271_v1, %v246_v36 }
  0xb9   :  { %6605 = vst [vmem:[#allocation2_spill] sm:$0xff] %v4145_v48 }
  0xbb   :  { %v297_v6 = vpop.f32.mrf.mxu3 }
  0xbc   :  { %v222_v12 = vpop.f32.mrf.mxu0 }
  0xbd   :  { %v223_v49 = vadd.f32 %v222_v12, %v4033_v3  ;;  %v615_v3 = vld [vmem:[%s6595_s5 + $0x250] sm:$0xff]  ;;  %v614_v12 = vld [vmem:[%s6595_s5 + $0x248] sm:$0xff] }
  0xbe   :  { %981 = vperm.xlu2 %3400, %v603_v50   ;;  %976 = vperm.xlu1 %3399, %v602_v53  }
  0xbf   :  { %971 = vperm.xlu0 %3398, %v601_v54   ;;  %v4156_v57 = vpop.permute.xlu1 %766  ;;  %v4160_v59 = vpop.permute.xlu0 %761  ;;  %v298_v54 = vadd.f32 %v297_v6, %v272_v44  ;;  %v613_v6 = vld [vmem:[%s6595_s5 + $0x240] sm:$0xff] }
  0xc0   :  { %v4158_v58 = vpop.permute.xlu2 %816  ;;  %v248_v22 = vpop.f32.mrf.mxu1 }
  0xc1   :  { %6606 = vst [vmem:[#allocation3_spill] sm:$0xff] %v4158_v58 }
  0xc2   :  { %v274_v26 = vpop.f32.mrf.mxu2 }
  0xc6   :  { %996 = vperm.xlu2 %3400, %v606_v62   ;;  %991 = vperm.xlu1 %3399, %v605_v63   ;;  %v249_v63 = vadd.f32 %v248_v22, %v223_v49 }
  0xc7   :  { %986 = vperm.xlu0 %3398, %v604_v0   ;;  %v300_v38 = vpop.f32.mrf.mxu3 }
  0xc8   :  { %v4172_v7 = vpop.permute.xlu2 %831  ;;  %v4174_v9 = vpop.permute.xlu1 %781  ;;  %v275_v15 = vadd.f32 %v274_v26, %v249_v63 }
  0xc9   :  { %6607 = vst [vmem:[#allocation4_spill] sm:$0xff] %v4172_v7  ;;  %v4176_v11 = vpop.permute.xlu0 %776  ;;  %v440_v7 = vld [vmem:[%s6601_s4 + $0xd8] sm:$0xff] }
  0xca   :  { %v301_v22 = vadd.f32 %v300_v38, %v275_v15  ;;  %v616_v38 = vld [vmem:[%s6595_s5 + $0x258] sm:$0xff]  ;;  %v407_v15 = vld [vmem:[%s6600_s3] sm:$0xff] }
  0xce   :  { %1011 = vperm.xlu2 %3400, %v609_v16   ;;  %1006 = vperm.xlu1 %3399, %v608_v17  }
  0xcf   :  { %1001 = vperm.xlu0 %3398, %v607_v4  }
  0xd0   :  { %v4188_v27 = vpop.permute.xlu2 %846  ;;  %v4190_v32 = vpop.permute.xlu1 %796 }
  0xd1   :  { %6608 = vst [vmem:[#allocation5_spill] sm:$0xff] %v4188_v27  ;;  %v4192_v33 = vpop.permute.xlu0 %791  ;;  %v320_v34 = vpop.f32.mrf.mxu0 }
  0xd2   :  { %6609 = vst [vmem:[#allocation6_spill] sm:$0xff] %v4190_v32  ;;  %v321_v39 = vadd.f32 %v320_v34, %v295_v28 }
  0xd4   :  { %v346_v45 = vpop.f32.mrf.mxu1 }
  0xd5   :  { %v347_v50 = vadd.f32 %v346_v45, %v321_v39 }
  0xd6   :  { %1026 = vperm.xlu2 %3400, %v612_v42   ;;  %1021 = vperm.xlu1 %3399, %v611_v13   ;;  %v618_v42 = vld [vmem:[%s6595_s5 + $0x268] sm:$0xff] }
  0xd7   :  { %1016 = vperm.xlu0 %3398, %v610_v43   ;;  %v372_v51 = vpop.f32.mrf.mxu2  ;;  %v617_v43 = vld [vmem:[%s6595_s5 + $0x260] sm:$0xff] }
  0xd8   :  { %v4204_v53 = vpop.permute.xlu2 %861  ;;  %v373_v55 = vadd.f32 %v372_v51, %v347_v50  ;;  %v4206_v56 = vpop.permute.xlu1 %811 }
  0xd9   :  { %6610 = vst [vmem:[#allocation7_spill] sm:$0xff] %v4204_v53  ;;  %v4208_v61 = vpop.permute.xlu0 %806  ;;  %v323_v62 = vpop.f32.mrf.mxu0 }
  0xda   :  { %6611 = vst [vmem:[#allocation8_spill] sm:$0xff] %v4206_v56  ;;  %v324_v0 = vadd.f32 %v323_v62, %v298_v54 }
  0xdb   :  { %6612 = vst [vmem:[#allocation9_spill] sm:$0xff] %v4208_v61  ;;  %v398_v1 = vpop.f32.mrf.mxu3 }
  0xdc   :  { %v399_v5 = vadd.f32 %v398_v1, %v373_v55  ;;  %v349_v16 = vpop.f32.mrf.mxu1  ;;  %v621_v1 = vld [vmem:[%s6595_s5 + $0x280] sm:$0xff] }
  0xdd   :  { %v350_v17 = vadd.f32 %v349_v16, %v324_v0 }
  0xde   :  { %3121 = vst.msk [vmem:[%s6599_s7] sm:$0xff] %vm3120_vm0, %v399_v5  ;;  %1041 = vperm.xlu2 %3400, %v615_v3   ;;  %1036 = vperm.xlu1 %3399, %v614_v12   ;;  %v620_v12 = vld [vmem:[%s6595_s5 + $0x278] sm:$0xff] }
  0xdf   :  { %1031 = vperm.xlu0 %3398, %v613_v6   ;;  %v375_v4 = vpop.f32.mrf.mxu2  ;;  %v619_v6 = vld [vmem:[%s6595_s5 + $0x270] sm:$0xff] }
  0xe0   :  { %v4223_v20 = vpop.permute.xlu2 %876  ;;  %v376_v23 = vadd.f32 %v375_v4, %v350_v17  ;;  %v4225_v28 = vpop.permute.xlu1 %826 }
  0xe1   :  { %6613 = vst [vmem:[#allocation10_spill] sm:$0xff] %v4223_v20  ;;  %v4227_v34 = vpop.permute.xlu0 %821  ;;  %v326_v26 = vpop.f32.mrf.mxu0 }
  0xe2   :  { %6614 = vst [vmem:[#allocation11_spill] sm:$0xff] %v4225_v28  ;;  %v327_v36 = vadd.f32 %v326_v26, %v301_v22 }
  0xe3   :  { %6615 = vst [vmem:[#allocation12_spill] sm:$0xff] %v4227_v34  ;;  %v401_v39 = vpop.f32.mrf.mxu3 }
  0xe4   :  { %v402_v13 = vadd.f32 %v401_v39, %v376_v23  ;;  %v352_v44 = vpop.f32.mrf.mxu1  ;;  %v445_v39 = vld [vmem:[%s6601_s4 + $0x100] sm:$0xff] }
  0xe5   :  { %v353_v49 = vadd.f32 %v352_v44, %v327_v36  ;;  %v413_v36 = vld [vmem:[%s6601_s4] sm:$0xff] }
  0xe6   :  { %v408_v45 = vmul.f32 0.5, %v402_v13  ;;  %3122 = vst.msk [vmem:[%s6599_s7 + $0x8] sm:$0xff] %vm3120_vm0, %v402_v13  ;;  %1056 = vperm.xlu2 %3400, %v618_v42   ;;  %1051 = vperm.xlu1 %3399, %v617_v43   ;;  %v509_v42 = vld [vmem:[%s6601_s4 + $0x300] sm:$0xff]  ;;  %v624_v13 = vld [vmem:[%s6595_s5 + $0x298] sm:$0xff]  ;;  %v623_v43 = vld [vmem:[%s6595_s5 + $0x290] sm:$0xff] }
  0xe7   :  { %1046 = vperm.xlu0 %3398, %v616_v38   ;;  %v378_v51 = vpop.f32.mrf.mxu2  ;;  %v622_v38 = vld [vmem:[%s6595_s5 + $0x288] sm:$0xff] }
  0xe8   :  { %v409_v50 = vmul.f32 1.442695, %v408_v45  ;;  %v4242_v54 = vpop.permute.xlu2 %891  ;;  %v379_v55 = vadd.f32 %v378_v51, %v353_v49  ;;  %v4244_v62 = vpop.permute.xlu1 %841  ;;  %v446_v51 = vld [vmem:[%s6601_s4 + $0x108] sm:$0xff] }
  0xe9   :  { %6616 = vst [vmem:[#allocation13_spill] sm:$0xff] %v4242_v54  ;;  %v4246_v63 = vpop.permute.xlu0 %836 }
  0xea   :  { %6617 = vst [vmem:[#allocation14_spill] sm:$0xff] %v4244_v62  ;;  %3401 = vpow2.f32 %v409_v50  ;;  %v414_v50 = vld [vmem:[%s6601_s4 + $0x8] sm:$0xff] }
  0xeb   :  { %v404_v0 = vpop.f32.mrf.mxu3 }
  0xec   :  { %v4251_v3 = vadd.f32 %v404_v0, %v379_v55  ;;  %v478_v55 = vld [vmem:[%s6601_s4 + $0x208] sm:$0xff] }
  0xed   :  { %v510_v0 = vld [vmem:[%s6601_s4 + $0x308] sm:$0xff] }
  0xee   :  { %3124 = vst.msk [vmem:[%s6599_s7 + $0x10] sm:$0x1] %vm3123_vm1, %v4251_v3  ;;  %1071 = vperm.xlu2 %3400, %v621_v1   ;;  %1066 = vperm.xlu1 %3399, %v620_v12   ;;  %v627_v1 = vld [vmem:[%s6595_s5 + $0x2b0] sm:$0xff]  ;;  %v626_v12 = vld [vmem:[%s6595_s5 + $0x2a8] sm:$0xff] }
  0xef   :  { %1061 = vperm.xlu0 %3398, %v619_v6   ;;  %v625_v6 = vld [vmem:[%s6595_s5 + $0x2a0] sm:$0xff] }
  0xf0   :  { %v3402_v16 = vpop.eup %3401  ;;  %v4266_v17 = vpop.permute.xlu2 %906 }
  0xf1   :  { %6618 = vst [vmem:[#allocation15_spill] sm:$0xff] %v4266_v17  ;;  %v411_v4 = vmul.f32 %v3402_v16, %v407_v15  ;;  %v4268_v22 = vpop.permute.xlu1 %856  ;;  %v4270_v23 = vpop.permute.xlu0 %851 }
  0xf2   :  { %6619 = vst [vmem:[#allocation16_spill] sm:$0xff] %v4268_v22 }
  0xf3   :  { %v412_v26 = vadd.f32 %v411_v4, %v399_v5  ;;  %v477_v5 = vld [vmem:[%s6601_s4 + $0x200] sm:$0xff] }
  0xf5   :  { %1838 = vmatpush.msra.mxu0 %v412_v26  ;;  %3125 = vst.msk [vmem:[%s6602_s8] sm:$0xff] %vm3120_vm0, %v412_v26  ;;  %3394 = vmatpush.msra.mxu1 %v412_v26 }
  0xf6   :  { %3395 = vmatpush.msra.mxu2 %v412_v26  ;;  %3396 = vmatpush.msra.mxu3 %v412_v26  ;;  %v415_v26 = vld [vmem:[%s6601_s4 + $0x10] sm:$0xff] }
  0xf7   :  { %3266 = vmatmul.msk.f32.vlgmr.msra.gmra.mxu0 %vm1438_vm2, %v413_v36  ;;  %3298 = vmatmul.msk.f32.vlgmr.msra.gmra.mxu1 %vm1438_vm2, %v445_v39  ;;  %v447_v36 = vld [vmem:[%s6601_s4 + $0x110] sm:$0xff] }
  0xf8   :  { %3330 = vmatmul.msk.f32.vlgmr.msra.gmra.mxu2 %vm1438_vm2, %v477_v5  ;;  %3362 = vmatmul.msk.f32.vlgmr.msra.gmra.mxu3 %vm1438_vm2, %v509_v42  ;;  %v4301_v44 = vpop.permute.xlu2 %921  ;;  %v479_v39 = vld [vmem:[%s6601_s4 + $0x210] sm:$0xff]  ;;  %v630_v42 = vld [vmem:[%s6595_s5 + $0x2c8] sm:$0xff] }
  0xf9   :  { %6620 = vst [vmem:[#allocation17_spill] sm:$0xff] %v4301_v44  ;;  %1086 = vperm.xlu2 %3400, %v624_v13   ;;  %1081 = vperm.xlu1 %3399, %v623_v43   ;;  %v4303_v45 = vpop.permute.xlu1 %871  ;;  %v4305_v49 = vpop.permute.xlu0 %866  ;;  %v511_v5 = vld [vmem:[%s6601_s4 + $0x310] sm:$0xff]  ;;  %v629_v13 = vld [vmem:[%s6595_s5 + $0x2c0] sm:$0xff]  ;;  %v628_v43 = vld [vmem:[%s6595_s5 + $0x2b8] sm:$0xff] }
  0xfa   :  { %6621 = vst [vmem:[#allocation18_spill] sm:$0xff] %v4303_v45  ;;  %1076 = vperm.xlu0 %3398, %v622_v38  }
  0xff   :  { %3267 = vmatmul.msk.f32.gmra.mxu0 %vm1438_vm2, %v414_v50  ;;  %3299 = vmatmul.msk.f32.gmra.mxu1 %vm1438_vm2, %v446_v51 }
 0x100   :  { %3331 = vmatmul.msk.f32.gmra.mxu2 %vm1438_vm2, %v478_v55  ;;  %3363 = vmatmul.msk.f32.gmra.mxu3 %vm1438_vm2, %v510_v0  ;;  %v4332_v15 = vpop.permute.xlu2 %936  ;;  %v416_v55 = vld [vmem:[%s6601_s4 + $0x18] sm:$0xff] }
 0x101   :  { %6622 = vst [vmem:[#allocation19_spill] sm:$0xff] %v4332_v15  ;;  %1101 = vperm.xlu2 %3400, %v627_v1   ;;  %1096 = vperm.xlu1 %3399, %v626_v12   ;;  %v4334_v16 = vpop.permute.xlu1 %886  ;;  %v4336_v4 = vpop.permute.xlu0 %881  ;;  %v448_v0 = vld [vmem:[%s6601_s4 + $0x118] sm:$0xff] }
 0x102   :  { %6623 = vst [vmem:[#allocation20_spill] sm:$0xff] %v4334_v16  ;;  %1091 = vperm.xlu0 %3398, %v625_v6   ;;  %v480_v1 = vld [vmem:[%s6601_s4 + $0x218] sm:$0xff]  ;;  %v633_v6 = vld [vmem:[%s6595_s5 + $0x2e0] sm:$0xff] }
 0x103   :  { %v512_v12 = vld [vmem:[%s6601_s4 + $0x318] sm:$0xff] }
 0x107   :  { %3268 = vmatmul.msk.f32.gmra.mxu0 %vm1438_vm2, %v415_v26  ;;  %3300 = vmatmul.msk.f32.gmra.mxu1 %vm1438_vm2, %v447_v36  ;;  %v632_v26 = vld [vmem:[%s6595_s5 + $0x2d8] sm:$0xff]  ;;  %v631_v36 = vld [vmem:[%s6595_s5 + $0x2d0] sm:$0xff] }
 0x108   :  { %3332 = vmatmul.msk.f32.gmra.mxu2 %vm1438_vm2, %v479_v39  ;;  %3364 = vmatmul.msk.f32.gmra.mxu3 %vm1438_vm2, %v511_v5  ;;  %v4363_v38 = vpop.permute.xlu2 %951 }
 0x109   :  { %6624 = vst [vmem:[#allocation21_spill] sm:$0xff] %v4363_v38  ;;  %1116 = vperm.xlu2 %3400, %v630_v42   ;;  %1111 = vperm.xlu1 %3399, %v629_v13   ;;  %v4365_v50 = vpop.permute.xlu1 %901  ;;  %v4367_v51 = vpop.permute.xlu0 %896  ;;  %v417_v13 = vld [vmem:[%s6601_s4 + $0x20] sm:$0xff] }
 0x10a   :  { %6625 = vst [vmem:[#allocation22_spill] sm:$0xff] %v4365_v50  ;;  %1106 = vperm.xlu0 %3398, %v628_v43   ;;  %v449_v43 = vld [vmem:[%s6601_s4 + $0x120] sm:$0xff] }
 0x10b   :  { %6626 = vst [vmem:[#allocation23_spill] sm:$0xff] %v4367_v51  ;;  %v2255_v51 = vld [vmem:[%s6603_s6 + $0xf8] sm:$0xff] }
 0x10f   :  { %3269 = vmatmul.msk.f32.gmra.mxu0 %vm1438_vm2, %v416_v55  ;;  %3301 = vmatmul.msk.f32.gmra.mxu1 %vm1438_vm2, %v448_v0  ;;  %v481_v55 = vld [vmem:[%s6601_s4 + $0x220] sm:$0xff] }
 0x110   :  { %3333 = vmatmul.msk.f32.gmra.mxu2 %vm1438_vm2, %v480_v1  ;;  %3365 = vmatmul.msk.f32.gmra.mxu3 %vm1438_vm2, %v512_v12  ;;  %v4394_v39 = vpop.permute.xlu2 %966  ;;  %v513_v0 = vld [vmem:[%s6601_s4 + $0x320] sm:$0xff]  ;;  %v636_v1 = vld [vmem:[%s6595_s5 + $0x2f8] sm:$0xff]  ;;  %v635_v12 = vld [vmem:[%s6595_s5 + $0x2f0] sm:$0xff] }
 0x111   :  { %6627 = vst [vmem:[#allocation24_spill] sm:$0xff] %v4394_v39  ;;  %1131 = vperm.xlu2 %3400, %v633_v6   ;;  %1126 = vperm.xlu1 %3399, %v632_v26   ;;  %v4396_v5 = vpop.permute.xlu1 %916  ;;  %v4398_v42 = vpop.permute.xlu0 %911  ;;  %v634_v6 = vld [vmem:[%s6595_s5 + $0x2e8] sm:$0xff] }
 0x112   :  { %6628 = vst [vmem:[#allocation25_spill] sm:$0xff] %v4396_v5  ;;  %1121 = vperm.xlu0 %3398, %v631_v36  }
 0x113   :  { %6629 = vst [vmem:[#allocation26_spill] sm:$0xff] %v4398_v42  ;;  %v2249_v42 = vld [vmem:[%s6603_s6 + $0xc8] sm:$0xff] }
 0x117   :  { %3270 = vmatmul.msk.f32.gmra.mxu0 %vm1438_vm2, %v417_v13  ;;  %3302 = vmatmul.msk.f32.gmra.mxu1 %vm1438_vm2, %v449_v43  ;;  %v418_v13 = vld [vmem:[%s6601_s4 + $0x28] sm:$0xff] }
 0x118   :  { %3334 = vmatmul.msk.f32.gmra.mxu2 %vm1438_vm2, %v481_v55  ;;  %3366 = vmatmul.msk.f32.gmra.mxu3 %vm1438_vm2, %v513_v0  ;;  %v4425_v26 = vpop.permute.xlu2 %981  ;;  %v450_v43 = vld [vmem:[%s6601_s4 + $0x128] sm:$0xff] }
 0x119   :  { %6630 = vst [vmem:[#allocation27_spill] sm:$0xff] %v4425_v26  ;;  %1146 = vperm.xlu2 %3400, %v636_v1   ;;  %1141 = vperm.xlu1 %3399, %v635_v12   ;;  %v4427_v36 = vpop.permute.xlu1 %931  ;;  %v4429_v39 = vpop.permute.xlu0 %926  ;;  %v482_v55 = vld [vmem:[%s6601_s4 + $0x228] sm:$0xff]  ;;  %v639_v1 = vld [vmem:[%s6595_s5 + $0x310] sm:$0xff] }
 0x11a   :  { %6631 = vst [vmem:[#allocation28_spill] sm:$0xff] %v4427_v36  ;;  %1136 = vperm.xlu0 %3398, %v634_v6   ;;  %v514_v0 = vld [vmem:[%s6601_s4 + $0x328] sm:$0xff]  ;;  %v637_v6 = vld [vmem:[%s6595_s5 + $0x300] sm:$0xff] }
 0x11b   :  { %6632 = vst [vmem:[#allocation29_spill] sm:$0xff] %v4429_v39  ;;  %v638_v12 = vld [vmem:[%s6595_s5 + $0x308] sm:$0xff] }
 0x11f   :  { %3271 = vmatmul.msk.f32.gmra.mxu0 %vm1438_vm2, %v418_v13  ;;  %3303 = vmatmul.msk.f32.gmra.mxu1 %vm1438_vm2, %v450_v43  ;;  %v419_v13 = vld [vmem:[%s6601_s4 + $0x30] sm:$0xff] }
 0x120   :  { %3335 = vmatmul.msk.f32.gmra.mxu2 %vm1438_vm2, %v482_v55  ;;  %3367 = vmatmul.msk.f32.gmra.mxu3 %vm1438_vm2, %v514_v0  ;;  %v4456_v26 = vpop.permute.xlu2 %996  ;;  %v451_v43 = vld [vmem:[%s6601_s4 + $0x130] sm:$0xff] }
 0x121   :  { %6633 = vst [vmem:[#allocation30_spill] sm:$0xff] %v4456_v26  ;;  %1161 = vperm.xlu2 %3400, %v639_v1   ;;  %1156 = vperm.xlu1 %3399, %v638_v12   ;;  %v4458_v38 = vpop.permute.xlu1 %946  ;;  %v4460_v36 = vpop.permute.xlu0 %941  ;;  %v483_v55 = vld [vmem:[%s6601_s4 + $0x230] sm:$0xff]  ;;  %v642_v1 = vld [vmem:[%s6595_s5 + $0x328] sm:$0xff]  ;;  %v641_v12 = vld [vmem:[%s6595_s5 + $0x320] sm:$0xff] }
 0x122   :  { %6634 = vst [vmem:[#allocation31_spill] sm:$0xff] %v4458_v38  ;;  %1151 = vperm.xlu0 %3398, %v637_v6   ;;  %v515_v0 = vld [vmem:[%s6601_s4 + $0x330] sm:$0xff]  ;;  %v640_v6 = vld [vmem:[%s6595_s5 + $0x318] sm:$0xff] }
 0x123   :  { %6635 = vst [vmem:[#allocation32_spill] sm:$0xff] %v4460_v36 }
 0x127   :  { %3272 = vmatmul.msk.f32.gmra.mxu0 %vm1438_vm2, %v419_v13  ;;  %3304 = vmatmul.msk.f32.gmra.mxu1 %vm1438_vm2, %v451_v43  ;;  %v420_v13 = vld [vmem:[%s6601_s4 + $0x38] sm:$0xff] }
 0x128   :  { %3336 = vmatmul.msk.f32.gmra.mxu2 %vm1438_vm2, %v483_v55  ;;  %3368 = vmatmul.msk.f32.gmra.mxu3 %vm1438_vm2, %v515_v0  ;;  %v4487_v26 = vpop.permute.xlu2 %1011  ;;  %v452_v43 = vld [vmem:[%s6601_s4 + $0x138] sm:$0xff] }
 0x129   :  { %6636 = vst [vmem:[#allocation33_spill] sm:$0xff] %v4487_v26  ;;  %1176 = vperm.xlu2 %3400, %v642_v1   ;;  %1171 = vperm.xlu1 %3399, %v641_v12   ;;  %v4489_v38 = vpop.permute.xlu1 %961  ;;  %v4491_v15 = vpop.permute.xlu0 %956  ;;  %v484_v55 = vld [vmem:[%s6601_s4 + $0x238] sm:$0xff]  ;;  %v645_v1 = vld [vmem:[%s6595_s5 + $0x340] sm:$0xff] }
 0x12a   :  { %6637 = vst [vmem:[#allocation34_spill] sm:$0xff] %v4489_v38  ;;  %1166 = vperm.xlu0 %3398, %v640_v6   ;;  %v516_v0 = vld [vmem:[%s6601_s4 + $0x338] sm:$0xff]  ;;  %v643_v6 = vld [vmem:[%s6595_s5 + $0x330] sm:$0xff] }
 0x12b   :  { %6638 = vst [vmem:[#allocation35_spill] sm:$0xff] %v4491_v15  ;;  %v644_v12 = vld [vmem:[%s6595_s5 + $0x338] sm:$0xff] }
 0x12f   :  { %3273 = vmatmul.msk.f32.gmra.mxu0 %vm1438_vm2, %v420_v13  ;;  %3305 = vmatmul.msk.f32.gmra.mxu1 %vm1438_vm2, %v452_v43  ;;  %v421_v13 = vld [vmem:[%s6601_s4 + $0x40] sm:$0xff] }
 0x130   :  { %3337 = vmatmul.msk.f32.gmra.mxu2 %vm1438_vm2, %v484_v55  ;;  %3369 = vmatmul.msk.f32.gmra.mxu3 %vm1438_vm2, %v516_v0  ;;  %v4518_v26 = vpop.permute.xlu2 %1026  ;;  %v453_v43 = vld [vmem:[%s6601_s4 + $0x140] sm:$0xff] }
 0x131   :  { %6639 = vst [vmem:[#allocation36_spill] sm:$0xff] %v4518_v26  ;;  %1191 = vperm.xlu2 %3400, %v645_v1   ;;  %1186 = vperm.xlu1 %3399, %v644_v12   ;;  %v4520_v38 = vpop.permute.xlu1 %976  ;;  %v4522_v28 = vpop.permute.xlu0 %971  ;;  %v485_v55 = vld [vmem:[%s6601_s4 + $0x240] sm:$0xff]  ;;  %v648_v1 = vld [vmem:[%s6595_s5 + $0x358] sm:$0xff]  ;;  %v647_v12 = vld [vmem:[%s6595_s5 + $0x350] sm:$0xff] }
 0x132   :  { %6640 = vst [vmem:[#allocation37_spill] sm:$0xff] %v4520_v38  ;;  %1181 = vperm.xlu0 %3398, %v643_v6   ;;  %v517_v0 = vld [vmem:[%s6601_s4 + $0x340] sm:$0xff]  ;;  %v646_v6 = vld [vmem:[%s6595_s5 + $0x348] sm:$0xff] }
 0x133   :  { %6641 = vst [vmem:[#allocation38_spill] sm:$0xff] %v4522_v28 }
 0x137   :  { %3274 = vmatmul.msk.f32.gmra.mxu0 %vm1438_vm2, %v421_v13  ;;  %3306 = vmatmul.msk.f32.gmra.mxu1 %vm1438_vm2, %v453_v43  ;;  %v422_v13 = vld [vmem:[%s6601_s4 + $0x48] sm:$0xff] }
 0x138   :  { %3338 = vmatmul.msk.f32.gmra.mxu2 %vm1438_vm2, %v485_v55  ;;  %3370 = vmatmul.msk.f32.gmra.mxu3 %vm1438_vm2, %v517_v0  ;;  %v4549_v26 = vpop.permute.xlu2 %1041  ;;  %v454_v43 = vld [vmem:[%s6601_s4 + $0x148] sm:$0xff] }
 0x139   :  { %6642 = vst [vmem:[#allocation39_spill] sm:$0xff] %v4549_v26  ;;  %1206 = vperm.xlu2 %3400, %v648_v1   ;;  %1201 = vperm.xlu1 %3399, %v647_v12   ;;  %v4551_v38 = vpop.permute.xlu1 %991  ;;  %v4553_v5 = vpop.permute.xlu0 %986  ;;  %v486_v55 = vld [vmem:[%s6601_s4 + $0x248] sm:$0xff]  ;;  %v651_v1 = vld [vmem:[%s6595_s5 + $0x370] sm:$0xff] }
 0x13a   :  { %6643 = vst [vmem:[#allocation40_spill] sm:$0xff] %v4551_v38  ;;  %1196 = vperm.xlu0 %3398, %v646_v6   ;;  %v518_v0 = vld [vmem:[%s6601_s4 + $0x348] sm:$0xff]  ;;  %v649_v6 = vld [vmem:[%s6595_s5 + $0x360] sm:$0xff] }
 0x13b   :  { %6644 = vst [vmem:[#allocation41_spill] sm:$0xff] %v4553_v5  ;;  %v650_v12 = vld [vmem:[%s6595_s5 + $0x368] sm:$0xff] }
 0x13f   :  { %3275 = vmatmul.msk.f32.gmra.mxu0 %vm1438_vm2, %v422_v13  ;;  %3307 = vmatmul.msk.f32.gmra.mxu1 %vm1438_vm2, %v454_v43  ;;  %v423_v13 = vld [vmem:[%s6601_s4 + $0x50] sm:$0xff] }
 0x140   :  { %3339 = vmatmul.msk.f32.gmra.mxu2 %vm1438_vm2, %v486_v55  ;;  %3371 = vmatmul.msk.f32.gmra.mxu3 %vm1438_vm2, %v518_v0  ;;  %v4580_v26 = vpop.permute.xlu2 %1056  ;;  %v455_v43 = vld [vmem:[%s6601_s4 + $0x150] sm:$0xff] }
 0x141   :  { %6645 = vst [vmem:[#allocation42_spill] sm:$0xff] %v4580_v26  ;;  %1221 = vperm.xlu2 %3400, %v651_v1   ;;  %1216 = vperm.xlu1 %3399, %v650_v12   ;;  %v4582_v38 = vpop.permute.xlu1 %1006  ;;  %v4584_v5 = vpop.permute.xlu0 %1001  ;;  %v487_v55 = vld [vmem:[%s6601_s4 + $0x250] sm:$0xff]  ;;  %v654_v1 = vld [vmem:[%s6595_s5 + $0x388] sm:$0xff]  ;;  %v653_v12 = vld [vmem:[%s6595_s5 + $0x380] sm:$0xff] }
 0x142   :  { %6646 = vst [vmem:[#allocation43_spill] sm:$0xff] %v4582_v38  ;;  %1211 = vperm.xlu0 %3398, %v649_v6   ;;  %v519_v0 = vld [vmem:[%s6601_s4 + $0x350] sm:$0xff]  ;;  %v652_v6 = vld [vmem:[%s6595_s5 + $0x378] sm:$0xff] }
 0x143   :  { %6647 = vst [vmem:[#allocation44_spill] sm:$0xff] %v4584_v5 }
 0x147   :  { %3276 = vmatmul.msk.f32.gmra.mxu0 %vm1438_vm2, %v423_v13  ;;  %3308 = vmatmul.msk.f32.gmra.mxu1 %vm1438_vm2, %v455_v43  ;;  %v424_v13 = vld [vmem:[%s6601_s4 + $0x58] sm:$0xff] }
 0x148   :  { %3340 = vmatmul.msk.f32.gmra.mxu2 %vm1438_vm2, %v487_v55  ;;  %3372 = vmatmul.msk.f32.gmra.mxu3 %vm1438_vm2, %v519_v0  ;;  %v4611_v26 = vpop.permute.xlu2 %1071  ;;  %v456_v43 = vld [vmem:[%s6601_s4 + $0x158] sm:$0xff] }
 0x149   :  { %6648 = vst [vmem:[#allocation45_spill] sm:$0xff] %v4611_v26  ;;  %1236 = vperm.xlu2 %3400, %v654_v1   ;;  %1231 = vperm.xlu1 %3399, %v653_v12   ;;  %v4613_v38 = vpop.permute.xlu1 %1021  ;;  %v4615_v5 = vpop.permute.xlu0 %1016  ;;  %v488_v55 = vld [vmem:[%s6601_s4 + $0x258] sm:$0xff]  ;;  %v657_v1 = vld [vmem:[%s6595_s5 + $0x3a0] sm:$0xff] }
 0x14a   :  { %6649 = vst [vmem:[#allocation46_spill] sm:$0xff] %v4613_v38  ;;  %1226 = vperm.xlu0 %3398, %v652_v6   ;;  %v520_v0 = vld [vmem:[%s6601_s4 + $0x358] sm:$0xff]  ;;  %v655_v6 = vld [vmem:[%s6595_s5 + $0x390] sm:$0xff] }
 0x14b   :  { %6650 = vst [vmem:[#allocation47_spill] sm:$0xff] %v4615_v5  ;;  %v656_v12 = vld [vmem:[%s6595_s5 + $0x398] sm:$0xff] }
 0x14f   :  { %3277 = vmatmul.msk.f32.gmra.mxu0 %vm1438_vm2, %v424_v13  ;;  %3309 = vmatmul.msk.f32.gmra.mxu1 %vm1438_vm2, %v456_v43  ;;  %v425_v13 = vld [vmem:[%s6601_s4 + $0x60] sm:$0xff] }
 0x150   :  { %3341 = vmatmul.msk.f32.gmra.mxu2 %vm1438_vm2, %v488_v55  ;;  %3373 = vmatmul.msk.f32.gmra.mxu3 %vm1438_vm2, %v520_v0  ;;  %v457_v43 = vld [vmem:[%s6601_s4 + $0x160] sm:$0xff] }
 0x151   :  { %1251 = vperm.xlu2 %3400, %v657_v1   ;;  %1246 = vperm.xlu1 %3399, %v656_v12   ;;  %v4642_v26 = vpop.permute.xlu1 %1036  ;;  %v4644_v38 = vpop.permute.xlu0 %1031  ;;  %v489_v55 = vld [vmem:[%s6601_s4 + $0x260] sm:$0xff]  ;;  %v660_v1 = vld [vmem:[%s6595_s5 + $0x3b8] sm:$0xff]  ;;  %v659_v12 = vld [vmem:[%s6595_s5 + $0x3b0] sm:$0xff] }
 0x152   :  { %6651 = vst [vmem:[#allocation48_spill] sm:$0xff] %v4642_v26  ;;  %1241 = vperm.xlu0 %3398, %v655_v6   ;;  %v521_v0 = vld [vmem:[%s6601_s4 + $0x360] sm:$0xff]  ;;  %v658_v6 = vld [vmem:[%s6595_s5 + $0x3a8] sm:$0xff] }
 0x153   :  { %6652 = vst [vmem:[#allocation49_spill] sm:$0xff] %v4644_v38  ;;  %v4646_v5 = vpop.permute.xlu2 %1086 }
 0x154   :  { %6653 = vst [vmem:[#allocation50_spill] sm:$0xff] %v4646_v5 }
 0x157   :  { %3278 = vmatmul.msk.f32.gmra.mxu0 %vm1438_vm2, %v425_v13  ;;  %3310 = vmatmul.msk.f32.gmra.mxu1 %vm1438_vm2, %v457_v43  ;;  %v426_v13 = vld [vmem:[%s6601_s4 + $0x68] sm:$0xff] }
 0x158   :  { %3342 = vmatmul.msk.f32.gmra.mxu2 %vm1438_vm2, %v489_v55  ;;  %3374 = vmatmul.msk.f32.gmra.mxu3 %vm1438_vm2, %v521_v0  ;;  %v458_v43 = vld [vmem:[%s6601_s4 + $0x168] sm:$0xff] }
 0x159   :  { %1266 = vperm.xlu2 %3400, %v660_v1   ;;  %1261 = vperm.xlu1 %3399, %v659_v12   ;;  %v4673_v5 = vpop.permute.xlu1 %1051  ;;  %v4675_v26 = vpop.permute.xlu0 %1046  ;;  %v490_v55 = vld [vmem:[%s6601_s4 + $0x268] sm:$0xff]  ;;  %v663_v1 = vld [vmem:[%s6595_s5 + $0x3d0] sm:$0xff] }
 0x15a   :  { %6654 = vst [vmem:[#allocation51_spill] sm:$0xff] %v4673_v5  ;;  %1256 = vperm.xlu0 %3398, %v658_v6   ;;  %v522_v0 = vld [vmem:[%s6601_s4 + $0x368] sm:$0xff]  ;;  %v661_v6 = vld [vmem:[%s6595_s5 + $0x3c0] sm:$0xff] }
 0x15b   :  { %6655 = vst [vmem:[#allocation52_spill] sm:$0xff] %v4675_v26  ;;  %v4677_v38 = vpop.permute.xlu2 %1101  ;;  %v662_v12 = vld [vmem:[%s6595_s5 + $0x3c8] sm:$0xff] }
 0x15c   :  { %6656 = vst [vmem:[#allocation53_spill] sm:$0xff] %v4677_v38 }
 0x15f   :  { %3279 = vmatmul.msk.f32.gmra.mxu0 %vm1438_vm2, %v426_v13  ;;  %3311 = vmatmul.msk.f32.gmra.mxu1 %vm1438_vm2, %v458_v43  ;;  %v427_v13 = vld [vmem:[%s6601_s4 + $0x70] sm:$0xff] }
 0x160   :  { %3343 = vmatmul.msk.f32.gmra.mxu2 %vm1438_vm2, %v490_v55  ;;  %3375 = vmatmul.msk.f32.gmra.mxu3 %vm1438_vm2, %v522_v0  ;;  %v459_v43 = vld [vmem:[%s6601_s4 + $0x170] sm:$0xff] }
 0x161   :  { %1281 = vperm.xlu2 %3400, %v663_v1   ;;  %1276 = vperm.xlu1 %3399, %v662_v12   ;;  %v4704_v38 = vpop.permute.xlu1 %1066  ;;  %v4706_v5 = vpop.permute.xlu0 %1061  ;;  %v491_v55 = vld [vmem:[%s6601_s4 + $0x270] sm:$0xff]  ;;  %v666_v1 = vld [vmem:[%s6595_s5 + $0x3e8] sm:$0xff]  ;;  %v665_v12 = vld [vmem:[%s6595_s5 + $0x3e0] sm:$0xff] }
 0x162   :  { %6657 = vst [vmem:[#allocation54_spill] sm:$0xff] %v4704_v38  ;;  %1271 = vperm.xlu0 %3398, %v661_v6   ;;  %v523_v0 = vld [vmem:[%s6601_s4 + $0x370] sm:$0xff]  ;;  %v664_v6 = vld [vmem:[%s6595_s5 + $0x3d8] sm:$0xff] }
 0x163   :  { %6658 = vst [vmem:[#allocation55_spill] sm:$0xff] %v4706_v5  ;;  %v4708_v26 = vpop.permute.xlu2 %1116 }
 0x164   :  { %6659 = vst [vmem:[#allocation56_spill] sm:$0xff] %v4708_v26 }
 0x167   :  { %3280 = vmatmul.msk.f32.gmra.mxu0 %vm1438_vm2, %v427_v13  ;;  %3312 = vmatmul.msk.f32.gmra.mxu1 %vm1438_vm2, %v459_v43  ;;  %v428_v13 = vld [vmem:[%s6601_s4 + $0x78] sm:$0xff] }
 0x168   :  { %3344 = vmatmul.msk.f32.gmra.mxu2 %vm1438_vm2, %v491_v55  ;;  %3376 = vmatmul.msk.f32.gmra.mxu3 %vm1438_vm2, %v523_v0  ;;  %v460_v43 = vld [vmem:[%s6601_s4 + $0x178] sm:$0xff] }
 0x169   :  { %1296 = vperm.xlu2 %3400, %v666_v1   ;;  %1291 = vperm.xlu1 %3399, %v665_v12   ;;  %v492_v55 = vld [vmem:[%s6601_s4 + $0x278] sm:$0xff]  ;;  %v2224_v1 = vld [vmem:[%s6603_s6] sm:$0xff] }
 0x16a   :  { %1286 = vperm.xlu0 %3398, %v664_v6   ;;  %v524_v0 = vld [vmem:[%s6601_s4 + $0x378] sm:$0xff]  ;;  %v667_v6 = vld [vmem:[%s6595_s5 + $0x3f0] sm:$0xff] }
 0x16b   :  { %v4735_v26 = vpop.permute.xlu2 %1131  ;;  %v4737_v38 = vpop.permute.xlu1 %1081  ;;  %v668_v12 = vld [vmem:[%s6595_s5 + $0x3f8] sm:$0xff] }
 0x16c   :  { %6660 = vst [vmem:[#allocation57_spill] sm:$0xff] %v4735_v26  ;;  %v4739_v5 = vpop.permute.xlu0 %1076 }
 0x16d   :  { %6661 = vst [vmem:[#allocation58_spill] sm:$0xff] %v4737_v38 }
 0x16e   :  { %6662 = vst [vmem:[#allocation59_spill] sm:$0xff] %v4739_v5 }
 0x16f   :  { %3281 = vmatmul.msk.f32.gmra.mxu0 %vm1438_vm2, %v428_v13  ;;  %3313 = vmatmul.msk.f32.gmra.mxu1 %vm1438_vm2, %v460_v43  ;;  %v429_v43 = vld [vmem:[%s6601_s4 + $0x80] sm:$0xff] }
 0x170   :  { %3345 = vmatmul.msk.f32.gmra.mxu2 %vm1438_vm2, %v492_v55  ;;  %3377 = vmatmul.msk.f32.gmra.mxu3 %vm1438_vm2, %v524_v0  ;;  %v461_v55 = vld [vmem:[%s6601_s4 + $0x180] sm:$0xff] }
 0x171   :  { %2354 = vperm.xlu2 %3400, %v2224_v1   ;;  %1306 = vperm.xlu1 %3399, %v668_v12   ;;  %v493_v1 = vld [vmem:[%s6601_s4 + $0x280] sm:$0xff] }
 0x172   :  { %1301 = vperm.xlu0 %3398, %v667_v6   ;;  %v525_v12 = vld [vmem:[%s6601_s4 + $0x380] sm:$0xff]  ;;  %v2227_v6 = vld [vmem:[%s6603_s6 + $0x18] sm:$0xff] }
 0x173   :  { %v4766_v26 = vpop.permute.xlu2 %1146  ;;  %v4768_v38 = vpop.permute.xlu1 %1096 }
 0x174   :  { %6663 = vst [vmem:[#allocation60_spill] sm:$0xff] %v4766_v26  ;;  %v4770_v5 = vpop.permute.xlu0 %1091  ;;  %v4772_v13 = vpop.f32.mrf.mxu0  ;;  %v2226_v26 = vld [vmem:[%s6603_s6 + $0x10] sm:$0xff] }
 0x175   :  { %6664 = vst [vmem:[#allocation61_spill] sm:$0xff] %v4768_v38  ;;  %v4780_v0 = vpop.f32.mrf.mxu1  ;;  %v2225_v38 = vld [vmem:[%s6603_s6 + $0x8] sm:$0xff] }
 0x176   :  { %6665 = vst [vmem:[#allocation62_spill] sm:$0xff] %v4770_v5 }
 0x177   :  { %6666 = vst [vmem:[#allocation63_spill] sm:$0xff] %v4780_v0  ;;  %3282 = vmatmul.msk.f32.gmra.mxu0 %vm1438_vm2, %v429_v43  ;;  %3314 = vmatmul.msk.f32.gmra.mxu1 %vm1438_vm2, %v461_v55  ;;  %v430_v43 = vld [vmem:[%s6601_s4 + $0x88] sm:$0xff] }
 0x178   :  { %3346 = vmatmul.msk.f32.gmra.mxu2 %vm1438_vm2, %v493_v1  ;;  %3378 = vmatmul.msk.f32.gmra.mxu3 %vm1438_vm2, %v525_v12  ;;  %v462_v55 = vld [vmem:[%s6601_s4 + $0x188] sm:$0xff] }
 0x179   :  { %2369 = vperm.xlu2 %3400, %v2227_v6   ;;  %2364 = vperm.xlu1 %3399, %v2226_v26   ;;  %v526_v26 = vld [vmem:[%s6601_s4 + $0x388] sm:$0xff] }
 0x17a   :  { %2359 = vperm.xlu0 %3398, %v2225_v38   ;;  %v494_v38 = vld [vmem:[%s6601_s4 + $0x288] sm:$0xff] }
 0x17b   :  { %v4801_v5 = vpop.f32.mrf.mxu3  ;;  %v4803_v28 = vpop.permute.xlu2 %1161 }
 0x17c   :  { %6667 = vst [vmem:[#allocation64_spill] sm:$0xff] %v4801_v5  ;;  %v4805_v44 = vpop.permute.xlu1 %1111  ;;  %v4813_v1 = vpop.permute.xlu0 %1106  ;;  %v2228_v5 = vld [vmem:[%s6603_s6 + $0x20] sm:$0xff] }
 0x17d   :  { %6668 = vst [vmem:[#allocation65_spill] sm:$0xff] %v4803_v28  ;;  %v4815_v12 = vpop.f32.mrf.mxu0  ;;  %v4823_v6 = vpop.f32.mrf.mxu1  ;;  %v2230_v28 = vld [vmem:[%s6603_s6 + $0x30] sm:$0xff] }
 0x17e   :  { %6669 = vst [vmem:[#allocation66_spill] sm:$0xff] %v4805_v44  ;;  %v2229_v44 = vld [vmem:[%s6603_s6 + $0x28] sm:$0xff] }
 0x17f   :  { %6670 = vst [vmem:[#allocation67_spill] sm:$0xff] %v4813_v1  ;;  %3283 = vmatmul.msk.f32.gmra.mxu0 %vm1438_vm2, %v430_v43  ;;  %3315 = vmatmul.msk.f32.gmra.mxu1 %vm1438_vm2, %v462_v55  ;;  %v431_v43 = vld [vmem:[%s6601_s4 + $0x90] sm:$0xff] }
 0x180   :  { %3347 = vmatmul.msk.f32.gmra.mxu2 %vm1438_vm2, %v494_v38  ;;  %3379 = vmatmul.msk.f32.gmra.mxu3 %vm1438_vm2, %v526_v26  ;;  %v463_v55 = vld [vmem:[%s6601_s4 + $0x190] sm:$0xff] }
 0x181   :  { %2384 = vperm.xlu2 %3400, %v2230_v28   ;;  %2379 = vperm.xlu1 %3399, %v2229_v44   ;;  %v495_v28 = vld [vmem:[%s6601_s4 + $0x290] sm:$0xff] }
 0x182   :  { %2374 = vperm.xlu0 %3398, %v2228_v5   ;;  %v527_v44 = vld [vmem:[%s6601_s4 + $0x390] sm:$0xff] }
 0x183   :  { %v4838_v1 = vpop.f32.mrf.mxu3  ;;  %v4840_v34 = vpop.permute.xlu2 %1176 }
 0x184   :  { %6671 = vst [vmem:[#allocation68_spill] sm:$0xff] %v4838_v1  ;;  %v4842_v50 = vpop.permute.xlu1 %1126  ;;  %v4850_v38 = vpop.permute.xlu0 %1121  ;;  %v2232_v1 = vld [vmem:[%s6603_s6 + $0x40] sm:$0xff] }
 0x185   :  { %6672 = vst [vmem:[#allocation69_spill] sm:$0xff] %v4840_v34  ;;  %v4852_v26 = vpop.f32.mrf.mxu0  ;;  %v4860_v5 = vpop.f32.mrf.mxu1  ;;  %v2233_v34 = vld [vmem:[%s6603_s6 + $0x48] sm:$0xff] }
 0x186   :  { %6673 = vst [vmem:[#allocation70_spill] sm:$0xff] %v4842_v50  ;;  %v2231_v50 = vld [vmem:[%s6603_s6 + $0x38] sm:$0xff] }
 0x187   :  { %6674 = vst [vmem:[#allocation71_spill] sm:$0xff] %v4850_v38  ;;  %3284 = vmatmul.msk.f32.gmra.mxu0 %vm1438_vm2, %v431_v43  ;;  %3316 = vmatmul.msk.f32.gmra.mxu1 %vm1438_vm2, %v463_v55  ;;  %v432_v43 = vld [vmem:[%s6601_s4 + $0x98] sm:$0xff] }
 0x188   :  { %6675 = vst [vmem:[#allocation72_spill] sm:$0xff] %v4860_v5  ;;  %3348 = vmatmul.msk.f32.gmra.mxu2 %vm1438_vm2, %v495_v28  ;;  %3380 = vmatmul.msk.f32.gmra.mxu3 %vm1438_vm2, %v527_v44  ;;  %v464_v55 = vld [vmem:[%s6601_s4 + $0x198] sm:$0xff] }
 0x189   :  { %2399 = vperm.xlu2 %3400, %v2233_v34   ;;  %2394 = vperm.xlu1 %3399, %v2232_v1   ;;  %v496_v34 = vld [vmem:[%s6601_s4 + $0x298] sm:$0xff] }
 0x18a   :  { %2389 = vperm.xlu0 %3398, %v2231_v50   ;;  %v528_v50 = vld [vmem:[%s6601_s4 + $0x398] sm:$0xff] }
 0x18b   :  { %v4875_v38 = vpop.f32.mrf.mxu3  ;;  %v4877_v15 = vpop.permute.xlu2 %1191 }
 0x18c   :  { %6676 = vst [vmem:[#allocation73_spill] sm:$0xff] %v4875_v38  ;;  %v4879_v17 = vpop.permute.xlu1 %1141  ;;  %v4887_v28 = vpop.permute.xlu0 %1136  ;;  %v2235_v38 = vld [vmem:[%s6603_s6 + $0x58] sm:$0xff] }
 0x18d   :  { %6677 = vst [vmem:[#allocation74_spill] sm:$0xff] %v4877_v15  ;;  %v4889_v44 = vpop.f32.mrf.mxu0  ;;  %v4897_v1 = vpop.f32.mrf.mxu1  ;;  %v2236_v15 = vld [vmem:[%s6603_s6 + $0x60] sm:$0xff] }
 0x18e   :  { %6678 = vst [vmem:[#allocation75_spill] sm:$0xff] %v4879_v17  ;;  %v4905_v17 = vpop.f32.mrf.mxu2 }
 0x18f   :  { %6679 = vst [vmem:[#allocation76_spill] sm:$0xff] %v4887_v28  ;;  %3285 = vmatmul.msk.f32.gmra.mxu0 %vm1438_vm2, %v432_v43  ;;  %3317 = vmatmul.msk.f32.gmra.mxu1 %vm1438_vm2, %v464_v55  ;;  %v2234_v28 = vld [vmem:[%s6603_s6 + $0x50] sm:$0xff]  ;;  %v433_v43 = vld [vmem:[%s6601_s4 + $0xa0] sm:$0xff] }
 0x190   :  { %6680 = vst [vmem:[#allocation77_spill] sm:$0xff] %v4897_v1  ;;  %3349 = vmatmul.msk.f32.gmra.mxu2 %vm1438_vm2, %v496_v34  ;;  %3381 = vmatmul.msk.f32.gmra.mxu3 %vm1438_vm2, %v528_v50  ;;  %v465_v55 = vld [vmem:[%s6601_s4 + $0x1a0] sm:$0xff] }
 0x191   :  { %6681 = vst [vmem:[#allocation78_spill] sm:$0xff] %v4905_v17  ;;  %2414 = vperm.xlu2 %3400, %v2236_v15   ;;  %2409 = vperm.xlu1 %3399, %v2235_v38   ;;  %v497_v15 = vld [vmem:[%s6601_s4 + $0x2a0] sm:$0xff] }
 0x192   :  { %2404 = vperm.xlu0 %3398, %v2234_v28   ;;  %v529_v38 = vld [vmem:[%s6601_s4 + $0x3a0] sm:$0xff] }
 0x193   :  { %v4914_v58 = vpop.f32.mrf.mxu3  ;;  %v4916_v16 = vpop.permute.xlu2 %1206  ;;  %v2252_v1 = vld [vmem:[%s6603_s6 + $0xe0] sm:$0xff] }
 0x194   :  { %6682 = vst [vmem:[#allocation79_spill] sm:$0xff] %v4914_v58  ;;  %v4918_v17 = vpop.permute.xlu1 %1156  ;;  %v4926_v34 = vpop.permute.xlu0 %1151  ;;  %v2237_v58 = vld [vmem:[%s6603_s6 + $0x68] sm:$0xff] }
 0x195   :  { %6683 = vst [vmem:[#allocation80_spill] sm:$0xff] %v4916_v16  ;;  %v4928_v50 = vpop.f32.mrf.mxu0  ;;  %v4936_v28 = vpop.f32.mrf.mxu1  ;;  %v2239_v16 = vld [vmem:[%s6603_s6 + $0x78] sm:$0xff] }
 0x196   :  { %6684 = vst [vmem:[#allocation81_spill] sm:$0xff] %v4918_v17  ;;  %v2238_v17 = vld [vmem:[%s6603_s6 + $0x70] sm:$0xff] }
 0x197   :  { %6685 = vst [vmem:[#allocation82_spill] sm:$0xff] %v4926_v34  ;;  %3286 = vmatmul.msk.f32.gmra.mxu0 %vm1438_vm2, %v433_v43  ;;  %3318 = vmatmul.msk.f32.gmra.mxu1 %vm1438_vm2, %v465_v55  ;;  %v4951_v34 = vpop.f32.mrf.mxu2  ;;  %v434_v55 = vld [vmem:[%s6601_s4 + $0xa8] sm:$0xff] }
 0x198   :  { %3350 = vmatmul.msk.f32.gmra.mxu2 %vm1438_vm2, %v497_v15  ;;  %3382 = vmatmul.msk.f32.gmra.mxu3 %vm1438_vm2, %v529_v38  ;;  %6686 = vst [vmem:[#allocation83_spill] sm:$0xff] %v4951_v34  ;;  %v466_v15 = vld [vmem:[%s6601_s4 + $0x1a8] sm:$0xff] }
 0x199   :  { %2429 = vperm.xlu2 %3400, %v2239_v16   ;;  %2424 = vperm.xlu1 %3399, %v2238_v17   ;;  %v530_v17 = vld [vmem:[%s6601_s4 + $0x3a8] sm:$0xff] }
 0x19a   :  { %2419 = vperm.xlu0 %3398, %v2237_v58   ;;  %v498_v58 = vld [vmem:[%s6601_s4 + $0x2a8] sm:$0xff] }
 0x19b   :  { %v4953_v54 = vpop.f32.mrf.mxu3  ;;  %v4955_v36 = vpop.permute.xlu2 %1221 }
 0x19c   :  { %6687 = vst [vmem:[#allocation84_spill] sm:$0xff] %v4953_v54  ;;  %v4957_v43 = vpop.permute.xlu1 %1171  ;;  %v4965_v38 = vpop.permute.xlu0 %1166  ;;  %v2242_v54 = vld [vmem:[%s6603_s6 + $0x90] sm:$0xff] }
 0x19d   :  { %6688 = vst [vmem:[#allocation85_spill] sm:$0xff] %v4957_v43  ;;  %v4967_v34 = vpop.f32.mrf.mxu0  ;;  %v4975_v16 = vpop.f32.mrf.mxu1  ;;  %v2241_v43 = vld [vmem:[%s6603_s6 + $0x88] sm:$0xff] }
 0x19e   :  { %6689 = vst [vmem:[#allocation86_spill] sm:$0xff] %v4965_v38  ;;  %v2240_v38 = vld [vmem:[%s6603_s6 + $0x80] sm:$0xff] }
 0x19f   :  { %6690 = vst [vmem:[#allocation87_spill] sm:$0xff] %v4975_v16  ;;  %3287 = vmatmul.msk.f32.gmra.mxu0 %vm1438_vm2, %v434_v55  ;;  %3319 = vmatmul.msk.f32.gmra.mxu1 %vm1438_vm2, %v466_v15  ;;  %v4990_v56 = vpop.f32.mrf.mxu2  ;;  %v435_v15 = vld [vmem:[%s6601_s4 + $0xb0] sm:$0xff] }
 0x1a0   :  { %3351 = vmatmul.msk.f32.gmra.mxu2 %vm1438_vm2, %v498_v58  ;;  %3383 = vmatmul.msk.f32.gmra.mxu3 %vm1438_vm2, %v530_v17  ;;  %6691 = vst [vmem:[#allocation88_spill] sm:$0xff] %v4990_v56  ;;  %v467_v58 = vld [vmem:[%s6601_s4 + $0x1b0] sm:$0xff]  ;;  %v2243_v56 = vld [vmem:[%s6603_s6 + $0x98] sm:$0xff] }
 0x1a1   :  { %2444 = vperm.xlu2 %3400, %v2242_v54   ;;  %2439 = vperm.xlu1 %3399, %v2241_v43   ;;  %v499_v43 = vld [vmem:[%s6601_s4 + $0x2b0] sm:$0xff] }
 0x1a2   :  { %2434 = vperm.xlu0 %3398, %v2240_v38   ;;  %v531_v38 = vld [vmem:[%s6601_s4 + $0x3b0] sm:$0xff] }
 0x1a3   :  { %v4992_v45 = vpop.f32.mrf.mxu3  ;;  %v4994_v20 = vpop.permute.xlu2 %1236 }
 0x1a4   :  { %6692 = vst [vmem:[#allocation89_spill] sm:$0xff] %v4992_v45  ;;  %v4996_v55 = vpop.permute.xlu1 %1186  ;;  %v5004_v17 = vpop.permute.xlu0 %1181  ;;  %v2245_v45 = vld [vmem:[%s6603_s6 + $0xa8] sm:$0xff] }
 0x1a5   :  { %6693 = vst [vmem:[#allocation90_spill] sm:$0xff] %v4996_v55  ;;  %v5006_v54 = vpop.f32.mrf.mxu0  ;;  %v5014_v55 = vpop.f32.mrf.mxu1 }
 0x1a6   :  { %6694 = vst [vmem:[#allocation91_spill] sm:$0xff] %v5004_v17  ;;  %v2244_v17 = vld [vmem:[%s6603_s6 + $0xa0] sm:$0xff] }
 0x1a7   :  { %6695 = vst [vmem:[#allocation92_spill] sm:$0xff] %v5014_v55  ;;  %3288 = vmatmul.msk.f32.gmra.mxu0 %vm1438_vm2, %v435_v15  ;;  %3320 = vmatmul.msk.f32.gmra.mxu1 %vm1438_vm2, %v467_v58  ;;  %v436_v15 = vld [vmem:[%s6601_s4 + $0xb8] sm:$0xff]  ;;  %v2246_v55 = vld [vmem:[%s6603_s6 + $0xb0] sm:$0xff] }
 0x1a8   :  { %3352 = vmatmul.msk.f32.gmra.mxu2 %vm1438_vm2, %v499_v43  ;;  %3384 = vmatmul.msk.f32.gmra.mxu3 %vm1438_vm2, %v531_v38  ;;  %v468_v58 = vld [vmem:[%s6601_s4 + $0x1b8] sm:$0xff] }
 0x1a9   :  { %2459 = vperm.xlu2 %3400, %v2245_v45   ;;  %2454 = vperm.xlu1 %3399, %v2244_v17   ;;  %v532_v45 = vld [vmem:[%s6601_s4 + $0x3b8] sm:$0xff] }
 0x1aa   :  { %2449 = vperm.xlu0 %3398, %v2243_v56   ;;  %v500_v56 = vld [vmem:[%s6601_s4 + $0x2b8] sm:$0xff] }
 0x1ab   :  { %v5029_v39 = vpop.f32.mrf.mxu3  ;;  %v5031_v61 = vpop.permute.xlu2 %1251 }
 0x1ac   :  { %6696 = vst [vmem:[#allocation93_spill] sm:$0xff] %v5029_v39  ;;  %v5033_v16 = vpop.permute.xlu1 %1201  ;;  %v5041_v43 = vpop.permute.xlu0 %1196 }
 0x1ad   :  { %6697 = vst [vmem:[#allocation94_spill] sm:$0xff] %v5033_v16  ;;  %v5043_v38 = vpop.f32.mrf.mxu0  ;;  %v5051_v17 = vpop.f32.mrf.mxu1  ;;  %v2248_v16 = vld [vmem:[%s6603_s6 + $0xc0] sm:$0xff] }
 0x1ae   :  { %6698 = vst [vmem:[#allocation95_spill] sm:$0xff] %v5041_v43  ;;  %v2247_v43 = vld [vmem:[%s6603_s6 + $0xb8] sm:$0xff]  ;;  %v5059_v39 = vpop.f32.mrf.mxu2 }
 0x1af   :  { %6699 = vst [vmem:[#allocation96_spill] sm:$0xff] %v5059_v39  ;;  %3289 = vmatmul.msk.f32.gmra.mxu0 %vm1438_vm2, %v436_v15  ;;  %3321 = vmatmul.msk.f32.gmra.mxu1 %vm1438_vm2, %v468_v58  ;;  %v437_v15 = vld [vmem:[%s6601_s4 + $0xc0] sm:$0xff] }
 0x1b0   :  { %3353 = vmatmul.msk.f32.gmra.mxu2 %vm1438_vm2, %v500_v56  ;;  %3385 = vmatmul.msk.f32.gmra.mxu3 %vm1438_vm2, %v532_v45  ;;  %v469_v58 = vld [vmem:[%s6601_s4 + $0x1c0] sm:$0xff] }
 0x1b1   :  { %2474 = vperm.xlu2 %3400, %v2248_v16   ;;  %2469 = vperm.xlu1 %3399, %v2247_v43   ;;  %v501_v16 = vld [vmem:[%s6601_s4 + $0x2c0] sm:$0xff] }
 0x1b2   :  { %2464 = vperm.xlu0 %3398, %v2246_v55   ;;  %v533_v55 = vld [vmem:[%s6601_s4 + $0x3c0] sm:$0xff] }
 0x1b3   :  { %v5068_v22 = vpop.f32.mrf.mxu3  ;;  %v5070_v53 = vpop.permute.xlu2 %1266 }
 0x1b4   :  { %6700 = vst [vmem:[#allocation97_spill] sm:$0xff] %v5068_v22  ;;  %v5072_v39 = vpop.permute.xlu1 %1216  ;;  %v5080_v56 = vpop.permute.xlu0 %1211  ;;  %v2251_v22 = vld [vmem:[%s6603_s6 + $0xd8] sm:$0xff] }
 0x1b5   :  { %6701 = vst [vmem:[#allocation98_spill] sm:$0xff] %v5080_v56  ;;  %v5082_v45 = vpop.f32.mrf.mxu0  ;;  %v5090_v43 = vpop.f32.mrf.mxu1  ;;  %v2250_v56 = vld [vmem:[%s6603_s6 + $0xd0] sm:$0xff] }
 0x1b6   :  { %6702 = vst [vmem:[#allocation99_spill] sm:$0xff] %v5090_v43  ;;  %v5105_v43 = vpop.f32.mrf.mxu2 }
 0x1b7   :  { %3290 = vmatmul.msk.f32.gmra.mxu0 %vm1438_vm2, %v437_v15  ;;  %3322 = vmatmul.msk.f32.gmra.mxu1 %vm1438_vm2, %v469_v58  ;;  %6703 = vst [vmem:[#allocation100_spill] sm:$0xff] %v5105_v43  ;;  %v438_v58 = vld [vmem:[%s6601_s4 + $0xc8] sm:$0xff] }
 0x1b8   :  { %3354 = vmatmul.msk.f32.gmra.mxu2 %vm1438_vm2, %v501_v16  ;;  %3386 = vmatmul.msk.f32.gmra.mxu3 %vm1438_vm2, %v533_v55  ;;  %v470_v16 = vld [vmem:[%s6601_s4 + $0x1c8] sm:$0xff] }
 0x1b9   :  { %2489 = vperm.xlu2 %3400, %v2251_v22   ;;  %2484 = vperm.xlu1 %3399, %v2250_v56   ;;  %v502_v22 = vld [vmem:[%s6601_s4 + $0x2c8] sm:$0xff] }
 0x1ba   :  { %2479 = vperm.xlu0 %3398, %v2249_v42   ;;  %v534_v42 = vld [vmem:[%s6601_s4 + $0x3c8] sm:$0xff] }
 0x1bb   :  { %v5107_v48 = vpop.f32.mrf.mxu3  ;;  %v5109_v5 = vpop.permute.xlu2 %1281 }
 0x1bc   :  { %6704 = vst [vmem:[#allocation101_spill] sm:$0xff] %v5107_v48  ;;  %v5111_v15 = vpop.permute.xlu1 %1231  ;;  %v5119_v55 = vpop.permute.xlu0 %1226  ;;  %v2253_v48 = vld [vmem:[%s6603_s6 + $0xe8] sm:$0xff] }
 0x1bd   :  { %6705 = vst [vmem:[#allocation102_spill] sm:$0xff] %v5109_v5  ;;  %v5121_v43 = vpop.f32.mrf.mxu0  ;;  %v5129_v56 = vpop.f32.mrf.mxu1  ;;  %v2254_v5 = vld [vmem:[%s6603_s6 + $0xf0] sm:$0xff] }
 0x1be   :  { %6706 = vst [vmem:[#allocation103_spill] sm:$0xff] %v5129_v56  ;;  %v5144_v56 = vpop.f32.mrf.mxu2 }
 0x1bf   :  { %3291 = vmatmul.msk.f32.gmra.mxu0 %vm1438_vm2, %v438_v58  ;;  %3323 = vmatmul.msk.f32.gmra.mxu1 %vm1438_vm2, %v470_v16  ;;  %6707 = vst [vmem:[#allocation104_spill] sm:$0xff] %v5144_v56  ;;  %v439_v16 = vld [vmem:[%s6601_s4 + $0xd0] sm:$0xff]  ;;  %v2257_v56 = vld [vmem:[%s6603_s6 + $0x108] sm:$0xff] }
 0x1c0   :  { %3355 = vmatmul.msk.f32.gmra.mxu2 %vm1438_vm2, %v502_v22  ;;  %3387 = vmatmul.msk.f32.gmra.mxu3 %vm1438_vm2, %v534_v42  ;;  %v471_v22 = vld [vmem:[%s6601_s4 + $0x1d0] sm:$0xff] }
 0x1c1   :  { %2504 = vperm.xlu2 %3400, %v2254_v5   ;;  %2499 = vperm.xlu1 %3399, %v2253_v48   ;;  %v5159_v5 = vperm.slane %v4251_v3, 0  ;;  %v503_v42 = vld [vmem:[%s6601_s4 + $0x2d0] sm:$0xff]  ;;  %v2256_v3 = vld [vmem:[%s6603_s6 + $0x100] sm:$0xff] }
 0x1c2   :  { %2494 = vperm.xlu0 %3398, %v2252_v1  }
 0x1c3   :  { %v5146_v62 = vpop.f32.mrf.mxu3  ;;  %v5148_v27 = vpop.permute.xlu2 %1296  ;;  %v1310_v32 = vmul.f32 %v5159_v5, %v4051_v10 }
 0x1c4   :  { %6708 = vst [vmem:[#allocation105_spill] sm:$0xff] %v5146_v62  ;;  %v5150_v58 = vpop.permute.xlu1 %1246  ;;  %v5161_v48 = vpop.permute.xlu0 %1241 }
 0x1c5   :  { %6709 = vst [vmem:[#allocation106_spill] sm:$0xff] %v5148_v27  ;;  %v5163_v1 = vpop.f32.mrf.mxu0  ;;  %v535_v27 = vld [vmem:[%s6601_s4 + $0x3d0] sm:$0xff]  ;;  %v5171_v62 = vpop.f32.mrf.mxu1 }
 0x1c6   :  { %6710 = vst [vmem:[#allocation107_spill] sm:$0xff] %v5171_v62  ;;  %v1841_v62 = vadd.f32 %v4772_v13, %v1310_v32  ;;  %v504_v32 = vld [vmem:[%s6601_s4 + $0x2d8] sm:$0xff] }
 0x1c7   :  { %3292 = vmatmul.msk.f32.gmra.mxu0 %vm1438_vm2, %v439_v16  ;;  %3324 = vmatmul.msk.f32.gmra.mxu1 %vm1438_vm2, %v471_v22 }
 0x1c8   :  { %3356 = vmatmul.msk.f32.gmra.mxu2 %vm1438_vm2, %v503_v42  ;;  %3388 = vmatmul.msk.f32.gmra.mxu3 %vm1438_vm2, %v535_v27  ;;  %v472_v27 = vld [vmem:[%s6601_s4 + $0x1d8] sm:$0xff] }
 0x1c9   :  { %2519 = vperm.xlu2 %3400, %v2257_v56   ;;  %2514 = vperm.xlu1 %3399, %v2256_v3   ;;  %v2260_v3 = vld [vmem:[%s6603_s6 + $0x120] sm:$0xff] }
 0x1ca   :  { %2509 = vperm.xlu0 %3398, %v2255_v51   ;;  %v536_v51 = vld [vmem:[%s6601_s4 + $0x3d8] sm:$0xff] }
 0x1cb   :  { %v5189_v0 = vpop.f32.mrf.mxu3  ;;  %v2355_v16 = vpop.permute.xlu2 %2354 }
 0x1cc   :  { %6711 = vst [vmem:[#allocation108_spill] sm:$0xff] %v5189_v0  ;;  %v5191_v22 = vpop.permute.xlu1 %1261  ;;  %v2992_v42 = vadd.f32 %v2355_v16, %v1841_v62  ;;  %v5199_v10 = vpop.permute.xlu0 %1256  ;;  %v2259_v62 = vld [vmem:[%s6603_s6 + $0x118] sm:$0xff]  ;;  %v2258_v0 = vld [vmem:[%s6603_s6 + $0x110] sm:$0xff] }
 0x1cd   :  { %6712 = vst [vmem:[#allocation109_spill] sm:$0xff] %v5199_v10  ;;  %v5201_v56 = vpop.f32.mrf.mxu0  ;;  %v5209_v13 = vpop.f32.mrf.mxu1  ;;  %v1313_v10 = vmul.f32 %v5159_v5, %v4074_v19 }
 0x1ce   :  { %6713 = vst [vmem:[#allocation110_spill] sm:$0xff] %v5209_v13  ;;  %v5217_v16 = vpop.f32.mrf.mxu2  ;;  %v441_v13 = vld [vmem:[%s6601_s4 + $0xe0] sm:$0xff] }
 0x1cf   :  { %6714 = vst [vmem:[#allocation111_spill] sm:$0xff] %v5217_v16  ;;  %3293 = vmatmul.msk.f32.gmra.mxu0 %vm1438_vm2, %v440_v7  ;;  %3325 = vmatmul.msk.f32.gmra.mxu1 %vm1438_vm2, %v472_v27 }
 0x1d0   :  { %3126 = vst.msk [vmem:[%s6604_s9] sm:$0xff] %vm3120_vm0, %v2992_v42  ;;  %3357 = vmatmul.msk.f32.gmra.mxu2 %vm1438_vm2, %v504_v32  ;;  %3389 = vmatmul.msk.f32.gmra.mxu3 %vm1438_vm2, %v536_v51  ;;  %v1850_v42 = vadd.f32 %v4889_v44, %v1313_v10  ;;  %v473_v32 = vld [vmem:[%s6601_s4 + $0x1e0] sm:$0xff] }
 0x1d1   :  { %2534 = vperm.xlu2 %3400, %v2260_v3   ;;  %2529 = vperm.xlu1 %3399, %v2259_v62   ;;  %v537_v44 = vld [vmem:[%s6601_s4 + $0x3e0] sm:$0xff]  ;;  %v2263_v62 = vld [vmem:[%s6603_s6 + $0x138] sm:$0xff] }
 0x1d2   :  { %2524 = vperm.xlu0 %3398, %v2258_v0   ;;  %v505_v0 = vld [vmem:[%s6601_s4 + $0x2e0] sm:$0xff] }
 0x1d3   :  { %v5233_v16 = vpop.f32.mrf.mxu3  ;;  %v2370_v7 = vpop.permute.xlu2 %2369 }
 0x1d4   :  { %6715 = vst [vmem:[#allocation112_spill] sm:$0xff] %v5233_v16  ;;  %v5235_v27 = vpop.permute.xlu1 %1276  ;;  %v2995_v51 = vadd.f32 %v2370_v7, %v1850_v42  ;;  %v5243_v19 = vpop.permute.xlu0 %1271  ;;  %v2262_v42 = vld [vmem:[%s6603_s6 + $0x130] sm:$0xff]  ;;  %v2261_v7 = vld [vmem:[%s6603_s6 + $0x128] sm:$0xff] }
 0x1d5   :  { %6716 = vst [vmem:[#allocation113_spill] sm:$0xff] %v5235_v27  ;;  %v5245_v3 = vpop.f32.mrf.mxu0  ;;  %v5253_v10 = vpop.f32.mrf.mxu1  ;;  %v1316_v27 = vmul.f32 %v5159_v5, %v4089_v25  ;;  %v474_v25 = vld [vmem:[%s6601_s4 + $0x1e8] sm:$0xff] }
 0x1d6   :  { %6717 = vst [vmem:[#allocation114_spill] sm:$0xff] %v5243_v19  ;;  %v5274_v19 = vpop.f32.mrf.mxu2 }
 0x1d7   :  { %6718 = vst [vmem:[#allocation115_spill] sm:$0xff] %v5253_v10  ;;  %3294 = vmatmul.msk.f32.gmra.mxu0 %vm1438_vm2, %v441_v13  ;;  %3326 = vmatmul.msk.f32.gmra.mxu1 %vm1438_vm2, %v473_v32  ;;  %v1859_v13 = vadd.f32 %v5006_v54, %v1316_v27  ;;  %v506_v54 = vld [vmem:[%s6601_s4 + $0x2e8] sm:$0xff] }
 0x1d8   :  { %3129 = vst.msk [vmem:[%s6604_s9 + $0x18] sm:$0xff] %vm3120_vm0, %v2995_v51  ;;  %3358 = vmatmul.msk.f32.gmra.mxu2 %vm1438_vm2, %v505_v0  ;;  %3390 = vmatmul.msk.f32.gmra.mxu3 %vm1438_vm2, %v537_v44  ;;  %v442_v0 = vld [vmem:[%s6601_s4 + $0xe8] sm:$0xff] }
 0x1d9   :  { %6719 = vst [vmem:[#allocation116_spill] sm:$0xff] %v5274_v19  ;;  %2549 = vperm.xlu2 %3400, %v2263_v62   ;;  %2544 = vperm.xlu1 %3399, %v2262_v42   ;;  %v538_v27 = vld [vmem:[%s6601_s4 + $0x3e8] sm:$0xff] }
 0x1da   :  { %2539 = vperm.xlu0 %3398, %v2261_v7   ;;  %v2266_v7 = vld [vmem:[%s6603_s6 + $0x150] sm:$0xff] }
 0x1db   :  { %v5277_v51 = vpop.f32.mrf.mxu3  ;;  %v2385_v32 = vpop.permute.xlu2 %2384 }
 0x1dc   :  { %6720 = vst [vmem:[#allocation117_spill] sm:$0xff] %v5277_v51  ;;  %v5279_v16 = vpop.permute.xlu1 %1291  ;;  %v2998_v44 = vadd.f32 %v2385_v32, %v1859_v13  ;;  %v5287_v19 = vpop.permute.xlu0 %1286  ;;  %v2265_v13 = vld [vmem:[%s6603_s6 + $0x148] sm:$0xff]  ;;  %v2264_v32 = vld [vmem:[%s6603_s6 + $0x140] sm:$0xff] }
 0x1dd   :  { %6721 = vst [vmem:[#allocation118_spill] sm:$0xff] %v5279_v16  ;;  %v5289_v62 = vpop.f32.mrf.mxu0  ;;  %v5297_v42 = vpop.f32.mrf.mxu1  ;;  %v1319_v16 = vmul.f32 %v5159_v5, %v4104_v31  ;;  %v443_v31 = vld [vmem:[%s6601_s4 + $0xf0] sm:$0xff] }
 0x1de   :  { %6722 = vst [vmem:[#allocation119_spill] sm:$0xff] %v5287_v19 }
 0x1df   :  { %3132 = vst.msk [vmem:[%s6604_s9 + $0x30] sm:$0xff] %vm3120_vm0, %v2998_v44  ;;  %3295 = vmatmul.msk.f32.gmra.mxu0 %vm1438_vm2, %v442_v0  ;;  %3327 = vmatmul.msk.f32.gmra.mxu1 %vm1438_vm2, %v474_v25  ;;  %v1419_v44 = vmul.f32 %v5159_v5, %v5072_v39  ;;  %v5320_v0 = vpop.f32.mrf.mxu2  ;;  %v1868_v25 = vadd.f32 %v5121_v43, %v1319_v16  ;;  %v507_v43 = vld [vmem:[%s6601_s4 + $0x2f0] sm:$0xff] }
 0x1e0   :  { %3359 = vmatmul.msk.f32.gmra.mxu2 %vm1438_vm2, %v506_v54  ;;  %3391 = vmatmul.msk.f32.gmra.mxu3 %vm1438_vm2, %v538_v27  ;;  %v475_v27 = vld [vmem:[%s6601_s4 + $0x1f0] sm:$0xff] }
 0x1e1   :  { %2564 = vperm.xlu2 %3400, %v2266_v7   ;;  %2559 = vperm.xlu1 %3399, %v2265_v13   ;;  %v539_v16 = vld [vmem:[%s6601_s4 + $0x3f0] sm:$0xff] }
 0x1e2   :  { %2554 = vperm.xlu0 %3398, %v2264_v32   ;;  %v2269_v32 = vld [vmem:[%s6603_s6 + $0x168] sm:$0xff] }
 0x1e3   :  { %v2167_v19 = vpop.f32.mrf.mxu3  ;;  %v2400_v10 = vpop.permute.xlu2 %2399 }
 0x1e4   :  { %v5323_v51 = vadd.f32 %v2167_v19, %v1419_v44  ;;  %v5325_v54 = vpop.permute.xlu1 %1306  ;;  %v3001_v39 = vadd.f32 %v2400_v10, %v1868_v25  ;;  %v5333_v7 = vpop.permute.xlu0 %1301  ;;  %v2268_v10 = vld [vmem:[%s6603_s6 + $0x160] sm:$0xff]  ;;  %v2267_v44 = vld [vmem:[%s6603_s6 + $0x158] sm:$0xff]  ;;  %v1312_v25 = vmul.f32 %v5159_v5, %v4014_v60 }
 0x1e5   :  { %6724 = vst [vmem:[#allocation121_spill] sm:$0xff] %v5325_v54  ;;  %v5335_v13 = vpop.f32.mrf.mxu0  ;;  %v5343_v19 = vpop.f32.mrf.mxu1  ;;  %v1322_v54 = vmul.f32 %v5159_v5, %v4128_v40 }
 0x1e6   :  { %6723 = vst [vmem:[#allocation120_spill] sm:$0xff] %v5323_v51 }
 0x1e7   :  { %6725 = vst [vmem:[#allocation122_spill] sm:$0xff] %v5333_v7  ;;  %3296 = vmatmul.msk.f32.gmra.mxu0 %vm1438_vm2, %v443_v31  ;;  %3328 = vmatmul.msk.f32.gmra.mxu1 %vm1438_vm2, %v475_v27  ;;  %v1311_v31 = vmul.f32 %v5159_v5, %v3991_v52  ;;  %v1420_v27 = vmul.f32 %v5159_v5, %v4955_v36  ;;  %v476_v52 = vld [vmem:[%s6601_s4 + $0x1f8] sm:$0xff] }
 0x1e8   :  { %3135 = vst.msk [vmem:[%s6604_s9 + $0x48] sm:$0xff] %vm3120_vm0, %v3001_v39  ;;  %3360 = vmatmul.msk.f32.gmra.mxu2 %vm1438_vm2, %v507_v43  ;;  %3392 = vmatmul.msk.f32.gmra.mxu3 %vm1438_vm2, %v539_v16  ;;  %v1847_v39 = vadd.f32 %v4852_v26, %v1312_v25  ;;  %v1877_v43 = vadd.f32 %v5245_v3, %v1322_v54  ;;  %v540_v3 = vld [vmem:[%s6601_s4 + $0x3f8] sm:$0xff] }
 0x1e9   :  { %2579 = vperm.xlu2 %3400, %v2269_v32   ;;  %2574 = vperm.xlu1 %3399, %v2268_v10   ;;  %v1844_v7 = vadd.f32 %v4815_v12, %v1311_v31  ;;  %v444_v32 = vld [vmem:[%s6601_s4 + $0xf8] sm:$0xff]  ;;  %v2272_v31 = vld [vmem:[%s6603_s6 + $0x180] sm:$0xff] }
 0x1ea   :  { %2569 = vperm.xlu0 %3398, %v2267_v44   ;;  %v508_v12 = vld [vmem:[%s6601_s4 + $0x2f8] sm:$0xff] }
 0x1eb   :  { %v2170_v16 = vpop.f32.mrf.mxu3  ;;  %v2415_v51 = vpop.permute.xlu2 %2414 }
 0x1ec   :  { %v5373_v60 = vadd.f32 %v2170_v16, %v1420_v27  ;;  %v2365_v40 = vpop.permute.xlu1 %2364  ;;  %v3004_v36 = vadd.f32 %v2415_v51, %v1877_v43  ;;  %v2360_v26 = vpop.permute.xlu0 %2359  ;;  %v2271_v51 = vld [vmem:[%s6603_s6 + $0x178] sm:$0xff]  ;;  %v1325_v43 = vmul.f32 %v5159_v5, %v4143_v47  ;;  %v1314_v16 = vmul.f32 %v5159_v5, %v4072_v18 }
 0x1ed   :  { %v2994_v10 = vadd.f32 %v2365_v40, %v1847_v39  ;;  %v1885_v44 = vpop.f32.mrf.mxu0  ;;  %v2993_v54 = vadd.f32 %v2360_v26, %v1844_v7  ;;  %v5387_v25 = vpop.f32.mrf.mxu1  ;;  %v2270_v7 = vld [vmem:[%s6603_s6 + $0x170] sm:$0xff]  ;;  %v1315_v39 = vmul.f32 %v5159_v5, %v4031_v2  ;;  %v1421_v40 = vmul.f32 %v5159_v5, %v5119_v55  ;;  %v2273_v55 = vld [vmem:[%s6603_s6 + $0x188] sm:$0xff] }
 0x1ee   :  { %v5395_v27 = vpop.f32.mrf.mxu2  ;;  %3138 = vst.msk [vmem:[%s6604_s9 + $0x60] sm:$0xff] %vm3120_vm0, %v3004_v36  ;;  %v1886_v2 = vadd.f32 %v1885_v44, %v1325_v43  ;;  %v1853_v36 = vadd.f32 %v4928_v50, %v1314_v16  ;;  %v2274_v50 = vld [vmem:[%s6603_s6 + $0x190] sm:$0xff]  ;;  %v1318_v44 = vmul.f32 %v5159_v5, %v4046_v8  ;;  %v1422_v43 = vmul.f32 %v5159_v5, %v5111_v15 }
 0x1ef   :  { %3297 = vmatmul.msk.f32.gmra.mxu0 %vm1438_vm2, %v444_v32  ;;  %3329 = vmatmul.msk.f32.gmra.mxu1 %vm1438_vm2, %v476_v52  ;;  %3128 = vst.msk [vmem:[%s6604_s9 + $0x10] sm:$0xff] %vm3120_vm0, %v2994_v10  ;;  %v1856_v32 = vadd.f32 %v4967_v34, %v1315_v39  ;;  %v2275_v34 = vld [vmem:[%s6603_s6 + $0x198] sm:$0xff]  ;;  %v1317_v39 = vmul.f32 %v5159_v5, %v4087_v24  ;;  %v2278_v24 = vld [vmem:[%s6603_s6 + $0x1b0] sm:$0xff] }
 0x1f0   :  { %3361 = vmatmul.msk.f32.gmra.mxu2 %vm1438_vm2, %v508_v12  ;;  %3393 = vmatmul.msk.f32.gmra.mxu3 %vm1438_vm2, %v540_v3  ;;  %3127 = vst.msk [vmem:[%s6604_s9 + $0x8] sm:$0xff] %vm3120_vm0, %v2993_v54  ;;  %v1865_v16 = vadd.f32 %v5082_v45, %v1318_v44  ;;  %v2277_v45 = vld [vmem:[%s6603_s6 + $0x1a8] sm:$0xff]  ;;  %v1321_v15 = vmul.f32 %v5159_v5, %v4061_v14 }
 0x1f1   :  { %2594 = vperm.xlu2 %3400, %v2272_v31   ;;  %2589 = vperm.xlu1 %3399, %v2271_v51   ;;  %v1862_v8 = vadd.f32 %v5043_v38, %v1317_v39  ;;  %v2276_v38 = vld [vmem:[%s6603_s6 + $0x1a0] sm:$0xff] }
 0x1f2   :  { %2584 = vperm.xlu0 %3398, %v2270_v7  }
 0x1f3   :  { %v2173_v52 = vpop.f32.mrf.mxu3  ;;  %v2430_v26 = vpop.permute.xlu2 %2429 }
 0x1f4   :  { %v5426_v10 = vadd.f32 %v2173_v52, %v1421_v40  ;;  %v2380_v12 = vpop.permute.xlu1 %2379  ;;  %v3007_v47 = vadd.f32 %v2430_v26, %v1886_v2  ;;  %v2375_v54 = vpop.permute.xlu0 %2374 }
 0x1f5   :  { %v2997_v3 = vadd.f32 %v2380_v12, %v1856_v32  ;;  %v5428_v31 = vpop.f32.mrf.mxu0  ;;  %v2996_v18 = vadd.f32 %v2375_v54, %v1853_v36  ;;  %v5430_v51 = vpop.f32.mrf.mxu1  ;;  %v1423_v54 = vmul.f32 %v5159_v5, %v4994_v20 }
 0x1f6   :  { %3141 = vst.msk [vmem:[%s6604_s9 + $0x78] sm:$0xff] %vm3120_vm0, %v3007_v47  ;;  %v5451_v7 = vpop.f32.mrf.mxu2 }
 0x1f7   :  { %3131 = vst.msk [vmem:[%s6604_s9 + $0x28] sm:$0xff] %vm3120_vm0, %v2997_v3 }
 0x1f8   :  { %3130 = vst.msk [vmem:[%s6604_s9 + $0x20] sm:$0xff] %vm3120_vm0, %v2996_v18  ;;  %v1320_v18 = vmul.f32 %v5159_v5, %v4102_v30 }
 0x1f9   :  { %2609 = vperm.xlu2 %3400, %v2275_v34   ;;  %2604 = vperm.xlu1 %3399, %v2274_v50   ;;  %v1874_v34 = vadd.f32 %v5201_v56, %v1321_v15  ;;  %v2281_v56 = vld [vmem:[%s6603_s6 + $0x1c8] sm:$0xff] }
 0x1fa   :  { %2599 = vperm.xlu0 %3398, %v2273_v55   ;;  %v1871_v44 = vadd.f32 %v5163_v1, %v1320_v18  ;;  %v2280_v1 = vld [vmem:[%s6603_s6 + $0x1c0] sm:$0xff] }
 0x1fb   :  { %v2176_v40 = vpop.f32.mrf.mxu3  ;;  %v2445_v2 = vpop.permute.xlu2 %2444 }
 0x1fc   :  { %v5463_v32 = vadd.f32 %v2176_v40, %v1422_v43  ;;  %v2395_v52 = vpop.permute.xlu1 %2394  ;;  %v2390_v26 = vpop.permute.xlu0 %2389 }
 0x1fd   :  { %v3000_v36 = vadd.f32 %v2395_v52, %v1865_v16  ;;  %v5465_v12 = vpop.f32.mrf.mxu0  ;;  %v2999_v47 = vadd.f32 %v2390_v26, %v1862_v8  ;;  %v5467_v3 = vpop.f32.mrf.mxu1  ;;  %v1328_v16 = vmul.f32 %v5159_v5, %v4160_v59  ;;  %v2279_v59 = vld [vmem:[%s6603_s6 + $0x1b8] sm:$0xff] }
 0x1fe   :  { %v5493_v50 = vpop.f32.mrf.mxu2 }
 0x1ff   :  { %3134 = vst.msk [vmem:[%s6604_s9 + $0x40] sm:$0xff] %vm3120_vm0, %v3000_v36 }
 0x200   :  { %3133 = vst.msk [vmem:[%s6604_s9 + $0x38] sm:$0xff] %vm3120_vm0, %v2999_v47  ;;  %v1324_v47 = vmul.f32 %v5159_v5, %v4079_v21 }
 0x201   :  { %2624 = vperm.xlu2 %3400, %v2278_v24   ;;  %2619 = vperm.xlu1 %3399, %v2277_v45   ;;  %v1424_v24 = vmul.f32 %v5159_v5, %v5161_v48  ;;  %v1323_v45 = vmul.f32 %v5159_v5, %v4120_v37 }
 0x202   :  { %2614 = vperm.xlu0 %3398, %v2276_v38   ;;  %v1883_v38 = vadd.f32 %v5335_v13, %v1324_v47  ;;  %v2283_v13 = vld [vmem:[%s6603_s6 + $0x1d8] sm:$0xff] }
 0x203   :  { %v2179_v55 = vpop.f32.mrf.mxu3  ;;  %v5498_v43 = vpop.permute.xlu2 %2459  ;;  %v1880_v15 = vadd.f32 %v5289_v62, %v1323_v45 }
 0x204   :  { %v5496_v39 = vadd.f32 %v2179_v55, %v1423_v54  ;;  %v2410_v14 = vpop.permute.xlu1 %2409  ;;  %v2405_v40 = vpop.permute.xlu0 %2404 }
 0x205   :  { %v3003_v20 = vadd.f32 %v2410_v14, %v1874_v34  ;;  %v1894_v8 = vpop.f32.mrf.mxu0  ;;  %v3002_v30 = vadd.f32 %v2405_v40, %v1871_v44  ;;  %v5502_v36 = vpop.f32.mrf.mxu1  ;;  %v2284_v14 = vld [vmem:[%s6603_s6 + $0x1e0] sm:$0xff]  ;;  %v1425_v40 = vmul.f32 %v5159_v5, %v5150_v58  ;;  %v2286_v58 = vld [vmem:[%s6603_s6 + $0x1f0] sm:$0xff] }
 0x206   :  { %v1895_v52 = vadd.f32 %v1894_v8, %v1328_v16  ;;  %v5545_v62 = vpop.f32.mrf.mxu2  ;;  %v2282_v16 = vld [vmem:[%s6603_s6 + $0x1d0] sm:$0xff]  ;;  %v1326_v8 = vmul.f32 %v5159_v5, %v4141_v46  ;;  %v2287_v46 = vld [vmem:[%s6603_s6 + $0x1f8] sm:$0xff] }
 0x207   :  { %3137 = vst.msk [vmem:[%s6604_s9 + $0x58] sm:$0xff] %vm3120_vm0, %v3003_v20  ;;  %v1327_v20 = vmul.f32 %v5159_v5, %v4100_v29 }
 0x208   :  { %3136 = vst.msk [vmem:[%s6604_s9 + $0x50] sm:$0xff] %vm3120_vm0, %v3002_v30  ;;  %v3010_v26 = vadd.f32 %v2445_v2, %v1895_v52 }
 0x209   :  { %2639 = vperm.xlu2 %3400, %v2281_v56   ;;  %2634 = vperm.xlu1 %3399, %v2280_v1   ;;  %v1892_v30 = vadd.f32 %v5465_v12, %v1327_v20  ;;  %v1889_v56 = vadd.f32 %v5428_v31, %v1326_v8  ;;  %v2285_v31 = vld [vmem:[%s6603_s6 + $0x1e8] sm:$0xff] }
 0x20a   :  { %3144 = vst.msk [vmem:[%s6604_s9 + $0x90] sm:$0xff] %vm3120_vm0, %v3010_v26  ;;  %2629 = vperm.xlu0 %3398, %v2279_v59  }
 0x20b   :  { %v2182_v2 = vpop.f32.mrf.mxu3  ;;  %v5535_v54 = vpop.permute.xlu2 %2474 }
 0x20c   :  { %v5533_v21 = vadd.f32 %v2182_v2, %v1424_v24  ;;  %v2425_v18 = vpop.permute.xlu1 %2424  ;;  %v2420_v34 = vpop.permute.xlu0 %2419  ;;  %v1330_v2 = vmul.f32 %v5159_v5, %v4115_v35  ;;  %v1331_v35 = vmul.f32 %v5159_v5, %v4176_v11  ;;  %v2288_v11 = vld [vmem:[%s6603_s6 + $0x200] sm:$0xff] }
 0x20d   :  { %v3006_v48 = vadd.f32 %v2425_v18, %v1883_v38  ;;  %v1897_v55 = vpop.f32.mrf.mxu0  ;;  %v3005_v37 = vadd.f32 %v2420_v34, %v1880_v15  ;;  %v5537_v44 = vpop.f32.mrf.mxu1  ;;  %v1426_v15 = vmul.f32 %v5159_v5, %v5031_v61  ;;  %v1329_v18 = vmul.f32 %v5159_v5, %v4156_v57  ;;  %v2290_v57 = vld [vmem:[%s6603_s6 + $0x210] sm:$0xff] }
 0x20e   :  { %v5589_v12 = vpop.f32.mrf.mxu2 }
 0x20f   :  { %3140 = vst.msk [vmem:[%s6604_s9 + $0x70] sm:$0xff] %vm3120_vm0, %v3006_v48 }
 0x210   :  { %3139 = vst.msk [vmem:[%s6604_s9 + $0x68] sm:$0xff] %vm3120_vm0, %v3005_v37  ;;  %v1898_v37 = vadd.f32 %v1897_v55, %v1329_v18  ;;  %v2289_v55 = vld [vmem:[%s6603_s6 + $0x208] sm:$0xff] }
 0x211   :  { %2654 = vperm.xlu2 %3400, %v2284_v14   ;;  %2649 = vperm.xlu1 %3399, %v2283_v13   ;;  %v2293_v18 = vld [vmem:[%s6603_s6 + $0x228] sm:$0xff] }
 0x212   :  { %2644 = vperm.xlu0 %3398, %v2282_v16  }
 0x213   :  { %v2185_v52 = vpop.f32.mrf.mxu3  ;;  %v5568_v59 = vpop.permute.xlu2 %2489 }
 0x214   :  { %v5566_v1 = vadd.f32 %v2185_v52, %v1425_v40  ;;  %v2440_v26 = vpop.permute.xlu1 %2439  ;;  %v2435_v47 = vpop.permute.xlu0 %2434 }
 0x215   :  { %v3009_v29 = vadd.f32 %v2440_v26, %v1892_v30  ;;  %v1900_v24 = vpop.f32.mrf.mxu0  ;;  %v3008_v45 = vadd.f32 %v2435_v47, %v1889_v56  ;;  %v5570_v38 = vpop.f32.mrf.mxu1  ;;  %v1343_v26 = vmul.f32 %v5159_v5, %v4246_v63 }
 0x216   :  { %v1901_v48 = vadd.f32 %v1900_v24, %v1330_v2  ;;  %v5630_v47 = vpop.f32.mrf.mxu2 }
 0x217   :  { %3143 = vst.msk [vmem:[%s6604_s9 + $0x88] sm:$0xff] %vm3120_vm0, %v3009_v29  ;;  %v1940_v29 = vadd.f32 %v4823_v6, %v1343_v26  ;;  %v2292_v6 = vld [vmem:[%s6603_s6 + $0x220] sm:$0xff] }
 0x218   :  { %3142 = vst.msk [vmem:[%s6604_s9 + $0x80] sm:$0xff] %vm3120_vm0, %v3008_v45 }
 0x219   :  { %2669 = vperm.xlu2 %3400, %v2287_v46   ;;  %2664 = vperm.xlu1 %3399, %v2286_v58  }
 0x21a   :  { %2659 = vperm.xlu0 %3398, %v2285_v31  }
 0x21b   :  { %v2188_v34 = vpop.f32.mrf.mxu3  ;;  %v5599_v13 = vpop.permute.xlu2 %2504 }
 0x21c   :  { %v5597_v14 = vadd.f32 %v2188_v34, %v1426_v15  ;;  %v2455_v16 = vpop.permute.xlu1 %2454  ;;  %v2450_v40 = vpop.permute.xlu0 %2449  ;;  %v1346_v34 = vmul.f32 %v5159_v5, %v4270_v23  ;;  %v1333_v23 = vmul.f32 %v5159_v5, %v4130_v41  ;;  %v2294_v41 = vld [vmem:[%s6603_s6 + $0x230] sm:$0xff] }
 0x21d   :  { %v3012_v20 = vadd.f32 %v2455_v16, %v1901_v48  ;;  %v1903_v8 = vpop.f32.mrf.mxu0  ;;  %v3011_v30 = vadd.f32 %v2450_v40, %v1898_v37  ;;  %v5603_v52 = vpop.f32.mrf.mxu1  ;;  %v1428_v37 = vmul.f32 %v5159_v5, %v5191_v22 }
 0x21e   :  { %v1904_v61 = vadd.f32 %v1903_v8, %v1331_v35  ;;  %v1949_v16 = vadd.f32 %v4936_v28, %v1346_v34  ;;  %v2295_v28 = vld [vmem:[%s6603_s6 + $0x238] sm:$0xff] }
 0x21f   :  { %3146 = vst.msk [vmem:[%s6604_s9 + $0xa0] sm:$0xff] %vm3120_vm0, %v3012_v20 }
 0x220   :  { %3145 = vst.msk [vmem:[%s6604_s9 + $0x98] sm:$0xff] %vm3120_vm0, %v3011_v30  ;;  %v3013_v56 = vadd.f32 %v5498_v43, %v1904_v61  ;;  %v1332_v43 = vmul.f32 %v5159_v5, %v4174_v9  ;;  %v2291_v9 = vld [vmem:[%s6603_s6 + $0x218] sm:$0xff] }
 0x221   :  { %2684 = vperm.xlu2 %3400, %v2290_v57   ;;  %2679 = vperm.xlu1 %3399, %v2289_v55  }
 0x222   :  { %3147 = vst.msk [vmem:[%s6604_s9 + $0xa8] sm:$0xff] %vm3120_vm0, %v3013_v56  ;;  %2674 = vperm.xlu0 %3398, %v2288_v11   ;;  %v2296_v11 = vld [vmem:[%s6603_s6 + $0x240] sm:$0xff]  ;;  %v5674_v56 = vpop.f32.mrf.mxu2 }
 0x223   :  { %v5632_v24 = vpop.f32.mrf.mxu3  ;;  %v2520_v45 = vpop.permute.xlu2 %2519 }
 0x224   :  { %v2470_v46 = vpop.permute.xlu1 %2469  ;;  %v3025_v63 = vadd.f32 %v2520_v45, %v1940_v29  ;;  %v2465_v58 = vpop.permute.xlu0 %2464  ;;  %v1349_v29 = vmul.f32 %v5159_v5, %v4305_v49  ;;  %v1429_v45 = vmul.f32 %v5159_v5, %v5070_v53  ;;  %v1334_v49 = vmul.f32 %v5159_v5, %v4192_v33  ;;  %v2297_v33 = vld [vmem:[%s6603_s6 + $0x248] sm:$0xff] }
 0x225   :  { %v1906_v31 = vpop.f32.mrf.mxu0  ;;  %v5636_v15 = vpop.f32.mrf.mxu1 }
 0x226   :  { %v1907_v2 = vadd.f32 %v1906_v31, %v1332_v43  ;;  %3159 = vst.msk [vmem:[%s6604_s9 + $0x108] sm:$0xff] %vm3120_vm0, %v3025_v63  ;;  %v1958_v43 = vadd.f32 %v5051_v17, %v1349_v29  ;;  %v2299_v17 = vld [vmem:[%s6603_s6 + $0x258] sm:$0xff] }
 0x228   :  { %v3014_v48 = vadd.f32 %v2465_v58, %v1907_v2 }
 0x229   :  { %2699 = vperm.xlu2 %3400, %v2293_v18   ;;  %2694 = vperm.xlu1 %3399, %v2292_v6  }
 0x22a   :  { %3148 = vst.msk [vmem:[%s6604_s9 + $0xb0] sm:$0xff] %vm3120_vm0, %v3014_v48  ;;  %2689 = vperm.xlu0 %3398, %v2291_v9   ;;  %v2298_v48 = vld [vmem:[%s6603_s6 + $0x250] sm:$0xff] }
 0x22b   :  { %v2194_v35 = vpop.f32.mrf.mxu3  ;;  %v2535_v40 = vpop.permute.xlu2 %2534 }
 0x22c   :  { %v5660_v20 = vadd.f32 %v2194_v35, %v1428_v37  ;;  %v5662_v8 = vpop.permute.xlu1 %2484  ;;  %v3028_v30 = vadd.f32 %v2535_v40, %v1949_v16  ;;  %v2480_v61 = vpop.permute.xlu0 %2479  ;;  %v1352_v37 = vmul.f32 %v5159_v5, %v4336_v4  ;;  %v6726_v16 = vld [vmem:[#allocation4_spill] sm:$0xff]  ;;  %v6729_v4 = vld [vmem:[#allocation6_spill] sm:$0xff] }
 0x22d   :  { %v1909_v22 = vpop.f32.mrf.mxu0  ;;  %v5666_v55 = vpop.f32.mrf.mxu1  ;;  %v1342_v35 = vmul.f32 %v5159_v5, %v6726_v16  ;;  %v6733_v16 = vld [vmem:[#allocation77_spill] sm:$0xff] }
 0x22e   :  { %v1910_v57 = vadd.f32 %v1909_v22, %v1333_v23  ;;  %3162 = vst.msk [vmem:[%s6604_s9 + $0x120] sm:$0xff] %vm3120_vm0, %v3028_v30  ;;  %v5720_v40 = vpop.f32.mrf.mxu2  ;;  %v6727_v23 = vld [vmem:[#allocation63_spill] sm:$0xff] }
 0x22f   :  { %v1937_v30 = vadd.f32 %v6727_v23, %v1342_v35  ;;  %v6728_v22 = vld [vmem:[#allocation107_spill] sm:$0xff] }
 0x230   :  { %v3015_v26 = vadd.f32 %v2470_v46, %v1910_v57 }
 0x231   :  { %2714 = vperm.xlu2 %3400, %v2296_v11   ;;  %2709 = vperm.xlu1 %3399, %v2295_v28   ;;  %v1335_v28 = vmul.f32 %v5159_v5, %v6729_v4 }
 0x232   :  { %3149 = vst.msk [vmem:[%s6604_s9 + $0xb8] sm:$0xff] %vm3120_vm0, %v3015_v26  ;;  %2704 = vperm.xlu0 %3398, %v2294_v41  }
 0x233   :  { %v2197_v63 = vpop.f32.mrf.mxu3  ;;  %v2550_v46 = vpop.permute.xlu2 %2549 }
 0x234   :  { %v5692_v58 = vadd.f32 %v2197_v63, %v1429_v45  ;;  %v5694_v31 = vpop.permute.xlu1 %2499  ;;  %v3031_v2 = vadd.f32 %v2550_v46, %v1958_v43  ;;  %v5698_v18 = vpop.permute.xlu0 %2494  ;;  %v2302_v46 = vld [vmem:[%s6603_s6 + $0x270] sm:$0xff] }
 0x235   :  { %v1912_v53 = vpop.f32.mrf.mxu0  ;;  %v5700_v9 = vpop.f32.mrf.mxu1 }
 0x236   :  { %v1913_v6 = vadd.f32 %v1912_v53, %v1334_v49  ;;  %3165 = vst.msk [vmem:[%s6604_s9 + $0x138] sm:$0xff] %vm3120_vm0, %v3031_v2  ;;  %v2301_v49 = vld [vmem:[%s6603_s6 + $0x268] sm:$0xff]  ;;  %v2300_v2 = vld [vmem:[%s6603_s6 + $0x260] sm:$0xff]  ;;  %v5763_v23 = vpop.f32.mrf.mxu2 }
 0x238   :  { %v3016_v34 = vadd.f32 %v5535_v54, %v1913_v6  ;;  %v1967_v54 = vadd.f32 %v6728_v22, %v1352_v37  ;;  %v6730_v6 = vld [vmem:[#allocation23_spill] sm:$0xff] }
 0x239   :  { %2729 = vperm.xlu2 %3400, %v2299_v17   ;;  %2724 = vperm.xlu1 %3399, %v2298_v48   ;;  %v1355_v17 = vmul.f32 %v5159_v5, %v6730_v6  ;;  %v6731_v48 = vld [vmem:[#allocation5_spill] sm:$0xff] }
 0x23a   :  { %3150 = vst.msk [vmem:[%s6604_s9 + $0xc0] sm:$0xff] %vm3120_vm0, %v3016_v34  ;;  %2719 = vperm.xlu0 %3398, %v2297_v33   ;;  %v1345_v33 = vmul.f32 %v5159_v5, %v6731_v48  ;;  %v6732_v34 = vld [vmem:[#allocation14_spill] sm:$0xff] }
 0x23b   :  { %v2565_v57 = vpop.permute.xlu2 %2564  ;;  %v1344_v37 = vmul.f32 %v5159_v5, %v6732_v34 }
 0x23c   :  { %v2515_v11 = vpop.permute.xlu1 %2514  ;;  %v3034_v41 = vadd.f32 %v2565_v57, %v1967_v54  ;;  %v5730_v29 = vpop.permute.xlu0 %2509  ;;  %v1946_v35 = vadd.f32 %v6733_v16, %v1345_v33  ;;  %v6737_v33 = vld [vmem:[#allocation7_spill] sm:$0xff] }
 0x23d   :  { %v3024_v26 = vadd.f32 %v2515_v11, %v1937_v30  ;;  %v1915_v45 = vpop.f32.mrf.mxu0  ;;  %v5732_v63 = vpop.f32.mrf.mxu1  ;;  %v6734_v30 = vld [vmem:[#allocation72_spill] sm:$0xff]  ;;  %v6735_v11 = vld [vmem:[#allocation2_spill] sm:$0xff]  ;;  %v1348_v34 = vmul.f32 %v5159_v5, %v6737_v33 }
 0x23e   :  { %v1916_v43 = vadd.f32 %v1915_v45, %v1335_v28  ;;  %3168 = vst.msk [vmem:[%s6604_s9 + $0x150] sm:$0xff] %vm3120_vm0, %v3034_v41  ;;  %v1943_v22 = vadd.f32 %v6734_v30, %v1344_v37  ;;  %v1336_v4 = vmul.f32 %v5159_v5, %v6735_v11  ;;  %v6738_v37 = vld [vmem:[#allocation16_spill] sm:$0xff]  ;;  %v6740_v30 = vld [vmem:[#allocation87_spill] sm:$0xff]  ;;  %v6741_v11 = vld [vmem:[#allocation9_spill] sm:$0xff] }
 0x23f   :  { %3158 = vst.msk [vmem:[%s6604_s9 + $0x100] sm:$0xff] %vm3120_vm0, %v3024_v26  ;;  %v1347_v16 = vmul.f32 %v5159_v5, %v6738_v37 }
 0x240   :  { %v3017_v53 = vadd.f32 %v2480_v61, %v1916_v43  ;;  %v1976_v61 = vadd.f32 %v5297_v42, %v1355_v17  ;;  %v2305_v42 = vld [vmem:[%s6603_s6 + $0x288] sm:$0xff]  ;;  %v6736_v17 = vld [vmem:[#allocation26_spill] sm:$0xff] }
 0x241   :  { %2744 = vperm.xlu2 %3400, %v2302_v46   ;;  %2739 = vperm.xlu1 %3399, %v2301_v49   ;;  %v1358_v48 = vmul.f32 %v5159_v5, %v6736_v17 }
 0x242   :  { %3151 = vst.msk [vmem:[%s6604_s9 + $0xc8] sm:$0xff] %vm3120_vm0, %v3017_v53  ;;  %2734 = vperm.xlu0 %3398, %v2300_v2   ;;  %v2304_v2 = vld [vmem:[%s6603_s6 + $0x280] sm:$0xff]  ;;  %v2303_v53 = vld [vmem:[%s6603_s6 + $0x278] sm:$0xff] }
 0x243   :  { %v2580_v54 = vpop.permute.xlu2 %2579 }
 0x244   :  { %v2530_v57 = vpop.permute.xlu1 %2529  ;;  %v3037_v28 = vadd.f32 %v2580_v54, %v1976_v61  ;;  %v2525_v26 = vpop.permute.xlu0 %2524  ;;  %v1985_v61 = vadd.f32 %v5430_v51, %v1358_v48  ;;  %v2307_v51 = vld [vmem:[%s6603_s6 + $0x298] sm:$0xff] }
 0x245   :  { %v3027_v41 = vadd.f32 %v2530_v57, %v1946_v35  ;;  %v1918_v45 = vpop.f32.mrf.mxu0  ;;  %v3026_v43 = vadd.f32 %v2525_v26, %v1943_v22  ;;  %v5768_v49 = vpop.f32.mrf.mxu1  ;;  %v1952_v22 = vadd.f32 %v6740_v30, %v1347_v16  ;;  %v6742_v48 = vld [vmem:[#allocation29_spill] sm:$0xff]  ;;  %v6744_v16 = vld [vmem:[#allocation18_spill] sm:$0xff]  ;;  %v6746_v30 = vld [vmem:[#allocation99_spill] sm:$0xff] }
 0x246   :  { %v1919_v46 = vadd.f32 %v1918_v45, %v1336_v4  ;;  %3171 = vst.msk [vmem:[%s6604_s9 + $0x168] sm:$0xff] %vm3120_vm0, %v3037_v28  ;;  %v1337_v4 = vmul.f32 %v5159_v5, %v6741_v11  ;;  %v1361_v33 = vmul.f32 %v5159_v5, %v6742_v48  ;;  %v6747_v11 = vld [vmem:[#allocation8_spill] sm:$0xff] }
 0x247   :  { %3161 = vst.msk [vmem:[%s6604_s9 + $0x118] sm:$0xff] %vm3120_vm0, %v3027_v41  ;;  %v6748_v48 = vld [vmem:[#allocation32_spill] sm:$0xff] }
 0x248   :  { %v3018_v6 = vadd.f32 %v5662_v8, %v1919_v46  ;;  %3160 = vst.msk [vmem:[%s6604_s9 + $0x110] sm:$0xff] %vm3120_vm0, %v3026_v43  ;;  %v6739_v8 = vld [vmem:[#allocation92_spill] sm:$0xff] }
 0x249   :  { %2759 = vperm.xlu2 %3400, %v2305_v42   ;;  %2754 = vperm.xlu1 %3399, %v2304_v2   ;;  %v1955_v35 = vadd.f32 %v6739_v8, %v1348_v34  ;;  %v2308_v2 = vld [vmem:[%s6603_s6 + $0x2a0] sm:$0xff]  ;;  %v1350_v8 = vmul.f32 %v5159_v5, %v6744_v16 }
 0x24a   :  { %3152 = vst.msk [vmem:[%s6604_s9 + $0xd0] sm:$0xff] %vm3120_vm0, %v3018_v6  ;;  %2749 = vperm.xlu0 %3398, %v2303_v53   ;;  %v5815_v53 = vpop.f32.mrf.mxu2  ;;  %v2306_v6 = vld [vmem:[%s6603_s6 + $0x290] sm:$0xff]  ;;  %v6743_v34 = vld [vmem:[#allocation10_spill] sm:$0xff] }
 0x24b   :  { %v2595_v54 = vpop.permute.xlu2 %2594  ;;  %v1351_v37 = vmul.f32 %v5159_v5, %v6743_v34  ;;  %v6749_v34 = vld [vmem:[#allocation13_spill] sm:$0xff] }
 0x24c   :  { %v2545_v57 = vpop.permute.xlu1 %2544  ;;  %v3040_v28 = vadd.f32 %v2595_v54, %v1985_v61  ;;  %v2540_v26 = vpop.permute.xlu0 %2539  ;;  %v1994_v61 = vadd.f32 %v5537_v44, %v1361_v33  ;;  %v2310_v44 = vld [vmem:[%s6603_s6 + $0x2b0] sm:$0xff]  ;;  %v1364_v33 = vmul.f32 %v5159_v5, %v6748_v48  ;;  %v6754_v48 = vld [vmem:[#allocation15_spill] sm:$0xff] }
 0x24d   :  { %v3030_v41 = vadd.f32 %v2545_v57, %v1955_v35  ;;  %v1921_v45 = vpop.f32.mrf.mxu0  ;;  %v3029_v43 = vadd.f32 %v2540_v26, %v1952_v22  ;;  %v5807_v42 = vpop.f32.mrf.mxu1  ;;  %v1961_v22 = vadd.f32 %v6746_v30, %v1350_v8  ;;  %v6750_v8 = vld [vmem:[#allocation20_spill] sm:$0xff]  ;;  %v6752_v30 = vld [vmem:[#allocation110_spill] sm:$0xff] }
 0x24e   :  { %v1922_v46 = vadd.f32 %v1921_v45, %v1337_v4  ;;  %3174 = vst.msk [vmem:[%s6604_s9 + $0x180] sm:$0xff] %vm3120_vm0, %v3040_v28  ;;  %v1338_v4 = vmul.f32 %v5159_v5, %v6747_v11  ;;  %v6753_v11 = vld [vmem:[#allocation3_spill] sm:$0xff] }
 0x24f   :  { %3164 = vst.msk [vmem:[%s6604_s9 + $0x130] sm:$0xff] %vm3120_vm0, %v3030_v41 }
 0x250   :  { %v3019_v17 = vadd.f32 %v5568_v59, %v1922_v46  ;;  %3163 = vst.msk [vmem:[%s6604_s9 + $0x128] sm:$0xff] %vm3120_vm0, %v3029_v43  ;;  %v6745_v59 = vld [vmem:[#allocation103_spill] sm:$0xff] }
 0x251   :  { %2774 = vperm.xlu2 %3400, %v2308_v2   ;;  %2769 = vperm.xlu1 %3399, %v2307_v51   ;;  %v1964_v35 = vadd.f32 %v6745_v59, %v1351_v37  ;;  %v2311_v51 = vld [vmem:[%s6603_s6 + $0x2b8] sm:$0xff]  ;;  %v1354_v37 = vmul.f32 %v5159_v5, %v6749_v34  ;;  %v1353_v59 = vmul.f32 %v5159_v5, %v6750_v8  ;;  %v6755_v34 = vld [vmem:[#allocation35_spill] sm:$0xff]  ;;  %v6756_v8 = vld [vmem:[#allocation22_spill] sm:$0xff] }
 0x252   :  { %3153 = vst.msk [vmem:[%s6604_s9 + $0xd8] sm:$0xff] %vm3120_vm0, %v3019_v17  ;;  %2764 = vperm.xlu0 %3398, %v2306_v6   ;;  %v2309_v6 = vld [vmem:[%s6603_s6 + $0x2a8] sm:$0xff]  ;;  %v5872_v16 = vpop.f32.mrf.mxu2 }
 0x253   :  { %v2610_v54 = vpop.permute.xlu2 %2609 }
 0x254   :  { %v2560_v57 = vpop.permute.xlu1 %2559  ;;  %v3043_v28 = vadd.f32 %v2610_v54, %v1994_v61  ;;  %v2555_v26 = vpop.permute.xlu0 %2554  ;;  %v2003_v61 = vadd.f32 %v5636_v15, %v1364_v33  ;;  %v2313_v15 = vld [vmem:[%s6603_s6 + $0x2c8] sm:$0xff]  ;;  %v1357_v33 = vmul.f32 %v5159_v5, %v6754_v48  ;;  %v6760_v48 = vld [vmem:[#allocation25_spill] sm:$0xff] }
 0x255   :  { %v3033_v41 = vadd.f32 %v2560_v57, %v1964_v35  ;;  %v1924_v45 = vpop.f32.mrf.mxu0  ;;  %v3032_v43 = vadd.f32 %v2555_v26, %v1961_v22  ;;  %v5848_v2 = vpop.f32.mrf.mxu1  ;;  %v1970_v22 = vadd.f32 %v6752_v30, %v1353_v59  ;;  %v1356_v59 = vmul.f32 %v5159_v5, %v6756_v8 }
 0x256   :  { %v1925_v46 = vadd.f32 %v1924_v45, %v1338_v4  ;;  %3177 = vst.msk [vmem:[%s6604_s9 + $0x198] sm:$0xff] %vm3120_vm0, %v3043_v28  ;;  %v1339_v4 = vmul.f32 %v5159_v5, %v6753_v11 }
 0x257   :  { %3167 = vst.msk [vmem:[%s6604_s9 + $0x148] sm:$0xff] %vm3120_vm0, %v3033_v41 }
 0x258   :  { %v3020_v17 = vadd.f32 %v5698_v18, %v1925_v46  ;;  %3166 = vst.msk [vmem:[%s6604_s9 + $0x140] sm:$0xff] %vm3120_vm0, %v3032_v43  ;;  %v6751_v18 = vld [vmem:[#allocation115_spill] sm:$0xff] }
 0x259   :  { %2789 = vperm.xlu2 %3400, %v2311_v51   ;;  %2784 = vperm.xlu1 %3399, %v2310_v44   ;;  %v1973_v35 = vadd.f32 %v6751_v18, %v1354_v37  ;;  %v2314_v44 = vld [vmem:[%s6603_s6 + $0x2d0] sm:$0xff]  ;;  %v1367_v37 = vmul.f32 %v5159_v5, %v6755_v34 }
 0x25a   :  { %3154 = vst.msk [vmem:[%s6604_s9 + $0xe0] sm:$0xff] %vm3120_vm0, %v3020_v17  ;;  %2779 = vperm.xlu0 %3398, %v2309_v6   ;;  %v2312_v6 = vld [vmem:[%s6603_s6 + $0x2c0] sm:$0xff]  ;;  %v5924_v18 = vpop.f32.mrf.mxu2 }
 0x25b   :  { %v2625_v54 = vpop.permute.xlu2 %2624 }
 0x25c   :  { %v2575_v57 = vpop.permute.xlu1 %2574  ;;  %v3046_v28 = vadd.f32 %v2625_v54, %v2003_v61  ;;  %v2570_v26 = vpop.permute.xlu0 %2569  ;;  %v1979_v61 = vadd.f32 %v5343_v19, %v1356_v59  ;;  %v6757_v54 = vld [vmem:[#allocation12_spill] sm:$0xff]  ;;  %v2316_v19 = vld [vmem:[%s6603_s6 + $0x2e0] sm:$0xff] }
 0x25d   :  { %v3036_v41 = vadd.f32 %v2575_v57, %v1973_v35  ;;  %v1927_v45 = vpop.f32.mrf.mxu0  ;;  %v3035_v43 = vadd.f32 %v2570_v26, %v1970_v22  ;;  %v5889_v51 = vpop.f32.mrf.mxu1  ;;  %v2012_v35 = vadd.f32 %v5732_v63, %v1367_v37  ;;  %v1340_v57 = vmul.f32 %v5159_v5, %v6757_v54  ;;  %v2315_v63 = vld [vmem:[%s6603_s6 + $0x2d8] sm:$0xff] }
 0x25e   :  { %v1928_v46 = vadd.f32 %v1927_v45, %v1339_v4  ;;  %3180 = vst.msk [vmem:[%s6604_s9 + $0x1b0] sm:$0xff] %vm3120_vm0, %v3046_v28 }
 0x25f   :  { %3170 = vst.msk [vmem:[%s6604_s9 + $0x160] sm:$0xff] %vm3120_vm0, %v3036_v41 }
 0x260   :  { %v3021_v17 = vadd.f32 %v5694_v31, %v1928_v46  ;;  %3169 = vst.msk [vmem:[%s6604_s9 + $0x158] sm:$0xff] %vm3120_vm0, %v3035_v43  ;;  %v1982_v31 = vadd.f32 %v5387_v25, %v1357_v33  ;;  %v2317_v25 = vld [vmem:[%s6603_s6 + $0x2e8] sm:$0xff]  ;;  %v1359_v33 = vmul.f32 %v5159_v5, %v6760_v48 }
 0x261   :  { %2804 = vperm.xlu2 %3400, %v2314_v44   ;;  %2799 = vperm.xlu1 %3399, %v2313_v15   ;;  %v6758_v44 = vld [vmem:[#allocation17_spill] sm:$0xff] }
 0x262   :  { %3155 = vst.msk [vmem:[%s6604_s9 + $0xe8] sm:$0xff] %vm3120_vm0, %v3021_v17  ;;  %2794 = vperm.xlu0 %3398, %v2312_v6   ;;  %v1360_v15 = vmul.f32 %v5159_v5, %v6758_v44  ;;  %v6759_v6 = vld [vmem:[#allocation38_spill] sm:$0xff]  ;;  %v1988_v37 = vadd.f32 %v5467_v3, %v1359_v33  ;;  %v5975_v3 = vpop.f32.mrf.mxu2 }
 0x263   :  { %v2640_v30 = vpop.permute.xlu2 %2639  ;;  %v1370_v17 = vmul.f32 %v5159_v5, %v6759_v6 }
 0x264   :  { %v2590_v22 = vpop.permute.xlu1 %2589  ;;  %v3049_v11 = vadd.f32 %v2640_v30, %v2012_v35  ;;  %v2585_v28 = vpop.permute.xlu0 %2584 }
 0x265   :  { %v3039_v4 = vadd.f32 %v2590_v22, %v1982_v31  ;;  %v1930_v41 = vpop.f32.mrf.mxu0  ;;  %v3038_v26 = vadd.f32 %v2585_v28, %v1979_v61  ;;  %v5930_v43 = vpop.f32.mrf.mxu1  ;;  %v2021_v34 = vadd.f32 %v5848_v2, %v1370_v17  ;;  %v6761_v31 = vld [vmem:[#allocation11_spill] sm:$0xff]  ;;  %v2318_v2 = vld [vmem:[%s6603_s6 + $0x2f0] sm:$0xff] }
 0x266   :  { %v1931_v45 = vadd.f32 %v1930_v41, %v1340_v57  ;;  %3183 = vst.msk [vmem:[%s6604_s9 + $0x1c8] sm:$0xff] %vm3120_vm0, %v3049_v11  ;;  %v1341_v35 = vmul.f32 %v5159_v5, %v6761_v31  ;;  %v6766_v31 = vld [vmem:[#allocation44_spill] sm:$0xff] }
 0x267   :  { %3173 = vst.msk [vmem:[%s6604_s9 + $0x178] sm:$0xff] %vm3120_vm0, %v3039_v4  ;;  %v2320_v4 = vld [vmem:[%s6603_s6 + $0x300] sm:$0xff] }
 0x268   :  { %v3022_v46 = vadd.f32 %v5599_v13, %v1931_v45  ;;  %3172 = vst.msk [vmem:[%s6604_s9 + $0x170] sm:$0xff] %vm3120_vm0, %v3038_v26  ;;  %v1991_v13 = vadd.f32 %v5502_v36, %v1360_v15  ;;  %v2319_v36 = vld [vmem:[%s6603_s6 + $0x2f8] sm:$0xff]  ;;  %v6762_v26 = vld [vmem:[#allocation19_spill] sm:$0xff] }
 0x269   :  { %2819 = vperm.xlu2 %3400, %v2317_v25   ;;  %2814 = vperm.xlu1 %3399, %v2316_v19   ;;  %v1363_v45 = vmul.f32 %v5159_v5, %v6762_v26  ;;  %v6763_v25 = vld [vmem:[#allocation41_spill] sm:$0xff] }
 0x26a   :  { %3156 = vst.msk [vmem:[%s6604_s9 + $0xf0] sm:$0xff] %vm3120_vm0, %v3022_v46  ;;  %2809 = vperm.xlu0 %3398, %v2315_v63   ;;  %v1373_v19 = vmul.f32 %v5159_v5, %v6763_v25  ;;  %v6764_v63 = vld [vmem:[#allocation28_spill] sm:$0xff] }
 0x26b   :  { %v2655_v8 = vpop.permute.xlu2 %2654  ;;  %v1362_v46 = vmul.f32 %v5159_v5, %v6764_v63  ;;  %v2326_v25 = vld [vmem:[%s6603_s6 + $0x330] sm:$0xff] }
 0x26c   :  { %v2605_v59 = vpop.permute.xlu1 %2604  ;;  %v3052_v61 = vadd.f32 %v2655_v8, %v2021_v34  ;;  %v2600_v22 = vpop.permute.xlu0 %2599  ;;  %v2322_v8 = vld [vmem:[%s6603_s6 + $0x310] sm:$0xff] }
 0x26d   :  { %v3042_v30 = vadd.f32 %v2605_v59, %v1991_v13  ;;  %v1933_v54 = vpop.f32.mrf.mxu0  ;;  %v3041_v57 = vadd.f32 %v2600_v22, %v1988_v37  ;;  %v2029_v41 = vpop.f32.mrf.mxu1  ;;  %v1997_v15 = vadd.f32 %v5570_v38, %v1362_v46  ;;  %v2323_v37 = vld [vmem:[%s6603_s6 + $0x318] sm:$0xff]  ;;  %v2321_v38 = vld [vmem:[%s6603_s6 + $0x308] sm:$0xff] }
 0x26e   :  { %v1934_v11 = vadd.f32 %v1933_v54, %v1341_v35  ;;  %3186 = vst.msk [vmem:[%s6604_s9 + $0x1e0] sm:$0xff] %vm3120_vm0, %v3052_v61  ;;  %v2030_v44 = vadd.f32 %v2029_v41, %v1373_v19  ;;  %v1376_v35 = vmul.f32 %v5159_v5, %v6766_v31  ;;  %v6026_v61 = vpop.f32.mrf.mxu2  ;;  %v6768_v54 = vld [vmem:[#allocation88_spill] sm:$0xff]  ;;  %v2325_v19 = vld [vmem:[%s6603_s6 + $0x328] sm:$0xff] }
 0x26f   :  { %3176 = vst.msk [vmem:[%s6604_s9 + $0x190] sm:$0xff] %vm3120_vm0, %v3042_v30  ;;  %v6767_v30 = vld [vmem:[#allocation31_spill] sm:$0xff] }
 0x270   :  { %v3023_v28 = vadd.f32 %v5730_v29, %v1934_v11  ;;  %3175 = vst.msk [vmem:[%s6604_s9 + $0x188] sm:$0xff] %vm3120_vm0, %v3041_v57  ;;  %v2000_v29 = vadd.f32 %v5603_v52, %v1363_v45  ;;  %v6765_v52 = vld [vmem:[#allocation21_spill] sm:$0xff]  ;;  %v1365_v22 = vmul.f32 %v5159_v5, %v6767_v30  ;;  %v2039_v57 = vadd.f32 %v6768_v54, %v1376_v35  ;;  %v6770_v46 = vld [vmem:[#allocation47_spill] sm:$0xff]  ;;  %v2328_v35 = vld [vmem:[%s6603_s6 + $0x340] sm:$0xff] }
 0x271   :  { %2834 = vperm.xlu2 %3400, %v2320_v4   ;;  %2829 = vperm.xlu1 %3399, %v2319_v36   ;;  %v1366_v59 = vmul.f32 %v5159_v5, %v6765_v52  ;;  %v2329_v31 = vld [vmem:[%s6603_s6 + $0x348] sm:$0xff] }
 0x272   :  { %3157 = vst.msk [vmem:[%s6604_s9 + $0xf8] sm:$0xff] %vm3120_vm0, %v3023_v28  ;;  %2824 = vperm.xlu0 %3398, %v2318_v2   ;;  %v2006_v4 = vadd.f32 %v5666_v55, %v1365_v22  ;;  %v2324_v55 = vld [vmem:[%s6603_s6 + $0x320] sm:$0xff]  ;;  %v6774_v22 = vld [vmem:[#allocation49_spill] sm:$0xff] }
 0x273   :  { %v2670_v6 = vpop.permute.xlu2 %2669  ;;  %v2009_v11 = vadd.f32 %v5700_v9, %v1366_v59  ;;  %v6769_v9 = vld [vmem:[#allocation24_spill] sm:$0xff]  ;;  %v1382_v54 = vmul.f32 %v5159_v5, %v6774_v22 }
 0x274   :  { %v2620_v17 = vpop.permute.xlu1 %2619  ;;  %v3055_v48 = vadd.f32 %v2670_v6, %v2030_v44  ;;  %v2615_v13 = vpop.permute.xlu0 %2614  ;;  %v1369_v63 = vmul.f32 %v5159_v5, %v6769_v9  ;;  %v6771_v44 = vld [vmem:[#allocation34_spill] sm:$0xff]  ;;  %v6772_v6 = vld [vmem:[#allocation104_spill] sm:$0xff] }
 0x275   :  { %v3045_v33 = vadd.f32 %v2620_v17, %v2000_v29  ;;  %v3044_v34 = vadd.f32 %v2615_v13, %v1997_v15  ;;  %v1379_v29 = vmul.f32 %v5159_v5, %v6770_v46  ;;  %v1368_v15 = vmul.f32 %v5159_v5, %v6771_v44  ;;  %v2332_v9 = vld [vmem:[%s6603_s6 + $0x360] sm:$0xff]  ;;  %v6777_v46 = vld [vmem:[#allocation52_spill] sm:$0xff] }
 0x276   :  { %3189 = vst.msk [vmem:[%s6604_s9 + $0x1f8] sm:$0xff] %vm3120_vm0, %v3055_v48  ;;  %v6065_v48 = vpop.f32.mrf.mxu2  ;;  %v6778_v44 = vld [vmem:[#allocation40_spill] sm:$0xff] }
 0x277   :  { %3179 = vst.msk [vmem:[%s6604_s9 + $0x1a8] sm:$0xff] %vm3120_vm0, %v3045_v33  ;;  %v2048_v17 = vadd.f32 %v6772_v6, %v1379_v29  ;;  %v2018_v33 = vadd.f32 %v5807_v42, %v1369_v63  ;;  %v2015_v13 = vadd.f32 %v5768_v49, %v1368_v15  ;;  %v2327_v49 = vld [vmem:[%s6603_s6 + $0x338] sm:$0xff]  ;;  %v6773_v42 = vld [vmem:[#allocation27_spill] sm:$0xff]  ;;  %v1385_v29 = vmul.f32 %v5159_v5, %v6777_v46  ;;  %v6786_v46 = vld [vmem:[#allocation36_spill] sm:$0xff] }
 0x278   :  { %3178 = vst.msk [vmem:[%s6604_s9 + $0x1a0] sm:$0xff] %vm3120_vm0, %v3044_v34  ;;  %v1372_v30 = vmul.f32 %v5159_v5, %v6773_v42  ;;  %v1374_v15 = vmul.f32 %v5159_v5, %v6778_v44  ;;  %v6779_v6 = vld [vmem:[#allocation83_spill] sm:$0xff] }
 0x279   :  { %2849 = vperm.xlu2 %3400, %v2323_v37   ;;  %2844 = vperm.xlu1 %3399, %v2322_v8   ;;  %v6787_v44 = vld [vmem:[#allocation59_spill] sm:$0xff] }
 0x27a   :  { %2839 = vperm.xlu0 %3398, %v2321_v38  }
 0x27b   :  { %v2685_v36 = vpop.permute.xlu2 %2684 }
 0x27c   :  { %v2635_v2 = vpop.permute.xlu1 %2634  ;;  %v3058_v28 = vadd.f32 %v2685_v36, %v2039_v57  ;;  %v2630_v26 = vpop.permute.xlu0 %2629  ;;  %v6775_v57 = vld [vmem:[#allocation37_spill] sm:$0xff]  ;;  %v2027_v36 = vadd.f32 %v5930_v43, %v1372_v30  ;;  %v6776_v43 = vld [vmem:[#allocation30_spill] sm:$0xff] }
 0x27d   :  { %v3048_v41 = vadd.f32 %v2635_v2, %v2009_v11  ;;  %v3047_v45 = vadd.f32 %v2630_v26, %v2006_v4  ;;  %v1371_v11 = vmul.f32 %v5159_v5, %v6775_v57  ;;  %v2057_v4 = vadd.f32 %v5320_v0, %v1382_v54  ;;  %v2331_v0 = vld [vmem:[%s6603_s6 + $0x358] sm:$0xff]  ;;  %v6782_v54 = vld [vmem:[#allocation55_spill] sm:$0xff] }
 0x27e   :  { %3192 = vst.msk [vmem:[%s6604_s9 + $0x210] sm:$0xff] %vm3120_vm0, %v3058_v28  ;;  %v6099_v26 = vpop.f32.mrf.mxu2  ;;  %v1375_v63 = vmul.f32 %v5159_v5, %v6776_v43  ;;  %v6781_v30 = vld [vmem:[#allocation33_spill] sm:$0xff]  ;;  %v1388_v57 = vmul.f32 %v5159_v5, %v6782_v54  ;;  %v2338_v43 = vld [vmem:[%s6603_s6 + $0x390] sm:$0xff]  ;;  %v6791_v54 = vld [vmem:[#allocation39_spill] sm:$0xff] }
 0x27f   :  { %3182 = vst.msk [vmem:[%s6604_s9 + $0x1c0] sm:$0xff] %vm3120_vm0, %v3048_v41  ;;  %v2024_v2 = vadd.f32 %v5889_v51, %v1371_v11  ;;  %v2330_v51 = vld [vmem:[%s6603_s6 + $0x350] sm:$0xff]  ;;  %v1378_v22 = vmul.f32 %v5159_v5, %v6781_v30  ;;  %v6783_v11 = vld [vmem:[#allocation43_spill] sm:$0xff] }
 0x280   :  { %3181 = vst.msk [vmem:[%s6604_s9 + $0x1b8] sm:$0xff] %vm3120_vm0, %v3047_v45  ;;  %v2341_v30 = vld [vmem:[%s6603_s6 + $0x3a8] sm:$0xff] }
 0x281   :  { %2864 = vperm.xlu2 %3400, %v2326_v25   ;;  %2859 = vperm.xlu1 %3399, %v2325_v19  }
 0x282   :  { %2854 = vperm.xlu0 %3398, %v2324_v55  }
 0x283   :  { %v2700_v34 = vpop.permute.xlu2 %2699 }
 0x284   :  { %v2650_v37 = vpop.permute.xlu1 %2649  ;;  %v3061_v8 = vadd.f32 %v2700_v34, %v2048_v17  ;;  %v2645_v52 = vpop.permute.xlu0 %2644  ;;  %v2036_v17 = vadd.f32 %v6779_v6, %v1375_v63  ;;  %v2337_v63 = vld [vmem:[%s6603_s6 + $0x388] sm:$0xff] }
 0x285   :  { %v3051_v38 = vadd.f32 %v2650_v37, %v2018_v33  ;;  %v3050_v59 = vadd.f32 %v2645_v52, %v2015_v13  ;;  %v2066_v33 = vadd.f32 %v5493_v50, %v1385_v29  ;;  %v6780_v13 = vld [vmem:[#allocation78_spill] sm:$0xff]  ;;  %v2333_v50 = vld [vmem:[%s6603_s6 + $0x368] sm:$0xff]  ;;  %v1381_v29 = vmul.f32 %v5159_v5, %v6786_v46 }
 0x286   :  { %3195 = vst.msk [vmem:[%s6604_s9 + $0x228] sm:$0xff] %vm3120_vm0, %v3061_v8  ;;  %v2033_v34 = vadd.f32 %v6780_v13, %v1374_v15  ;;  %v6137_v42 = vpop.f32.mrf.mxu2  ;;  %v1391_v15 = vmul.f32 %v5159_v5, %v6787_v44  ;;  %v6789_v13 = vld [vmem:[#allocation116_spill] sm:$0xff]  ;;  %v6795_v46 = vld [vmem:[#allocation67_spill] sm:$0xff] }
 0x287   :  { %3185 = vst.msk [vmem:[%s6604_s9 + $0x1d8] sm:$0xff] %vm3120_vm0, %v3051_v38  ;;  %v6796_v44 = vld [vmem:[#allocation51_spill] sm:$0xff] }
 0x288   :  { %3184 = vst.msk [vmem:[%s6604_s9 + $0x1d0] sm:$0xff] %vm3120_vm0, %v3050_v59 }
 0x289   :  { %2879 = vperm.xlu2 %3400, %v2329_v31   ;;  %2874 = vperm.xlu1 %3399, %v2328_v35   ;;  %v2335_v35 = vld [vmem:[%s6603_s6 + $0x378] sm:$0xff] }
 0x28a   :  { %2869 = vperm.xlu0 %3398, %v2327_v49   ;;  %v2334_v49 = vld [vmem:[%s6603_s6 + $0x370] sm:$0xff] }
 0x28b   :  { %v2715_v28 = vpop.permute.xlu2 %2714 }
 0x28c   :  { %v2665_v41 = vpop.permute.xlu1 %2664  ;;  %v3064_v45 = vadd.f32 %v2715_v28, %v2057_v4  ;;  %v2660_v19 = vpop.permute.xlu0 %2659  ;;  %v1377_v4 = vmul.f32 %v5159_v5, %v6783_v11  ;;  %v2075_v28 = vadd.f32 %v5630_v47, %v1388_v57  ;;  %v2336_v47 = vld [vmem:[%s6603_s6 + $0x380] sm:$0xff]  ;;  %v1384_v57 = vmul.f32 %v5159_v5, %v6791_v54 }
 0x28d   :  { %v3054_v25 = vadd.f32 %v2665_v41, %v2027_v36  ;;  %v3053_v55 = vadd.f32 %v2660_v19, %v2024_v2  ;;  %v6784_v36 = vld [vmem:[#allocation100_spill] sm:$0xff]  ;;  %v6792_v11 = vld [vmem:[#allocation62_spill] sm:$0xff] }
 0x28e   :  { %3198 = vst.msk [vmem:[%s6604_s9 + $0x240] sm:$0xff] %vm3120_vm0, %v3064_v45  ;;  %v2045_v2 = vadd.f32 %v6784_v36, %v1378_v22  ;;  %v6785_v41 = vld [vmem:[#allocation96_spill] sm:$0xff]  ;;  %v6184_v6 = vpop.f32.mrf.mxu2  ;;  %v2340_v22 = vld [vmem:[%s6603_s6 + $0x3a0] sm:$0xff] }
 0x28f   :  { %3188 = vst.msk [vmem:[%s6604_s9 + $0x1f0] sm:$0xff] %vm3120_vm0, %v3054_v25  ;;  %v2042_v45 = vadd.f32 %v6785_v41, %v1377_v4  ;;  %v1394_v4 = vmul.f32 %v5159_v5, %v6792_v11  ;;  %v6793_v36 = vld [vmem:[#allocation48_spill] sm:$0xff] }
 0x290   :  { %3187 = vst.msk [vmem:[%s6604_s9 + $0x1e8] sm:$0xff] %vm3120_vm0, %v3053_v55 }
 0x291   :  { %2894 = vperm.xlu2 %3400, %v2332_v9   ;;  %2889 = vperm.xlu1 %3399, %v2331_v0   ;;  %v2093_v41 = vadd.f32 %v5924_v18, %v1394_v4  ;;  %v6794_v18 = vld [vmem:[#allocation42_spill] sm:$0xff] }
 0x292   :  { %2884 = vperm.xlu0 %3398, %v2330_v51  }
 0x293   :  { %v2730_v37 = vpop.permute.xlu2 %2729 }
 0x294   :  { %v2680_v8 = vpop.permute.xlu1 %2679  ;;  %v3067_v38 = vadd.f32 %v2730_v37, %v2066_v33  ;;  %v2675_v59 = vpop.permute.xlu0 %2674  ;;  %v2084_v37 = vadd.f32 %v5763_v23, %v1391_v15  ;;  %v2339_v23 = vld [vmem:[%s6603_s6 + $0x398] sm:$0xff]  ;;  %v1386_v15 = vmul.f32 %v5159_v5, %v6796_v44 }
 0x295   :  { %v3057_v52 = vadd.f32 %v2680_v8, %v2036_v17  ;;  %v3056_v31 = vadd.f32 %v2675_v59, %v2033_v34  ;;  %v6788_v17 = vld [vmem:[#allocation46_spill] sm:$0xff]  ;;  %v2054_v34 = vadd.f32 %v6789_v13, %v1381_v29  ;;  %v6790_v8 = vld [vmem:[#allocation111_spill] sm:$0xff]  ;;  %v1397_v29 = vmul.f32 %v5159_v5, %v6795_v46 }
 0x296   :  { %3201 = vst.msk [vmem:[%s6604_s9 + $0x258] sm:$0xff] %vm3120_vm0, %v3067_v38  ;;  %v1380_v33 = vmul.f32 %v5159_v5, %v6788_v17  ;;  %v2069_v13 = vadd.f32 %v5545_v62, %v1386_v15  ;;  %v2345_v62 = vld [vmem:[%s6603_s6 + $0x3c8] sm:$0xff] }
 0x297   :  { %3191 = vst.msk [vmem:[%s6604_s9 + $0x208] sm:$0xff] %vm3120_vm0, %v3057_v52 }
 0x298   :  { %3190 = vst.msk [vmem:[%s6604_s9 + $0x200] sm:$0xff] %vm3120_vm0, %v3056_v31  ;;  %v2051_v38 = vadd.f32 %v6790_v8, %v1380_v33  ;;  %v2102_v33 = vadd.f32 %v6065_v48, %v1397_v29  ;;  %v6797_v48 = vld [vmem:[#allocation45_spill] sm:$0xff] }
 0x299   :  { %2909 = vperm.xlu2 %3400, %v2335_v35   ;;  %2904 = vperm.xlu1 %3399, %v2334_v49  }
 0x29a   :  { %2899 = vperm.xlu0 %3398, %v2333_v50  }
 0x29b   :  { %v2745_v25 = vpop.permute.xlu2 %2744 }
 0x29c   :  { %v2695_v19 = vpop.permute.xlu1 %2694  ;;  %v3070_v55 = vadd.f32 %v2745_v25, %v2075_v28  ;;  %v2690_v0 = vpop.permute.xlu0 %2689  ;;  %v2063_v28 = vadd.f32 %v5451_v7, %v1384_v57  ;;  %v2343_v7 = vld [vmem:[%s6603_s6 + $0x3b8] sm:$0xff] }
 0x29d   :  { %v3060_v9 = vadd.f32 %v2695_v19, %v2045_v2  ;;  %v3059_v51 = vadd.f32 %v2690_v0, %v2042_v45  ;;  %v1383_v2 = vmul.f32 %v5159_v5, %v6793_v36  ;;  %v6224_v45 = vpop.f32.mrf.mxu2 }
 0x29e   :  { %3204 = vst.msk [vmem:[%s6604_s9 + $0x270] sm:$0xff] %vm3120_vm0, %v3070_v55 }
 0x29f   :  { %3194 = vst.msk [vmem:[%s6604_s9 + $0x220] sm:$0xff] %vm3120_vm0, %v3060_v9  ;;  %v2060_v25 = vadd.f32 %v5395_v27, %v1383_v2  ;;  %v2342_v27 = vld [vmem:[%s6603_s6 + $0x3b0] sm:$0xff] }
 0x2a0   :  { %3193 = vst.msk [vmem:[%s6604_s9 + $0x218] sm:$0xff] %vm3120_vm0, %v3059_v51 }
 0x2a1   :  { %2924 = vperm.xlu2 %3400, %v2338_v43   ;;  %2919 = vperm.xlu1 %3399, %v2337_v63   ;;  %v2344_v63 = vld [vmem:[%s6603_s6 + $0x3c0] sm:$0xff] }
 0x2a2   :  { %2914 = vperm.xlu0 %3398, %v2336_v47   ;;  %v1387_v47 = vmul.f32 %v5159_v5, %v6794_v18 }
 0x2a3   :  { %v2760_v52 = vpop.permute.xlu2 %2759 }
 0x2a4   :  { %v2710_v59 = vpop.permute.xlu1 %2709  ;;  %v3073_v31 = vadd.f32 %v2760_v52, %v2084_v37  ;;  %v2705_v49 = vpop.permute.xlu0 %2704  ;;  %v2072_v17 = vadd.f32 %v5589_v12, %v1387_v47  ;;  %v2346_v12 = vld [vmem:[%s6603_s6 + $0x3d0] sm:$0xff] }
 0x2a5   :  { %v3063_v35 = vadd.f32 %v2710_v59, %v2054_v34  ;;  %v3062_v50 = vadd.f32 %v2705_v49, %v2051_v38  ;;  %v6257_v59 = vpop.f32.mrf.mxu2  ;;  %v1390_v49 = vmul.f32 %v5159_v5, %v6797_v48 }
 0x2a6   :  { %3207 = vst.msk [vmem:[%s6604_s9 + $0x288] sm:$0xff] %vm3120_vm0, %v3073_v31 }
 0x2a7   :  { %3197 = vst.msk [vmem:[%s6604_s9 + $0x238] sm:$0xff] %vm3120_vm0, %v3063_v35  ;;  %v2347_v35 = vld [vmem:[%s6603_s6 + $0x3d8] sm:$0xff]  ;;  %v2081_v54 = vadd.f32 %v5720_v40, %v1390_v49 }
 0x2a8   :  { %3196 = vst.msk [vmem:[%s6604_s9 + $0x230] sm:$0xff] %vm3120_vm0, %v3062_v50  ;;  %v6798_v50 = vld [vmem:[#allocation71_spill] sm:$0xff] }
 0x2a9   :  { %2939 = vperm.xlu2 %3400, %v2341_v30   ;;  %2934 = vperm.xlu1 %3399, %v2340_v22   ;;  %v1400_v30 = vmul.f32 %v5159_v5, %v6798_v50  ;;  %v6799_v22 = vld [vmem:[#allocation54_spill] sm:$0xff] }
 0x2aa   :  { %2929 = vperm.xlu0 %3398, %v2339_v23   ;;  %v1389_v23 = vmul.f32 %v5159_v5, %v6799_v22  ;;  %v6807_v22 = vld [vmem:[#allocation86_spill] sm:$0xff] }
 0x2ab   :  { %v2775_v19 = vpop.permute.xlu2 %2774  ;;  %v2111_v57 = vadd.f32 %v6184_v6, %v1400_v30  ;;  %v6800_v6 = vld [vmem:[#allocation50_spill] sm:$0xff] }
 0x2ac   :  { %v2725_v55 = vpop.permute.xlu1 %2724  ;;  %v3076_v9 = vadd.f32 %v2775_v19, %v2093_v41  ;;  %v2720_v51 = vpop.permute.xlu0 %2719  ;;  %v2078_v11 = vadd.f32 %v5674_v56, %v1389_v23  ;;  %v2350_v19 = vld [vmem:[%s6603_s6 + $0x3f0] sm:$0xff]  ;;  %v2348_v56 = vld [vmem:[%s6603_s6 + $0x3e0] sm:$0xff]  ;;  %v1409_v23 = vmul.f32 %v5159_v5, %v6807_v22 }
 0x2ad   :  { %v3066_v0 = vadd.f32 %v2725_v55, %v2063_v28  ;;  %v3065_v43 = vadd.f32 %v2720_v51, %v2060_v25  ;;  %v2349_v55 = vld [vmem:[%s6603_s6 + $0x3e8] sm:$0xff]  ;;  %v2119_v40 = vpop.f32.mrf.mxu2 }
 0x2ae   :  { %3210 = vst.msk [vmem:[%s6604_s9 + $0x2a0] sm:$0xff] %vm3120_vm0, %v3076_v9  ;;  %v1393_v9 = vmul.f32 %v5159_v5, %v6800_v6  ;;  %v6812_v6 = vld [vmem:[#allocation91_spill] sm:$0xff] }
 0x2af   :  { %3200 = vst.msk [vmem:[%s6604_s9 + $0x250] sm:$0xff] %vm3120_vm0, %v3066_v0  ;;  %v6801_v0 = vld [vmem:[#allocation76_spill] sm:$0xff] }
 0x2b0   :  { %3199 = vst.msk [vmem:[%s6604_s9 + $0x248] sm:$0xff] %vm3120_vm0, %v3065_v43  ;;  %v1403_v51 = vmul.f32 %v5159_v5, %v6801_v0  ;;  %v6802_v43 = vld [vmem:[#allocation58_spill] sm:$0xff] }
 0x2b1   :  { %2954 = vperm.xlu2 %3400, %v2344_v63   ;;  %2949 = vperm.xlu1 %3399, %v2343_v7   ;;  %v1392_v63 = vmul.f32 %v5159_v5, %v6802_v43  ;;  %v2090_v7 = vadd.f32 %v5872_v16, %v1393_v9  ;;  %v2351_v16 = vld [vmem:[%s6603_s6 + $0x3f8] sm:$0xff]  ;;  %v1412_v9 = vmul.f32 %v5159_v5, %v6812_v6  ;;  %v6813_v0 = vld [vmem:[#allocation70_spill] sm:$0xff] }
 0x2b2   :  { %2944 = vperm.xlu0 %3398, %v2342_v27   ;;  %v2120_v27 = vadd.f32 %v2119_v40, %v1403_v51  ;;  %v1401_v51 = vmul.f32 %v5159_v5, %v6813_v0  ;;  %v6814_v43 = vld [vmem:[#allocation93_spill] sm:$0xff] }
 0x2b3   :  { %v2790_v34 = vpop.permute.xlu2 %2789  ;;  %v2087_v18 = vadd.f32 %v5815_v53, %v1392_v63  ;;  %v6804_v53 = vld [vmem:[#allocation53_spill] sm:$0xff]  ;;  %v2147_v63 = vadd.f32 %v6814_v43, %v1412_v9 }
 0x2b4   :  { %v2740_v37 = vpop.permute.xlu1 %2739  ;;  %v3079_v8 = vadd.f32 %v2790_v34, %v2102_v33  ;;  %v2735_v52 = vpop.permute.xlu0 %2734  ;;  %v6803_v33 = vld [vmem:[#allocation82_spill] sm:$0xff]  ;;  %v1396_v34 = vmul.f32 %v5159_v5, %v6804_v53  ;;  %v6817_v53 = vld [vmem:[#allocation75_spill] sm:$0xff]  ;;  %v6826_v9 = vld [vmem:[#allocation69_spill] sm:$0xff] }
 0x2b5   :  { %v3069_v38 = vadd.f32 %v2740_v37, %v2072_v17  ;;  %v3068_v31 = vadd.f32 %v2735_v52, %v2069_v13  ;;  %v1406_v13 = vmul.f32 %v5159_v5, %v6803_v33  ;;  %v6805_v37 = vld [vmem:[#allocation61_spill] sm:$0xff]  ;;  %v6806_v52 = vld [vmem:[#allocation64_spill] sm:$0xff]  ;;  %v1411_v0 = vmul.f32 %v5159_v5, %v6826_v9 }
 0x2b6   :  { %3213 = vst.msk [vmem:[%s6604_s9 + $0x2b8] sm:$0xff] %vm3120_vm0, %v3079_v8  ;;  %v1395_v8 = vmul.f32 %v5159_v5, %v6805_v37  ;;  %v6818_v37 = vld [vmem:[#allocation105_spill] sm:$0xff] }
 0x2b7   :  { %3203 = vst.msk [vmem:[%s6604_s9 + $0x268] sm:$0xff] %vm3120_vm0, %v3069_v38  ;;  %v2099_v38 = vadd.f32 %v6026_v61, %v1396_v34  ;;  %v1404_v34 = vmul.f32 %v5159_v5, %v6817_v53  ;;  %v6832_v53 = vld [vmem:[#allocation97_spill] sm:$0xff] }
 0x2b8   :  { %3202 = vst.msk [vmem:[%s6604_s9 + $0x260] sm:$0xff] %vm3120_vm0, %v3068_v31  ;;  %v2129_v31 = vadd.f32 %v6806_v52, %v1406_v13  ;;  %v6816_v13 = vld [vmem:[#allocation95_spill] sm:$0xff] }
 0x2b9   :  { %2969 = vperm.xlu2 %3400, %v2347_v35   ;;  %2964 = vperm.xlu1 %3399, %v2346_v12   ;;  %v2096_v35 = vadd.f32 %v5975_v3, %v1395_v8  ;;  %v6808_v3 = vld [vmem:[#allocation56_spill] sm:$0xff] }
 0x2ba   :  { %2959 = vperm.xlu0 %3398, %v2345_v62   ;;  %v1399_v61 = vmul.f32 %v5159_v5, %v6808_v3 }
 0x2bb   :  { %v2805_v4 = vpop.permute.xlu2 %2804 }
 0x2bc   :  { %v2755_v36 = vpop.permute.xlu1 %2754  ;;  %v3082_v2 = vadd.f32 %v2805_v4, %v2111_v57  ;;  %v2750_v41 = vpop.permute.xlu0 %2749  ;;  %v6810_v4 = vld [vmem:[#allocation79_spill] sm:$0xff] }
 0x2bd   :  { %v3072_v28 = vadd.f32 %v2755_v36, %v2081_v54  ;;  %v3071_v25 = vadd.f32 %v2750_v41, %v2078_v11  ;;  %v6809_v54 = vld [vmem:[#allocation66_spill] sm:$0xff]  ;;  %v2108_v11 = vadd.f32 %v6137_v42, %v1399_v61  ;;  %v2138_v36 = vadd.f32 %v6810_v4, %v1409_v23  ;;  %v6811_v42 = vld [vmem:[#allocation57_spill] sm:$0xff] }
 0x2be   :  { %3216 = vst.msk [vmem:[%s6604_s9 + $0x2d0] sm:$0xff] %vm3120_vm0, %v3082_v2  ;;  %v1398_v57 = vmul.f32 %v5159_v5, %v6809_v54  ;;  %v6820_v23 = vld [vmem:[#allocation65_spill] sm:$0xff]  ;;  %v6821_v61 = vld [vmem:[#allocation98_spill] sm:$0xff] }
 0x2bf   :  { %3206 = vst.msk [vmem:[%s6604_s9 + $0x280] sm:$0xff] %vm3120_vm0, %v3072_v28  ;;  %v1408_v3 = vmul.f32 %v5159_v5, %v6820_v23  ;;  %v1418_v54 = vmul.f32 %v5159_v5, %v6821_v61  ;;  %v6823_v4 = vld [vmem:[#allocation117_spill] sm:$0xff] }
 0x2c0   :  { %3205 = vst.msk [vmem:[%s6604_s9 + $0x278] sm:$0xff] %vm3120_vm0, %v3071_v25  ;;  %v2105_v2 = vadd.f32 %v6099_v26, %v1398_v57  ;;  %v1402_v26 = vmul.f32 %v5159_v5, %v6811_v42  ;;  %v6822_v57 = vld [vmem:[#allocation73_spill] sm:$0xff] }
 0x2c1   :  { %2984 = vperm.xlu2 %3400, %v2350_v19   ;;  %2979 = vperm.xlu1 %3399, %v2349_v55  }
 0x2c2   :  { %2974 = vperm.xlu0 %3398, %v2348_v56   ;;  %v2122_v56 = vpop.f32.mrf.mxu2 }
 0x2c3   :  { %v2820_v47 = vpop.permute.xlu2 %2819  ;;  %v2123_v52 = vadd.f32 %v2122_v56, %v1404_v34 }
 0x2c4   :  { %v2770_v46 = vpop.permute.xlu1 %2769  ;;  %v3085_v29 = vadd.f32 %v2820_v47, %v2120_v27  ;;  %v2765_v15 = vpop.permute.xlu0 %2764  ;;  %v2117_v27 = vadd.f32 %v6257_v59, %v1402_v26  ;;  %v6815_v59 = vld [vmem:[#allocation60_spill] sm:$0xff]  ;;  %v6825_v26 = vld [vmem:[#allocation85_spill] sm:$0xff] }
 0x2c5   :  { %v3075_v44 = vadd.f32 %v2770_v46, %v2090_v7  ;;  %v3074_v17 = vadd.f32 %v2765_v15, %v2087_v18  ;;  %v6382_v7 = vpop.f32.mrf.mxu3  ;;  %v2114_v18 = vadd.f32 %v6224_v45, %v1401_v51  ;;  %v1405_v45 = vmul.f32 %v5159_v5, %v6815_v59  ;;  %v6827_v51 = vld [vmem:[#allocation89_spill] sm:$0xff] }
 0x2c6   :  { %3219 = vst.msk [vmem:[%s6604_s9 + $0x2e8] sm:$0xff] %vm3120_vm0, %v3085_v29  ;;  %v1410_v6 = vmul.f32 %v5159_v5, %v6825_v26  ;;  %v2144_v43 = vadd.f32 %v6827_v51, %v1411_v0  ;;  %v6839_v0 = vld [vmem:[#allocation120_spill] sm:$0xff] }
 0x2c7   :  { %3209 = vst.msk [vmem:[%s6604_s9 + $0x298] sm:$0xff] %vm3120_vm0, %v3075_v44 }
 0x2c8   :  { %3208 = vst.msk [vmem:[%s6604_s9 + $0x290] sm:$0xff] %vm3120_vm0, %v3074_v17 }
 0x2ca   :  { %2989 = vperm.xlu0 %3398, %v2351_v16   ;;  %v2125_v33 = vpop.f32.mrf.mxu2  ;;  %v1415_v16 = vmul.f32 %v5159_v5, %v6816_v13  ;;  %v6831_v13 = vld [vmem:[#allocation101_spill] sm:$0xff] }
 0x2cb   :  { %v2835_v12 = vpop.permute.xlu2 %2834 }
 0x2cc   :  { %v2785_v62 = vpop.permute.xlu1 %2784  ;;  %v3088_v48 = vadd.f32 %v2835_v12, %v2129_v31  ;;  %v2780_v50 = vpop.permute.xlu0 %2779  ;;  %v2156_v8 = vadd.f32 %v6818_v37, %v1415_v16 }
 0x2cd   :  { %v3078_v49 = vadd.f32 %v2785_v62, %v2099_v38  ;;  %v3077_v30 = vadd.f32 %v2780_v50, %v2096_v35  ;;  %v2126_v38 = vadd.f32 %v2125_v33, %v1405_v45  ;;  %v6405_v12 = vpop.f32.mrf.mxu3 }
 0x2ce   :  { %3222 = vst.msk [vmem:[%s6604_s9 + $0x300] sm:$0xff] %vm3120_vm0, %v3088_v48 }
 0x2cf   :  { %3212 = vst.msk [vmem:[%s6604_s9 + $0x2b0] sm:$0xff] %vm3120_vm0, %v3078_v49 }
 0x2d0   :  { %3211 = vst.msk [vmem:[%s6604_s9 + $0x2a8] sm:$0xff] %vm3120_vm0, %v3077_v30  ;;  %v6819_v30 = vld [vmem:[#allocation81_spill] sm:$0xff] }
 0x2d1   :  { %v1407_v22 = vmul.f32 %v5159_v5, %v6819_v30 }
 0x2d3   :  { %v2850_v28 = vpop.permute.xlu2 %2849 }
 0x2d4   :  { %v2800_v41 = vpop.permute.xlu1 %2799  ;;  %v3091_v25 = vadd.f32 %v2850_v28, %v2138_v36  ;;  %v2795_v55 = vpop.permute.xlu0 %2794  ;;  %v2165_v36 = vadd.f32 %v6823_v4, %v1418_v54  ;;  %v6837_v54 = vld [vmem:[#allocation108_spill] sm:$0xff] }
 0x2d5   :  { %v3081_v19 = vadd.f32 %v2800_v41, %v2108_v11  ;;  %v3080_v40 = vadd.f32 %v2795_v55, %v2105_v2  ;;  %v2135_v11 = vadd.f32 %v6822_v57, %v1408_v3  ;;  %v6824_v41 = vld [vmem:[#allocation68_spill] sm:$0xff]  ;;  %v6428_v42 = vpop.f32.mrf.mxu3 }
 0x2d6   :  { %3225 = vst.msk [vmem:[%s6604_s9 + $0x318] sm:$0xff] %vm3120_vm0, %v3091_v25  ;;  %v2132_v25 = vadd.f32 %v6824_v41, %v1407_v22  ;;  %v6836_v22 = vld [vmem:[#allocation112_spill] sm:$0xff] }
 0x2d7   :  { %3215 = vst.msk [vmem:[%s6604_s9 + $0x2c8] sm:$0xff] %vm3120_vm0, %v3081_v19 }
 0x2d8   :  { %3214 = vst.msk [vmem:[%s6604_s9 + $0x2c0] sm:$0xff] %vm3120_vm0, %v3080_v40 }
 0x2db   :  { %v2865_v47 = vpop.permute.xlu2 %2864 }
 0x2dc   :  { %v2815_v46 = vpop.permute.xlu1 %2814  ;;  %v3094_v29 = vadd.f32 %v2865_v47, %v2147_v63  ;;  %v2810_v15 = vpop.permute.xlu0 %2809 }
 0x2dd   :  { %v3084_v44 = vadd.f32 %v2815_v46, %v2117_v27  ;;  %v3083_v17 = vadd.f32 %v2810_v15, %v2114_v18  ;;  %v6828_v18 = vld [vmem:[#allocation84_spill] sm:$0xff]  ;;  %v2209_v59 = vpop.f32.mrf.mxu3 }
 0x2de   :  { %3228 = vst.msk [vmem:[%s6604_s9 + $0x330] sm:$0xff] %vm3120_vm0, %v3094_v29  ;;  %v2141_v47 = vadd.f32 %v6828_v18, %v1410_v6 }
 0x2df   :  { %3218 = vst.msk [vmem:[%s6604_s9 + $0x2e0] sm:$0xff] %vm3120_vm0, %v3084_v44 }
 0x2e0   :  { %3217 = vst.msk [vmem:[%s6604_s9 + $0x2d8] sm:$0xff] %vm3120_vm0, %v3083_v17  ;;  %v6829_v17 = vld [vmem:[#allocation74_spill] sm:$0xff] }
 0x2e1   :  { %v1414_v33 = vmul.f32 %v5159_v5, %v6829_v17 }
 0x2e3   :  { %v2880_v31 = vpop.permute.xlu2 %2879  ;;  %v2153_v16 = vadd.f32 %v6831_v13, %v1414_v33 }
 0x2e4   :  { %v2830_v35 = vpop.permute.xlu1 %2829  ;;  %v3097_v62 = vadd.f32 %v2880_v31, %v2156_v8  ;;  %v2825_v49 = vpop.permute.xlu0 %2824 }
 0x2e5   :  { %v3087_v48 = vadd.f32 %v2830_v35, %v2126_v38  ;;  %v3086_v50 = vadd.f32 %v2825_v49, %v2123_v52  ;;  %v6834_v49 = vld [vmem:[#allocation109_spill] sm:$0xff]  ;;  %v6488_v61 = vpop.f32.mrf.mxu3 }
 0x2e6   :  { %3231 = vst.msk [vmem:[%s6604_s9 + $0x348] sm:$0xff] %vm3120_vm0, %v3097_v62  ;;  %v6833_v62 = vld [vmem:[#allocation80_spill] sm:$0xff] }
 0x2e7   :  { %3221 = vst.msk [vmem:[%s6604_s9 + $0x2f8] sm:$0xff] %vm3120_vm0, %v3087_v48  ;;  %v1417_v48 = vmul.f32 %v5159_v5, %v6833_v62 }
 0x2e8   :  { %3220 = vst.msk [vmem:[%s6604_s9 + $0x2f0] sm:$0xff] %vm3120_vm0, %v3086_v50  ;;  %v1427_v50 = vmul.f32 %v5159_v5, %v6834_v49 }
 0x2e9   :  { %v2162_v23 = vadd.f32 %v6836_v22, %v1417_v48  ;;  %v6844_v48 = vld [vmem:[#allocation106_spill] sm:$0xff] }
 0x2ea   :  { %v2192_v3 = vadd.f32 %v5632_v24, %v1427_v50  ;;  %v6838_v24 = vld [vmem:[#allocation114_spill] sm:$0xff]  ;;  %v1435_v49 = vmul.f32 %v5159_v5, %v6844_v48 }
 0x2eb   :  { %v2895_v2 = vpop.permute.xlu2 %2894 }
 0x2ec   :  { %v2845_v28 = vpop.permute.xlu1 %2844  ;;  %v3100_v19 = vadd.f32 %v2895_v2, %v2165_v36  ;;  %v2840_v56 = vpop.permute.xlu0 %2839 }
 0x2ed   :  { %v3090_v55 = vadd.f32 %v2845_v28, %v2135_v11  ;;  %v3089_v40 = vadd.f32 %v2840_v56, %v2132_v25  ;;  %v1430_v25 = vmul.f32 %v5159_v5, %v6838_v24  ;;  %v2215_v9 = vpop.f32.mrf.mxu3 }
 0x2ee   :  { %3234 = vst.msk [vmem:[%s6604_s9 + $0x360] sm:$0xff] %vm3120_vm0, %v3100_v19  ;;  %v2216_v50 = vadd.f32 %v2215_v9, %v1435_v49 }
 0x2ef   :  { %3224 = vst.msk [vmem:[%s6604_s9 + $0x310] sm:$0xff] %vm3120_vm0, %v3090_v55  ;;  %v2201_v19 = vadd.f32 %v6382_v7, %v1430_v25  ;;  %v6840_v7 = vld [vmem:[#allocation119_spill] sm:$0xff] }
 0x2f0   :  { %3223 = vst.msk [vmem:[%s6604_s9 + $0x308] sm:$0xff] %vm3120_vm0, %v3089_v40 }
 0x2f3   :  { %v2910_v63 = vpop.permute.xlu2 %2909 }
 0x2f4   :  { %v2860_v27 = vpop.permute.xlu1 %2859  ;;  %v3103_v46 = vadd.f32 %v2910_v63, %v5426_v10  ;;  %v2855_v44 = vpop.permute.xlu0 %2854  ;;  %v6830_v10 = vld [vmem:[#allocation90_spill] sm:$0xff] }
 0x2f5   :  { %v3093_v29 = vadd.f32 %v2860_v27, %v2144_v43  ;;  %v3092_v15 = vadd.f32 %v2855_v44, %v2141_v47  ;;  %v1413_v45 = vmul.f32 %v5159_v5, %v6830_v10  ;;  %v1433_v43 = vmul.f32 %v5159_v5, %v6840_v7  ;;  %v2218_v44 = vpop.f32.mrf.mxu3 }
 0x2f6   :  { %3237 = vst.msk [vmem:[%s6604_s9 + $0x378] sm:$0xff] %vm3120_vm0, %v3103_v46 }
 0x2f7   :  { %3227 = vst.msk [vmem:[%s6604_s9 + $0x328] sm:$0xff] %vm3120_vm0, %v3093_v29  ;;  %v2150_v34 = vadd.f32 %v6832_v53, %v1413_v45 }
 0x2f8   :  { %3226 = vst.msk [vmem:[%s6604_s9 + $0x320] sm:$0xff] %vm3120_vm0, %v3092_v15  ;;  %v6841_v15 = vld [vmem:[#allocation122_spill] sm:$0xff] }
 0x2f9   :  { %v1436_v17 = vmul.f32 %v5159_v5, %v6841_v15 }
 0x2fb   :  { %v2925_v37 = vpop.permute.xlu2 %2924 }
 0x2fc   :  { %v2875_v8 = vpop.permute.xlu1 %2874  ;;  %v3106_v38 = vadd.f32 %v2925_v37, %v5533_v21  ;;  %v2870_v31 = vpop.permute.xlu0 %2869  ;;  %v6835_v21 = vld [vmem:[#allocation94_spill] sm:$0xff] }
 0x2fd   :  { %v3096_v52 = vadd.f32 %v2875_v8, %v2153_v16  ;;  %v3095_v35 = vadd.f32 %v2870_v31, %v2150_v34  ;;  %v1416_v30 = vmul.f32 %v5159_v5, %v6835_v21  ;;  %v6842_v34 = vld [vmem:[#allocation102_spill] sm:$0xff]  ;;  %v6843_v8 = vld [vmem:[#allocation113_spill] sm:$0xff] }
 0x2fe   :  { %3240 = vst.msk [vmem:[%s6604_s9 + $0x390] sm:$0xff] %vm3120_vm0, %v3106_v38  ;;  %v1432_v37 = vmul.f32 %v5159_v5, %v6842_v34  ;;  %v1431_v38 = vmul.f32 %v5159_v5, %v6843_v8 }
 0x2ff   :  { %3230 = vst.msk [vmem:[%s6604_s9 + $0x340] sm:$0xff] %vm3120_vm0, %v3096_v52  ;;  %v2159_v57 = vadd.f32 %v6837_v54, %v1416_v30  ;;  %v2221_v54 = vpop.f32.mrf.mxu3 }
 0x300   :  { %3229 = vst.msk [vmem:[%s6604_s9 + $0x338] sm:$0xff] %vm3120_vm0, %v3095_v35 }
 0x303   :  { %v2940_v11 = vpop.permute.xlu2 %2939 }
 0x304   :  { %v2890_v4 = vpop.permute.xlu1 %2889  ;;  %v3109_v36 = vadd.f32 %v2940_v11, %v2192_v3  ;;  %v2885_v28 = vpop.permute.xlu0 %2884 }
 0x305   :  { %v3099_v2 = vadd.f32 %v2890_v4, %v2162_v23  ;;  %v3098_v41 = vadd.f32 %v2885_v28, %v2159_v57  ;;  %v6846_v57 = vld [vmem:[#allocation121_spill] sm:$0xff] }
 0x306   :  { %3243 = vst.msk [vmem:[%s6604_s9 + $0x3a8] sm:$0xff] %vm3120_vm0, %v3109_v36  ;;  %v1437_v11 = vmul.f32 %v5159_v5, %v6846_v57 }
 0x307   :  { %3233 = vst.msk [vmem:[%s6604_s9 + $0x358] sm:$0xff] %vm3120_vm0, %v3099_v2 }
 0x308   :  { %3232 = vst.msk [vmem:[%s6604_s9 + $0x350] sm:$0xff] %vm3120_vm0, %v3098_v41  ;;  %v2222_v4 = vadd.f32 %v2221_v54, %v1437_v11 }
 0x30b   :  { %v2955_v55 = vpop.permute.xlu2 %2954 }
 0x30c   :  { %v2905_v56 = vpop.permute.xlu1 %2904  ;;  %v3112_v40 = vadd.f32 %v2955_v55, %v2201_v19  ;;  %v2900_v6 = vpop.permute.xlu0 %2899 }
 0x30d   :  { %v3102_v26 = vadd.f32 %v2905_v56, %v5373_v60  ;;  %v3101_v51 = vadd.f32 %v2900_v6, %v6839_v0  ;;  %v2210_v60 = vadd.f32 %v2209_v59, %v1433_v43 }
 0x30e   :  { %3246 = vst.msk [vmem:[%s6604_s9 + $0x3c0] sm:$0xff] %vm3120_vm0, %v3112_v40 }
 0x30f   :  { %3236 = vst.msk [vmem:[%s6604_s9 + $0x370] sm:$0xff] %vm3120_vm0, %v3102_v26 }
 0x310   :  { %3235 = vst.msk [vmem:[%s6604_s9 + $0x368] sm:$0xff] %vm3120_vm0, %v3101_v51 }
 0x313   :  { %v2970_v63 = vpop.permute.xlu2 %2969 }
 0x314   :  { %v2920_v27 = vpop.permute.xlu1 %2919  ;;  %v3115_v18 = vadd.f32 %v2970_v63, %v2210_v60  ;;  %v2915_v46 = vpop.permute.xlu0 %2914 }
 0x315   :  { %v3105_v47 = vadd.f32 %v2920_v27, %v5496_v39  ;;  %v3104_v29 = vadd.f32 %v2915_v46, %v5463_v32  ;;  %v2219_v32 = vadd.f32 %v2218_v44, %v1436_v17 }
 0x316   :  { %3249 = vst.msk [vmem:[%s6604_s9 + $0x3d8] sm:$0xff] %vm3120_vm0, %v3115_v18 }
 0x317   :  { %3239 = vst.msk [vmem:[%s6604_s9 + $0x388] sm:$0xff] %vm3120_vm0, %v3105_v47 }
 0x318   :  { %3238 = vst.msk [vmem:[%s6604_s9 + $0x380] sm:$0xff] %vm3120_vm0, %v3104_v29 }
 0x31b   :  { %v2985_v39 = vpop.permute.xlu2 %2984 }
 0x31c   :  { %v2935_v33 = vpop.permute.xlu1 %2934  ;;  %v3118_v59 = vadd.f32 %v2985_v39, %v2219_v32  ;;  %v2930_v45 = vpop.permute.xlu0 %2929 }
 0x31d   :  { %v3108_v10 = vadd.f32 %v2935_v33, %v5597_v14  ;;  %v3107_v13 = vadd.f32 %v2930_v45, %v5566_v1 }
 0x31e   :  { %3252 = vst.msk [vmem:[%s6604_s9 + $0x3f0] sm:$0xff] %vm3120_vm0, %v3118_v59 }
 0x31f   :  { %3242 = vst.msk [vmem:[%s6604_s9 + $0x3a0] sm:$0xff] %vm3120_vm0, %v3108_v10 }
 0x320   :  { %3241 = vst.msk [vmem:[%s6604_s9 + $0x398] sm:$0xff] %vm3120_vm0, %v3107_v13 }
 0x324   :  { %v2950_v16 = vpop.permute.xlu1 %2949  ;;  %v2945_v53 = vpop.permute.xlu0 %2944 }
 0x325   :  { %v3111_v14 = vadd.f32 %v2950_v16, %v5692_v58  ;;  %v3110_v1 = vadd.f32 %v2945_v53, %v5660_v20  ;;  %v2207_v58 = vadd.f32 %v6428_v42, %v1432_v37  ;;  %v2204_v20 = vadd.f32 %v6405_v12, %v1431_v38  ;;  %v6845_v42 = vld [vmem:[#allocation118_spill] sm:$0xff] }
 0x326   :  { %v1434_v12 = vmul.f32 %v5159_v5, %v6845_v42 }
 0x327   :  { %3245 = vst.msk [vmem:[%s6604_s9 + $0x3b8] sm:$0xff] %vm3120_vm0, %v3111_v14 }
 0x328   :  { %3244 = vst.msk [vmem:[%s6604_s9 + $0x3b0] sm:$0xff] %vm3120_vm0, %v3110_v1  ;;  %v2213_v21 = vadd.f32 %v6488_v61, %v1434_v12 }
 0x32c   :  { %v2965_v52 = vpop.permute.xlu1 %2964  ;;  %v2960_v35 = vpop.permute.xlu0 %2959 }
 0x32d   :  { %v3114_v31 = vadd.f32 %v2965_v52, %v2207_v58  ;;  %v3113_v62 = vadd.f32 %v2960_v35, %v2204_v20 }
 0x32f   :  { %3248 = vst.msk [vmem:[%s6604_s9 + $0x3d0] sm:$0xff] %vm3120_vm0, %v3114_v31 }
 0x330   :  { %3247 = vst.msk [vmem:[%s6604_s9 + $0x3c8] sm:$0xff] %vm3120_vm0, %v3113_v62 }
 0x334   :  { %v2980_v30 = vpop.permute.xlu1 %2979  ;;  %v2975_v23 = vpop.permute.xlu0 %2974 }
 0x335   :  { %v3117_v22 = vadd.f32 %v2980_v30, %v2216_v50  ;;  %v3116_v3 = vadd.f32 %v2975_v23, %v2213_v21 }
 0x337   :  { %3251 = vst.msk [vmem:[%s6604_s9 + $0x3e8] sm:$0xff] %vm3120_vm0, %v3117_v22 }
 0x338   :  { %3250 = vst.msk [vmem:[%s6604_s9 + $0x3e0] sm:$0xff] %vm3120_vm0, %v3116_v3 }
 0x33c   :  { %v2990_v61 = vpop.permute.xlu0 %2989 }
 0x33d   :  { %v3119_v36 = vadd.f32 %v2990_v61, %v2222_v4 }
 0x33f   :  { %3253 = vst.msk [vmem:[%s6604_s9 + $0x3f8] sm:$0xff] %vm3120_vm0, %v3119_v36 }

// kernel: shape_vae_forward.15
= control target key start
LH: loop header
LB: loop body
LE: loop exit
PB: predicated region body
PF: predicated region fallthrough
CT: control target
= control target key end

     0   :  { %vm37_vm0 = vcmask 261120   ;;  %vm235_vm1 = vcmask 277504   ;;  %s574_s1 = inlined_call_operand.vmem [shape: f32[32,162], index: 1, kind: input, shape index: {}]   ;;  %s575_s0 = inlined_call_operand.vmem [shape: f32[144,32], index: 0, kind: input, shape index: {}]   ;;  %s576_s2 = inlined_call_operand.vmem [shape: f32[144,162], index: 2, kind: output, shape index: {}]  }
   0x1   :  { %v35_v0 = vld [vmem:[%s574_s1 + $0x30] sm:$0xff]  ;;  %v36_v1 = vld [vmem:[%s574_s1 + $0x38] sm:$0xff]  ;;  %v33_v2 = vld [vmem:[%s574_s1 + $0x20] sm:$0xff] }
   0x2   :  { %311 = vmatpush.msra.mxu2 %v35_v0  ;;  %315 = vmatpush.msra.mxu3 %v36_v1  ;;  %v34_v3 = vld [vmem:[%s574_s1 + $0x28] sm:$0xff]  ;;  %v31_v4 = vld [vmem:[%s574_s1 + $0x10] sm:$0xff]  ;;  %v32_v5 = vld [vmem:[%s574_s1 + $0x18] sm:$0xff] }
   0x3   :  { %104 = vmatpush.msra.mxu0 %v35_v0  ;;  %175 = vmatpush.msra.mxu1 %v36_v1  ;;  %v29_v6 = vld [vmem:[%s574_s1] sm:$0xff]  ;;  %v30_v7 = vld [vmem:[%s574_s1 + $0x8] sm:$0xff]  ;;  %v21_v10 = vld [vmem:[%s575_s0 + $0x50] sm:$0xff] }
   0x4   :  { %312 = vmatpush.msra.mxu2 %v33_v2  ;;  %316 = vmatpush.msra.mxu3 %v34_v3  ;;  %v20_v8 = vld [vmem:[%s575_s0 + $0x48] sm:$0xff]  ;;  %v11_v9 = vld [vmem:[%s575_s0] sm:$0xff]  ;;  %v22_v12 = vld [vmem:[%s575_s0 + $0x58] sm:$0xff] }
   0x5   :  { %105 = vmatpush.msra.mxu0 %v33_v2  ;;  %176 = vmatpush.msra.mxu1 %v34_v3  ;;  %v12_v11 = vld [vmem:[%s575_s0 + $0x8] sm:$0xff]  ;;  %v13_v13 = vld [vmem:[%s575_s0 + $0x10] sm:$0xff]  ;;  %v23_v14 = vld [vmem:[%s575_s0 + $0x60] sm:$0xff] }
   0x6   :  { %313 = vmatpush.msra.mxu2 %v31_v4  ;;  %317 = vmatpush.msra.mxu3 %v32_v5  ;;  %v14_v15 = vld [vmem:[%s575_s0 + $0x18] sm:$0xff]  ;;  %v24_v16 = vld [vmem:[%s575_s0 + $0x68] sm:$0xff]  ;;  %v15_v17 = vld [vmem:[%s575_s0 + $0x20] sm:$0xff] }
   0x7   :  { %106 = vmatpush.msra.mxu0 %v31_v4  ;;  %177 = vmatpush.msra.mxu1 %v32_v5  ;;  %v25_v18 = vld [vmem:[%s575_s0 + $0x70] sm:$0xff]  ;;  %v16_v19 = vld [vmem:[%s575_s0 + $0x28] sm:$0xff]  ;;  %v26_v20 = vld [vmem:[%s575_s0 + $0x78] sm:$0xff] }
   0x8   :  { %314 = vmatpush.msra.mxu2 %v29_v6  ;;  %318 = vmatpush.msra.mxu3 %v30_v7  ;;  %v17_v21 = vld [vmem:[%s575_s0 + $0x30] sm:$0xff]  ;;  %v27_v22 = vld [vmem:[%s575_s0 + $0x80] sm:$0xff]  ;;  %v18_v23 = vld [vmem:[%s575_s0 + $0x38] sm:$0xff] }
   0x9   :  { %284 = vmatmul.msk.f32.vlgmr.msra.gmra.mxu2 %vm37_vm0, %v20_v8  ;;  %302 = vmatmul.msk.f32.vlgmr.msra.gmra.mxu3 %vm37_vm0, %v20_v8  ;;  %v28_v24 = vld [vmem:[%s575_s0 + $0x88] sm:$0xff]  ;;  %v19_v25 = vld [vmem:[%s575_s0 + $0x40] sm:$0xff] }
   0xa   :  { %107 = vmatpush.msra.mxu0 %v29_v6  ;;  %178 = vmatpush.msra.mxu1 %v30_v7 }
   0xb   :  { %275 = vmatmul.msk.f32.vlgmr.msra.gmra.mxu0 %vm37_vm0, %v11_v9  ;;  %293 = vmatmul.msk.f32.vlgmr.msra.gmra.mxu1 %vm37_vm0, %v11_v9 }
  0x11   :  { %285 = vmatmul.msk.f32.gmra.mxu2 %vm37_vm0, %v21_v10  ;;  %303 = vmatmul.msk.f32.gmra.mxu3 %vm37_vm0, %v21_v10 }
  0x13   :  { %276 = vmatmul.msk.f32.gmra.mxu0 %vm37_vm0, %v12_v11  ;;  %294 = vmatmul.msk.f32.gmra.mxu1 %vm37_vm0, %v12_v11 }
  0x19   :  { %286 = vmatmul.msk.f32.gmra.mxu2 %vm37_vm0, %v22_v12  ;;  %304 = vmatmul.msk.f32.gmra.mxu3 %vm37_vm0, %v22_v12 }
  0x1b   :  { %277 = vmatmul.msk.f32.gmra.mxu0 %vm37_vm0, %v13_v13  ;;  %295 = vmatmul.msk.f32.gmra.mxu1 %vm37_vm0, %v13_v13 }
  0x21   :  { %287 = vmatmul.msk.f32.gmra.mxu2 %vm37_vm0, %v23_v14  ;;  %305 = vmatmul.msk.f32.gmra.mxu3 %vm37_vm0, %v23_v14 }
  0x23   :  { %278 = vmatmul.msk.f32.gmra.mxu0 %vm37_vm0, %v14_v15  ;;  %296 = vmatmul.msk.f32.gmra.mxu1 %vm37_vm0, %v14_v15 }
  0x29   :  { %288 = vmatmul.msk.f32.gmra.mxu2 %vm37_vm0, %v24_v16  ;;  %306 = vmatmul.msk.f32.gmra.mxu3 %vm37_vm0, %v24_v16 }
  0x2b   :  { %279 = vmatmul.msk.f32.gmra.mxu0 %vm37_vm0, %v15_v17  ;;  %297 = vmatmul.msk.f32.gmra.mxu1 %vm37_vm0, %v15_v17 }
  0x31   :  { %289 = vmatmul.msk.f32.gmra.mxu2 %vm37_vm0, %v25_v18  ;;  %307 = vmatmul.msk.f32.gmra.mxu3 %vm37_vm0, %v25_v18 }
  0x33   :  { %280 = vmatmul.msk.f32.gmra.mxu0 %vm37_vm0, %v16_v19  ;;  %298 = vmatmul.msk.f32.gmra.mxu1 %vm37_vm0, %v16_v19 }
  0x39   :  { %290 = vmatmul.msk.f32.gmra.mxu2 %vm37_vm0, %v26_v20  ;;  %308 = vmatmul.msk.f32.gmra.mxu3 %vm37_vm0, %v26_v20 }
  0x3b   :  { %281 = vmatmul.msk.f32.gmra.mxu0 %vm37_vm0, %v17_v21  ;;  %299 = vmatmul.msk.f32.gmra.mxu1 %vm37_vm0, %v17_v21 }
  0x41   :  { %291 = vmatmul.msk.f32.gmra.mxu2 %vm37_vm0, %v27_v22  ;;  %309 = vmatmul.msk.f32.gmra.mxu3 %vm37_vm0, %v27_v22 }
  0x43   :  { %282 = vmatmul.msk.f32.gmra.mxu0 %vm37_vm0, %v18_v23  ;;  %300 = vmatmul.msk.f32.gmra.mxu1 %vm37_vm0, %v18_v23 }
  0x49   :  { %292 = vmatmul.msk.f32.gmra.mxu2 %vm37_vm0, %v28_v24  ;;  %310 = vmatmul.msk.f32.gmra.mxu3 %vm37_vm0, %v28_v24 }
  0x4b   :  { %283 = vmatmul.msk.f32.gmra.mxu0 %vm37_vm0, %v19_v25  ;;  %301 = vmatmul.msk.f32.gmra.mxu1 %vm37_vm0, %v19_v25 }
  0x88   :  { %v109_v26 = vpop.f32.mrf.mxu0  ;;  %v180_v27 = vpop.f32.mrf.mxu1 }
  0x89   :  { %234 = vst [vmem:[%s576_s2] sm:$0xff] %v109_v26 }
  0x8a   :  { %236 = vst.msk [vmem:[%s576_s2 + $0x8] sm:$0xff] %vm235_vm1, %v180_v27 }
  0x8c   :  { %v136_v28 = vpop.f32.mrf.mxu2  ;;  %v207_v29 = vpop.f32.mrf.mxu3 }
  0x8d   :  { %253 = vst [vmem:[%s576_s2 + $0x90] sm:$0xff] %v136_v28 }
  0x8e   :  { %254 = vst.msk [vmem:[%s576_s2 + $0x98] sm:$0xff] %vm235_vm1, %v207_v29 }
  0x90   :  { %v112_v30 = vpop.f32.mrf.mxu0  ;;  %v183_v31 = vpop.f32.mrf.mxu1 }
  0x91   :  { %237 = vst [vmem:[%s576_s2 + $0x10] sm:$0xff] %v112_v30 }
  0x92   :  { %238 = vst.msk [vmem:[%s576_s2 + $0x18] sm:$0xff] %vm235_vm1, %v183_v31 }
  0x94   :  { %v139_v32 = vpop.f32.mrf.mxu2  ;;  %v210_v33 = vpop.f32.mrf.mxu3 }
  0x95   :  { %255 = vst [vmem:[%s576_s2 + $0xa0] sm:$0xff] %v139_v32 }
  0x96   :  { %256 = vst.msk [vmem:[%s576_s2 + $0xa8] sm:$0xff] %vm235_vm1, %v210_v33 }
  0x98   :  { %v115_v34 = vpop.f32.mrf.mxu0  ;;  %v186_v35 = vpop.f32.mrf.mxu1 }
  0x99   :  { %239 = vst [vmem:[%s576_s2 + $0x20] sm:$0xff] %v115_v34 }
  0x9a   :  { %240 = vst.msk [vmem:[%s576_s2 + $0x28] sm:$0xff] %vm235_vm1, %v186_v35 }
  0x9c   :  { %v142_v36 = vpop.f32.mrf.mxu2  ;;  %v213_v37 = vpop.f32.mrf.mxu3 }
  0x9d   :  { %257 = vst [vmem:[%s576_s2 + $0xb0] sm:$0xff] %v142_v36 }
  0x9e   :  { %258 = vst.msk [vmem:[%s576_s2 + $0xb8] sm:$0xff] %vm235_vm1, %v213_v37 }
  0xa0   :  { %v118_v38 = vpop.f32.mrf.mxu0  ;;  %v189_v39 = vpop.f32.mrf.mxu1 }
  0xa1   :  { %241 = vst [vmem:[%s576_s2 + $0x30] sm:$0xff] %v118_v38 }
  0xa2   :  { %242 = vst.msk [vmem:[%s576_s2 + $0x38] sm:$0xff] %vm235_vm1, %v189_v39 }
  0xa4   :  { %v145_v40 = vpop.f32.mrf.mxu2  ;;  %v216_v41 = vpop.f32.mrf.mxu3 }
  0xa5   :  { %259 = vst [vmem:[%s576_s2 + $0xc0] sm:$0xff] %v145_v40 }
  0xa6   :  { %260 = vst.msk [vmem:[%s576_s2 + $0xc8] sm:$0xff] %vm235_vm1, %v216_v41 }
  0xa8   :  { %v121_v42 = vpop.f32.mrf.mxu0  ;;  %v192_v43 = vpop.f32.mrf.mxu1 }
  0xa9   :  { %243 = vst [vmem:[%s576_s2 + $0x40] sm:$0xff] %v121_v42 }
  0xaa   :  { %244 = vst.msk [vmem:[%s576_s2 + $0x48] sm:$0xff] %vm235_vm1, %v192_v43 }
  0xac   :  { %v148_v44 = vpop.f32.mrf.mxu2  ;;  %v219_v45 = vpop.f32.mrf.mxu3 }
  0xad   :  { %261 = vst [vmem:[%s576_s2 + $0xd0] sm:$0xff] %v148_v44 }
  0xae   :  { %262 = vst.msk [vmem:[%s576_s2 + $0xd8] sm:$0xff] %vm235_vm1, %v219_v45 }
  0xb0   :  { %v124_v46 = vpop.f32.mrf.mxu0  ;;  %v195_v47 = vpop.f32.mrf.mxu1 }
  0xb1   :  { %245 = vst [vmem:[%s576_s2 + $0x50] sm:$0xff] %v124_v46 }
  0xb2   :  { %246 = vst.msk [vmem:[%s576_s2 + $0x58] sm:$0xff] %vm235_vm1, %v195_v47 }
  0xb4   :  { %v151_v48 = vpop.f32.mrf.mxu2  ;;  %v222_v49 = vpop.f32.mrf.mxu3 }
  0xb5   :  { %263 = vst [vmem:[%s576_s2 + $0xe0] sm:$0xff] %v151_v48 }
  0xb6   :  { %264 = vst.msk [vmem:[%s576_s2 + $0xe8] sm:$0xff] %vm235_vm1, %v222_v49 }
  0xb8   :  { %v127_v50 = vpop.f32.mrf.mxu0  ;;  %v198_v51 = vpop.f32.mrf.mxu1 }
  0xb9   :  { %247 = vst [vmem:[%s576_s2 + $0x60] sm:$0xff] %v127_v50 }
  0xba   :  { %248 = vst.msk [vmem:[%s576_s2 + $0x68] sm:$0xff] %vm235_vm1, %v198_v51 }
  0xbc   :  { %v154_v52 = vpop.f32.mrf.mxu2  ;;  %v225_v53 = vpop.f32.mrf.mxu3 }
  0xbd   :  { %265 = vst [vmem:[%s576_s2 + $0xf0] sm:$0xff] %v154_v52 }
  0xbe   :  { %266 = vst.msk [vmem:[%s576_s2 + $0xf8] sm:$0xff] %vm235_vm1, %v225_v53 }
  0xc0   :  { %v130_v54 = vpop.f32.mrf.mxu0  ;;  %v201_v55 = vpop.f32.mrf.mxu1 }
  0xc1   :  { %249 = vst [vmem:[%s576_s2 + $0x70] sm:$0xff] %v130_v54 }
  0xc2   :  { %250 = vst.msk [vmem:[%s576_s2 + $0x78] sm:$0xff] %vm235_vm1, %v201_v55 }
  0xc4   :  { %v157_v56 = vpop.f32.mrf.mxu2  ;;  %v228_v57 = vpop.f32.mrf.mxu3 }
  0xc5   :  { %267 = vst [vmem:[%s576_s2 + $0x100] sm:$0xff] %v157_v56 }
  0xc6   :  { %268 = vst.msk [vmem:[%s576_s2 + $0x108] sm:$0xff] %vm235_vm1, %v228_v57 }
  0xc8   :  { %v133_v58 = vpop.f32.mrf.mxu0  ;;  %v204_v59 = vpop.f32.mrf.mxu1 }
  0xc9   :  { %251 = vst [vmem:[%s576_s2 + $0x80] sm:$0xff] %v133_v58 }
  0xca   :  { %252 = vst.msk [vmem:[%s576_s2 + $0x88] sm:$0xff] %vm235_vm1, %v204_v59 }
  0xcc   :  { %v160_v60 = vpop.f32.mrf.mxu2  ;;  %v231_v61 = vpop.f32.mrf.mxu3 }
  0xcd   :  { %269 = vst [vmem:[%s576_s2 + $0x110] sm:$0xff] %v160_v60 }
  0xce   :  { %270 = vst.msk [vmem:[%s576_s2 + $0x118] sm:$0xff] %vm235_vm1, %v231_v61 }

// kernel: shape_vae_forward.16
= control target key start
LH: loop header
LB: loop body
LE: loop exit
PB: predicated region body
PF: predicated region fallthrough
CT: control target
= control target key end

     0   :  { %s1904_s9 = smov 0   ;;  %s1906_s10 = smov 0   ;;  %s2643_s0 = inlined_call_operand.vmem [shape: f32[72,16], index: 0, kind: input, shape index: {}]   ;;  %s2644_s1 = inlined_call_operand.vmem [shape: f32[16,578], index: 1, kind: input, shape index: {}]   ;;  %s2645_s2 = inlined_call_operand.vmem [shape: f32[72,578], index: 2, kind: output, shape index: {}]  }
   0x1   :  { %s1908_s11 = smov 0  }
   0x2 LB: > { %s1920_s12 = sadd.s32 4294967295, %s1755_s11   ;;  %s1923_s13 = sadd.s32 1, %s1755_s11   ;;  %s1755_s11 = sphi %s1908_s11, %s2677_s11   ;;  %s1751_s10 = sphi %s1906_s10, %s2676_s10   ;;  %s1747_s9 = sphi %s1904_s9, %s2675_s9  }
   0x3   : > { %s37_s14 = ssub.s32 %s1755_s11, %s1923_s13  ;;  %s40_s15 = sadd.s32 1, %s1751_s10 }
   0x4   : > { %p38_p0 = scmp.eq.s32.totalorder %s37_s14, 0  ;;  %p47_p1 = scmp.ne.s32.totalorder %s1751_s10, %s1747_s9 }
   0x5   : > { %p48_p2 = scmp.eq.s32.totalorder %s1755_s11, 0  ;;  %p77_p3 = scmp.eq.s32.totalorder %s1920_s12, 1 }
   0x6   : > { %s1933_s16 = scalar_select %p38_p0, %s1751_s10, %s40_s15  }
   0x7   : > { %p49_p4 = por %p48_p2, %p47_p1  ;;  %p1935_p5 = por %p77_p3, %p47_p1 }
   0x8   : > { %p1218_p6 = scmp.ge.s32.totalorder %s1755_s11, 2 }
   0xa   : > { %102 = sbr.rel (%p1218_p6) target bundleno = 145 (0x91), region = 20 }
   0xf   : > { %105 = sbr.rel (!%p49_p4) target bundleno = 145 (0x91), region = 24  ;;  %s107_s18 = sand.u32 (%p49_p4), 1, %s1751_s10  }
  0x10   : > { %s110_s19 = smul.u32 (%p49_p4), 3, %s1755_s11 }
  0x11   : > { %s1318_s20 = smul.u32 (%p49_p4), 48, %s107_s18 }
  0x12   : > { %s111_s21 = ssub.s32 (%p49_p4), 5, %s110_s19  ;;  %s1302_s22 = smul.u32 (%p49_p4), 24, %s1755_s11 }
  0x13   : > { %p112_p7 = scmp.lt.s32.totalorder (%p49_p4), %s111_s21, 3  ;;  %s1950_s28 = scalar_lea.vmem (%p49_p4), [#allocation2], %s1318_s20  }
  0x14   : > { %s1946_s25 = scalar_lea.vmem %s2644_s1, %s1302_s22  }
  0x15   : > { %s2679_s21 = smov (!%p112_p7, %s111_s21), 3 }
  0x16   : > { %s1219_s26 = sshll.u32 %s2679_s21, 4  ;;  %s1948_s27 = sshll.u32 %s2679_s21, 3 }
  0x17   : > { %p1223_p8 = scmp.eq.s32.totalorder %s1219_s26, 0 }
  0x18   : > { %p122_p9 = scmp.lt.u32.totalorder (!%p1223_p8), %s1948_s27, 8 }
  0x19   : > { %121 = sbr.rel (%p1223_p8) target bundleno = 145 (0x91), region = 28 }
  0x1e   : > { %125 = sbr.rel (%p122_p9) target bundleno = 135 (0x87), region = 32  ;;  %s1954_s29 = sand.u32 (!%p122_p9), 7, %s1948_s27  }
  0x1f   : > { %p144_p10 = scmp.eq.s32.totalorder (!%p122_p9), %s1954_s29, 0  ;;  %p1224_p11 = scmp.ne.s32.totalorder (!%p122_p9), %s1954_s29, 0 }
  0x23   : > { %147 = sbr.rel (%p1224_p11) target bundleno = 82 (0x52), region = 47  ;;  %s148_s30 = sshrl.u32 (!%p1224_p11), %s1948_s27, 3 }
  0x24   : > { %s1961_s3 = sshrl.u32 (!%p1224_p11), %s148_s30, 4 }
  0x25   : > { %p1225_p12 = scmp.le.s32.totalorder (!%p1224_p11), %s1961_s3, 0 }
  0x28   : > { %1088 = sbr.rel (%p1225_p12) target bundleno = 65 (0x41), region = 225  ;;  %s2647_s4 = smov (!%p1225_p12), %s1950_s28 }
  0x29   : > { %s2648_s5 = smov (!%p1225_p12), %s1946_s25  ;;  %s1970_s6 = smov (!%p1225_p12), 0  }
  0x2a   : > { %s1972_s7 = smov (!%p1225_p12), 0  }
  0x2d LB: >> { %v169_v0 = vld [vmem:[%s1763_s5 + $0x28] sm:$0xff]  ;;  %v171_v1 = vld [vmem:[%s1763_s5 + $0x30] sm:$0xff]  ;;  %v173_v2 = vld [vmem:[%s1763_s5 + $0x38] sm:$0xff]  ;;  %s223_s8 = sadd.s32 1, %s1767_s6  ;;  %s153_s7 = sadd.s32 1, %s1771_s7   ;;  %s1771_s7 = sphi %s1972_s7, %s153_s7   ;;  %s1767_s6 = sphi %s1970_s6, %s2651_s6   ;;  %s1763_s5 = sphi %s2648_s5, %s2650_s5   ;;  %s1759_s4 = sphi %s2647_s4, %s2649_s4  }
  0x2e   : >> { %192 = vst [vmem:[%s1759_s4 + $0x18] sm:$0xff] %v169_v0  ;;  %v159_v3 = vld [vmem:[%s1763_s5] sm:$0xff]  ;;  %p224_p13 = scmp.ge.s32.totalorder %s223_s8, %s1961_s3  ;;  %v161_v5 = vld [vmem:[%s1763_s5 + $0x8] sm:$0xff]  ;;  %v163_v6 = vld [vmem:[%s1763_s5 + $0x10] sm:$0xff]  ;;  %p152_p0 = scmp.ge.s32.totalorder %s153_s7, %s1961_s3 }
  0x2f   : >> { %194 = vst [vmem:[%s1759_s4 + $0x20] sm:$0xff] %v171_v1  ;;  %v175_v4 = vld [vmem:[%s1763_s5 + $0x40] sm:$0xff]  ;;  %v177_v7 = vld [vmem:[%s1763_s5 + $0x48] sm:$0xff]  ;;  %v179_v8 = vld [vmem:[%s1763_s5 + $0x50] sm:$0xff] }
  0x30   : >> { %196 = vst [vmem:[%s1759_s4 + $0x28] sm:$0xff] %v173_v2  ;;  %s2681_s8 = smov (%p224_p13, %s223_s8), 0  ;;  %v181_v9 = vld [vmem:[%s1763_s5 + $0x58] sm:$0xff]  ;;  %v183_v10 = vld [vmem:[%s1763_s5 + $0x60] sm:$0xff]  ;;  %v185_v11 = vld [vmem:[%s1763_s5 + $0x68] sm:$0xff] }
  0x31   : >> { %160 = vst [vmem:[%s1759_s4] sm:$0xff] %v159_v3  ;;  %s1226_s14 = sshll.u32 %s2681_s8, 7  ;;  %v187_v12 = vld [vmem:[%s1763_s5 + $0x70] sm:$0xff]  ;;  %v189_v13 = vld [vmem:[%s1763_s5 + $0x78] sm:$0xff]  ;;  %v213_v14 = vld [vmem:[%s1763_s5 + $0x80] sm:$0xff]  ;;  %s2651_s6 = smov %s2681_s8 }
  0x32   : >> { %162 = vst [vmem:[%s1759_s4 + $0x8] sm:$0xff] %v161_v5  ;;  %s228_s15 = scalar_lea.vmem %s1946_s25, %s1226_s14   ;;  %s229_s18 = scalar_lea.vmem %s1950_s28, %s1226_s14 [#allocation2]   ;;  %v215_v15 = vld [vmem:[%s1763_s5 + $0x88] sm:$0xff]  ;;  %v217_v16 = vld [vmem:[%s1763_s5 + $0x90] sm:$0xff]  ;;  %v219_v17 = vld [vmem:[%s1763_s5 + $0x98] sm:$0xff] }
  0x33   : >> { %164 = vst [vmem:[%s1759_s4 + $0x10] sm:$0xff] %v163_v6  ;;  %v221_v18 = vld [vmem:[%s1763_s5 + $0xa0] sm:$0xff]  ;;  %s2650_s5 = smov %s228_s15 }
  0x34   : >> { %198 = vst [vmem:[%s1759_s4 + $0x30] sm:$0xff] %v175_v4 }
  0x35   : >> { %200 = vst [vmem:[%s1759_s4 + $0x38] sm:$0xff] %v177_v7 }
  0x36   : >> { %202 = vst [vmem:[%s1759_s4 + $0x40] sm:$0xff] %v179_v8 }
  0x37   : >> { %204 = vst [vmem:[%s1759_s4 + $0x48] sm:$0xff] %v181_v9 }
  0x38   : >> { %206 = vst [vmem:[%s1759_s4 + $0x50] sm:$0xff] %v183_v10 }
  0x39   : >> { %208 = vst [vmem:[%s1759_s4 + $0x58] sm:$0xff] %v185_v11 }
  0x3a   : >> { %210 = vst [vmem:[%s1759_s4 + $0x60] sm:$0xff] %v187_v12 }
  0x3b   : >> { %212 = vst [vmem:[%s1759_s4 + $0x68] sm:$0xff] %v189_v13 }
  0x3c   : >> { %214 = vst [vmem:[%s1759_s4 + $0x70] sm:$0xff] %v213_v14  ;;  %155 = sbr.rel (!%p152_p0) target bundleno = 45 (0x2d), region = 231 }
  0x3d   : >> { %216 = vst [vmem:[%s1759_s4 + $0x78] sm:$0xff] %v215_v15 }
  0x3e   : >> { %218 = vst [vmem:[%s1759_s4 + $0x80] sm:$0xff] %v217_v16 }
  0x3f   : >> { %220 = vst [vmem:[%s1759_s4 + $0x88] sm:$0xff] %v219_v17 }
  0x40   : >> { %222 = vst [vmem:[%s1759_s4 + $0x90] sm:$0xff] %v221_v18  ;;  %s2649_s4 = smov %s229_s18 }
  0x41 PF: > { %s2041_s19 = sand.u32 15, %s148_s30   ;;  %s1303_s20 = sshll.u32 %s1961_s3, 7 }
  0x42   : > { %s2045_s21 = scalar_lea.vmem %s1946_s25, %s1303_s20   ;;  %s236_s22 = scalar_lea.vmem %s1950_s28, %s1303_s20 [#allocation2]  }
  0x43   : > { %p1231_p1 = scmp.le.s32.totalorder %s2041_s19, 0 }
  0x44   : > { %s1773_s23 = smov (!%p1231_p1), %s236_s22   ;;  %s1777_s24 = smov (!%p1231_p1), %s2045_s21  }
  0x45   : > { %1102 = sbr.rel (%p1231_p1) target bundleno = 82 (0x52), region = 236  ;;  %s1781_s26 = smov (!%p1231_p1), 0  }
  0x46   : > { %s1785_s7 = smov (!%p1231_p1), 0  }
  0x4a LB: >> { %v246_v19 = vld [vmem:[%s1779_s24] sm:$0xff]  ;;  %v248_v20 = vld [vmem:[%s1779_s24 + $0x28] sm:$0xff]  ;;  %s250_s30 = sadd.s32 1, %s1783_s26  ;;  %s240_s7 = sadd.s32 1, %s1787_s7   ;;  %s1787_s7 = sphi %s1785_s7, %s240_s7   ;;  %s1783_s26 = sphi %s1781_s26, %s1782_s26   ;;  %s1779_s24 = sphi %s1777_s24, %s255_s24   ;;  %s1775_s23 = sphi %s1773_s23, %s256_s23  }
  0x4b   : >> { %247 = vst [vmem:[%s1775_s23] sm:$0xff] %v246_v19  ;;  %p251_p2 = scmp.ge.s32.totalorder %s250_s30, %s2041_s19  ;;  %p239_p3 = scmp.ge.s32.totalorder %s240_s7, %s2041_s19 }
  0x4c   : >> { %249 = vst [vmem:[%s1775_s23 + $0x18] sm:$0xff] %v248_v20 }
  0x4d   : >> { %s2683_s30 = smov (%p251_p2, %s250_s30), 0  ;;  %242 = sbr.rel (!%p239_p3) target bundleno = 74 (0x4a), region = 242 }
  0x4e   : >> { %s1232_s3 = sshll.u32 %s2683_s30, 3  ;;  %s1782_s26 = smov %s2683_s30  }
  0x4f   : >> { %s255_s24 = scalar_lea.vmem %s2045_s21, %s1232_s3   ;;  %s256_s23 = scalar_lea.vmem %s236_s22, %s1232_s3 [#allocation2]  }
  0x52 PF: > { %259 = sbr.rel (%p144_p10) target bundleno = 135 (0x87), region = 65  ;;  %s261_s4 = ssub.s32 (!%p144_p10), %s1948_s27, %s1954_s29 }
  0x53   : > { %s265_s5 = sshrl.u32 (!%p144_p10), %s1948_s27, 3  ;;  %s2059_s6 = scalar_lea.vmem (!%p144_p10), %s1946_s25, %s261_s4 }
  0x54   : > { %s2062_s8 = scalar_lea.vmem (!%p144_p10), %s1950_s28, %s261_s4 [#allocation2]  ;;  %s2066_s14 = sshrl.u32 (!%p144_p10), %s265_s5, 4 }
  0x55   : > { %p1234_p4 = scmp.le.s32.totalorder (!%p144_p10), %s2066_s14, 0 }
  0x57   : > { %1116 = sbr.rel (%p1234_p4) target bundleno = 112 (0x70), region = 247  ;;  %s2652_s15 = smov (!%p1234_p4), %s1950_s28 }
  0x58   : > { %s2653_s18 = smov (!%p1234_p4), %s1946_s25  ;;  %s2075_s19 = smov (!%p1234_p4), 0  }
  0x59   : > { %s2077_s20 = smov (!%p1234_p4), 0  }
  0x5c LB: >> { %v286_v21 = vld [vmem:[%s1795_s18 + $0x28] sm:$0xff]  ;;  %v288_v22 = vld [vmem:[%s1795_s18 + $0x30] sm:$0xff]  ;;  %v290_v23 = vld [vmem:[%s1795_s18 + $0x38] sm:$0xff]  ;;  %s340_s21 = sadd.s32 1, %s1799_s19  ;;  %s270_s20 = sadd.s32 1, %s1803_s20   ;;  %s1803_s20 = sphi %s2077_s20, %s270_s20   ;;  %s1799_s19 = sphi %s2075_s19, %s2656_s19   ;;  %s1795_s18 = sphi %s2653_s18, %s2655_s18   ;;  %s1791_s15 = sphi %s2652_s15, %s2654_s15  }
  0x5d   : >> { %309 = vst [vmem:[%s1791_s15 + $0x18] sm:$0xff] %v286_v21  ;;  %v276_v24 = vld [vmem:[%s1795_s18] sm:$0xff]  ;;  %p341_p6 = scmp.ge.s32.totalorder %s340_s21, %s2066_s14  ;;  %v278_v26 = vld [vmem:[%s1795_s18 + $0x8] sm:$0xff]  ;;  %v280_v27 = vld [vmem:[%s1795_s18 + $0x10] sm:$0xff]  ;;  %p269_p7 = scmp.ge.s32.totalorder %s270_s20, %s2066_s14 }
  0x5e   : >> { %311 = vst [vmem:[%s1791_s15 + $0x20] sm:$0xff] %v288_v22  ;;  %v292_v25 = vld [vmem:[%s1795_s18 + $0x40] sm:$0xff]  ;;  %v294_v28 = vld [vmem:[%s1795_s18 + $0x48] sm:$0xff]  ;;  %v296_v29 = vld [vmem:[%s1795_s18 + $0x50] sm:$0xff] }
  0x5f   : >> { %313 = vst [vmem:[%s1791_s15 + $0x28] sm:$0xff] %v290_v23  ;;  %s2685_s21 = smov (%p341_p6, %s340_s21), 0  ;;  %v298_v30 = vld [vmem:[%s1795_s18 + $0x58] sm:$0xff]  ;;  %v300_v31 = vld [vmem:[%s1795_s18 + $0x60] sm:$0xff]  ;;  %v302_v32 = vld [vmem:[%s1795_s18 + $0x68] sm:$0xff] }
  0x60   : >> { %277 = vst [vmem:[%s1791_s15] sm:$0xff] %v276_v24  ;;  %s1235_s22 = sshll.u32 %s2685_s21, 7  ;;  %v304_v33 = vld [vmem:[%s1795_s18 + $0x70] sm:$0xff]  ;;  %v306_v34 = vld [vmem:[%s1795_s18 + $0x78] sm:$0xff]  ;;  %v330_v35 = vld [vmem:[%s1795_s18 + $0x80] sm:$0xff]  ;;  %s2656_s19 = smov %s2685_s21 }
  0x61   : >> { %279 = vst [vmem:[%s1791_s15 + $0x8] sm:$0xff] %v278_v26  ;;  %s345_s23 = scalar_lea.vmem %s1946_s25, %s1235_s22   ;;  %s346_s24 = scalar_lea.vmem %s1950_s28, %s1235_s22 [#allocation2]   ;;  %v332_v36 = vld [vmem:[%s1795_s18 + $0x88] sm:$0xff]  ;;  %v334_v37 = vld [vmem:[%s1795_s18 + $0x90] sm:$0xff]  ;;  %v336_v38 = vld [vmem:[%s1795_s18 + $0x98] sm:$0xff] }
  0x62   : >> { %281 = vst [vmem:[%s1791_s15 + $0x10] sm:$0xff] %v280_v27  ;;  %v338_v39 = vld [vmem:[%s1795_s18 + $0xa0] sm:$0xff]  ;;  %s2655_s18 = smov %s345_s23 }
  0x63   : >> { %315 = vst [vmem:[%s1791_s15 + $0x30] sm:$0xff] %v292_v25 }
  0x64   : >> { %317 = vst [vmem:[%s1791_s15 + $0x38] sm:$0xff] %v294_v28 }
  0x65   : >> { %319 = vst [vmem:[%s1791_s15 + $0x40] sm:$0xff] %v296_v29 }
  0x66   : >> { %321 = vst [vmem:[%s1791_s15 + $0x48] sm:$0xff] %v298_v30 }
  0x67   : >> { %323 = vst [vmem:[%s1791_s15 + $0x50] sm:$0xff] %v300_v31 }
  0x68   : >> { %325 = vst [vmem:[%s1791_s15 + $0x58] sm:$0xff] %v302_v32 }
  0x69   : >> { %327 = vst [vmem:[%s1791_s15 + $0x60] sm:$0xff] %v304_v33 }
  0x6a   : >> { %329 = vst [vmem:[%s1791_s15 + $0x68] sm:$0xff] %v306_v34 }
  0x6b   : >> { %331 = vst [vmem:[%s1791_s15 + $0x70] sm:$0xff] %v330_v35  ;;  %272 = sbr.rel (!%p269_p7) target bundleno = 92 (0x5c), region = 253 }
  0x6c   : >> { %333 = vst [vmem:[%s1791_s15 + $0x78] sm:$0xff] %v332_v36 }
  0x6d   : >> { %335 = vst [vmem:[%s1791_s15 + $0x80] sm:$0xff] %v334_v37 }
  0x6e   : >> { %337 = vst [vmem:[%s1791_s15 + $0x88] sm:$0xff] %v336_v38 }
  0x6f   : >> { %339 = vst [vmem:[%s1791_s15 + $0x90] sm:$0xff] %v338_v39  ;;  %s2654_s15 = smov %s346_s24 }
  0x70 PF: > { %s2146_s26 = sand.u32 15, %s265_s5   ;;  %s1305_s7 = sshll.u32 %s2066_s14, 7 }
  0x71   : > { %s2150_s30 = scalar_lea.vmem %s1946_s25, %s1305_s7   ;;  %s353_s3 = scalar_lea.vmem %s1950_s28, %s1305_s7 [#allocation2]  }
  0x72   : > { %p1240_p8 = scmp.le.s32.totalorder %s2146_s26, 0 }
  0x73   : > { %s1805_s4 = smov (!%p1240_p8), %s353_s3   ;;  %s1809_s21 = smov (!%p1240_p8), %s2150_s30  }
  0x74   : > { %1130 = sbr.rel (%p1240_p8) target bundleno = 129 (0x81), region = 258  ;;  %s1813_s20 = smov (!%p1240_p8), 0  }
  0x75   : > { %s1817_s22 = smov (!%p1240_p8), 0  }
  0x79 LB: >> { %v363_v40 = vld [vmem:[%s1811_s21] sm:$0xff]  ;;  %v365_v41 = vld [vmem:[%s1811_s21 + $0x28] sm:$0xff]  ;;  %s367_s5 = sadd.s32 1, %s1815_s20  ;;  %s357_s22 = sadd.s32 1, %s1819_s22   ;;  %s1819_s22 = sphi %s1817_s22, %s357_s22   ;;  %s1815_s20 = sphi %s1813_s20, %s1814_s20   ;;  %s1811_s21 = sphi %s1809_s21, %s372_s21   ;;  %s1807_s4 = sphi %s1805_s4, %s373_s4  }
  0x7a   : >> { %364 = vst [vmem:[%s1807_s4] sm:$0xff] %v363_v40  ;;  %p368_p9 = scmp.ge.s32.totalorder %s367_s5, %s2146_s26  ;;  %p356_p10 = scmp.ge.s32.totalorder %s357_s22, %s2146_s26 }
  0x7b   : >> { %366 = vst [vmem:[%s1807_s4 + $0x18] sm:$0xff] %v365_v41 }
  0x7c   : >> { %s2687_s5 = smov (%p368_p9, %s367_s5), 0  ;;  %359 = sbr.rel (!%p356_p10) target bundleno = 121 (0x79), region = 264 }
  0x7d   : >> { %s1241_s14 = sshll.u32 %s2687_s5, 3  ;;  %s1814_s20 = smov %s2687_s5  }
  0x7e   : >> { %s372_s21 = scalar_lea.vmem %s2150_s30, %s1241_s14   ;;  %s373_s4 = scalar_lea.vmem %s353_s3, %s1241_s14 [#allocation2]  }
  0x81 PF: > { %s1885_s15 = smov 1  }
  0x82   : > { %s374_s18 = sshll.u32 %s1885_s15, %s1954_s29 }
  0x83   : > { %s1243_s19 = sadd.s32 4294967295, %s374_s18 }
  0x84   : > { %v384_v42 = vld [vmem:[%s2059_s6] sm:%s1243_s19]  ;;  %v386_v43 = vld [vmem:[%s2059_s6 + $0x28] sm:%s1243_s19] }
  0x85   : > { %385 = vst [vmem:[%s2062_s8] sm:%s1243_s19] %v384_v42 }
  0x86   : > { %387 = vst [vmem:[%s2062_s8 + $0x18] sm:%s1243_s19] %v386_v43 }
  0x87 PF: > { %p1244_p11 = scmp.ge.u32.totalorder %s1948_s27, 8 }
  0x88   : > { %s1886_s23 = smov (!%p1244_p11), 1  }
  0x89   : > { %128 = sbr.rel (%p1244_p11) target bundleno = 145 (0x91), region = 36  ;;  %s129_s24 = sshll.u32 (!%p1244_p11), %s1886_s23, %s1948_s27 }
  0x8a   : > { %s1245_s26 = sadd.s32 (!%p1244_p11), 4294967295, %s129_s24 }
  0x8e   : > { %v139_v44 = vld [vmem:[%s1946_s25] sm:%s1245_s26]  ;;  %v141_v45 = vld [vmem:[%s1946_s25 + $0x28] sm:%s1245_s26] }
  0x8f   : > { %140 = vst [vmem:[%s1950_s28] sm:%s1245_s26] %v139_v44 }
  0x90   : > { %142 = vst [vmem:[%s1950_s28 + $0x18] sm:%s1245_s26] %v141_v45 }
  0x91 PF: > { %p1246_p12 = scmp.ge.s32.totalorder %s1755_s11, 1  ;;  %p390_p13 = scmp.lt.s32.totalorder %s1755_s11, 3 }
  0x93   : > { %p391_p0 = pnand %p1246_p12, %p390_p13 }
  0x94   : > { %s397_s29 = sand.u32 (!%p391_p0), 1, %s1747_s9  }
  0x95   : > { %394 = sbr.rel (%p391_p0) target bundleno = 518 (0x206), region = 90 }
  0x96   : > { %s1319_s27 = smul.u32 (!%p391_p0), 48, %s397_s29 }
  0x97   : > { %s1320_s26 = smul.u32 (!%p391_p0), 216, %s397_s29 }
  0x98   : > { %s399_s25 = scalar_lea.vmem (!%p391_p0), [#allocation2], %s1319_s27 }
  0x99   : > { %s2230_s27 = scalar_lea.vmem (!%p391_p0), [#allocation3], %s1320_s26  }
  0x9a   : > { %v427_v46 = vld [vmem:[%s2643_s0] sm:$0xff]  ;;  %v441_v47 = vld [vmem:[%s399_s25 + $0x28] sm:$0xff]  ;;  %v439_v49 = vld [vmem:[%s399_s25 + $0x18] sm:$0xff]  ;;  %vm442_vm0 = vcmask 130048   ;;  %s636_s9 = smul.u32 (%p1935_p5), 3, %s1920_s12 }
  0x9b   : > { %v438_v48 = vld [vmem:[%s399_s25 + $0x10] sm:$0xff]  ;;  %572 = vmatpush.msra.mxu2 %v441_v47  ;;  %484 = vmatpush.msra.mxu0 %v439_v49  ;;  %v440_v50 = vld [vmem:[%s399_s25 + $0x20] sm:$0xff]  ;;  %v437_v52 = vld [vmem:[%s399_s25 + $0x8] sm:$0xff]  ;;  %s1307_s29 = smul.u32 (%p1935_p5), 24, %s1920_s12 }
  0x9c   : > { %v436_v51 = vld [vmem:[%s399_s25] sm:$0xff]  ;;  %528 = vmatpush.msra.mxu1 %v440_v50  ;;  %1312 = vmatpush.msra.mxu3 %v439_v49  ;;  %v434_v53 = vld [vmem:[%s2643_s0 + $0x38] sm:$0xff]  ;;  %v428_v54 = vld [vmem:[%s2643_s0 + $0x8] sm:$0xff]  ;;  %s637_s6 = ssub.s32 (%p1935_p5), 5, %s636_s9 }
  0x9d   : > { %573 = vmatpush.msra.mxu2 %v438_v48  ;;  %485 = vmatpush.msra.mxu0 %v436_v51  ;;  %v435_v55 = vld [vmem:[%s2643_s0 + $0x40] sm:$0xff]  ;;  %v429_v56 = vld [vmem:[%s2643_s0 + $0x10] sm:$0xff]  ;;  %v430_v57 = vld [vmem:[%s2643_s0 + $0x18] sm:$0xff]  ;;  %p638_p1 = scmp.lt.s32.totalorder (%p1935_p5), %s637_s6, 3  ;;  %s2266_s11 = scalar_lea.vmem (%p1935_p5), %s2645_s2, %s1307_s29  }
  0x9e   : > { %1265 = vmatmul.msk.f32.vlgmr.msra.gmra.mxu2 %vm442_vm0, %v427_v46  ;;  %529 = vmatpush.msra.mxu1 %v437_v52  ;;  %v431_v58 = vld [vmem:[%s2643_s0 + $0x20] sm:$0xff]  ;;  %v432_v59 = vld [vmem:[%s2643_s0 + $0x28] sm:$0xff]  ;;  %v433_v60 = vld [vmem:[%s2643_s0 + $0x30] sm:$0xff] }
  0x9f   : > { %1247 = vmatmul.msk.f32.vlgmr.msra.gmra.mxu0 %vm442_vm0, %v427_v46  ;;  %1256 = vmatmul.msk.f32.vlgmr.msra.gmra.mxu1 %vm442_vm0, %v427_v46 }
  0xa0   : > { %1313 = vmatpush.msra.mxu3 %v436_v51 }
  0xa1   : > { %1254 = vmatmul.msk.f32.vlgmr.msra.gmra.mxu3 %vm442_vm0, %v434_v53 }
  0xa2   : > { %1314 = vmatpush.msrb.mxu3 %v440_v50 }
  0xa4   : > { %1315 = vmatpush.msrb.mxu3 %v437_v52 }
  0xa6   : > { %1316 = vmatpush.msra.mxu3 %v441_v47  ;;  %1266 = vmatmul.msk.f32.gmra.mxu2 %vm442_vm0, %v428_v54 }
  0xa7   : > { %1248 = vmatmul.msk.f32.gmra.mxu0 %vm442_vm0, %v428_v54  ;;  %1257 = vmatmul.msk.f32.gmra.mxu1 %vm442_vm0, %v428_v54 }
  0xa8   : > { %1317 = vmatpush.msra.mxu3 %v438_v48 }
  0xa9   : > { %1255 = vmatmul.msk.f32.gmra.mxu3 %vm442_vm0, %v435_v55 }
  0xae   : > { %1267 = vmatmul.msk.f32.gmra.mxu2 %vm442_vm0, %v429_v56 }
  0xaf   : > { %1249 = vmatmul.msk.f32.gmra.mxu0 %vm442_vm0, %v429_v56  ;;  %1258 = vmatmul.msk.f32.gmra.mxu1 %vm442_vm0, %v429_v56 }
  0xb1   : > { %1263 = vmatmul.msk.f32.vlgmr.msrb.gmra.mxu3 %vm442_vm0, %v434_v53 }
  0xb6   : > { %1268 = vmatmul.msk.f32.gmra.mxu2 %vm442_vm0, %v430_v57 }
  0xb7   : > { %1250 = vmatmul.msk.f32.gmra.mxu0 %vm442_vm0, %v430_v57  ;;  %1259 = vmatmul.msk.f32.gmra.mxu1 %vm442_vm0, %v430_v57 }
  0xb9   : > { %1264 = vmatmul.msk.f32.gmra.mxu3 %vm442_vm0, %v435_v55 }
  0xbe   : > { %1269 = vmatmul.msk.f32.gmra.mxu2 %vm442_vm0, %v431_v58 }
  0xbf   : > { %1251 = vmatmul.msk.f32.gmra.mxu0 %vm442_vm0, %v431_v58  ;;  %1260 = vmatmul.msk.f32.gmra.mxu1 %vm442_vm0, %v431_v58 }
  0xc1   : > { %1272 = vmatmul.msk.f32.vlgmr.msra.gmra.mxu3 %vm442_vm0, %v434_v53 }
  0xc6   : > { %1270 = vmatmul.msk.f32.gmra.mxu2 %vm442_vm0, %v432_v59 }
  0xc7   : > { %1252 = vmatmul.msk.f32.gmra.mxu0 %vm442_vm0, %v432_v59  ;;  %1261 = vmatmul.msk.f32.gmra.mxu1 %vm442_vm0, %v432_v59 }
  0xc9   : > { %1273 = vmatmul.msk.f32.gmra.mxu3 %vm442_vm0, %v435_v55 }
  0xce   : > { %1271 = vmatmul.msk.f32.gmra.mxu2 %vm442_vm0, %v433_v60 }
  0xcf   : > { %1253 = vmatmul.msk.f32.gmra.mxu0 %vm442_vm0, %v433_v60  ;;  %1262 = vmatmul.msk.f32.gmra.mxu1 %vm442_vm0, %v433_v60 }
 0x11c   : > { %v487_v61 = vpop.f32.mrf.mxu0  ;;  %v531_v62 = vpop.f32.mrf.mxu1 }
 0x11d   : > { %602 = vst [vmem:[%s2230_s27] sm:$0xff] %v487_v61 }
 0x11e   : > { %603 = vst [vmem:[%s2230_s27 + $0x8] sm:$0xff] %v531_v62 }
 0x121   : > { %v575_v63 = vpop.f32.mrf.mxu2 }
 0x122   : > { %604 = vst [vmem:[%s2230_s27 + $0x10] sm:$0xff] %v575_v63 }
 0x124   : > { %v490_v0 = vpop.f32.mrf.mxu0  ;;  %v508_v1 = vpop.f32.mrf.mxu3 }
 0x125   : > { %605 = vst [vmem:[%s2230_s27 + $0x18] sm:$0xff] %v490_v0  ;;  %v534_v2 = vpop.f32.mrf.mxu1 }
 0x126   : > { %623 = vst [vmem:[%s2230_s27 + $0xa8] sm:$0xff] %v508_v1 }
 0x127   : > { %606 = vst [vmem:[%s2230_s27 + $0x20] sm:$0xff] %v534_v2 }
 0x129   : > { %v578_v3 = vpop.f32.mrf.mxu2 }
 0x12a   : > { %607 = vst [vmem:[%s2230_s27 + $0x28] sm:$0xff] %v578_v3 }
 0x12c   : > { %v493_v4 = vpop.f32.mrf.mxu0  ;;  %v511_v5 = vpop.f32.mrf.mxu3 }
 0x12d   : > { %608 = vst [vmem:[%s2230_s27 + $0x30] sm:$0xff] %v493_v4  ;;  %v537_v6 = vpop.f32.mrf.mxu1 }
 0x12e   : > { %626 = vst [vmem:[%s2230_s27 + $0xc0] sm:$0xff] %v511_v5 }
 0x12f   : > { %609 = vst [vmem:[%s2230_s27 + $0x38] sm:$0xff] %v537_v6 }
 0x131   : > { %v581_v7 = vpop.f32.mrf.mxu2 }
 0x132   : > { %610 = vst [vmem:[%s2230_s27 + $0x40] sm:$0xff] %v581_v7 }
 0x134   : > { %v496_v8 = vpop.f32.mrf.mxu0  ;;  %v552_v9 = vpop.f32.mrf.mxu3 }
 0x135   : > { %611 = vst [vmem:[%s2230_s27 + $0x48] sm:$0xff] %v496_v8  ;;  %v540_v10 = vpop.f32.mrf.mxu1 }
 0x136   : > { %612 = vst [vmem:[%s2230_s27 + $0x50] sm:$0xff] %v540_v10 }
 0x137   : > { %624 = vst [vmem:[%s2230_s27 + $0xb0] sm:$0xff] %v552_v9 }
 0x139   : > { %v584_v11 = vpop.f32.mrf.mxu2 }
 0x13a   : > { %613 = vst [vmem:[%s2230_s27 + $0x58] sm:$0xff] %v584_v11 }
 0x13c   : > { %v499_v12 = vpop.f32.mrf.mxu0  ;;  %v555_v13 = vpop.f32.mrf.mxu3 }
 0x13d   : > { %614 = vst [vmem:[%s2230_s27 + $0x60] sm:$0xff] %v499_v12  ;;  %v543_v14 = vpop.f32.mrf.mxu1 }
 0x13e   : > { %615 = vst [vmem:[%s2230_s27 + $0x68] sm:$0xff] %v543_v14 }
 0x13f   : > { %627 = vst [vmem:[%s2230_s27 + $0xc8] sm:$0xff] %v555_v13 }
 0x141   : > { %v587_v15 = vpop.f32.mrf.mxu2 }
 0x142   : > { %616 = vst [vmem:[%s2230_s27 + $0x70] sm:$0xff] %v587_v15 }
 0x144   : > { %v502_v16 = vpop.f32.mrf.mxu0  ;;  %v596_v17 = vpop.f32.mrf.mxu3 }
 0x145   : > { %617 = vst [vmem:[%s2230_s27 + $0x78] sm:$0xff] %v502_v16  ;;  %v546_v18 = vpop.f32.mrf.mxu1 }
 0x146   : > { %618 = vst [vmem:[%s2230_s27 + $0x80] sm:$0xff] %v546_v18 }
 0x147   : > { %625 = vst [vmem:[%s2230_s27 + $0xb8] sm:$0xff] %v596_v17 }
 0x149   : > { %v590_v19 = vpop.f32.mrf.mxu2 }
 0x14a   : > { %619 = vst [vmem:[%s2230_s27 + $0x88] sm:$0xff] %v590_v19 }
 0x14c   : > { %v505_v20 = vpop.f32.mrf.mxu0  ;;  %v599_v21 = vpop.f32.mrf.mxu3 }
 0x14d   : > { %620 = vst [vmem:[%s2230_s27 + $0x90] sm:$0xff] %v505_v20  ;;  %v549_v22 = vpop.f32.mrf.mxu1 }
 0x14e   : > { %621 = vst [vmem:[%s2230_s27 + $0x98] sm:$0xff] %v549_v22  ;;  %635 = sbr.rel (!%p1935_p5) target bundleno = 518 (0x206), region = 98 }
 0x14f   : > { %628 = vst [vmem:[%s2230_s27 + $0xd0] sm:$0xff] %v599_v21 }
 0x151   : > { %v593_v23 = vpop.f32.mrf.mxu2 }
 0x152   : > { %622 = vst [vmem:[%s2230_s27 + $0xa0] sm:$0xff] %v593_v23 }
 0x153   : > { %s2689_s6 = smov (!%p638_p1, %s637_s6), 3 }
 0x154   : > { %s640_s28 = smul.u32 72, %s2689_s6  ;;  %s2268_s7 = sshll.u32 %s2689_s6, 3 }
 0x156   : > { %p1277_p2 = scmp.eq.s32.totalorder %s640_s28, 0 }
 0x157   : > { %p648_p3 = scmp.lt.u32.totalorder (!%p1277_p2), %s2268_s7, 8 }
 0x158   : > { %647 = sbr.rel (%p1277_p2) target bundleno = 518 (0x206), region = 102 }
 0x15d   : > { %651 = sbr.rel (%p648_p3) target bundleno = 501 (0x1f5), region = 106  ;;  %s2272_s17 = sand.u32 (!%p648_p3), 7, %s2268_s7  }
 0x15e   : > { %p684_p5 = scmp.eq.s32.totalorder (!%p648_p3), %s2272_s17, 0  ;;  %p1278_p4 = scmp.ne.s32.totalorder (!%p648_p3), %s2272_s17, 0 }
 0x162   : > { %687 = sbr.rel (%p1278_p4) target bundleno = 421 (0x1a5), region = 121  ;;  %s688_s12 = sshrl.u32 (!%p1278_p4), %s2268_s7, 3 }
 0x163   : > { %s2279_s30 = sshrl.u32 (!%p1278_p4), %s688_s12, 2 }
 0x164   : > { %p1279_p6 = scmp.le.s32.totalorder (!%p1278_p4), %s2279_s30, 0 }
 0x167   : > { %1144 = sbr.rel (%p1279_p6) target bundleno = 401 (0x191), region = 269  ;;  %s2657_s3 = smov (!%p1279_p6), %s2266_s11 }
 0x168   : > { %s2658_s4 = smov (!%p1279_p6), %s2230_s27  ;;  %s2288_s21 = smov (!%p1279_p6), 0  }
 0x169   : > { %s2290_s20 = smov (!%p1279_p6), 0  }
 0x16c LB: >> { %v699_v24 = vld [vmem:[%s1827_s4] sm:$0xff]  ;;  %v701_v25 = vld [vmem:[%s1827_s4 + $0x8] sm:$0xff]  ;;  %v703_v26 = vld [vmem:[%s1827_s4 + $0x10] sm:$0xff]  ;;  %s771_s22 = sadd.s32 1, %s1831_s21  ;;  %s693_s20 = sadd.s32 1, %s1835_s20   ;;  %s1835_s20 = sphi %s2290_s20, %s693_s20   ;;  %s1831_s21 = sphi %s2288_s21, %s2661_s21   ;;  %s1827_s4 = sphi %s2658_s4, %s2660_s4   ;;  %s1823_s3 = sphi %s2657_s3, %s2659_s3  }
 0x16d   : >> { %700 = vst [vmem:[%s1823_s3] sm:$0xff] %v699_v24  ;;  %v705_v27 = vld [vmem:[%s1827_s4 + $0x18] sm:$0xff]  ;;  %p772_p7 = scmp.ge.s32.totalorder %s771_s22, %s2279_s30  ;;  %v709_v28 = vld [vmem:[%s1827_s4 + $0x20] sm:$0xff]  ;;  %v711_v29 = vld [vmem:[%s1827_s4 + $0x28] sm:$0xff]  ;;  %p692_p8 = scmp.ge.s32.totalorder %s693_s20, %s2279_s30 }
 0x16e   : >> { %702 = vst [vmem:[%s1823_s3 + $0x8] sm:$0xff] %v701_v25  ;;  %v713_v30 = vld [vmem:[%s1827_s4 + $0x30] sm:$0xff]  ;;  %v717_v31 = vld [vmem:[%s1827_s4 + $0x38] sm:$0xff]  ;;  %v719_v32 = vld [vmem:[%s1827_s4 + $0x40] sm:$0xff] }
 0x16f   : >> { %704 = vst [vmem:[%s1823_s3 + $0x10] sm:$0xff] %v703_v26  ;;  %s2691_s22 = smov (%p772_p7, %s771_s22), 0  ;;  %v721_v33 = vld [vmem:[%s1827_s4 + $0x48] sm:$0xff]  ;;  %v725_v34 = vld [vmem:[%s1827_s4 + $0x50] sm:$0xff]  ;;  %v727_v35 = vld [vmem:[%s1827_s4 + $0x58] sm:$0xff] }
 0x170   : >> { %706 = vst [vmem:[%s1823_s3 + $0x18] sm:$0xff] %v705_v27  ;;  %s1280_s5 = sshll.u32 %s2691_s22, 5  ;;  %v729_v36 = vld [vmem:[%s1827_s4 + $0x60] sm:$0xff]  ;;  %v733_v37 = vld [vmem:[%s1827_s4 + $0x68] sm:$0xff]  ;;  %v735_v38 = vld [vmem:[%s1827_s4 + $0x70] sm:$0xff]  ;;  %s2661_s21 = smov %s2691_s22 }
 0x171   : >> { %708 = vst [vmem:[%s1823_s3 + $0x28] sm:$0xff] %v705_v27  ;;  %s2320_s14 = scalar_lea.vmem %s2230_s27, %s1280_s5 [#allocation3]   ;;  %s2323_s15 = scalar_lea.vmem %s2266_s11, %s1280_s5   ;;  %v737_v39 = vld [vmem:[%s1827_s4 + $0x78] sm:$0xff]  ;;  %v741_v40 = vld [vmem:[%s1827_s4 + $0x80] sm:$0xff]  ;;  %v743_v41 = vld [vmem:[%s1827_s4 + $0x88] sm:$0xff] }
 0x172   : >> { %710 = vst [vmem:[%s1823_s3 + $0x30] sm:$0xff] %v709_v28  ;;  %v745_v42 = vld [vmem:[%s1827_s4 + $0x90] sm:$0xff]  ;;  %v749_v43 = vld [vmem:[%s1827_s4 + $0x98] sm:$0xff]  ;;  %v751_v44 = vld [vmem:[%s1827_s4 + $0xa0] sm:$0xff] }
 0x173   : >> { %712 = vst [vmem:[%s1823_s3 + $0x38] sm:$0xff] %v711_v29  ;;  %v753_v45 = vld [vmem:[%s1827_s4 + $0xa8] sm:$0xff]  ;;  %v757_v46 = vld [vmem:[%s1827_s4 + $0xb0] sm:$0xff]  ;;  %v759_v47 = vld [vmem:[%s1827_s4 + $0xb8] sm:$0xff] }
 0x174   : >> { %714 = vst [vmem:[%s1823_s3 + $0x40] sm:$0xff] %v713_v30  ;;  %v761_v48 = vld [vmem:[%s1827_s4 + $0xc0] sm:$0xff]  ;;  %v765_v49 = vld [vmem:[%s1827_s4 + $0xc8] sm:$0xff]  ;;  %v767_v50 = vld [vmem:[%s1827_s4 + $0xd0] sm:$0xff] }
 0x175   : >> { %716 = vst [vmem:[%s1823_s3 + $0x50] sm:$0xff] %v713_v30  ;;  %v769_v51 = vld [vmem:[%s1827_s4 + $0xd8] sm:$0xff]  ;;  %s2660_s4 = smov %s2320_s14 }
 0x176   : >> { %718 = vst [vmem:[%s1823_s3 + $0x58] sm:$0xff] %v717_v31 }
 0x177   : >> { %720 = vst [vmem:[%s1823_s3 + $0x60] sm:$0xff] %v719_v32 }
 0x178   : >> { %722 = vst [vmem:[%s1823_s3 + $0x68] sm:$0xff] %v721_v33 }
 0x179   : >> { %724 = vst [vmem:[%s1823_s3 + $0x78] sm:$0xff] %v721_v33 }
 0x17a   : >> { %726 = vst [vmem:[%s1823_s3 + $0x80] sm:$0xff] %v725_v34 }
 0x17b   : >> { %728 = vst [vmem:[%s1823_s3 + $0x88] sm:$0xff] %v727_v35 }
 0x17c   : >> { %730 = vst [vmem:[%s1823_s3 + $0x90] sm:$0xff] %v729_v36 }
 0x17d   : >> { %732 = vst [vmem:[%s1823_s3 + $0xa0] sm:$0xff] %v729_v36 }
 0x17e   : >> { %734 = vst [vmem:[%s1823_s3 + $0xa8] sm:$0xff] %v733_v37 }
 0x17f   : >> { %736 = vst [vmem:[%s1823_s3 + $0xb0] sm:$0xff] %v735_v38 }
 0x180   : >> { %738 = vst [vmem:[%s1823_s3 + $0xb8] sm:$0xff] %v737_v39 }
 0x181   : >> { %740 = vst [vmem:[%s1823_s3 + $0xc8] sm:$0xff] %v737_v39 }
 0x182   : >> { %742 = vst [vmem:[%s1823_s3 + $0xd0] sm:$0xff] %v741_v40 }
 0x183   : >> { %744 = vst [vmem:[%s1823_s3 + $0xd8] sm:$0xff] %v743_v41 }
 0x184   : >> { %746 = vst [vmem:[%s1823_s3 + $0xe0] sm:$0xff] %v745_v42 }
 0x185   : >> { %748 = vst [vmem:[%s1823_s3 + $0xf0] sm:$0xff] %v745_v42 }
 0x186   : >> { %750 = vst [vmem:[%s1823_s3 + $0xf8] sm:$0xff] %v749_v43 }
 0x187   : >> { %752 = vst [vmem:[%s1823_s3 + $0x100] sm:$0xff] %v751_v44 }
 0x188   : >> { %754 = vst [vmem:[%s1823_s3 + $0x108] sm:$0xff] %v753_v45 }
 0x189   : >> { %756 = vst [vmem:[%s1823_s3 + $0x118] sm:$0xff] %v753_v45 }
 0x18a   : >> { %758 = vst [vmem:[%s1823_s3 + $0x120] sm:$0xff] %v757_v46 }
 0x18b   : >> { %760 = vst [vmem:[%s1823_s3 + $0x128] sm:$0xff] %v759_v47 }
 0x18c   : >> { %762 = vst [vmem:[%s1823_s3 + $0x130] sm:$0xff] %v761_v48  ;;  %695 = sbr.rel (!%p692_p8) target bundleno = 364 (0x16c), region = 275 }
 0x18d   : >> { %764 = vst [vmem:[%s1823_s3 + $0x140] sm:$0xff] %v761_v48 }
 0x18e   : >> { %766 = vst [vmem:[%s1823_s3 + $0x148] sm:$0xff] %v765_v49 }
 0x18f   : >> { %768 = vst [vmem:[%s1823_s3 + $0x150] sm:$0xff] %v767_v50 }
 0x190   : >> { %770 = vst [vmem:[%s1823_s3 + $0x158] sm:$0xff] %v769_v51  ;;  %s2659_s3 = smov %s2323_s15 }
 0x191 PF: > { %s2391_s18 = sand.u32 3, %s688_s12   ;;  %s1308_s19 = sshll.u32 %s2279_s30, 5 }
 0x192   : > { %s2395_s23 = scalar_lea.vmem %s2230_s27, %s1308_s19 [#allocation3]   ;;  %s2398_s24 = scalar_lea.vmem %s2266_s11, %s1308_s19  }
 0x193   : > { %p1285_p9 = scmp.le.s32.totalorder %s2391_s18, 0 }
 0x194   : > { %s2662_s26 = smov (!%p1285_p9), %s2398_s24  ;;  %s2663_s9 = smov (!%p1285_p9), %s2395_s23 }
 0x195   : > { %1158 = sbr.rel (%p1285_p9) target bundleno = 421 (0x1a5), region = 280  ;;  %s2407_s29 = smov (!%p1285_p9), 0  }
 0x196   : > { %s2409_s6 = smov (!%p1285_p9), 0  }
 0x19a LB: >> { %v794_v52 = vld [vmem:[%s1843_s9] sm:$0xff]  ;;  %v796_v53 = vld [vmem:[%s1843_s9 + $0x18] sm:$0xff]  ;;  %v798_v54 = vld [vmem:[%s1843_s9 + $0x30] sm:$0xff]  ;;  %s812_s8 = sadd.s32 1, %s1847_s29  ;;  %s788_s6 = sadd.s32 1, %s1851_s6   ;;  %s1851_s6 = sphi %s2409_s6, %s788_s6   ;;  %s1847_s29 = sphi %s2407_s29, %s2665_s29   ;;  %s1843_s9 = sphi %s2663_s9, %s817_s9   ;;  %s1839_s26 = sphi %s2662_s26, %s2664_s26  }
 0x19b   : >> { %795 = vst [vmem:[%s1839_s26] sm:$0xff] %v794_v52  ;;  %v800_v55 = vld [vmem:[%s1843_s9 + $0x48] sm:$0xff]  ;;  %p813_p10 = scmp.ge.s32.totalorder %s812_s8, %s2391_s18  ;;  %v802_v56 = vld [vmem:[%s1843_s9 + $0x60] sm:$0xff]  ;;  %v804_v57 = vld [vmem:[%s1843_s9 + $0x78] sm:$0xff]  ;;  %p787_p11 = scmp.ge.s32.totalorder %s788_s6, %s2391_s18 }
 0x19c   : >> { %797 = vst [vmem:[%s1839_s26 + $0x28] sm:$0xff] %v796_v53  ;;  %v806_v58 = vld [vmem:[%s1843_s9 + $0x90] sm:$0xff]  ;;  %v808_v59 = vld [vmem:[%s1843_s9 + $0xa8] sm:$0xff]  ;;  %v810_v60 = vld [vmem:[%s1843_s9 + $0xc0] sm:$0xff] }
 0x19d   : >> { %799 = vst [vmem:[%s1839_s26 + $0x50] sm:$0xff] %v798_v54  ;;  %s2693_s8 = smov (%p813_p10, %s812_s8), 0 }
 0x19e   : >> { %801 = vst [vmem:[%s1839_s26 + $0x78] sm:$0xff] %v800_v55  ;;  %s1286_s25 = sshll.u32 %s2693_s8, 3  ;;  %s2665_s29 = smov %s2693_s8 }
 0x19f   : >> { %803 = vst [vmem:[%s1839_s26 + $0xa0] sm:$0xff] %v802_v56  ;;  %s817_s9 = scalar_lea.vmem %s2395_s23, %s1286_s25 [#allocation3]   ;;  %s818_s28 = scalar_lea.vmem %s2398_s24, %s1286_s25  }
 0x1a0   : >> { %805 = vst [vmem:[%s1839_s26 + $0xc8] sm:$0xff] %v804_v57  ;;  %790 = sbr.rel (!%p787_p11) target bundleno = 410 (0x19a), region = 286 }
 0x1a1   : >> { %807 = vst [vmem:[%s1839_s26 + $0xf0] sm:$0xff] %v806_v58 }
 0x1a2   : >> { %809 = vst [vmem:[%s1839_s26 + $0x118] sm:$0xff] %v808_v59 }
 0x1a3   : >> { %811 = vst [vmem:[%s1839_s26 + $0x140] sm:$0xff] %v810_v60  ;;  %s2664_s26 = smov %s818_s28 }
 0x1a5 PF: > { %821 = sbr.rel (%p684_p5) target bundleno = 501 (0x1f5), region = 139  ;;  %s823_s12 = ssub.s32 (!%p684_p5), %s2268_s7, %s2272_s17 }
 0x1a6   : > { %s827_s30 = sshrl.u32 (!%p684_p5), %s2268_s7, 3  ;;  %s2436_s3 = scalar_lea.vmem (!%p684_p5), %s2230_s27, %s823_s12 [#allocation3] }
 0x1a7   : > { %s2439_s4 = scalar_lea.vmem (!%p684_p5), %s2266_s11, %s823_s12  ;;  %s2443_s21 = sshrl.u32 (!%p684_p5), %s827_s30, 2 }
 0x1a8   : > { %p1288_p12 = scmp.le.s32.totalorder (!%p684_p5), %s2443_s21, 0 }
 0x1aa   : > { %1172 = sbr.rel (%p1288_p12) target bundleno = 468 (0x1d4), region = 291  ;;  %s2666_s20 = smov (!%p1288_p12), %s2266_s11 }
 0x1ab   : > { %s2667_s22 = smov (!%p1288_p12), %s2230_s27  ;;  %s2452_s5 = smov (!%p1288_p12), 0  }
 0x1ac   : > { %s2454_s14 = smov (!%p1288_p12), 0  }
 0x1af LB: >> { %v838_v61 = vld [vmem:[%s1859_s22] sm:$0xff]  ;;  %v840_v62 = vld [vmem:[%s1859_s22 + $0x8] sm:$0xff]  ;;  %v842_v63 = vld [vmem:[%s1859_s22 + $0x10] sm:$0xff]  ;;  %s910_s15 = sadd.s32 1, %s1863_s5  ;;  %s832_s14 = sadd.s32 1, %s1867_s14   ;;  %s1867_s14 = sphi %s2454_s14, %s832_s14   ;;  %s1863_s5 = sphi %s2452_s5, %s2670_s5   ;;  %s1859_s22 = sphi %s2667_s22, %s2669_s22   ;;  %s1855_s20 = sphi %s2666_s20, %s2668_s20  }
 0x1b0   : >> { %839 = vst [vmem:[%s1855_s20] sm:$0xff] %v838_v61  ;;  %v844_v0 = vld [vmem:[%s1859_s22 + $0x18] sm:$0xff]  ;;  %p911_p13 = scmp.ge.s32.totalorder %s910_s15, %s2443_s21  ;;  %v848_v1 = vld [vmem:[%s1859_s22 + $0x20] sm:$0xff]  ;;  %v850_v2 = vld [vmem:[%s1859_s22 + $0x28] sm:$0xff]  ;;  %p831_p0 = scmp.ge.s32.totalorder %s832_s14, %s2443_s21 }
 0x1b1   : >> { %841 = vst [vmem:[%s1855_s20 + $0x8] sm:$0xff] %v840_v62  ;;  %v852_v3 = vld [vmem:[%s1859_s22 + $0x30] sm:$0xff]  ;;  %v856_v4 = vld [vmem:[%s1859_s22 + $0x38] sm:$0xff]  ;;  %v858_v5 = vld [vmem:[%s1859_s22 + $0x40] sm:$0xff] }
 0x1b2   : >> { %843 = vst [vmem:[%s1855_s20 + $0x10] sm:$0xff] %v842_v63  ;;  %s2695_s15 = smov (%p911_p13, %s910_s15), 0  ;;  %v860_v6 = vld [vmem:[%s1859_s22 + $0x48] sm:$0xff]  ;;  %v864_v7 = vld [vmem:[%s1859_s22 + $0x50] sm:$0xff]  ;;  %v866_v8 = vld [vmem:[%s1859_s22 + $0x58] sm:$0xff] }
 0x1b3   : >> { %845 = vst [vmem:[%s1855_s20 + $0x18] sm:$0xff] %v844_v0  ;;  %s1289_s18 = sshll.u32 %s2695_s15, 5  ;;  %v868_v9 = vld [vmem:[%s1859_s22 + $0x60] sm:$0xff]  ;;  %v872_v10 = vld [vmem:[%s1859_s22 + $0x68] sm:$0xff]  ;;  %v874_v11 = vld [vmem:[%s1859_s22 + $0x70] sm:$0xff]  ;;  %s2670_s5 = smov %s2695_s15 }
 0x1b4   : >> { %847 = vst [vmem:[%s1855_s20 + $0x28] sm:$0xff] %v844_v0  ;;  %s2484_s19 = scalar_lea.vmem %s2230_s27, %s1289_s18 [#allocation3]   ;;  %s2487_s23 = scalar_lea.vmem %s2266_s11, %s1289_s18   ;;  %v876_v12 = vld [vmem:[%s1859_s22 + $0x78] sm:$0xff]  ;;  %v880_v13 = vld [vmem:[%s1859_s22 + $0x80] sm:$0xff]  ;;  %v882_v14 = vld [vmem:[%s1859_s22 + $0x88] sm:$0xff] }
 0x1b5   : >> { %849 = vst [vmem:[%s1855_s20 + $0x30] sm:$0xff] %v848_v1  ;;  %v884_v15 = vld [vmem:[%s1859_s22 + $0x90] sm:$0xff]  ;;  %v888_v16 = vld [vmem:[%s1859_s22 + $0x98] sm:$0xff]  ;;  %v890_v17 = vld [vmem:[%s1859_s22 + $0xa0] sm:$0xff] }
 0x1b6   : >> { %851 = vst [vmem:[%s1855_s20 + $0x38] sm:$0xff] %v850_v2  ;;  %v892_v18 = vld [vmem:[%s1859_s22 + $0xa8] sm:$0xff]  ;;  %v896_v19 = vld [vmem:[%s1859_s22 + $0xb0] sm:$0xff]  ;;  %v898_v20 = vld [vmem:[%s1859_s22 + $0xb8] sm:$0xff] }
 0x1b7   : >> { %853 = vst [vmem:[%s1855_s20 + $0x40] sm:$0xff] %v852_v3  ;;  %v900_v21 = vld [vmem:[%s1859_s22 + $0xc0] sm:$0xff]  ;;  %v904_v22 = vld [vmem:[%s1859_s22 + $0xc8] sm:$0xff]  ;;  %v906_v23 = vld [vmem:[%s1859_s22 + $0xd0] sm:$0xff] }
 0x1b8   : >> { %855 = vst [vmem:[%s1855_s20 + $0x50] sm:$0xff] %v852_v3  ;;  %v908_v24 = vld [vmem:[%s1859_s22 + $0xd8] sm:$0xff]  ;;  %s2669_s22 = smov %s2484_s19 }
 0x1b9   : >> { %857 = vst [vmem:[%s1855_s20 + $0x58] sm:$0xff] %v856_v4 }
 0x1ba   : >> { %859 = vst [vmem:[%s1855_s20 + $0x60] sm:$0xff] %v858_v5 }
 0x1bb   : >> { %861 = vst [vmem:[%s1855_s20 + $0x68] sm:$0xff] %v860_v6 }
 0x1bc   : >> { %863 = vst [vmem:[%s1855_s20 + $0x78] sm:$0xff] %v860_v6 }
 0x1bd   : >> { %865 = vst [vmem:[%s1855_s20 + $0x80] sm:$0xff] %v864_v7 }
 0x1be   : >> { %867 = vst [vmem:[%s1855_s20 + $0x88] sm:$0xff] %v866_v8 }
 0x1bf   : >> { %869 = vst [vmem:[%s1855_s20 + $0x90] sm:$0xff] %v868_v9 }
 0x1c0   : >> { %871 = vst [vmem:[%s1855_s20 + $0xa0] sm:$0xff] %v868_v9 }
 0x1c1   : >> { %873 = vst [vmem:[%s1855_s20 + $0xa8] sm:$0xff] %v872_v10 }
 0x1c2   : >> { %875 = vst [vmem:[%s1855_s20 + $0xb0] sm:$0xff] %v874_v11 }
 0x1c3   : >> { %877 = vst [vmem:[%s1855_s20 + $0xb8] sm:$0xff] %v876_v12 }
 0x1c4   : >> { %879 = vst [vmem:[%s1855_s20 + $0xc8] sm:$0xff] %v876_v12 }
 0x1c5   : >> { %881 = vst [vmem:[%s1855_s20 + $0xd0] sm:$0xff] %v880_v13 }
 0x1c6   : >> { %883 = vst [vmem:[%s1855_s20 + $0xd8] sm:$0xff] %v882_v14 }
 0x1c7   : >> { %885 = vst [vmem:[%s1855_s20 + $0xe0] sm:$0xff] %v884_v15 }
 0x1c8   : >> { %887 = vst [vmem:[%s1855_s20 + $0xf0] sm:$0xff] %v884_v15 }
 0x1c9   : >> { %889 = vst [vmem:[%s1855_s20 + $0xf8] sm:$0xff] %v888_v16 }
 0x1ca   : >> { %891 = vst [vmem:[%s1855_s20 + $0x100] sm:$0xff] %v890_v17 }
 0x1cb   : >> { %893 = vst [vmem:[%s1855_s20 + $0x108] sm:$0xff] %v892_v18 }
 0x1cc   : >> { %895 = vst [vmem:[%s1855_s20 + $0x118] sm:$0xff] %v892_v18 }
 0x1cd   : >> { %897 = vst [vmem:[%s1855_s20 + $0x120] sm:$0xff] %v896_v19 }
 0x1ce   : >> { %899 = vst [vmem:[%s1855_s20 + $0x128] sm:$0xff] %v898_v20 }
 0x1cf   : >> { %901 = vst [vmem:[%s1855_s20 + $0x130] sm:$0xff] %v900_v21  ;;  %834 = sbr.rel (!%p831_p0) target bundleno = 431 (0x1af), region = 297 }
 0x1d0   : >> { %903 = vst [vmem:[%s1855_s20 + $0x140] sm:$0xff] %v900_v21 }
 0x1d1   : >> { %905 = vst [vmem:[%s1855_s20 + $0x148] sm:$0xff] %v904_v22 }
 0x1d2   : >> { %907 = vst [vmem:[%s1855_s20 + $0x150] sm:$0xff] %v906_v23 }
 0x1d3   : >> { %909 = vst [vmem:[%s1855_s20 + $0x158] sm:$0xff] %v908_v24  ;;  %s2668_s20 = smov %s2487_s23 }
 0x1d4 PF: > { %s2555_s24 = sand.u32 3, %s827_s30   ;;  %s1310_s26 = sshll.u32 %s2443_s21, 5 }
 0x1d5   : > { %s2559_s9 = scalar_lea.vmem %s2230_s27, %s1310_s26 [#allocation3]   ;;  %s2562_s29 = scalar_lea.vmem %s2266_s11, %s1310_s26  }
 0x1d6   : > { %p1294_p1 = scmp.le.s32.totalorder %s2555_s24, 0 }
 0x1d7   : > { %s2671_s6 = smov (!%p1294_p1), %s2562_s29  ;;  %s2672_s8 = smov (!%p1294_p1), %s2559_s9 }
 0x1d8   : > { %1186 = sbr.rel (%p1294_p1) target bundleno = 488 (0x1e8), region = 302  ;;  %s2571_s25 = smov (!%p1294_p1), 0  }
 0x1d9   : > { %s2573_s28 = smov (!%p1294_p1), 0  }
 0x1dd LB: >> { %v933_v25 = vld [vmem:[%s1875_s8] sm:$0xff]  ;;  %v935_v26 = vld [vmem:[%s1875_s8 + $0x18] sm:$0xff]  ;;  %v937_v27 = vld [vmem:[%s1875_s8 + $0x30] sm:$0xff]  ;;  %s951_s12 = sadd.s32 1, %s1879_s25  ;;  %s927_s28 = sadd.s32 1, %s1883_s28   ;;  %s1883_s28 = sphi %s2573_s28, %s927_s28   ;;  %s1879_s25 = sphi %s2571_s25, %s2674_s25   ;;  %s1875_s8 = sphi %s2672_s8, %s956_s8   ;;  %s1871_s6 = sphi %s2671_s6, %s2673_s6  }
 0x1de   : >> { %934 = vst [vmem:[%s1871_s6] sm:$0xff] %v933_v25  ;;  %v939_v28 = vld [vmem:[%s1875_s8 + $0x48] sm:$0xff]  ;;  %p952_p2 = scmp.ge.s32.totalorder %s951_s12, %s2555_s24  ;;  %v941_v29 = vld [vmem:[%s1875_s8 + $0x60] sm:$0xff]  ;;  %v943_v30 = vld [vmem:[%s1875_s8 + $0x78] sm:$0xff]  ;;  %p926_p3 = scmp.ge.s32.totalorder %s927_s28, %s2555_s24 }
 0x1df   : >> { %936 = vst [vmem:[%s1871_s6 + $0x28] sm:$0xff] %v935_v26  ;;  %v945_v31 = vld [vmem:[%s1875_s8 + $0x90] sm:$0xff]  ;;  %v947_v32 = vld [vmem:[%s1875_s8 + $0xa8] sm:$0xff]  ;;  %v949_v33 = vld [vmem:[%s1875_s8 + $0xc0] sm:$0xff] }
 0x1e0   : >> { %938 = vst [vmem:[%s1871_s6 + $0x50] sm:$0xff] %v937_v27  ;;  %s2697_s12 = smov (%p952_p2, %s951_s12), 0 }
 0x1e1   : >> { %940 = vst [vmem:[%s1871_s6 + $0x78] sm:$0xff] %v939_v28  ;;  %s1295_s30 = sshll.u32 %s2697_s12, 3  ;;  %s2674_s25 = smov %s2697_s12 }
 0x1e2   : >> { %942 = vst [vmem:[%s1871_s6 + $0xa0] sm:$0xff] %v941_v29  ;;  %s956_s8 = scalar_lea.vmem %s2559_s9, %s1295_s30 [#allocation3]   ;;  %s957_s21 = scalar_lea.vmem %s2562_s29, %s1295_s30  }
 0x1e3   : >> { %944 = vst [vmem:[%s1871_s6 + $0xc8] sm:$0xff] %v943_v30  ;;  %929 = sbr.rel (!%p926_p3) target bundleno = 477 (0x1dd), region = 308 }
 0x1e4   : >> { %946 = vst [vmem:[%s1871_s6 + $0xf0] sm:$0xff] %v945_v31 }
 0x1e5   : >> { %948 = vst [vmem:[%s1871_s6 + $0x118] sm:$0xff] %v947_v32 }
 0x1e6   : >> { %950 = vst [vmem:[%s1871_s6 + $0x140] sm:$0xff] %v949_v33  ;;  %s2673_s6 = smov %s957_s21 }
 0x1e8 PF: > { %s1887_s20 = smov 1  }
 0x1e9   : > { %s958_s22 = sshll.u32 %s1887_s20, %s2272_s17 }
 0x1ea   : > { %s1297_s5 = sadd.s32 4294967295, %s958_s22 }
 0x1eb   : > { %v968_v34 = vld [vmem:[%s2436_s3] sm:%s1297_s5]  ;;  %v970_v35 = vld [vmem:[%s2436_s3 + $0x18] sm:%s1297_s5] }
 0x1ec   : > { %969 = vst [vmem:[%s2439_s4] sm:%s1297_s5] %v968_v34  ;;  %v972_v36 = vld [vmem:[%s2436_s3 + $0x30] sm:%s1297_s5] }
 0x1ed   : > { %971 = vst [vmem:[%s2439_s4 + $0x28] sm:%s1297_s5] %v970_v35  ;;  %v974_v37 = vld [vmem:[%s2436_s3 + $0x48] sm:%s1297_s5] }
 0x1ee   : > { %973 = vst [vmem:[%s2439_s4 + $0x50] sm:%s1297_s5] %v972_v36  ;;  %v976_v38 = vld [vmem:[%s2436_s3 + $0x60] sm:%s1297_s5] }
 0x1ef   : > { %975 = vst [vmem:[%s2439_s4 + $0x78] sm:%s1297_s5] %v974_v37  ;;  %v978_v39 = vld [vmem:[%s2436_s3 + $0x78] sm:%s1297_s5] }
 0x1f0   : > { %977 = vst [vmem:[%s2439_s4 + $0xa0] sm:%s1297_s5] %v976_v38  ;;  %v980_v40 = vld [vmem:[%s2436_s3 + $0x90] sm:%s1297_s5] }
 0x1f1   : > { %979 = vst [vmem:[%s2439_s4 + $0xc8] sm:%s1297_s5] %v978_v39  ;;  %v982_v41 = vld [vmem:[%s2436_s3 + $0xa8] sm:%s1297_s5] }
 0x1f2   : > { %981 = vst [vmem:[%s2439_s4 + $0xf0] sm:%s1297_s5] %v980_v40  ;;  %v984_v42 = vld [vmem:[%s2436_s3 + $0xc0] sm:%s1297_s5] }
 0x1f3   : > { %983 = vst [vmem:[%s2439_s4 + $0x118] sm:%s1297_s5] %v982_v41 }
 0x1f4   : > { %985 = vst [vmem:[%s2439_s4 + $0x140] sm:%s1297_s5] %v984_v42 }
 0x1f5 PF: > { %p1298_p5 = scmp.ge.u32.totalorder %s2268_s7, 8 }
 0x1f6   : > { %s1888_s17 = smov (!%p1298_p5), 1  }
 0x1f7   : > { %654 = sbr.rel (%p1298_p5) target bundleno = 518 (0x206), region = 110  ;;  %s655_s3 = sshll.u32 (!%p1298_p5), %s1888_s17, %s2268_s7 }
 0x1f8   : > { %s1299_s4 = sadd.s32 (!%p1298_p5), 4294967295, %s655_s3 }
 0x1fc   : > { %v665_v43 = vld [vmem:[%s2230_s27] sm:%s1299_s4]  ;;  %v667_v44 = vld [vmem:[%s2230_s27 + $0x18] sm:%s1299_s4] }
 0x1fd   : > { %666 = vst [vmem:[%s2266_s11] sm:%s1299_s4] %v665_v43  ;;  %v669_v45 = vld [vmem:[%s2230_s27 + $0x30] sm:%s1299_s4] }
 0x1fe   : > { %668 = vst [vmem:[%s2266_s11 + $0x28] sm:%s1299_s4] %v667_v44  ;;  %v671_v46 = vld [vmem:[%s2230_s27 + $0x48] sm:%s1299_s4] }
 0x1ff   : > { %670 = vst [vmem:[%s2266_s11 + $0x50] sm:%s1299_s4] %v669_v45  ;;  %v673_v47 = vld [vmem:[%s2230_s27 + $0x60] sm:%s1299_s4] }
 0x200   : > { %672 = vst [vmem:[%s2266_s11 + $0x78] sm:%s1299_s4] %v671_v46  ;;  %v675_v48 = vld [vmem:[%s2230_s27 + $0x78] sm:%s1299_s4] }
 0x201   : > { %674 = vst [vmem:[%s2266_s11 + $0xa0] sm:%s1299_s4] %v673_v47  ;;  %v677_v49 = vld [vmem:[%s2230_s27 + $0x90] sm:%s1299_s4] }
 0x202   : > { %676 = vst [vmem:[%s2266_s11 + $0xc8] sm:%s1299_s4] %v675_v48  ;;  %v679_v50 = vld [vmem:[%s2230_s27 + $0xa8] sm:%s1299_s4] }
 0x203   : > { %678 = vst [vmem:[%s2266_s11 + $0xf0] sm:%s1299_s4] %v677_v49  ;;  %v681_v51 = vld [vmem:[%s2230_s27 + $0xc0] sm:%s1299_s4] }
 0x204   : > { %680 = vst [vmem:[%s2266_s11 + $0x118] sm:%s1299_s4] %v679_v50 }
 0x205   : > { %682 = vst [vmem:[%s2266_s11 + $0x140] sm:%s1299_s4] %v681_v51 }
 0x206 PF: > { %p9_p4 = scmp.ge.s32.totalorder %s1923_s13, 4   ;;  %s2675_s9 = smov %s1751_s10 }
 0x207   : > { %s2676_s10 = smov %s1933_s16  ;;  %s2677_s11 = smov %s1923_s13 }
 0x208   :  { %11 = sbr.rel (!%p9_p4) target bundleno = 2 (0x2), region = 319 }

// kernel: shape_vae_forward.17
= control target key start
LH: loop header
LB: loop body
LE: loop exit
PB: predicated region body
PF: predicated region fallthrough
CT: control target
= control target key end

     0   :  { %s1152_s9 = smov 0   ;;  %s1154_s10 = smov 0   ;;  %s1506_s0 = inlined_call_operand.vmem [shape: f32[4,8], index: 0, kind: input, shape index: {}]   ;;  %s1507_s1 = inlined_call_operand.vmem [shape: f32[8,2178], index: 1, kind: input, shape index: {}]   ;;  %s1508_s2 = inlined_call_operand.vmem [shape: f32[4,2178], index: 2, kind: output, shape index: {}]  }
   0x1   :  { %s1156_s11 = smov 0  }
   0x2 LB: > { %s1165_s12 = sadd.s32 4294967295, %s1069_s11   ;;  %s1167_s13 = sadd.s32 1, %s1069_s11   ;;  %s1069_s11 = sphi %s1156_s11, %s1522_s11   ;;  %s1065_s10 = sphi %s1154_s10, %s1521_s10   ;;  %s1061_s9 = sphi %s1152_s9, %s1520_s9  }
   0x3   : > { %s63_s14 = ssub.s32 %s1069_s11, %s1167_s13  ;;  %s66_s15 = sadd.s32 1, %s1065_s10 }
   0x4   : > { %p64_p0 = scmp.eq.s32.totalorder %s63_s14, 0  ;;  %p76_p1 = scmp.ne.s32.totalorder %s1065_s10, %s1061_s9 }
   0x5   : > { %p77_p2 = scmp.eq.s32.totalorder %s1165_s12, 2  ;;  %p781_p3 = scmp.ge.s32.totalorder %s1069_s11, 1 }
   0x6   : > { %s1175_s16 = scalar_select %p64_p0, %s1065_s10, %s66_s15  }
   0x7   : > { %p1177_p4 = por %p77_p2, %p76_p1  ;;  %p121_p5 = scmp.lt.s32.totalorder %s1069_s11, 4 }
   0x9   : > { %p122_p6 = pnand %p781_p3, %p121_p5 }
   0xa   : > { %s1182_s18 = sshll.u32 (!%p122_p6), %s1165_s12, 3  ;;  %s143_s26 = sand.u32 (!%p122_p6), 1, %s1061_s9  }
   0xb   : > { %125 = sbr.rel (%p122_p6) target bundleno = 314 (0x13a), region = 28  ;;  %p151_p7 = scmp.lt.s32.totalorder (!%p122_p6), %s1182_s18, 17 }
   0xc   : > { %s782_s27 = sshll.u32 (!%p122_p6), %s143_s26, 5 }
   0xd   : > { %s1202_s28 = scalar_lea.vmem (!%p122_p6), [#allocation2], %s782_s27  }
  0x10   : > { %s152_s19 = scalar_select %p151_p7, %s1182_s18, 17  ;;  %v165_v0 = vld [vmem:[%s1506_s0] sm:$0xf]  ;;  %vm174_vm0 = vcmask 64512   ;;  %vm350_vm1 = vcmask 1043456  }
  0x11   : > { %s371_s29 = ssub.s32 (%p1177_p4), 18, %s1182_s18  ;;  %s824_s30 = sshll.u32 (%p1177_p4), %s1165_s12, 5 }
  0x12   : > { %s784_s20 = sshll.u32 %s152_s19, 3  ;;  %p372_p8 = scmp.lt.s32.totalorder (%p1177_p4), %s371_s29, 8 }
  0x13   : > { %s154_s23 = scalar_lea.vmem %s1507_s1, %s784_s20  ;;  %s1218_s5 = scalar_lea.vmem (%p1177_p4), %s1508_s2, %s824_s30  }
  0x14   : > { %v169_v1 = vld [vmem:[%s154_s23 + $0x18] sm:$0xff]  ;;  %v168_v3 = vld [vmem:[%s154_s23 + $0x10] sm:$0xff]  ;;  %v167_v5 = vld [vmem:[%s154_s23 + $0x8] sm:$0xff] }
  0x15   : > { %v173_v2 = vld [vmem:[%s154_s23 + $0x38] sm:$0xff]  ;;  %253 = vmatpush.msra.mxu3 %v169_v1  ;;  %233 = vmatpush.msra.mxu2 %v168_v3  ;;  %v172_v4 = vld [vmem:[%s154_s23 + $0x30] sm:$0xff]  ;;  %v166_v6 = vld [vmem:[%s154_s23] sm:$0xff] }
  0x16   : > { %788 = vmatmul.msk.f32.vlgmr.msra.gmra.mxu3 %vm174_vm0, %v165_v0  ;;  %787 = vmatmul.msk.f32.vlgmr.msra.gmra.mxu2 %vm174_vm0, %v165_v0  ;;  %v171_v7 = vld [vmem:[%s154_s23 + $0x28] sm:$0xff]  ;;  %v170_v8 = vld [vmem:[%s154_s23 + $0x20] sm:$0xff] }
  0x17   : > { %333 = vmatpush.msrb.mxu3 %v173_v2  ;;  %313 = vmatpush.msrb.mxu2 %v172_v4 }
  0x18   : > { %213 = vmatpush.msra.mxu1 %v167_v5  ;;  %193 = vmatpush.msra.mxu0 %v166_v6 }
  0x19   : > { %786 = vmatmul.msk.f32.vlgmr.msra.gmra.mxu1 %vm174_vm0, %v165_v0  ;;  %785 = vmatmul.msk.f32.vlgmr.msra.gmra.mxu0 %vm174_vm0, %v165_v0 }
  0x1a   : > { %293 = vmatpush.msrb.mxu1 %v171_v7  ;;  %273 = vmatpush.msrb.mxu0 %v170_v8 }
  0x1e   : > { %792 = vmatmul.msk.f32.vlgmr.msrb.gmra.mxu3 %vm174_vm0, %v165_v0  ;;  %791 = vmatmul.msk.f32.vlgmr.msrb.gmra.mxu2 %vm174_vm0, %v165_v0 }
  0x21   : > { %790 = vmatmul.msk.f32.vlgmr.msrb.gmra.mxu1 %vm174_vm0, %v165_v0  ;;  %789 = vmatmul.msk.f32.vlgmr.msrb.gmra.mxu0 %vm174_vm0, %v165_v0 }
  0x96   : > { %v215_v9 = vpop.f32.mrf.mxu1  ;;  %v195_v10 = vpop.f32.mrf.mxu0 }
  0x97   : > { %v346_v11 = vrot.slane %v215_v9, 4 }
  0x99   : > { %v255_v12 = vpop.f32.mrf.mxu3  ;;  %v351_v13 = vsel %vm350_vm1, %v195_v10, %v346_v11  ;;  %v235_v14 = vpop.f32.mrf.mxu2 }
  0x9a   : > { %v347_v15 = vrot.slane %v255_v12, 4  ;;  %359 = vst [vmem:[%s1202_s28] sm:$0xff] %v351_v13 }
  0x9c   : > { %v352_v16 = vsel %vm350_vm1, %v235_v14, %v347_v15 }
  0x9d   : > { %360 = vst [vmem:[%s1202_s28 + $0x8] sm:$0xff] %v352_v16 }
  0x9e   : > { %v295_v17 = vpop.f32.mrf.mxu1  ;;  %v275_v18 = vpop.f32.mrf.mxu0 }
  0x9f   : > { %v348_v19 = vrot.slane %v295_v17, 4 }
  0xa1   : > { %v335_v20 = vpop.f32.mrf.mxu3  ;;  %v353_v21 = vsel %vm350_vm1, %v275_v18, %v348_v19  ;;  %v315_v22 = vpop.f32.mrf.mxu2  ;;  %369 = sbr.rel (!%p1177_p4) target bundleno = 314 (0x13a), region = 32 }
  0xa2   : > { %v349_v23 = vrot.slane %v335_v20, 4  ;;  %361 = vst [vmem:[%s1202_s28 + $0x10] sm:$0xff] %v353_v21 }
  0xa4   : > { %v354_v24 = vsel %vm350_vm1, %v315_v22, %v349_v23 }
  0xa5   : > { %362 = vst [vmem:[%s1202_s28 + $0x18] sm:$0xff] %v354_v24 }
  0xa6   : > { %s1524_s29 = smov (!%p372_p8, %s371_s29), 8 }
  0xa7   : > { %s1220_s6 = sshll.u32 %s1524_s29, 2 }
  0xa8   : > { %p799_p9 = scmp.eq.s32.totalorder %s1220_s6, 0 }
  0xa9   : > { %p382_p10 = scmp.lt.u32.totalorder (!%p799_p9), %s1220_s6, 8 }
  0xaa   : > { %381 = sbr.rel (%p799_p9) target bundleno = 314 (0x13a), region = 36 }
  0xaf   : > { %385 = sbr.rel (%p382_p10) target bundleno = 305 (0x131), region = 40  ;;  %s1225_s7 = sand.u32 (!%p382_p10), 7, %s1220_s6  }
  0xb0   : > { %p402_p11 = scmp.eq.s32.totalorder (!%p382_p10), %s1225_s7, 0  ;;  %p800_p12 = scmp.ne.s32.totalorder (!%p382_p10), %s1225_s7, 0 }
  0xb4   : > { %405 = sbr.rel (%p800_p12) target bundleno = 240 (0xf0), region = 55  ;;  %s406_s8 = sshrl.u32 (!%p800_p12), %s1220_s6, 3 }
  0xb5   : > { %s1232_s9 = sshrl.u32 (!%p800_p12), %s406_s8, 5 }
  0xb6   : > { %p801_p13 = scmp.le.s32.totalorder (!%p800_p12), %s1232_s9, 0 }
  0xb9   : > { %706 = sbr.rel (%p801_p13) target bundleno = 223 (0xdf), region = 136  ;;  %s1510_s11 = smov (!%p801_p13), %s1218_s5 }
  0xba   : > { %s1511_s12 = smov (!%p801_p13), %s1202_s28  ;;  %s1241_s14 = smov (!%p801_p13), 0  }
  0xbb   : > { %s1243_s15 = smov (!%p801_p13), 0  }
  0xbe LB: >> { %v417_v25 = vld [vmem:[%s1077_s12] sm:$0xff]  ;;  %v419_v26 = vld [vmem:[%s1077_s12 + $0x8] sm:$0xff]  ;;  %v421_v27 = vld [vmem:[%s1077_s12 + $0x10] sm:$0xff]  ;;  %s481_s17 = sadd.s32 1, %s1081_s14  ;;  %s411_s15 = sadd.s32 1, %s1085_s15   ;;  %s1085_s15 = sphi %s1243_s15, %s411_s15   ;;  %s1081_s14 = sphi %s1241_s14, %s1514_s14   ;;  %s1077_s12 = sphi %s1511_s12, %s1513_s12   ;;  %s1073_s11 = sphi %s1510_s11, %s1512_s11  }
  0xbf   : >> { %418 = vst [vmem:[%s1073_s11] sm:$0xff] %v417_v25  ;;  %v423_v28 = vld [vmem:[%s1077_s12 + $0x18] sm:$0xff]  ;;  %p482_p0 = scmp.ge.s32.totalorder %s481_s17, %s1232_s9  ;;  %v425_v29 = vld [vmem:[%s1077_s12 + $0x20] sm:$0xff]  ;;  %v427_v30 = vld [vmem:[%s1077_s12 + $0x28] sm:$0xff]  ;;  %p410_p1 = scmp.ge.s32.totalorder %s411_s15, %s1232_s9 }
  0xc0   : >> { %420 = vst [vmem:[%s1073_s11 + $0x8] sm:$0xff] %v419_v26  ;;  %v429_v31 = vld [vmem:[%s1077_s12 + $0x30] sm:$0xff]  ;;  %v431_v32 = vld [vmem:[%s1077_s12 + $0x38] sm:$0xff]  ;;  %v433_v33 = vld [vmem:[%s1077_s12 + $0x40] sm:$0xff] }
  0xc1   : >> { %422 = vst [vmem:[%s1073_s11 + $0x10] sm:$0xff] %v421_v27  ;;  %s1526_s17 = smov (%p482_p0, %s481_s17), 0  ;;  %v435_v34 = vld [vmem:[%s1077_s12 + $0x48] sm:$0xff]  ;;  %v437_v35 = vld [vmem:[%s1077_s12 + $0x50] sm:$0xff]  ;;  %v439_v36 = vld [vmem:[%s1077_s12 + $0x58] sm:$0xff] }
  0xc2   : >> { %424 = vst [vmem:[%s1073_s11 + $0x18] sm:$0xff] %v423_v28  ;;  %s802_s18 = sshll.u32 %s1526_s17, 8  ;;  %v441_v37 = vld [vmem:[%s1077_s12 + $0x60] sm:$0xff]  ;;  %v443_v38 = vld [vmem:[%s1077_s12 + $0x68] sm:$0xff]  ;;  %v445_v39 = vld [vmem:[%s1077_s12 + $0x70] sm:$0xff]  ;;  %s1514_s14 = smov %s1526_s17 }
  0xc3   : >> { %426 = vst [vmem:[%s1073_s11 + $0x20] sm:$0xff] %v425_v29  ;;  %s1275_s19 = scalar_lea.vmem %s1202_s28, %s802_s18 [#allocation2]   ;;  %s1278_s20 = scalar_lea.vmem %s1218_s5, %s802_s18   ;;  %v447_v40 = vld [vmem:[%s1077_s12 + $0x78] sm:$0xff]  ;;  %v449_v41 = vld [vmem:[%s1077_s12 + $0x80] sm:$0xff]  ;;  %v451_v42 = vld [vmem:[%s1077_s12 + $0x88] sm:$0xff] }
  0xc4   : >> { %428 = vst [vmem:[%s1073_s11 + $0x28] sm:$0xff] %v427_v30  ;;  %v453_v43 = vld [vmem:[%s1077_s12 + $0x90] sm:$0xff]  ;;  %v455_v44 = vld [vmem:[%s1077_s12 + $0x98] sm:$0xff]  ;;  %v457_v45 = vld [vmem:[%s1077_s12 + $0xa0] sm:$0xff] }
  0xc5   : >> { %430 = vst [vmem:[%s1073_s11 + $0x30] sm:$0xff] %v429_v31  ;;  %v459_v46 = vld [vmem:[%s1077_s12 + $0xa8] sm:$0xff]  ;;  %v461_v47 = vld [vmem:[%s1077_s12 + $0xb0] sm:$0xff]  ;;  %v463_v48 = vld [vmem:[%s1077_s12 + $0xb8] sm:$0xff] }
  0xc6   : >> { %432 = vst [vmem:[%s1073_s11 + $0x38] sm:$0xff] %v431_v32  ;;  %v465_v49 = vld [vmem:[%s1077_s12 + $0xc0] sm:$0xff]  ;;  %v467_v50 = vld [vmem:[%s1077_s12 + $0xc8] sm:$0xff]  ;;  %v469_v51 = vld [vmem:[%s1077_s12 + $0xd0] sm:$0xff] }
  0xc7   : >> { %434 = vst [vmem:[%s1073_s11 + $0x40] sm:$0xff] %v433_v33  ;;  %v471_v52 = vld [vmem:[%s1077_s12 + $0xd8] sm:$0xff]  ;;  %v473_v53 = vld [vmem:[%s1077_s12 + $0xe0] sm:$0xff]  ;;  %v475_v54 = vld [vmem:[%s1077_s12 + $0xe8] sm:$0xff] }
  0xc8   : >> { %436 = vst [vmem:[%s1073_s11 + $0x48] sm:$0xff] %v435_v34  ;;  %v477_v55 = vld [vmem:[%s1077_s12 + $0xf0] sm:$0xff]  ;;  %v479_v56 = vld [vmem:[%s1077_s12 + $0xf8] sm:$0xff]  ;;  %s1513_s12 = smov %s1275_s19 }
  0xc9   : >> { %438 = vst [vmem:[%s1073_s11 + $0x50] sm:$0xff] %v437_v35 }
  0xca   : >> { %440 = vst [vmem:[%s1073_s11 + $0x58] sm:$0xff] %v439_v36 }
  0xcb   : >> { %442 = vst [vmem:[%s1073_s11 + $0x60] sm:$0xff] %v441_v37 }
  0xcc   : >> { %444 = vst [vmem:[%s1073_s11 + $0x68] sm:$0xff] %v443_v38 }
  0xcd   : >> { %446 = vst [vmem:[%s1073_s11 + $0x70] sm:$0xff] %v445_v39 }
  0xce   : >> { %448 = vst [vmem:[%s1073_s11 + $0x78] sm:$0xff] %v447_v40 }
  0xcf   : >> { %450 = vst [vmem:[%s1073_s11 + $0x80] sm:$0xff] %v449_v41 }
  0xd0   : >> { %452 = vst [vmem:[%s1073_s11 + $0x88] sm:$0xff] %v451_v42 }
  0xd1   : >> { %454 = vst [vmem:[%s1073_s11 + $0x90] sm:$0xff] %v453_v43 }
  0xd2   : >> { %456 = vst [vmem:[%s1073_s11 + $0x98] sm:$0xff] %v455_v44 }
  0xd3   : >> { %458 = vst [vmem:[%s1073_s11 + $0xa0] sm:$0xff] %v457_v45 }
  0xd4   : >> { %460 = vst [vmem:[%s1073_s11 + $0xa8] sm:$0xff] %v459_v46 }
  0xd5   : >> { %462 = vst [vmem:[%s1073_s11 + $0xb0] sm:$0xff] %v461_v47 }
  0xd6   : >> { %464 = vst [vmem:[%s1073_s11 + $0xb8] sm:$0xff] %v463_v48 }
  0xd7   : >> { %466 = vst [vmem:[%s1073_s11 + $0xc0] sm:$0xff] %v465_v49 }
  0xd8   : >> { %468 = vst [vmem:[%s1073_s11 + $0xc8] sm:$0xff] %v467_v50 }
  0xd9   : >> { %470 = vst [vmem:[%s1073_s11 + $0xd0] sm:$0xff] %v469_v51 }
  0xda   : >> { %472 = vst [vmem:[%s1073_s11 + $0xd8] sm:$0xff] %v471_v52  ;;  %413 = sbr.rel (!%p410_p1) target bundleno = 190 (0xbe), region = 142 }
  0xdb   : >> { %474 = vst [vmem:[%s1073_s11 + $0xe0] sm:$0xff] %v473_v53 }
  0xdc   : >> { %476 = vst [vmem:[%s1073_s11 + $0xe8] sm:$0xff] %v475_v54 }
  0xdd   : >> { %478 = vst [vmem:[%s1073_s11 + $0xf0] sm:$0xff] %v477_v55 }
  0xde   : >> { %480 = vst [vmem:[%s1073_s11 + $0xf8] sm:$0xff] %v479_v56  ;;  %s1512_s11 = smov %s1278_s20 }
  0xdf PF: > { %s1344_s21 = sand.u32 31, %s406_s8   ;;  %s825_s22 = sshll.u32 %s1232_s9, 8 }
  0xe0   : > { %s492_s23 = scalar_lea.vmem %s1202_s28, %s825_s22 [#allocation2]   ;;  %s494_s24 = scalar_lea.vmem %s1218_s5, %s825_s22  }
  0xe1   : > { %p807_p2 = scmp.le.s32.totalorder %s1344_s21, 0 }
  0xe2   : > { %s1087_s25 = smov (!%p807_p2), %s494_s24   ;;  %s1091_s26 = smov (!%p807_p2), %s492_s23  }
  0xe3   : > { %720 = sbr.rel (%p807_p2) target bundleno = 240 (0xf0), region = 147  ;;  %s1095_s27 = smov (!%p807_p2), 0  }
  0xe4   : > { %s1099_s29 = smov (!%p807_p2), 0  }
  0xe8 LB: >> { %v504_v57 = vld [vmem:[%s1093_s26] sm:$0xff]  ;;  %s506_s30 = sadd.s32 1, %s1097_s27  ;;  %s498_s29 = sadd.s32 1, %s1101_s29   ;;  %s1101_s29 = sphi %s1099_s29, %s498_s29   ;;  %s1097_s27 = sphi %s1095_s27, %s1096_s27   ;;  %s1093_s26 = sphi %s1091_s26, %s511_s26   ;;  %s1089_s25 = sphi %s1087_s25, %s512_s25  }
  0xe9   : >> { %505 = vst [vmem:[%s1089_s25] sm:$0xff] %v504_v57  ;;  %p507_p3 = scmp.ge.s32.totalorder %s506_s30, %s1344_s21  ;;  %p497_p4 = scmp.ge.s32.totalorder %s498_s29, %s1344_s21 }
  0xeb   : >> { %s1528_s30 = smov (%p507_p3, %s506_s30), 0  ;;  %500 = sbr.rel (!%p497_p4) target bundleno = 232 (0xe8), region = 153 }
  0xec   : >> { %s808_s3 = sshll.u32 %s1528_s30, 3  ;;  %s1096_s27 = smov %s1528_s30  }
  0xed   : >> { %s511_s26 = scalar_lea.vmem %s492_s23, %s808_s3 [#allocation2]   ;;  %s512_s25 = scalar_lea.vmem %s494_s24, %s808_s3  }
  0xf0 PF: > { %515 = sbr.rel (%p402_p11) target bundleno = 305 (0x131), region = 73  ;;  %s1356_s4 = ssub.s32 (!%p402_p11), %s1220_s6, %s1225_s7 }
  0xf1   : > { %s521_s8 = sshrl.u32 (!%p402_p11), %s1220_s6, 3  ;;  %s518_s9 = scalar_lea.vmem (!%p402_p11), %s1202_s28, %s1356_s4 [#allocation2] }
  0xf2   : > { %s520_s11 = scalar_lea.vmem (!%p402_p11), %s1218_s5, %s1356_s4  ;;  %s1365_s12 = sshrl.u32 (!%p402_p11), %s521_s8, 5 }
  0xf3   : > { %p810_p5 = scmp.le.s32.totalorder (!%p402_p11), %s1365_s12, 0 }
  0xf5   : > { %734 = sbr.rel (%p810_p5) target bundleno = 283 (0x11b), region = 158  ;;  %s1515_s14 = smov (!%p810_p5), %s1218_s5 }
  0xf6   : > { %s1516_s15 = smov (!%p810_p5), %s1202_s28  ;;  %s1374_s17 = smov (!%p810_p5), 0  }
  0xf7   : > { %s1376_s18 = smov (!%p810_p5), 0  }
  0xfa LB: >> { %v532_v58 = vld [vmem:[%s1109_s15] sm:$0xff]  ;;  %v534_v59 = vld [vmem:[%s1109_s15 + $0x8] sm:$0xff]  ;;  %v536_v60 = vld [vmem:[%s1109_s15 + $0x10] sm:$0xff]  ;;  %s596_s19 = sadd.s32 1, %s1113_s17  ;;  %s526_s18 = sadd.s32 1, %s1117_s18   ;;  %s1117_s18 = sphi %s1376_s18, %s526_s18   ;;  %s1113_s17 = sphi %s1374_s17, %s1519_s17   ;;  %s1109_s15 = sphi %s1516_s15, %s1518_s15   ;;  %s1105_s14 = sphi %s1515_s14, %s1517_s14  }
  0xfb   : >> { %533 = vst [vmem:[%s1105_s14] sm:$0xff] %v532_v58  ;;  %v538_v61 = vld [vmem:[%s1109_s15 + $0x18] sm:$0xff]  ;;  %p597_p6 = scmp.ge.s32.totalorder %s596_s19, %s1365_s12  ;;  %v540_v62 = vld [vmem:[%s1109_s15 + $0x20] sm:$0xff]  ;;  %v542_v63 = vld [vmem:[%s1109_s15 + $0x28] sm:$0xff]  ;;  %p525_p7 = scmp.ge.s32.totalorder %s526_s18, %s1365_s12 }
  0xfc   : >> { %535 = vst [vmem:[%s1105_s14 + $0x8] sm:$0xff] %v534_v59  ;;  %v544_v0 = vld [vmem:[%s1109_s15 + $0x30] sm:$0xff]  ;;  %v546_v1 = vld [vmem:[%s1109_s15 + $0x38] sm:$0xff]  ;;  %v548_v2 = vld [vmem:[%s1109_s15 + $0x40] sm:$0xff] }
  0xfd   : >> { %537 = vst [vmem:[%s1105_s14 + $0x10] sm:$0xff] %v536_v60  ;;  %s1530_s19 = smov (%p597_p6, %s596_s19), 0  ;;  %v550_v3 = vld [vmem:[%s1109_s15 + $0x48] sm:$0xff]  ;;  %v552_v4 = vld [vmem:[%s1109_s15 + $0x50] sm:$0xff]  ;;  %v554_v5 = vld [vmem:[%s1109_s15 + $0x58] sm:$0xff] }
  0xfe   : >> { %539 = vst [vmem:[%s1105_s14 + $0x18] sm:$0xff] %v538_v61  ;;  %s811_s20 = sshll.u32 %s1530_s19, 8  ;;  %v556_v6 = vld [vmem:[%s1109_s15 + $0x60] sm:$0xff]  ;;  %v558_v7 = vld [vmem:[%s1109_s15 + $0x68] sm:$0xff]  ;;  %v560_v8 = vld [vmem:[%s1109_s15 + $0x70] sm:$0xff]  ;;  %s1519_s17 = smov %s1530_s19 }
  0xff   : >> { %541 = vst [vmem:[%s1105_s14 + $0x20] sm:$0xff] %v540_v62  ;;  %s1408_s21 = scalar_lea.vmem %s1202_s28, %s811_s20 [#allocation2]   ;;  %s1411_s22 = scalar_lea.vmem %s1218_s5, %s811_s20   ;;  %v562_v9 = vld [vmem:[%s1109_s15 + $0x78] sm:$0xff]  ;;  %v564_v10 = vld [vmem:[%s1109_s15 + $0x80] sm:$0xff]  ;;  %v566_v11 = vld [vmem:[%s1109_s15 + $0x88] sm:$0xff] }
 0x100   : >> { %543 = vst [vmem:[%s1105_s14 + $0x28] sm:$0xff] %v542_v63  ;;  %v568_v12 = vld [vmem:[%s1109_s15 + $0x90] sm:$0xff]  ;;  %v570_v13 = vld [vmem:[%s1109_s15 + $0x98] sm:$0xff]  ;;  %v572_v14 = vld [vmem:[%s1109_s15 + $0xa0] sm:$0xff] }
 0x101   : >> { %545 = vst [vmem:[%s1105_s14 + $0x30] sm:$0xff] %v544_v0  ;;  %v574_v15 = vld [vmem:[%s1109_s15 + $0xa8] sm:$0xff]  ;;  %v576_v16 = vld [vmem:[%s1109_s15 + $0xb0] sm:$0xff]  ;;  %v578_v17 = vld [vmem:[%s1109_s15 + $0xb8] sm:$0xff] }
 0x102   : >> { %547 = vst [vmem:[%s1105_s14 + $0x38] sm:$0xff] %v546_v1  ;;  %v580_v18 = vld [vmem:[%s1109_s15 + $0xc0] sm:$0xff]  ;;  %v582_v19 = vld [vmem:[%s1109_s15 + $0xc8] sm:$0xff]  ;;  %v584_v20 = vld [vmem:[%s1109_s15 + $0xd0] sm:$0xff] }
 0x103   : >> { %549 = vst [vmem:[%s1105_s14 + $0x40] sm:$0xff] %v548_v2  ;;  %v586_v21 = vld [vmem:[%s1109_s15 + $0xd8] sm:$0xff]  ;;  %v588_v22 = vld [vmem:[%s1109_s15 + $0xe0] sm:$0xff]  ;;  %v590_v23 = vld [vmem:[%s1109_s15 + $0xe8] sm:$0xff] }
 0x104   : >> { %551 = vst [vmem:[%s1105_s14 + $0x48] sm:$0xff] %v550_v3  ;;  %v592_v24 = vld [vmem:[%s1109_s15 + $0xf0] sm:$0xff]  ;;  %v594_v25 = vld [vmem:[%s1109_s15 + $0xf8] sm:$0xff]  ;;  %s1518_s15 = smov %s1408_s21 }
 0x105   : >> { %553 = vst [vmem:[%s1105_s14 + $0x50] sm:$0xff] %v552_v4 }
 0x106   : >> { %555 = vst [vmem:[%s1105_s14 + $0x58] sm:$0xff] %v554_v5 }
 0x107   : >> { %557 = vst [vmem:[%s1105_s14 + $0x60] sm:$0xff] %v556_v6 }
 0x108   : >> { %559 = vst [vmem:[%s1105_s14 + $0x68] sm:$0xff] %v558_v7 }
 0x109   : >> { %561 = vst [vmem:[%s1105_s14 + $0x70] sm:$0xff] %v560_v8 }
 0x10a   : >> { %563 = vst [vmem:[%s1105_s14 + $0x78] sm:$0xff] %v562_v9 }
 0x10b   : >> { %565 = vst [vmem:[%s1105_s14 + $0x80] sm:$0xff] %v564_v10 }
 0x10c   : >> { %567 = vst [vmem:[%s1105_s14 + $0x88] sm:$0xff] %v566_v11 }
 0x10d   : >> { %569 = vst [vmem:[%s1105_s14 + $0x90] sm:$0xff] %v568_v12 }
 0x10e   : >> { %571 = vst [vmem:[%s1105_s14 + $0x98] sm:$0xff] %v570_v13 }
 0x10f   : >> { %573 = vst [vmem:[%s1105_s14 + $0xa0] sm:$0xff] %v572_v14 }
 0x110   : >> { %575 = vst [vmem:[%s1105_s14 + $0xa8] sm:$0xff] %v574_v15 }
 0x111   : >> { %577 = vst [vmem:[%s1105_s14 + $0xb0] sm:$0xff] %v576_v16 }
 0x112   : >> { %579 = vst [vmem:[%s1105_s14 + $0xb8] sm:$0xff] %v578_v17 }
 0x113   : >> { %581 = vst [vmem:[%s1105_s14 + $0xc0] sm:$0xff] %v580_v18 }
 0x114   : >> { %583 = vst [vmem:[%s1105_s14 + $0xc8] sm:$0xff] %v582_v19 }
 0x115   : >> { %585 = vst [vmem:[%s1105_s14 + $0xd0] sm:$0xff] %v584_v20 }
 0x116   : >> { %587 = vst [vmem:[%s1105_s14 + $0xd8] sm:$0xff] %v586_v21  ;;  %528 = sbr.rel (!%p525_p7) target bundleno = 250 (0xfa), region = 164 }
 0x117   : >> { %589 = vst [vmem:[%s1105_s14 + $0xe0] sm:$0xff] %v588_v22 }
 0x118   : >> { %591 = vst [vmem:[%s1105_s14 + $0xe8] sm:$0xff] %v590_v23 }
 0x119   : >> { %593 = vst [vmem:[%s1105_s14 + $0xf0] sm:$0xff] %v592_v24 }
 0x11a   : >> { %595 = vst [vmem:[%s1105_s14 + $0xf8] sm:$0xff] %v594_v25  ;;  %s1517_s14 = smov %s1411_s22 }
 0x11b PF: > { %s1477_s23 = sand.u32 31, %s521_s8   ;;  %s827_s24 = sshll.u32 %s1365_s12, 8 }
 0x11c   : > { %s607_s25 = scalar_lea.vmem %s1202_s28, %s827_s24 [#allocation2]   ;;  %s609_s26 = scalar_lea.vmem %s1218_s5, %s827_s24  }
 0x11d   : > { %p816_p8 = scmp.le.s32.totalorder %s1477_s23, 0 }
 0x11e   : > { %s1119_s27 = smov (!%p816_p8), %s609_s26   ;;  %s1123_s29 = smov (!%p816_p8), %s607_s25  }
 0x11f   : > { %748 = sbr.rel (%p816_p8) target bundleno = 300 (0x12c), region = 169  ;;  %s1127_s30 = smov (!%p816_p8), 0  }
 0x120   : > { %s1131_s3 = smov (!%p816_p8), 0  }
 0x124 LB: >> { %v619_v26 = vld [vmem:[%s1125_s29] sm:$0xff]  ;;  %s621_s8 = sadd.s32 1, %s1129_s30  ;;  %s613_s3 = sadd.s32 1, %s1133_s3   ;;  %s1133_s3 = sphi %s1131_s3, %s613_s3   ;;  %s1129_s30 = sphi %s1127_s30, %s1128_s30   ;;  %s1125_s29 = sphi %s1123_s29, %s626_s29   ;;  %s1121_s27 = sphi %s1119_s27, %s627_s27  }
 0x125   : >> { %620 = vst [vmem:[%s1121_s27] sm:$0xff] %v619_v26  ;;  %p622_p9 = scmp.ge.s32.totalorder %s621_s8, %s1477_s23  ;;  %p612_p10 = scmp.ge.s32.totalorder %s613_s3, %s1477_s23 }
 0x127   : >> { %s1532_s8 = smov (%p622_p9, %s621_s8), 0  ;;  %615 = sbr.rel (!%p612_p10) target bundleno = 292 (0x124), region = 175 }
 0x128   : >> { %s817_s12 = sshll.u32 %s1532_s8, 3  ;;  %s1128_s30 = smov %s1532_s8  }
 0x129   : >> { %s626_s29 = scalar_lea.vmem %s607_s25, %s817_s12 [#allocation2]   ;;  %s627_s27 = scalar_lea.vmem %s609_s26, %s817_s12  }
 0x12c PF: > { %s1135_s14 = smov 1  }
 0x12d   : > { %s628_s15 = sshll.u32 %s1135_s14, %s1225_s7 }
 0x12e   : > { %s819_s17 = sadd.s32 4294967295, %s628_s15 }
 0x12f   : > { %v638_v27 = vld [vmem:[%s518_s9] sm:%s819_s17] }
 0x130   : > { %639 = vst [vmem:[%s520_s11] sm:%s819_s17] %v638_v27 }
 0x131 PF: > { %p820_p11 = scmp.ge.u32.totalorder %s1220_s6, 8 }
 0x132   : > { %s1136_s18 = smov (!%p820_p11), 1  }
 0x133   : > { %388 = sbr.rel (%p820_p11) target bundleno = 314 (0x13a), region = 44  ;;  %s389_s19 = sshll.u32 (!%p820_p11), %s1136_s18, %s1220_s6 }
 0x134   : > { %s821_s20 = sadd.s32 (!%p820_p11), 4294967295, %s389_s19 }
 0x138   : > { %v399_v28 = vld [vmem:[%s1202_s28] sm:%s821_s20] }
 0x139   : > { %400 = vst [vmem:[%s1218_s5] sm:%s821_s20] %v399_v28 }
 0x13a PF: > { %p9_p12 = scmp.ge.s32.totalorder %s1167_s13, 5   ;;  %s1520_s9 = smov %s1065_s10 }
 0x13b   : > { %s1521_s10 = smov %s1175_s16  ;;  %s1522_s11 = smov %s1167_s13 }
 0x13c   :  { %11 = sbr.rel (!%p9_p12) target bundleno = 2 (0x2), region = 186 }

</bundles_post_ra>
